<compile_context>
chip_gen: v7x
topology: tpu7x:2x2x1
jax: 0.10.0
libtpu: 0.0.40
codegen_flags: <defaults>
</compile_context>

<pallas_src>
import jax
import jax.numpy as jnp
from jax import lax
from jax.experimental import pallas as pl
from jax.experimental.pallas import tpu as pltpu

n_embd = 384
num_heads = 6
head_size = n_embd // num_heads   # 64


# ---------------------------------------------------------------------------
# Fused kernel: QKV + all heads' causal attention + accumulated output
# projection; BB batch elements per grid step.
# ---------------------------------------------------------------------------
def _mha_fused_kernel(x_ref, wqkv_ref, wproj_ref, bproj_ref, o_ref):
    # x_ref    : (BB, T, C)    bf16
    # wqkv_ref : (C, 3*H*hs)   bf16   columns = [Q heads | K heads | V heads],
    #                                 Q columns pre-scaled by C**-0.5
    # wproj_ref: (H, hs, C)    bf16   (out = sum_h o_h @ wproj[h] + b)
    # bproj_ref: (1, C)        f32
    # o_ref    : (BB, T, C)    f32
    BB, T, C = x_ref.shape
    H, hs, _ = wproj_ref.shape
    Dh = H * hs

    # --- fused QKV projection: one lane-dense (BB*T, C) @ (C, 3*Dh) GEMM ---
    x2 = x_ref[...].reshape(BB * T, C)                       # merge leading dims
    qkv = jnp.dot(x2, wqkv_ref[...], preferred_element_type=jnp.float32)
    qkv = qkv.astype(jnp.bfloat16).reshape(BB, T, 3 * Dh)    # cast once, reuse

    # --- causal mask: computed once per grid step, reused across heads -----
    row = lax.broadcasted_iota(jnp.int32, (T, T), 0)
    col = lax.broadcasted_iota(jnp.int32, (T, T), 1)
    causal = col <= row                                      # (T, T), broadcasts over BB

    # --- per-head attention + accumulated projection (no concat) -----------
    y = jnp.zeros((BB * T, C), jnp.float32)
    for h in range(H):                                       # static loop; slices are free
        q = qkv[:, :, h * hs:(h + 1) * hs]                   # (BB, T, hs) bf16 (pre-scaled)
        k = qkv[:, :, Dh + h * hs:Dh + (h + 1) * hs]
        v = qkv[:, :, 2 * Dh + h * hs:2 * Dh + (h + 1) * hs]

        # scores: batched over BB, MXU handles the transposed operand
        s = jnp.einsum('bqd,bkd->bqk', q, k,
                       preferred_element_type=jnp.float32)   # scale already folded in
        s = jnp.where(causal, s, -jnp.inf)                   # tril mask (diag never masked)

        m = jnp.max(s, axis=-1, keepdims=True)               # softmax in f32
        p = jnp.exp(s - m)
        denom = jnp.sum(p, axis=-1, keepdims=True)           # (BB, T, 1)

        # deferred normalization: matmul with un-normalized p, scale (T, hs) result
        o_h = jnp.einsum('bqk,bkd->bqd', p.astype(jnp.bfloat16), v,
                         preferred_element_type=jnp.float32)
        o_h = o_h * pl.reciprocal(denom, approx=True)        # EUP slot, ~free
        o_h = o_h.reshape(BB * T, hs).astype(jnp.bfloat16)

        # accumulate this head's contribution to the output projection
        y = y + jnp.dot(o_h, wproj_ref[h], preferred_element_type=jnp.float32)

    # --- bias + lane-dense (BB, T, 384) store -------------------------------
    y = y + bproj_ref[...]                                   # broadcast (1, C)
    o_ref[...] = y.reshape(BB, T, C).astype(o_ref.dtype)


# ---------------------------------------------------------------------------
# One-time weight preparation (hoisted out of the forward pass)
# ---------------------------------------------------------------------------
def prepare_mha_weights(wq, wk, wv, w_proj, b_proj):
    """
    wq/wk/wv : (H, C, hs)  per-head projection weights (out = x @ w)
    w_proj   : (C, C)      projection weight (out = a @ w_proj + b)
    b_proj   : (C,)
    Returns packed bf16 weights consumed by the kernel.
    """
    H, C, hs = wq.shape
    assert wk.shape == wq.shape and wv.shape == wq.shape
    assert w_proj.shape == (H * hs, C) == (C, C)

    def _flat(w):                                            # (H, C, hs) -> (C, H*hs)
        return jnp.transpose(w, (1, 0, 2)).reshape(C, H * hs)

    scale = jnp.float32(C) ** jnp.float32(-0.5)              # v2.py scales by C = n_embd
    w_qkv = jnp.concatenate([_flat(wq) * scale, _flat(wk), _flat(wv)],
                            axis=1).astype(jnp.bfloat16)     # (C, 3*H*hs)
    w_proj_h = w_proj.reshape(H, hs, C).astype(jnp.bfloat16) # rows grouped by head
    b2 = b_proj.reshape(1, C).astype(jnp.float32)
    return w_qkv, w_proj_h, b2


def _pick_bb(B, T, max_rows=1024):
    """Largest divisor BB of B with BB*T <= max_rows (VMEM headroom, sized for
    v7x's 32 MiB scoped default) while keeping >= 2 grid steps when B >= 2
    (so v7x's second TensorCore gets work)."""
    best = 1
    for bb in range(1, B + 1):
        if B % bb:
            continue
        if bb * T > max_rows:
            continue
        if B >= 2 and B // bb < 2:
            continue
        best = bb
    return best


# ---------------------------------------------------------------------------
# Forward wrapper (takes pre-packed weights)
# ---------------------------------------------------------------------------
def multi_head_attention(x, w_qkv, w_proj_h, b2):
    """
    x        : (B, T, C) float32
    w_qkv    : (C, 3*H*hs) bf16   (from prepare_mha_weights)
    w_proj_h : (H, hs, C)  bf16
    b2       : (1, C)      f32
    returns  : (B, T, C) float32
    """
    B, T, C = x.shape
    H, hs, _ = w_proj_h.shape
    Dh = H * hs
    assert w_qkv.shape == (C, 3 * Dh) and Dh == C

    BB = _pick_bb(B, T)
    assert B % BB == 0
    x_bf = x.astype(jnp.bfloat16)

    out = pl.pallas_call(
        _mha_fused_kernel,
        out_shape=jax.ShapeDtypeStruct((B, T, C), jnp.float32),
        grid_spec=pltpu.PrefetchScalarGridSpec(
            num_scalar_prefetch=0,
            grid=(B // BB,),
            in_specs=[
                pl.BlockSpec((BB, T, C), lambda b: (b, 0, 0)),
                # constant-index weights (never re-fetched across steps)
                pl.BlockSpec((C, 3 * Dh), lambda b: (0, 0)),
                pl.BlockSpec((H, hs, C), lambda b: (0, 0, 0)),
                pl.BlockSpec((1, C), lambda b: (0, 0)),
            ],
            out_specs=pl.BlockSpec((BB, T, C), lambda b: (b, 0, 0)),
        ),
        compiler_params=pltpu.CompilerParams(
            dimension_semantics=("parallel",),               # batch-block steps across TCs
            vmem_limit_bytes=32 * 1024 * 1024),              # explicit, v7x-safe bound
    )(x_bf, w_qkv, w_proj_h, b2)

    return out


# ---------------------------------------------------------------------------
# Pure-JAX (f32) reference for sanity checking
# ---------------------------------------------------------------------------
def _reference(x, wq, wk, wv, w_proj, b_proj):
    B, T, C = x.shape
    H, _, hs = wq.shape
    outs = []
    for h in range(H):
        q = x @ wq[h]
        k = x @ wk[h]
        v = x @ wv[h]
        wei = (q @ jnp.swapaxes(k, -1, -2)) * (C ** -0.5)
        mask = jnp.tril(jnp.ones((T, T), dtype=bool))
        wei = jnp.where(mask, wei, -jnp.inf)
        wei = jax.nn.softmax(wei, axis=-1)
        outs.append(wei @ v)
    cat = jnp.concatenate(outs, axis=-1)
    return cat @ w_proj + b_proj


if __name__ == "__main__":
    key = jax.random.PRNGKey(0)
    B, T = 8, 64   # T <= block_size (256); BB=4 -> grid of 2 steps

    k_x, k_q, k_k, k_v, k_p, k_b = jax.random.split(key, 6)
    x = jax.random.normal(k_x, (B, T, n_embd), dtype=jnp.float32)

    scale = 1.0 / (n_embd ** 0.5)
    wq = jax.random.uniform(k_q, (num_heads, n_embd, head_size),
                            minval=-scale, maxval=scale, dtype=jnp.float32)
    wk = jax.random.uniform(k_k, (num_heads, n_embd, head_size),
                            minval=-scale, maxval=scale, dtype=jnp.float32)
    wv = jax.random.uniform(k_v, (num_heads, n_embd, head_size),
                            minval=-scale, maxval=scale, dtype=jnp.float32)
    w_proj = jax.random.uniform(k_p, (n_embd, n_embd),
                                minval=-scale, maxval=scale, dtype=jnp.float32)
    b_proj = jax.random.uniform(k_b, (n_embd,),
                                minval=-scale, maxval=scale, dtype=jnp.float32)

    # one-time weight packing (in practice done at parameter load time)
    w_qkv, w_proj_h, b2 = prepare_mha_weights(wq, wk, wv, w_proj, b_proj)
    w_qkv, w_proj_h, b2 = jax.block_until_ready((w_qkv, w_proj_h, b2))

    out = multi_head_attention(x, w_qkv, w_proj_h, b2)
    jax.block_until_ready(out)

    ref = _reference(x, wq, wk, wv, w_proj, b_proj)
    assert out.shape == (B, T, n_embd)
    # bf16 MXU inputs (f32 accumulate) + approx reciprocal -> loosened tolerance
    assert jnp.allclose(out, ref, atol=2e-2, rtol=2e-2), \
        f"max err {jnp.max(jnp.abs(out - ref))}"

    print("KERNEL_OK")
</pallas_src>

<mosaic_0001>
module attributes {stable_mosaic.version = 11 : i64} {
  func.func @_mha_fused_kernel(%arg0: i32, %arg1: memref<4x64x384xbf16, #tpu.memory_space<vmem>>, %arg2: memref<384x1152xbf16, #tpu.memory_space<vmem>>, %arg3: memref<6x64x384xbf16, #tpu.memory_space<vmem>>, %arg4: memref<1x384xf32, #tpu.memory_space<vmem>>, %arg5: memref<4x64x384xf32, #tpu.memory_space<vmem>>) attributes {dimension_semantics = [#tpu.dimension_semantics<parallel>], iteration_bounds = array<i64: 2>, scalar_prefetch = 0 : i64, scratch_operands = 0 : i64, tpu.core_type = #tpu.core_type<tc>, window_params = [{transform_indices = @transform_0, window_bounds = array<i64: 4, 64, 384>}, {pipeline_mode = #tpu.pipeline_mode<synchronous>, transform_indices = @transform_1, window_bounds = array<i64: 384, 1152>}, {pipeline_mode = #tpu.pipeline_mode<synchronous>, transform_indices = @transform_2, window_bounds = array<i64: 6, 64, 384>}, {pipeline_mode = #tpu.pipeline_mode<synchronous>, transform_indices = @transform_3, window_bounds = array<i64: 1, 384>}, {transform_indices = @transform_4, window_bounds = array<i64: 4, 64, 384>}]} {
    %c0 = arith.constant 0 : index
    %c0_0 = arith.constant 0 : index
    %c0_1 = arith.constant 0 : index
    %0 = vector.load %arg1[%c0, %c0_0, %c0_1] : memref<4x64x384xbf16, #tpu.memory_space<vmem>>, vector<4x64x384xbf16>
    %1 = vector.shape_cast %0 : vector<4x64x384xbf16> to vector<256x384xbf16>
    %c0_2 = arith.constant 0 : index
    %c0_3 = arith.constant 0 : index
    %2 = vector.load %arg2[%c0_2, %c0_3] : memref<384x1152xbf16, #tpu.memory_space<vmem>>, vector<384x1152xbf16>
    %cst = arith.constant dense<0.000000e+00> : vector<256x1152xf32>
    %3 = tpu.matmul %1, %2, %cst {dimension_numbers = #tpu.dot_dimension_numbers<[1], [0], [0], [1], [0, 0, 1, 1], [], []>} : vector<256x384xbf16>, vector<384x1152xbf16>, vector<256x1152xf32> -> vector<256x1152xf32>
    %4 = arith.truncf %3 : vector<256x1152xf32> to vector<256x1152xbf16>
    %5 = vector.shape_cast %4 : vector<256x1152xbf16> to vector<4x64x1152xbf16>
    %6 = tpu.iota {dimensions = array<i32: 0>} : vector<64x64xi32>
    %7 = tpu.iota {dimensions = array<i32: 1>} : vector<64x64xi32>
    %8 = arith.cmpi sle, %7, %6 : vector<64x64xi32>
    %cst_4 = arith.constant 0.000000e+00 : f32
    %9 = vector.broadcast %cst_4 : f32 to vector<256x384xf32>
    %10 = vector.extract_strided_slice %5 {offsets = [0, 0, 0], sizes = [4, 64, 64], strides = [1, 1, 1]} : vector<4x64x1152xbf16> to vector<4x64x64xbf16>
    %11 = vector.extract_strided_slice %5 {offsets = [0, 0, 384], sizes = [4, 64, 64], strides = [1, 1, 1]} : vector<4x64x1152xbf16> to vector<4x64x64xbf16>
    %12 = vector.extract_strided_slice %5 {offsets = [0, 0, 768], sizes = [4, 64, 64], strides = [1, 1, 1]} : vector<4x64x1152xbf16> to vector<4x64x64xbf16>
    "tpu.trace_start"() <{level = 10 : i32, message = "bqd,bkd->bqk"}> : () -> ()
    %cst_5 = arith.constant dense<0.000000e+00> : vector<4x64x64xf32>
    %13 = tpu.matmul %10, %11, %cst_5 {dimension_numbers = #tpu.dot_dimension_numbers<[2], [2], [1], [1], [0, 0, 0, 1, 1, 1], [0], [0]>} : vector<4x64x64xbf16>, vector<4x64x64xbf16>, vector<4x64x64xf32> -> vector<4x64x64xf32>
    %cst_6 = arith.constant 0xFF800000 : f32
    "tpu.trace_stop"() : () -> ()
    %14 = vector.shape_cast %8 : vector<64x64xi1> to vector<1x64x64xi1>
    %15 = vector.broadcast %14 : vector<1x64x64xi1> to vector<4x64x64xi1>
    %16 = vector.broadcast %cst_6 : f32 to vector<4x64x64xf32>
    %17 = arith.select %15, %13, %16 : vector<4x64x64xi1>, vector<4x64x64xf32>
    %cst_7 = arith.constant dense<0xFF800000> : vector<4x64xf32>
    %18 = vector.multi_reduction <maximumf>, %17, %cst_7 [2] : vector<4x64x64xf32> to vector<4x64xf32>
    %19 = vector.shape_cast %18 : vector<4x64xf32> to vector<4x64x1xf32>
    %20 = vector.broadcast %19 : vector<4x64x1xf32> to vector<4x64x64xf32>
    %21 = arith.subf %17, %20 : vector<4x64x64xf32>
    %22 = math.exp %21 : vector<4x64x64xf32>
    %cst_8 = arith.constant dense<0.000000e+00> : vector<4x64xf32>
    %23 = vector.multi_reduction <add>, %22, %cst_8 [2] : vector<4x64x64xf32> to vector<4x64xf32>
    %24 = vector.shape_cast %23 : vector<4x64xf32> to vector<4x64x1xf32>
    %25 = arith.truncf %22 : vector<4x64x64xf32> to vector<4x64x64xbf16>
    "tpu.trace_start"() <{level = 10 : i32, message = "bqk,bkd->bqd"}> : () -> ()
    %cst_9 = arith.constant dense<0.000000e+00> : vector<4x64x64xf32>
    %26 = tpu.matmul %25, %12, %cst_9 {dimension_numbers = #tpu.dot_dimension_numbers<[2], [1], [1], [2], [0, 0, 0, 1, 1, 2], [0], [0]>} : vector<4x64x64xbf16>, vector<4x64x64xbf16>, vector<4x64x64xf32> -> vector<4x64x64xf32>
    "tpu.trace_stop"() : () -> ()
    %27 = tpu.reciprocal %24 {approx = true} : vector<4x64x1xf32> -> vector<4x64x1xf32>
    %28 = vector.broadcast %27 : vector<4x64x1xf32> to vector<4x64x64xf32>
    %29 = arith.mulf %26, %28 : vector<4x64x64xf32>
    %30 = vector.shape_cast %29 : vector<4x64x64xf32> to vector<256x64xf32>
    %31 = arith.truncf %30 : vector<256x64xf32> to vector<256x64xbf16>
    %c0_10 = arith.constant 0 : index
    %c0_11 = arith.constant 0 : index
    %c0_12 = arith.constant 0 : index
    %32 = vector.load %arg3[%c0_10, %c0_11, %c0_12] : memref<6x64x384xbf16, #tpu.memory_space<vmem>>, vector<1x64x384xbf16>
    %33 = vector.shape_cast %32 : vector<1x64x384xbf16> to vector<64x384xbf16>
    %cst_13 = arith.constant dense<0.000000e+00> : vector<256x384xf32>
    %34 = tpu.matmul %31, %33, %cst_13 {dimension_numbers = #tpu.dot_dimension_numbers<[1], [0], [0], [1], [0, 0, 1, 1], [], []>} : vector<256x64xbf16>, vector<64x384xbf16>, vector<256x384xf32> -> vector<256x384xf32>
    %35 = arith.addf %9, %34 : vector<256x384xf32>
    %36 = vector.extract_strided_slice %5 {offsets = [0, 0, 64], sizes = [4, 64, 64], strides = [1, 1, 1]} : vector<4x64x1152xbf16> to vector<4x64x64xbf16>
    %37 = vector.extract_strided_slice %5 {offsets = [0, 0, 448], sizes = [4, 64, 64], strides = [1, 1, 1]} : vector<4x64x1152xbf16> to vector<4x64x64xbf16>
    %38 = vector.extract_strided_slice %5 {offsets = [0, 0, 832], sizes = [4, 64, 64], strides = [1, 1, 1]} : vector<4x64x1152xbf16> to vector<4x64x64xbf16>
    "tpu.trace_start"() <{level = 10 : i32, message = "bqd,bkd->bqk"}> : () -> ()
    %cst_14 = arith.constant dense<0.000000e+00> : vector<4x64x64xf32>
    %39 = tpu.matmul %36, %37, %cst_14 {dimension_numbers = #tpu.dot_dimension_numbers<[2], [2], [1], [1], [0, 0, 0, 1, 1, 1], [0], [0]>} : vector<4x64x64xbf16>, vector<4x64x64xbf16>, vector<4x64x64xf32> -> vector<4x64x64xf32>
    %cst_15 = arith.constant 0xFF800000 : f32
    "tpu.trace_stop"() : () -> ()
    %40 = vector.shape_cast %8 : vector<64x64xi1> to vector<1x64x64xi1>
    %41 = vector.broadcast %40 : vector<1x64x64xi1> to vector<4x64x64xi1>
    %42 = vector.broadcast %cst_15 : f32 to vector<4x64x64xf32>
    %43 = arith.select %41, %39, %42 : vector<4x64x64xi1>, vector<4x64x64xf32>
    %cst_16 = arith.constant dense<0xFF800000> : vector<4x64xf32>
    %44 = vector.multi_reduction <maximumf>, %43, %cst_16 [2] : vector<4x64x64xf32> to vector<4x64xf32>
    %45 = vector.shape_cast %44 : vector<4x64xf32> to vector<4x64x1xf32>
    %46 = vector.broadcast %45 : vector<4x64x1xf32> to vector<4x64x64xf32>
    %47 = arith.subf %43, %46 : vector<4x64x64xf32>
    %48 = math.exp %47 : vector<4x64x64xf32>
    %cst_17 = arith.constant dense<0.000000e+00> : vector<4x64xf32>
    %49 = vector.multi_reduction <add>, %48, %cst_17 [2] : vector<4x64x64xf32> to vector<4x64xf32>
    %50 = vector.shape_cast %49 : vector<4x64xf32> to vector<4x64x1xf32>
    %51 = arith.truncf %48 : vector<4x64x64xf32> to vector<4x64x64xbf16>
    "tpu.trace_start"() <{level = 10 : i32, message = "bqk,bkd->bqd"}> : () -> ()
    %cst_18 = arith.constant dense<0.000000e+00> : vector<4x64x64xf32>
    %52 = tpu.matmul %51, %38, %cst_18 {dimension_numbers = #tpu.dot_dimension_numbers<[2], [1], [1], [2], [0, 0, 0, 1, 1, 2], [0], [0]>} : vector<4x64x64xbf16>, vector<4x64x64xbf16>, vector<4x64x64xf32> -> vector<4x64x64xf32>
    "tpu.trace_stop"() : () -> ()
    %53 = tpu.reciprocal %50 {approx = true} : vector<4x64x1xf32> -> vector<4x64x1xf32>
    %54 = vector.broadcast %53 : vector<4x64x1xf32> to vector<4x64x64xf32>
    %55 = arith.mulf %52, %54 : vector<4x64x64xf32>
    %56 = vector.shape_cast %55 : vector<4x64x64xf32> to vector<256x64xf32>
    %57 = arith.truncf %56 : vector<256x64xf32> to vector<256x64xbf16>
    %c1 = arith.constant 1 : index
    %c0_19 = arith.constant 0 : index
    %c0_20 = arith.constant 0 : index
    %58 = vector.load %arg3[%c1, %c0_19, %c0_20] : memref<6x64x384xbf16, #tpu.memory_space<vmem>>, vector<1x64x384xbf16>
    %59 = vector.shape_cast %58 : vector<1x64x384xbf16> to vector<64x384xbf16>
    %cst_21 = arith.constant dense<0.000000e+00> : vector<256x384xf32>
    %60 = tpu.matmul %57, %59, %cst_21 {dimension_numbers = #tpu.dot_dimension_numbers<[1], [0], [0], [1], [0, 0, 1, 1], [], []>} : vector<256x64xbf16>, vector<64x384xbf16>, vector<256x384xf32> -> vector<256x384xf32>
    %61 = arith.addf %35, %60 : vector<256x384xf32>
    %62 = vector.extract_strided_slice %5 {offsets = [0, 0, 128], sizes = [4, 64, 64], strides = [1, 1, 1]} : vector<4x64x1152xbf16> to vector<4x64x64xbf16>
    %63 = vector.extract_strided_slice %5 {offsets = [0, 0, 512], sizes = [4, 64, 64], strides = [1, 1, 1]} : vector<4x64x1152xbf16> to vector<4x64x64xbf16>
    %64 = vector.extract_strided_slice %5 {offsets = [0, 0, 896], sizes = [4, 64, 64], strides = [1, 1, 1]} : vector<4x64x1152xbf16> to vector<4x64x64xbf16>
    "tpu.trace_start"() <{level = 10 : i32, message = "bqd,bkd->bqk"}> : () -> ()
    %cst_22 = arith.constant dense<0.000000e+00> : vector<4x64x64xf32>
    %65 = tpu.matmul %62, %63, %cst_22 {dimension_numbers = #tpu.dot_dimension_numbers<[2], [2], [1], [1], [0, 0, 0, 1, 1, 1], [0], [0]>} : vector<4x64x64xbf16>, vector<4x64x64xbf16>, vector<4x64x64xf32> -> vector<4x64x64xf32>
    %cst_23 = arith.constant 0xFF800000 : f32
    "tpu.trace_stop"() : () -> ()
    %66 = vector.shape_cast %8 : vector<64x64xi1> to vector<1x64x64xi1>
    %67 = vector.broadcast %66 : vector<1x64x64xi1> to vector<4x64x64xi1>
    %68 = vector.broadcast %cst_23 : f32 to vector<4x64x64xf32>
    %69 = arith.select %67, %65, %68 : vector<4x64x64xi1>, vector<4x64x64xf32>
    %cst_24 = arith.constant dense<0xFF800000> : vector<4x64xf32>
    %70 = vector.multi_reduction <maximumf>, %69, %cst_24 [2] : vector<4x64x64xf32> to vector<4x64xf32>
    %71 = vector.shape_cast %70 : vector<4x64xf32> to vector<4x64x1xf32>
    %72 = vector.broadcast %71 : vector<4x64x1xf32> to vector<4x64x64xf32>
    %73 = arith.subf %69, %72 : vector<4x64x64xf32>
    %74 = math.exp %73 : vector<4x64x64xf32>
    %cst_25 = arith.constant dense<0.000000e+00> : vector<4x64xf32>
    %75 = vector.multi_reduction <add>, %74, %cst_25 [2] : vector<4x64x64xf32> to vector<4x64xf32>
    %76 = vector.shape_cast %75 : vector<4x64xf32> to vector<4x64x1xf32>
    %77 = arith.truncf %74 : vector<4x64x64xf32> to vector<4x64x64xbf16>
    "tpu.trace_start"() <{level = 10 : i32, message = "bqk,bkd->bqd"}> : () -> ()
    %cst_26 = arith.constant dense<0.000000e+00> : vector<4x64x64xf32>
    %78 = tpu.matmul %77, %64, %cst_26 {dimension_numbers = #tpu.dot_dimension_numbers<[2], [1], [1], [2], [0, 0, 0, 1, 1, 2], [0], [0]>} : vector<4x64x64xbf16>, vector<4x64x64xbf16>, vector<4x64x64xf32> -> vector<4x64x64xf32>
    "tpu.trace_stop"() : () -> ()
    %79 = tpu.reciprocal %76 {approx = true} : vector<4x64x1xf32> -> vector<4x64x1xf32>
    %80 = vector.broadcast %79 : vector<4x64x1xf32> to vector<4x64x64xf32>
    %81 = arith.mulf %78, %80 : vector<4x64x64xf32>
    %82 = vector.shape_cast %81 : vector<4x64x64xf32> to vector<256x64xf32>
    %83 = arith.truncf %82 : vector<256x64xf32> to vector<256x64xbf16>
    %c2 = arith.constant 2 : index
    %c0_27 = arith.constant 0 : index
    %c0_28 = arith.constant 0 : index
    %84 = vector.load %arg3[%c2, %c0_27, %c0_28] : memref<6x64x384xbf16, #tpu.memory_space<vmem>>, vector<1x64x384xbf16>
    %85 = vector.shape_cast %84 : vector<1x64x384xbf16> to vector<64x384xbf16>
    %cst_29 = arith.constant dense<0.000000e+00> : vector<256x384xf32>
    %86 = tpu.matmul %83, %85, %cst_29 {dimension_numbers = #tpu.dot_dimension_numbers<[1], [0], [0], [1], [0, 0, 1, 1], [], []>} : vector<256x64xbf16>, vector<64x384xbf16>, vector<256x384xf32> -> vector<256x384xf32>
    %87 = arith.addf %61, %86 : vector<256x384xf32>
    %88 = vector.extract_strided_slice %5 {offsets = [0, 0, 192], sizes = [4, 64, 64], strides = [1, 1, 1]} : vector<4x64x1152xbf16> to vector<4x64x64xbf16>
    %89 = vector.extract_strided_slice %5 {offsets = [0, 0, 576], sizes = [4, 64, 64], strides = [1, 1, 1]} : vector<4x64x1152xbf16> to vector<4x64x64xbf16>
    %90 = vector.extract_strided_slice %5 {offsets = [0, 0, 960], sizes = [4, 64, 64], strides = [1, 1, 1]} : vector<4x64x1152xbf16> to vector<4x64x64xbf16>
    "tpu.trace_start"() <{level = 10 : i32, message = "bqd,bkd->bqk"}> : () -> ()
    %cst_30 = arith.constant dense<0.000000e+00> : vector<4x64x64xf32>
    %91 = tpu.matmul %88, %89, %cst_30 {dimension_numbers = #tpu.dot_dimension_numbers<[2], [2], [1], [1], [0, 0, 0, 1, 1, 1], [0], [0]>} : vector<4x64x64xbf16>, vector<4x64x64xbf16>, vector<4x64x64xf32> -> vector<4x64x64xf32>
    %cst_31 = arith.constant 0xFF800000 : f32
    "tpu.trace_stop"() : () -> ()
    %92 = vector.shape_cast %8 : vector<64x64xi1> to vector<1x64x64xi1>
    %93 = vector.broadcast %92 : vector<1x64x64xi1> to vector<4x64x64xi1>
    %94 = vector.broadcast %cst_31 : f32 to vector<4x64x64xf32>
    %95 = arith.select %93, %91, %94 : vector<4x64x64xi1>, vector<4x64x64xf32>
    %cst_32 = arith.constant dense<0xFF800000> : vector<4x64xf32>
    %96 = vector.multi_reduction <maximumf>, %95, %cst_32 [2] : vector<4x64x64xf32> to vector<4x64xf32>
    %97 = vector.shape_cast %96 : vector<4x64xf32> to vector<4x64x1xf32>
    %98 = vector.broadcast %97 : vector<4x64x1xf32> to vector<4x64x64xf32>
    %99 = arith.subf %95, %98 : vector<4x64x64xf32>
    %100 = math.exp %99 : vector<4x64x64xf32>
    %cst_33 = arith.constant dense<0.000000e+00> : vector<4x64xf32>
    %101 = vector.multi_reduction <add>, %100, %cst_33 [2] : vector<4x64x64xf32> to vector<4x64xf32>
    %102 = vector.shape_cast %101 : vector<4x64xf32> to vector<4x64x1xf32>
    %103 = arith.truncf %100 : vector<4x64x64xf32> to vector<4x64x64xbf16>
    "tpu.trace_start"() <{level = 10 : i32, message = "bqk,bkd->bqd"}> : () -> ()
    %cst_34 = arith.constant dense<0.000000e+00> : vector<4x64x64xf32>
    %104 = tpu.matmul %103, %90, %cst_34 {dimension_numbers = #tpu.dot_dimension_numbers<[2], [1], [1], [2], [0, 0, 0, 1, 1, 2], [0], [0]>} : vector<4x64x64xbf16>, vector<4x64x64xbf16>, vector<4x64x64xf32> -> vector<4x64x64xf32>
    "tpu.trace_stop"() : () -> ()
    %105 = tpu.reciprocal %102 {approx = true} : vector<4x64x1xf32> -> vector<4x64x1xf32>
    %106 = vector.broadcast %105 : vector<4x64x1xf32> to vector<4x64x64xf32>
    %107 = arith.mulf %104, %106 : vector<4x64x64xf32>
    %108 = vector.shape_cast %107 : vector<4x64x64xf32> to vector<256x64xf32>
    %109 = arith.truncf %108 : vector<256x64xf32> to vector<256x64xbf16>
    %c3 = arith.constant 3 : index
    %c0_35 = arith.constant 0 : index
    %c0_36 = arith.constant 0 : index
    %110 = vector.load %arg3[%c3, %c0_35, %c0_36] : memref<6x64x384xbf16, #tpu.memory_space<vmem>>, vector<1x64x384xbf16>
    %111 = vector.shape_cast %110 : vector<1x64x384xbf16> to vector<64x384xbf16>
    %cst_37 = arith.constant dense<0.000000e+00> : vector<256x384xf32>
    %112 = tpu.matmul %109, %111, %cst_37 {dimension_numbers = #tpu.dot_dimension_numbers<[1], [0], [0], [1], [0, 0, 1, 1], [], []>} : vector<256x64xbf16>, vector<64x384xbf16>, vector<256x384xf32> -> vector<256x384xf32>
    %113 = arith.addf %87, %112 : vector<256x384xf32>
    %114 = vector.extract_strided_slice %5 {offsets = [0, 0, 256], sizes = [4, 64, 64], strides = [1, 1, 1]} : vector<4x64x1152xbf16> to vector<4x64x64xbf16>
    %115 = vector.extract_strided_slice %5 {offsets = [0, 0, 640], sizes = [4, 64, 64], strides = [1, 1, 1]} : vector<4x64x1152xbf16> to vector<4x64x64xbf16>
    %116 = vector.extract_strided_slice %5 {offsets = [0, 0, 1024], sizes = [4, 64, 64], strides = [1, 1, 1]} : vector<4x64x1152xbf16> to vector<4x64x64xbf16>
    "tpu.trace_start"() <{level = 10 : i32, message = "bqd,bkd->bqk"}> : () -> ()
    %cst_38 = arith.constant dense<0.000000e+00> : vector<4x64x64xf32>
    %117 = tpu.matmul %114, %115, %cst_38 {dimension_numbers = #tpu.dot_dimension_numbers<[2], [2], [1], [1], [0, 0, 0, 1, 1, 1], [0], [0]>} : vector<4x64x64xbf16>, vector<4x64x64xbf16>, vector<4x64x64xf32> -> vector<4x64x64xf32>
    %cst_39 = arith.constant 0xFF800000 : f32
    "tpu.trace_stop"() : () -> ()
    %118 = vector.shape_cast %8 : vector<64x64xi1> to vector<1x64x64xi1>
    %119 = vector.broadcast %118 : vector<1x64x64xi1> to vector<4x64x64xi1>
    %120 = vector.broadcast %cst_39 : f32 to vector<4x64x64xf32>
    %121 = arith.select %119, %117, %120 : vector<4x64x64xi1>, vector<4x64x64xf32>
    %cst_40 = arith.constant dense<0xFF800000> : vector<4x64xf32>
    %122 = vector.multi_reduction <maximumf>, %121, %cst_40 [2] : vector<4x64x64xf32> to vector<4x64xf32>
    %123 = vector.shape_cast %122 : vector<4x64xf32> to vector<4x64x1xf32>
    %124 = vector.broadcast %123 : vector<4x64x1xf32> to vector<4x64x64xf32>
    %125 = arith.subf %121, %124 : vector<4x64x64xf32>
    %126 = math.exp %125 : vector<4x64x64xf32>
    %cst_41 = arith.constant dense<0.000000e+00> : vector<4x64xf32>
    %127 = vector.multi_reduction <add>, %126, %cst_41 [2] : vector<4x64x64xf32> to vector<4x64xf32>
    %128 = vector.shape_cast %127 : vector<4x64xf32> to vector<4x64x1xf32>
    %129 = arith.truncf %126 : vector<4x64x64xf32> to vector<4x64x64xbf16>
    "tpu.trace_start"() <{level = 10 : i32, message = "bqk,bkd->bqd"}> : () -> ()
    %cst_42 = arith.constant dense<0.000000e+00> : vector<4x64x64xf32>
    %130 = tpu.matmul %129, %116, %cst_42 {dimension_numbers = #tpu.dot_dimension_numbers<[2], [1], [1], [2], [0, 0, 0, 1, 1, 2], [0], [0]>} : vector<4x64x64xbf16>, vector<4x64x64xbf16>, vector<4x64x64xf32> -> vector<4x64x64xf32>
    "tpu.trace_stop"() : () -> ()
    %131 = tpu.reciprocal %128 {approx = true} : vector<4x64x1xf32> -> vector<4x64x1xf32>
    %132 = vector.broadcast %131 : vector<4x64x1xf32> to vector<4x64x64xf32>
    %133 = arith.mulf %130, %132 : vector<4x64x64xf32>
    %134 = vector.shape_cast %133 : vector<4x64x64xf32> to vector<256x64xf32>
    %135 = arith.truncf %134 : vector<256x64xf32> to vector<256x64xbf16>
    %c4 = arith.constant 4 : index
    %c0_43 = arith.constant 0 : index
    %c0_44 = arith.constant 0 : index
    %136 = vector.load %arg3[%c4, %c0_43, %c0_44] : memref<6x64x384xbf16, #tpu.memory_space<vmem>>, vector<1x64x384xbf16>
    %137 = vector.shape_cast %136 : vector<1x64x384xbf16> to vector<64x384xbf16>
    %cst_45 = arith.constant dense<0.000000e+00> : vector<256x384xf32>
    %138 = tpu.matmul %135, %137, %cst_45 {dimension_numbers = #tpu.dot_dimension_numbers<[1], [0], [0], [1], [0, 0, 1, 1], [], []>} : vector<256x64xbf16>, vector<64x384xbf16>, vector<256x384xf32> -> vector<256x384xf32>
    %139 = arith.addf %113, %138 : vector<256x384xf32>
    %140 = vector.extract_strided_slice %5 {offsets = [0, 0, 320], sizes = [4, 64, 64], strides = [1, 1, 1]} : vector<4x64x1152xbf16> to vector<4x64x64xbf16>
    %141 = vector.extract_strided_slice %5 {offsets = [0, 0, 704], sizes = [4, 64, 64], strides = [1, 1, 1]} : vector<4x64x1152xbf16> to vector<4x64x64xbf16>
    %142 = vector.extract_strided_slice %5 {offsets = [0, 0, 1088], sizes = [4, 64, 64], strides = [1, 1, 1]} : vector<4x64x1152xbf16> to vector<4x64x64xbf16>
    "tpu.trace_start"() <{level = 10 : i32, message = "bqd,bkd->bqk"}> : () -> ()
    %cst_46 = arith.constant dense<0.000000e+00> : vector<4x64x64xf32>
    %143 = tpu.matmul %140, %141, %cst_46 {dimension_numbers = #tpu.dot_dimension_numbers<[2], [2], [1], [1], [0, 0, 0, 1, 1, 1], [0], [0]>} : vector<4x64x64xbf16>, vector<4x64x64xbf16>, vector<4x64x64xf32> -> vector<4x64x64xf32>
    %cst_47 = arith.constant 0xFF800000 : f32
    "tpu.trace_stop"() : () -> ()
    %144 = vector.shape_cast %8 : vector<64x64xi1> to vector<1x64x64xi1>
    %145 = vector.broadcast %144 : vector<1x64x64xi1> to vector<4x64x64xi1>
    %146 = vector.broadcast %cst_47 : f32 to vector<4x64x64xf32>
    %147 = arith.select %145, %143, %146 : vector<4x64x64xi1>, vector<4x64x64xf32>
    %cst_48 = arith.constant dense<0xFF800000> : vector<4x64xf32>
    %148 = vector.multi_reduction <maximumf>, %147, %cst_48 [2] : vector<4x64x64xf32> to vector<4x64xf32>
    %149 = vector.shape_cast %148 : vector<4x64xf32> to vector<4x64x1xf32>
    %150 = vector.broadcast %149 : vector<4x64x1xf32> to vector<4x64x64xf32>
    %151 = arith.subf %147, %150 : vector<4x64x64xf32>
    %152 = math.exp %151 : vector<4x64x64xf32>
    %cst_49 = arith.constant dense<0.000000e+00> : vector<4x64xf32>
    %153 = vector.multi_reduction <add>, %152, %cst_49 [2] : vector<4x64x64xf32> to vector<4x64xf32>
    %154 = vector.shape_cast %153 : vector<4x64xf32> to vector<4x64x1xf32>
    %155 = arith.truncf %152 : vector<4x64x64xf32> to vector<4x64x64xbf16>
    "tpu.trace_start"() <{level = 10 : i32, message = "bqk,bkd->bqd"}> : () -> ()
    %cst_50 = arith.constant dense<0.000000e+00> : vector<4x64x64xf32>
    %156 = tpu.matmul %155, %142, %cst_50 {dimension_numbers = #tpu.dot_dimension_numbers<[2], [1], [1], [2], [0, 0, 0, 1, 1, 2], [0], [0]>} : vector<4x64x64xbf16>, vector<4x64x64xbf16>, vector<4x64x64xf32> -> vector<4x64x64xf32>
    "tpu.trace_stop"() : () -> ()
    %157 = tpu.reciprocal %154 {approx = true} : vector<4x64x1xf32> -> vector<4x64x1xf32>
    %158 = vector.broadcast %157 : vector<4x64x1xf32> to vector<4x64x64xf32>
    %159 = arith.mulf %156, %158 : vector<4x64x64xf32>
    %160 = vector.shape_cast %159 : vector<4x64x64xf32> to vector<256x64xf32>
    %161 = arith.truncf %160 : vector<256x64xf32> to vector<256x64xbf16>
    %c5 = arith.constant 5 : index
    %c0_51 = arith.constant 0 : index
    %c0_52 = arith.constant 0 : index
    %162 = vector.load %arg3[%c5, %c0_51, %c0_52] : memref<6x64x384xbf16, #tpu.memory_space<vmem>>, vector<1x64x384xbf16>
    %163 = vector.shape_cast %162 : vector<1x64x384xbf16> to vector<64x384xbf16>
    %cst_53 = arith.constant dense<0.000000e+00> : vector<256x384xf32>
    %164 = tpu.matmul %161, %163, %cst_53 {dimension_numbers = #tpu.dot_dimension_numbers<[1], [0], [0], [1], [0, 0, 1, 1], [], []>} : vector<256x64xbf16>, vector<64x384xbf16>, vector<256x384xf32> -> vector<256x384xf32>
    %165 = arith.addf %139, %164 : vector<256x384xf32>
    %c0_54 = arith.constant 0 : index
    %c0_55 = arith.constant 0 : index
    %166 = vector.load %arg4[%c0_54, %c0_55] : memref<1x384xf32, #tpu.memory_space<vmem>>, vector<1x384xf32>
    %167 = vector.broadcast %166 : vector<1x384xf32> to vector<256x384xf32>
    %168 = arith.addf %165, %167 : vector<256x384xf32>
    %169 = vector.shape_cast %168 : vector<256x384xf32> to vector<4x64x384xf32>
    %c0_56 = arith.constant 0 : index
    %c0_57 = arith.constant 0 : index
    %c0_58 = arith.constant 0 : index
    %170 = vector.load %arg5[%c0_56, %c0_57, %c0_58] : memref<4x64x384xf32, #tpu.memory_space<vmem>>, vector<4x64x384xf32>
    tpu.vector_store %arg5[%c0_56, %c0_57, %c0_58], %169 {strides = array<i32>} : memref<4x64x384xf32, #tpu.memory_space<vmem>>, vector<4x64x384xf32>,
    return
  }
  func.func @transform_0(%arg0: i32) -> (i32, i32, i32) {
    %c0_i32 = arith.constant 0 : i32
    %c0_i32_0 = arith.constant 0 : i32
    %c0_i32_1 = arith.constant 0 : i32
    return %arg0, %c0_i32, %c0_i32_0 : i32, i32, i32
  }
  func.func @transform_1(%arg0: i32) -> (i32, i32) {
    %c0_i32 = arith.constant 0 : i32
    %c0_i32_0 = arith.constant 0 : i32
    %c0_i32_1 = arith.constant 0 : i32
    return %c0_i32, %c0_i32_0 : i32, i32
  }
  func.func @transform_2(%arg0: i32) -> (i32, i32, i32) {
    %c0_i32 = arith.constant 0 : i32
    %c0_i32_0 = arith.constant 0 : i32
    %c0_i32_1 = arith.constant 0 : i32
    %c0_i32_2 = arith.constant 0 : i32
    return %c0_i32, %c0_i32_0, %c0_i32_1 : i32, i32, i32
  }
  func.func @transform_3(%arg0: i32) -> (i32, i32) {
    %c0_i32 = arith.constant 0 : i32
    %c0_i32_0 = arith.constant 0 : i32
    %c0_i32_1 = arith.constant 0 : i32
    return %c0_i32, %c0_i32_0 : i32, i32
  }
  func.func @transform_4(%arg0: i32) -> (i32, i32, i32) {
    %c0_i32 = arith.constant 0 : i32
    %c0_i32_0 = arith.constant 0 : i32
    %c0_i32_1 = arith.constant 0 : i32
    return %arg0, %c0_i32, %c0_i32_0 : i32, i32, i32
  }
}

</mosaic_0001>

<bundles_post_ra>
// kernel: tpu_custom_call.1
= control target key start
LH: loop header
LB: loop body
LE: loop exit
PB: predicated region body
PF: predicated region fallthrough
CT: control target
= control target key end

     0   :  { %9 = vsyncpa [#allocation3], 0  ;;  %s24579_s0 = inlined_call_operand.hbm [shape: bf16[8,64,384], index: 0, kind: input, shape index: {}]   ;;  %s24580_s1 = inlined_call_operand.hbm [shape: bf16[384,1152], index: 1, kind: input, shape index: {}]   ;;  %s24581_s2 = inlined_call_operand.hbm [shape: bf16[6,64,384], index: 2, kind: input, shape index: {}]   ;;  %s24582_s3 = inlined_call_operand.vmem [shape: f32[1,384], index: 3, kind: input, shape index: {}]   ;;  %s24583_s4 = inlined_call_operand.hbm [shape: f32[8,64,384], index: 4, kind: output, shape index: {}]  }
   0x1   :  { %11 = vsyncpa [#allocation3 + $0x1], 0 }
   0x2   :  { %12 = vsyncpa [#allocation6], 0 }
   0x3   :  { %13 = vsyncpa [#allocation4], 0 }
   0x4   :  { %15 = vsyncpa [#allocation4 + $0x1], 0  ;;  %s19376_s15 = smov 0   ;;  %s19378_s16 = smov 0  }
   0x5   :  { %s19380_s17 = smov 0   ;;  %s19382_s18 = smov 0  }
   0x6 LB: > { %s19397_s19 = sadd.s32 4294967295, %s19337_s18   ;;  %s14516_s20 = sadd.s32 4294967294, %s19337_s18   ;;  %s19337_s18 = sphi %s19382_s18, %s25412_s18   ;;  %s19333_s17 = sphi %s19380_s17, %s25411_s17   ;;  %s19329_s16 = sphi %s19378_s16, %s25410_s16   ;;  %s19325_s15 = sphi %s19376_s15, %s25409_s15  }
   0x7   : > { %p41_p0 = scmp.ne.s32.totalorder %s19329_s16, %s19325_s15  ;;  %p24584_p1 = scmp.eq.s32.totalorder %s19397_s19, 0 }
   0x8   : > { %p134_p3 = scmp.eq.s32.totalorder %s14516_s20, 1  ;;  %p14517_p5 = scmp.ge.s32.totalorder %s19337_s18, 1 }
   0x9   : > { %p19406_p4 = por %p24584_p1, %p41_p0  ;;  %p141_p7 = scmp.lt.s32.totalorder %s19337_s18, 3 }
   0xa   : > { %p19411_p6 = por %p134_p3, %p41_p0  ;;  %s19339_s24 = smov [#allocation5]  }
   0xb   : > { %s24852_s21 = scalar_select %p19406_p4, 1, 0 }
   0xc   : > { %s24853_s22 = scalar_select %p19411_p6, 1, 0 }
   0xd   : > { %p19416_p8 = pnand %p14517_p5, %p141_p7  ;;  %s153_s25 = sshll.u32 %s19339_s24, 4  ;;  %s19420_s25 = int_to_ptr.vmem [resolvable:$true] %s153_s25 }
   0xe   : > { %s19340_s27 = smov [#allocation7]   ;;  %s19181_s5 = scalar_lea.hbm %s24580_s1, 27648 }
   0xf   : > { %p17821_p9 = pneg %p19416_p8  ;;  %s166_s28 = sshll.u32 %s19340_s27, 4  ;;  %s19431_s28 = int_to_ptr.vmem [resolvable:$true] %s166_s28 }
  0x10   : > { %p19182_p12 = scmp.ne.s32.totalorder %s24580_s1, %s19181_s5  ;;  %p19188_p5 = scmp.lt.u32.totalorder %s19181_s5, %s24580_s1 }
  0x11   : > { %p19427_p11 = pnand %p17821_p9, %p24584_p1 }
  0x13   : > { %p19183_p13 = pneg %p19427_p11 }
  0x15   : > { %p19184_p0 = pnand %p19183_p13, %p19182_p12 }
  0x17   : > { %p19185_p3 = pneg %p19184_p0 }
  0x19   : > { %p19190_p7 = pnand %p19188_p5, %p19185_p3 }
  0x1b   : > { %19193 = shalt.err (!%p19190_p7)
}
  0x1c   : > { %s19194_s10 = scalar_lea.vmem %s19420_s25, 27648  ;;  %p19202_p2 = scmp.lt.s32.totalorder %s19420_s25, %s19420_s25 }
  0x1d   : > { %p19195_p9 = scmp.ne.s32.totalorder %s19420_s25, %s19194_s10  ;;  %p19203_p12 = scmp.lt.s32.totalorder %s19194_s10, %s19194_s10 }
  0x1f   : > { %p19197_p10 = pnand %p19195_p9, %p19183_p13  ;;  %p19204_p0 = por %p19203_p12, %p19202_p2 }
  0x21   : > { %p19198_p1 = pneg %p19197_p10 }
  0x23   : > { %p19205_p6 = pnand %p19204_p0, %p19198_p1 }
  0x25   : > { %19208 = shalt.err (!%p19205_p6)
}
  0x26   : > { %s19341_s11 = smov 576   ;;  %s19342_s12 = smov 36  }
  0x27   : > { %17824 = dma.hbm_to_vmem [thread:$0]  (!%p19427_p11), %s24580_s1, 27648, %s19420_s25, [#allocation6], %s19341_s11, %s19341_s11, %s19342_s12  }
  0x28   : > { %s19209_s27 = scalar_lea.hbm %s24581_s2, 9216 }
  0x29   : > { %p19210_p2 = scmp.ne.s32.totalorder %s24581_s2, %s19209_s27  ;;  %p19216_p10 = scmp.lt.u32.totalorder %s19209_s27, %s24581_s2 }
  0x2b   : > { %p19212_p1 = pnand %p19210_p2, %p19183_p13 }
  0x2d   : > { %p19213_p6 = pneg %p19212_p1 }
  0x2f   : > { %p19218_p3 = pnand %p19216_p10, %p19213_p6 }
  0x31   : > { %19221 = shalt.err (!%p19218_p3)
}
  0x32   : > { %s19222_s25 = scalar_lea.vmem %s19431_s28, 9216  ;;  %p19230_p12 = scmp.lt.s32.totalorder %s19431_s28, %s19431_s28 }
  0x33   : > { %p19223_p5 = scmp.ne.s32.totalorder %s19431_s28, %s19222_s25  ;;  %p19231_p0 = scmp.lt.s32.totalorder %s19222_s25, %s19222_s25 }
  0x35   : > { %p19225_p7 = pnand %p19223_p5, %p19183_p13  ;;  %p19232_p2 = por %p19231_p0, %p19230_p12 }
  0x37   : > { %p19226_p9 = pneg %p19225_p7 }
  0x39   : > { %p19233_p1 = pnand %p19232_p2, %p19226_p9 }
  0x3b   : > { %19236 = shalt.err (!%p19233_p1)
}
  0x3c   : > { %s19343_s7 = smov 192   ;;  %s19344_s8 = smov 12  }
  0x3d   : > { %17827 = dma.hbm_to_vmem [thread:$0]  (!%p19427_p11), %s24581_s2, 9216, %s19431_s28, [#allocation6], %s19343_s7, %s19343_s7, %s19344_s8  }
  0x3e   : > { %s19489_s11 = sadd.s32 1, %s19337_s18   ;;  %s28_s13 = sadd.s32 1, %s19333_s17 }
  0x3f   : > { %s25_s12 = ssub.s32 %s19337_s18, %s19489_s11  ;;  %p35_p6 = scmp.ne.s32.totalorder %s19333_s17, %s19329_s16 }
  0x40   : > { %p26_p13 = scmp.eq.s32.totalorder %s25_s12, 0  ;;  %p36_p10 = scmp.eq.s32.totalorder %s19337_s18, 0 }
  0x41   : > { %p24856_p5 = scmp.eq.s32.totalorder %s19397_s19, 1  ;;  %p17838_p9 = scmp.lt.s32.totalorder %s19337_s18, 2 }
  0x42   : > { %s19498_s14 = scalar_select %p26_p13, %s19333_s17, %s28_s13  }
  0x43   : > { %p37_p3 = por %p36_p10, %p35_p6  ;;  %p19502_p7 = por %p24856_p5, %p35_p6 }
  0x44   : > { %s183_s20 = sand.u32 1, %s19333_s17   ;;  %s17805_s28 = smul.u32 6144, %s19337_s18 }
  0x45   : > { %s24857_s26 = scalar_select %p19502_p7, 1, 0 }
  0x46   : > { %s17804_s24 = smul.u32 384, %s183_s20  ;;  %p19509_p11 = pnand %p17838_p9, %p37_p3 }
  0x47   : > { %s19516_s5 = scalar_lea.hbm %s24579_s0, %s17805_s28  ;;  %s19520_s9 = scalar_lea.sflag [#allocation3], %s183_s20 }
  0x48   : > { %s187_s6 = scalar_lea.vmem [#allocation2], %s17804_s24  ;;  %s19237_s10 = scalar_lea.hbm %s19516_s5, 6144 }
  0x49   : > { %s195_s25 = sshll.u32 %s187_s6, 4  ;;  %p19238_p12 = scmp.ne.s32.totalorder %s19516_s5, %s19237_s10  ;;  %s19518_s25 = int_to_ptr.vmem [resolvable:$true] %s195_s25 }
  0x4a   : > { %p19239_p0 = pneg %p19509_p11  ;;  %s19242_s28 = scalar_lea.hbm %s24579_s0, 12288 }
  0x4b   : > { %p19243_p13 = scmp.lt.u32.totalorder %s19516_s5, %s24579_s0  ;;  %p19244_p6 = scmp.lt.u32.totalorder %s19242_s28, %s19237_s10 }
  0x4c   : > { %p19240_p2 = pnand %p19239_p0, %p19238_p12  ;;  %p19246_p3 = scmp.lt.u32.totalorder %s19237_s10, %s19516_s5 }
  0x4d   : > { %p19245_p10 = por %p19244_p6, %p19243_p13 }
  0x4e   : > { %p19241_p1 = pneg %p19240_p2 }
  0x4f   : > { %p19247_p5 = por %p19246_p3, %p19245_p10 }
  0x51   : > { %p19248_p9 = pnand %p19247_p5, %p19241_p1 }
  0x53   : > { %19251 = shalt.err (!%p19248_p9)
}
  0x54   : > { %s19252_s20 = scalar_lea.vmem %s19518_s25, 6144  ;;  %s19345_s24 = smov [#allocation2]  }
  0x55   : > { %p19253_p12 = scmp.ne.s32.totalorder %s19518_s25, %s19252_s20  ;;  %s19257_s6 = sshll.u32 %s19345_s24, 4  ;;  %s19258_s6 = int_to_ptr.vmem [resolvable:$false] %s19257_s6 }
  0x56   : > { %s19259_s12 = scalar_lea.vmem %s19258_s6, 12288  ;;  %p19260_p4 = scmp.lt.s32.totalorder %s19518_s25, %s19258_s6 }
  0x57   : > { %p19255_p2 = pnand %p19253_p12, %p19239_p0  ;;  %p19261_p13 = scmp.lt.s32.totalorder %s19259_s12, %s19252_s20 }
  0x59   : > { %p19256_p7 = pneg %p19255_p2  ;;  %p19262_p6 = por %p19261_p13, %p19260_p4 }
  0x5b   : > { %p19263_p10 = pnand %p19262_p6, %p19256_p7 }
  0x5d   : > { %19266 = shalt.err (!%p19263_p10)
}
  0x5e   : > { %17831 = dma.hbm_to_vmem [thread:$0]  (!%p19509_p11), %s19516_s5, 6144, %s19518_s25, %s19520_s9, %s19343_s7, %s19343_s7, %s19344_s8  }
  0x5f   : > { %207 = sbr.rel (%p19416_p8) target bundleno = 5247 (0x147f), region = 36 }
  0x66   : > { %s19554_s10 = sand.u32 1, %s19329_s16   ;;  %p24859_p4 = scmp.ne.s32.totalorder %s24852_s21, 0 }
  0x67   : > { %s17806_s13 = smul.u32 384, %s19554_s10  ;;  %s210_s28 = scalar_lea.sflag [#allocation3], %s19554_s10 }
  0x69   : > { %s19558_s29 = scalar_lea.vmem [#allocation2], %s17806_s13 }
  0x6a   : > { %19312 = dma.done.wait (%p24859_p4), %s210_s28, 6144  }
  0x6b   : > { %19314 = vsyncadd (%p24859_p4), %s210_s28, 4294961152  ;;  %p24860_p7 = scmp.eq.s32.totalorder %s19397_s19, 0 }
  0x6d   : > { %19316 = dma.done.wait (%p24860_p7), [#allocation6], 36864   ;;  %p24861_p8 = pmov %p24860_p7 }
  0x6e   : > { %v24590_v0 = vmov 0   ;;  %v17884_v1 = vld [vmem:[#allocation5 + $0x4] ss:$36 sps:$4 sm:$0xff]   ;;  %v17890_v5 = vld [vmem:[#allocation5 + $0x4c] ss:$36 sps:$4 sm:$0xff]   ;;  %s19347_s21 = smov 64  }
  0x6f   : > { %19318 = vsyncadd (%p24861_p8), [#allocation6], 4294930432  ;;  %2218 = vmatprep.mubr.bf16.mxu1 %v24590_v0  ;;  %v19569_v2 = vld [vmem:[#allocation5 + $0x484] ss:$36 sps:$4 sm:$0xff]   ;;  %1913 = vmatprep.subr.bf16.mxu0 %v17884_v1  ;;  %v19575_v6 = vld [vmem:[#allocation5 + $0x4cc] ss:$36 sps:$4 sm:$0xff]  }
  0x70   : > { %v17888_v3 = vld [vmem:[#allocation5] ss:$36 sps:$4 sm:$0xff]   ;;  %16948 = vmatprep.subr.bf16.mxu1 %v19569_v2  ;;  %v17894_v7 = vld [vmem:[#allocation5 + $0x48] ss:$36 sps:$4 sm:$0xff]   ;;  %v17896_v9 = vld [vmem:[#allocation5 + $0x94] ss:$36 sps:$4 sm:$0xff]  }
  0x71   : > { %v19571_v4 = vld [vmem:[#allocation5 + $0x480] ss:$36 sps:$4 sm:$0xff]   ;;  %1914 = vmatpush1.bf16.msra.mxu0 %v17888_v3  ;;  %v19577_v8 = vld [vmem:[#allocation5 + $0x4c8] ss:$36 sps:$4 sm:$0xff]   ;;  %v19580_v10 = vld [vmem:[#allocation5 + $0x514] ss:$36 sps:$4 sm:$0xff]  }
  0x72   : > { %16956 = vmatpush1.bf16.msra.mxu1 %v19571_v4  ;;  %1915 = vmatprep.subr.bf16.mxu0 %v17890_v5  ;;  %v17900_v11 = vld [vmem:[#allocation5 + $0x90] ss:$36 sps:$4 sm:$0xff]   ;;  %v17902_v13 = vld [vmem:[#allocation5 + $0xdc] ss:$36 sps:$4 sm:$0xff]   ;;  %v17908_v17 = vld [vmem:[#allocation5 + $0x124] ss:$36 sps:$4 sm:$0xff]  }
  0x73   : > { %16949 = vmatprep.subr.bf16.mxu1 %v19575_v6  ;;  %v19582_v12 = vld [vmem:[#allocation5 + $0x510] ss:$36 sps:$4 sm:$0xff]   ;;  %v19586_v14 = vld [vmem:[#allocation5 + $0x55c] ss:$36 sps:$4 sm:$0xff]   ;;  %v19592_v18 = vld [vmem:[#allocation5 + $0x5a4] ss:$36 sps:$4 sm:$0xff]  }
  0x74   : > { %v17906_v15 = vld [vmem:[#allocation5 + $0xd8] ss:$36 sps:$4 sm:$0xff]   ;;  %v17912_v19 = vld [vmem:[#allocation5 + $0x120] ss:$36 sps:$4 sm:$0xff]   ;;  %v17914_v21 = vld [vmem:[#allocation5 + $0x16c] ss:$36 sps:$4 sm:$0xff]  }
  0x75   : > { %1916 = vmatpush1.bf16.msra.mxu0 %v17894_v7  ;;  %v19589_v16 = vld [vmem:[#allocation5 + $0x558] ss:$36 sps:$4 sm:$0xff]   ;;  %v19594_v20 = vld [vmem:[#allocation5 + $0x5a0] ss:$36 sps:$4 sm:$0xff]   ;;  %v19598_v22 = vld [vmem:[#allocation5 + $0x5ec] ss:$36 sps:$4 sm:$0xff]  }
  0x76   : > { %16957 = vmatpush1.bf16.msra.mxu1 %v19577_v8  ;;  %1917 = vmatprep.subr.bf16.mxu0 %v17896_v9  ;;  %v17918_v23 = vld [vmem:[#allocation5 + $0x168] ss:$36 sps:$4 sm:$0xff]   ;;  %v17920_v25 = vld [vmem:[#allocation5 + $0x1b4] ss:$36 sps:$4 sm:$0xff]   ;;  %v17926_v29 = vld [vmem:[#allocation5 + $0x1fc] ss:$36 sps:$4 sm:$0xff]  }
  0x77   : > { %16950 = vmatprep.subr.bf16.mxu1 %v19580_v10  ;;  %v19601_v24 = vld [vmem:[#allocation5 + $0x5e8] ss:$36 sps:$4 sm:$0xff]   ;;  %v19604_v26 = vld [vmem:[#allocation5 + $0x634] ss:$36 sps:$4 sm:$0xff]   ;;  %v19610_v30 = vld [vmem:[#allocation5 + $0x67c] ss:$36 sps:$4 sm:$0xff]  }
  0x78   : > { %v17924_v27 = vld [vmem:[#allocation5 + $0x1b0] ss:$36 sps:$4 sm:$0xff]   ;;  %v17930_v31 = vld [vmem:[#allocation5 + $0x1f8] ss:$36 sps:$4 sm:$0xff]   ;;  %v17932_v33 = vld [vmem:[#allocation5 + $0x244] ss:$36 sps:$4 sm:$0xff]  }
  0x79   : > { %1918 = vmatpush1.bf16.msra.mxu0 %v17900_v11  ;;  %v19607_v28 = vld [vmem:[#allocation5 + $0x630] ss:$36 sps:$4 sm:$0xff]   ;;  %v19612_v32 = vld [vmem:[#allocation5 + $0x678] ss:$36 sps:$4 sm:$0xff]   ;;  %v17935_v36 = vld [vmem:[#allocation5 + $0x8] ss:$36 sps:$4 sm:$0xff]  }
  0x7a   : > { %16958 = vmatpush1.bf16.msra.mxu1 %v19582_v12  ;;  %1919 = vmatprep.subr.bf16.mxu0 %v17902_v13  ;;  %v17937_v34 = vld [vmem:[#allocation5 + $0xc] ss:$36 sps:$4 sm:$0xff]   ;;  %v17934_v35 = vld [vmem:[%s19558_s29 + $0xc8] ss:$12 sps:$4 sm:$0xff]   ;;  %v17938_v37 = vld [vmem:[#allocation5 + $0x240] ss:$36 sps:$4 sm:$0xff]  }
  0x7b   : > { %16951 = vmatprep.subr.bf16.mxu1 %v19586_v14  ;;  %v17939_v38 = vld [vmem:[#allocation5 + $0x28c] ss:$36 sps:$4 sm:$0xff]   ;;  %v17943_v39 = vld [vmem:[#allocation5 + $0x54] ss:$36 sps:$4 sm:$0xff]   ;;  %v17950_v43 = vld [vmem:[#allocation5 + $0x9c] ss:$36 sps:$4 sm:$0xff]  }
  0x7c   : > { %v17941_v40 = vld [vmem:[#allocation5 + $0x50] ss:$36 sps:$4 sm:$0xff]   ;;  %v17944_v41 = vld [vmem:[#allocation5 + $0x288] ss:$36 sps:$4 sm:$0xff]   ;;  %v17948_v45 = vld [vmem:[#allocation5 + $0x98] ss:$36 sps:$4 sm:$0xff]  }
  0x7d   : > { %1920 = vmatpush1.bf16.msra.mxu0 %v17906_v15  ;;  %v17945_v42 = vld [vmem:[#allocation5 + $0x2d4] ss:$36 sps:$4 sm:$0xff]   ;;  %v17947_v44 = vld [vmem:[%s19558_s29 + $0xe0] ss:$12 sps:$4 sm:$0xff]   ;;  %v17956_v48 = vld [vmem:[#allocation5 + $0xe4] ss:$36 sps:$4 sm:$0xff]  }
  0x7e   : > { %16959 = vmatpush1.bf16.msra.mxu1 %v19589_v16  ;;  %1921 = vmatprep.subr.bf16.mxu0 %v17908_v17  ;;  %v17951_v46 = vld [vmem:[#allocation5 + $0x2d0] ss:$36 sps:$4 sm:$0xff]   ;;  %v17952_v47 = vld [vmem:[#allocation5 + $0x31c] ss:$36 sps:$4 sm:$0xff]   ;;  %v17958_v51 = vld [vmem:[#allocation5 + $0x364] ss:$36 sps:$4 sm:$0xff]  }
  0x7f   : > { %16952 = vmatprep.subr.bf16.mxu1 %v19592_v18  ;;  %v17954_v49 = vld [vmem:[#allocation5 + $0xe0] ss:$36 sps:$4 sm:$0xff]   ;;  %v17957_v50 = vld [vmem:[#allocation5 + $0x318] ss:$36 sps:$4 sm:$0xff]   ;;  %v17963_v52 = vld [vmem:[#allocation5 + $0x12c] ss:$36 sps:$4 sm:$0xff]  }
  0x80   : > { %v17960_v53 = vld [vmem:[%s19558_s29 + $0xf8] ss:$12 sps:$4 sm:$0xff]   ;;  %v17961_v54 = vld [vmem:[#allocation5 + $0x128] ss:$36 sps:$4 sm:$0xff]   ;;  %v17967_v59 = vld [vmem:[#allocation5 + $0x170] ss:$36 sps:$4 sm:$0xff]  }
  0x81   : > { %1922 = vmatpush1.bf16.msra.mxu0 %v17912_v19  ;;  %v17964_v55 = vld [vmem:[#allocation5 + $0x360] ss:$36 sps:$4 sm:$0xff]   ;;  %v17965_v57 = vld [vmem:[#allocation5 + $0x3ac] ss:$36 sps:$4 sm:$0xff]   ;;  %v17969_v58 = vld [vmem:[#allocation5 + $0x174] ss:$36 sps:$4 sm:$0xff]  }
  0x82   : > { %16960 = vmatpush1.bf16.msra.mxu1 %v19594_v20  ;;  %1923 = vmatprep.subr.bf16.mxu0 %v17914_v21  ;;  %v19623_v56 = vld [vmem:[%s19558_s29 + $0x4] ss:$12 sps:$4 sm:$0xff]   ;;  %v17970_v60 = vld [vmem:[#allocation5 + $0x3a8] ss:$36 sps:$4 sm:$0xff]   ;;  %v17971_v61 = vld [vmem:[#allocation5 + $0x3f4] ss:$36 sps:$4 sm:$0xff]  }
  0x83   : > { %16953 = vmatprep.subr.bf16.mxu1 %v19598_v22  ;;  %1945 = vmatprep.mubr.bf16.mxu0 %v19623_v56  ;;  %v17976_v62 = vld [vmem:[#allocation5 + $0x1bc] ss:$36 sps:$4 sm:$0xff]   ;;  %v17977_v3 = vld [vmem:[#allocation5 + $0x3f0] ss:$36 sps:$4 sm:$0xff]   ;;  %v17982_v7 = vld [vmem:[#allocation5 + $0x204] ss:$36 sps:$4 sm:$0xff]  }
  0x84   : > { %v17973_v63 = vld [vmem:[%s19558_s29 + $0x110] ss:$12 sps:$4 sm:$0xff]   ;;  %v17980_v9 = vld [vmem:[#allocation5 + $0x200] ss:$36 sps:$4 sm:$0xff]   ;;  %v17987_v17 = vld [vmem:[%s19558_s29 + $0x128] ss:$12 sps:$4 sm:$0xff]  }
  0x85   : > { %1924 = vmatpush1.bf16.msra.mxu0 %v17918_v23  ;;  %v17974_v1 = vld [vmem:[#allocation5 + $0x1b8] ss:$36 sps:$4 sm:$0xff]   ;;  %v17990_v13 = vld [vmem:[#allocation5 + $0x24c] ss:$36 sps:$4 sm:$0xff]   ;;  %vm3942_vm0 = vcmask 523264   ;;  %s17807_s8 = smul.u32 768, %s19554_s10 }
  0x86   : > { %16961 = vmatpush1.bf16.msra.mxu1 %v19601_v24  ;;  %1925 = vmatprep.subr.bf16.mxu0 %v17920_v25  ;;  %v17978_v5 = vld [vmem:[#allocation5 + $0x43c] ss:$36 sps:$4 sm:$0xff]   ;;  %v17988_v19 = vld [vmem:[#allocation5 + $0x248] ss:$36 sps:$4 sm:$0xff]   ;;  %v17993_v23 = vld [vmem:[#allocation5 + $0x294] ss:$36 sps:$4 sm:$0xff]  }
  0x87   : > { %16954 = vmatprep.subr.bf16.mxu1 %v19604_v26  ;;  %v17983_v11 = vld [vmem:[#allocation5 + $0x438] ss:$36 sps:$4 sm:$0xff]   ;;  %v19630_v15 = vld [vmem:[%s19558_s29] ss:$12 sps:$4 sm:$0xff]   ;;  %v17991_v25 = vld [vmem:[#allocation5 + $0x290] ss:$36 sps:$4 sm:$0xff]  }
  0x88   : > { %v19634_v21 = vld [vmem:[%s19558_s29 + $0x1c] ss:$12 sps:$4 sm:$0xff]   ;;  %s24330_s27 = scalar_lea.vmem [#allocation8], %s17807_s8  ;;  %s17808_s5 = smul.u32 12288, %s19397_s19 }
  0x89   : > { %1926 = vmatpush1.bf16.msra.mxu0 %v17924_v27  ;;  %v18000_v27 = vld [vmem:[#allocation5 + $0x2dc] ss:$36 sps:$4 sm:$0xff]   ;;  %s14424_s25 = sshll.u32 %s24330_s27, 4  ;;  %s14410_s20 = scalar_lea.sflag [#allocation4], %s19554_s10  ;;  %s24533_s25 = int_to_ptr.vmem [resolvable:$true] %s14424_s25 }
  0x8a   : > { %16962 = vmatpush1.bf16.msra.mxu1 %v19607_v28  ;;  %1927 = vmatprep.subr.bf16.mxu0 %v17926_v29  ;;  %v19641_v29 = vld [vmem:[%s19558_s29 + $0x18] ss:$12 sps:$4 sm:$0xff]   ;;  %s24529_s30 = scalar_lea.hbm %s24583_s4, %s17808_s5  ;;  %s19267_s24 = scalar_lea.vmem %s24533_s25, 12288 }
  0x8b   : > { %16955 = vmatprep.subr.bf16.mxu1 %v19610_v30  ;;  %p19268_p11 = scmp.ne.s32.totalorder %s24533_s25, %s19267_s24  ;;  %p25406_p0 = scmp.ne.s32.totalorder %s24857_s26, 0 }
  0x8c   : > { %s19348_s6 = smov [#allocation8]  }
  0x8d   : > { %1928 = vmatpush1.bf16.msra.mxu0 %v17930_v31  ;;  %v17997_v31 = vld [vmem:[%s19558_s29 + $0x140] ss:$12 sps:$4 sm:$0xff]   ;;  %p19269_p1 = pnand %p19268_p11, %p25406_p0  ;;  %s19271_s12 = sshll.u32 %s19348_s6, 4  ;;  %s19272_s12 = int_to_ptr.vmem [resolvable:$false] %s19271_s12 }
  0x8e   : > { %16963 = vmatpush1.bf16.msra.mxu1 %v19612_v32  ;;  %1929 = vmatprep.subr.bf16.mxu0 %v17932_v33  ;;  %v17998_v33 = vld [vmem:[#allocation5 + $0x2d8] ss:$36 sps:$4 sm:$0xff]   ;;  %s19273_s13 = scalar_lea.vmem %s19272_s12, 24576  ;;  %p19274_p5 = scmp.lt.s32.totalorder %s24533_s25, %s19272_s12 }
  0x8f   : > { %2299 = vmatprep.subr.bf16.mxu1 %v17937_v34  ;;  %v18003_v34 = vld [vmem:[#allocation5 + $0x324] ss:$36 sps:$4 sm:$0xff]   ;;  %p19270_p3 = pneg %p19269_p1  ;;  %p19275_p9 = scmp.lt.s32.totalorder %s19273_s13, %s19267_s24 }
  0x91   : > { %2219 = vmatmul.mubr.bf16.vlgmr.msra.gmra.mrb[0].mxu1 %v17934_v35  ;;  %1930 = vmatpush1.bf16.msra.mxu0 %v17938_v37  ;;  %v18001_v35 = vld [vmem:[#allocation5 + $0x320] ss:$36 sps:$4 sm:$0xff]   ;;  %v18008_v37 = vld [vmem:[#allocation5 + $0x368] ss:$36 sps:$4 sm:$0xff]   ;;  %p19276_p12 = por %p19275_p9, %p19274_p5 }
  0x92   : > { %2300 = vmatpush1.bf16.msra.mxu1 %v17935_v36  ;;  %1931 = vmatprep.subr.bf16.mxu0 %v17939_v38  ;;  %v18007_v36 = vld [vmem:[%s19558_s29 + $0x158] ss:$12 sps:$4 sm:$0xff]  }
  0x93   : > { %2301 = vmatprep.subr.bf16.mxu1 %v17943_v39  ;;  %2228 = vmatprep.mubr.bf16.mxu1 %v24590_v0  ;;  %v18013_v38 = vld [vmem:[#allocation5 + $0x3b4] ss:$36 sps:$4 sm:$0xff]   ;;  %p19277_p2 = pnand %p19276_p12, %p19270_p3 }
  0x94   : > { %v18011_v39 = vld [vmem:[#allocation5 + $0x3b0] ss:$36 sps:$4 sm:$0xff]  }
  0x95   : > { %1932 = vmatpush1.bf16.msra.mxu0 %v17944_v41  ;;  %v19673_v41 = vld [vmem:[%s19558_s29 + $0x64] ss:$12 sps:$4 sm:$0xff]  }
  0x96   : > { %2302 = vmatpush1.bf16.msra.mxu1 %v17941_v40  ;;  %1933 = vmatprep.subr.bf16.mxu0 %v17945_v42  ;;  %v18017_v40 = vld [vmem:[%s19558_s29 + $0x170] ss:$12 sps:$4 sm:$0xff]   ;;  %v18023_v42 = vld [vmem:[#allocation5 + $0x444] ss:$36 sps:$4 sm:$0xff]  }
  0x97   : > { %2303 = vmatprep.subr.bf16.mxu1 %v17950_v43  ;;  %v19681_v43 = vld [vmem:[%s19558_s29 + $0x60] ss:$12 sps:$4 sm:$0xff]  }
  0x99   : > { %2229 = vmatmul.mubr.bf16.gmra.mrb[4].mxu1 %v17947_v44  ;;  %1934 = vmatpush1.bf16.msra.mxu0 %v17951_v46  ;;  %v19685_v44 = vld [vmem:[%s19558_s29 + $0x7c] ss:$12 sps:$4 sm:$0xff]   ;;  %v18029_v46 = vld [vmem:[%s19558_s29 + $0x78] ss:$12 sps:$4 sm:$0xff]  }
  0x9a   : > { %2304 = vmatpush1.bf16.msra.mxu1 %v17948_v45  ;;  %1935 = vmatprep.subr.bf16.mxu0 %v17952_v47  ;;  %v18069_v45 = vld [vmem:[#allocation5 + $0x4d4] ss:$36 sps:$4 sm:$0xff]  }
  0x9b   : > { %2305 = vmatprep.subr.bf16.mxu1 %v17956_v48  ;;  %2238 = vmatprep.mubr.bf16.mxu1 %v24590_v0  ;;  %v18030_v47 = vld [vmem:[%s19558_s29 + $0x94] ss:$12 sps:$4 sm:$0xff]   ;;  %v18074_v48 = vld [vmem:[#allocation5 + $0x518] ss:$36 sps:$4 sm:$0xff]  }
  0x9d   : > { %1936 = vmatpush1.bf16.msra.mxu0 %v17957_v50  ;;  %v18032_v50 = vld [vmem:[%s19558_s29 + $0x90] ss:$12 sps:$4 sm:$0xff]  }
  0x9e   : > { %2306 = vmatpush1.bf16.msra.mxu1 %v17954_v49  ;;  %1937 = vmatprep.subr.bf16.mxu0 %v17958_v51  ;;  %v18082_v49 = vld [vmem:[#allocation5 + $0x564] ss:$36 sps:$4 sm:$0xff]   ;;  %v18033_v51 = vld [vmem:[%s19558_s29 + $0xac] ss:$12 sps:$4 sm:$0xff]  }
  0x9f   : > { %2307 = vmatprep.subr.bf16.mxu1 %v17963_v52  ;;  %v18095_v52 = vld [vmem:[#allocation5 + $0x5f4] ss:$36 sps:$4 sm:$0xff]  }
  0xa1   : > { %2239 = vmatmul.mubr.bf16.gmra.mrb[8].mxu1 %v17960_v53  ;;  %1938 = vmatpush1.bf16.msra.mxu0 %v17964_v55  ;;  %v18035_v53 = vld [vmem:[%s19558_s29 + $0xa8] ss:$12 sps:$4 sm:$0xff]   ;;  %v18036_v55 = vld [vmem:[%s19558_s29 + $0xc4] ss:$12 sps:$4 sm:$0xff]  }
  0xa2   : > { %2308 = vmatpush1.bf16.msra.mxu1 %v17961_v54  ;;  %1939 = vmatprep.subr.bf16.mxu0 %v17965_v57  ;;  %v18093_v54 = vld [vmem:[#allocation5 + $0x5f0] ss:$36 sps:$4 sm:$0xff]   ;;  %v18100_v57 = vld [vmem:[#allocation5 + $0x638] ss:$36 sps:$4 sm:$0xff]  }
  0xa3   : > { %2309 = vmatprep.subr.bf16.mxu1 %v17969_v58  ;;  %2248 = vmatprep.mubr.bf16.mxu1 %v24590_v0  ;;  %v18108_v58 = vld [vmem:[#allocation5 + $0x684] ss:$36 sps:$4 sm:$0xff]  }
  0xa5   : > { %1940 = vmatpush1.bf16.msra.mxu0 %v17970_v60  ;;  %v18106_v60 = vld [vmem:[#allocation5 + $0x680] ss:$36 sps:$4 sm:$0xff]  }
  0xa6   : > { %2310 = vmatpush1.bf16.msra.mxu1 %v17967_v59  ;;  %1941 = vmatprep.subr.bf16.mxu0 %v17971_v61  ;;  %v18038_v59 = vld [vmem:[%s19558_s29 + $0xc0] ss:$12 sps:$4 sm:$0xff]   ;;  %v19709_v61 = vld [vmem:[%s19558_s29 + $0xdc] ss:$12 sps:$4 sm:$0xff]  }
  0xa7   : > { %2311 = vmatprep.subr.bf16.mxu1 %v17976_v62  ;;  %v19715_v62 = vld [vmem:[%s19558_s29 + $0xd8] ss:$12 sps:$4 sm:$0xff]  }
  0xa9   : > { %2249 = vmatmul.mubr.bf16.gmra.mrb[12].mxu1 %v17973_v63  ;;  %1942 = vmatpush1.bf16.msra.mxu0 %v17977_v3  ;;  %v19718_v63 = vld [vmem:[%s19558_s29 + $0xf4] ss:$12 sps:$4 sm:$0xff]   ;;  %v19726_v3 = vld [vmem:[%s19558_s29 + $0x10c] ss:$12 sps:$4 sm:$0xff]  }
  0xaa   : > { %2312 = vmatpush1.bf16.msra.mxu1 %v17974_v1  ;;  %1943 = vmatprep.subr.bf16.mxu0 %v17978_v5  ;;  %v19723_v1 = vld [vmem:[%s19558_s29 + $0xf0] ss:$12 sps:$4 sm:$0xff]   ;;  %v19731_v5 = vld [vmem:[%s19558_s29 + $0x108] ss:$12 sps:$4 sm:$0xff]  }
  0xab   : > { %2313 = vmatprep.subr.bf16.mxu1 %v17982_v7  ;;  %2258 = vmatprep.mubr.bf16.mxu1 %v24590_v0  ;;  %v19734_v7 = vld [vmem:[%s19558_s29 + $0x124] ss:$12 sps:$4 sm:$0xff]  }
  0xad   : > { %1944 = vmatpush1.bf16.msra.mxu0 %v17983_v11  ;;  %v19742_v11 = vld [vmem:[%s19558_s29 + $0x13c] ss:$12 sps:$4 sm:$0xff]  }
  0xae   : > { %2314 = vmatpush1.bf16.msra.mxu1 %v17980_v9  ;;  %2106 = vmatprep.subr.bf16.mxu0 %v19569_v2  ;;  %v19647_v2 = vld [vmem:[%s19558_s29 + $0x34] ss:$12 sps:$4 sm:$0xff]  }
  0xaf   : > { %2315 = vmatprep.subr.bf16.mxu1 %v17990_v13  ;;  %v19739_v9 = vld [vmem:[%s19558_s29 + $0x120] ss:$12 sps:$4 sm:$0xff]  }
  0xb0   : > { %1946 = vmatmul.mubr.bf16.vlgmr.msra.gmra.mrb[0].mxu0 %v19630_v15  ;;  %v18142_v13 = vld [vmem:[#allocation5 + $0x1c] ss:$36 sps:$4 sm:$0xff]  }
  0xb1   : > { %2259 = vmatmul.mubr.bf16.gmra.mrb[16].mxu1 %v17987_v17  ;;  %1955 = vmatprep.mubr.bf16.mxu0 %v19634_v21  ;;  %v19751_v17 = vld [vmem:[%s19558_s29 + $0x154] ss:$12 sps:$4 sm:$0xff]  }
  0xb2   : > { %2316 = vmatpush1.bf16.msra.mxu1 %v17988_v19  ;;  %2268 = vmatprep.mubr.bf16.mxu1 %v24590_v0  ;;  %v19758_v19 = vld [vmem:[%s19558_s29 + $0x150] ss:$12 sps:$4 sm:$0xff]  }
  0xb3   : > { %2317 = vmatprep.subr.bf16.mxu1 %v17993_v23  ;;  %2107 = vmatpush1.bf16.msra.mxu0 %v19571_v4  ;;  %v18010_v4 = vld [vmem:[#allocation5 + $0x36c] ss:$36 sps:$4 sm:$0xff]   ;;  %v19768_v23 = vld [vmem:[%s19558_s29 + $0x168] ss:$12 sps:$4 sm:$0xff]  }
  0xb4   : > { %2108 = vmatprep.subr.bf16.mxu0 %v19575_v6  ;;  %v19654_v6 = vld [vmem:[%s19558_s29 + $0x30] ss:$12 sps:$4 sm:$0xff]  }
  0xb6   : > { %2318 = vmatpush1.bf16.msra.mxu1 %v17991_v25  ;;  %v19775_v25 = vld [vmem:[%s19558_s29 + $0x8] ss:$12 sps:$4 sm:$0xff]  }
  0xb7   : > { %2319 = vmatprep.subr.bf16.mxu1 %v18000_v27  ;;  %2109 = vmatpush1.bf16.msra.mxu0 %v19577_v8  ;;  %v19660_v8 = vld [vmem:[%s19558_s29 + $0x4c] ss:$12 sps:$4 sm:$0xff]   ;;  %v18064_v27 = vld [vmem:[#allocation5 + $0x10] ss:$36 sps:$4 sm:$0xff]  }
  0xb8   : > { %1956 = vmatmul.mubr.bf16.gmra.mrb[4].mxu0 %v19641_v29  ;;  %2110 = vmatprep.subr.bf16.mxu0 %v19580_v10  ;;  %v18020_v10 = vld [vmem:[#allocation5 + $0x3fc] ss:$36 sps:$4 sm:$0xff]  }
  0xb9   : > { %2269 = vmatmul.mubr.bf16.gmra.mrb[20].mxu1 %v17997_v31  ;;  %1965 = vmatprep.mubr.bf16.mxu0 %v19647_v2  ;;  %v18070_v31 = vld [vmem:[#allocation5 + $0x58] ss:$36 sps:$4 sm:$0xff]  }
  0xba   : > { %2320 = vmatpush1.bf16.msra.mxu1 %v17998_v33  ;;  %2278 = vmatprep.mubr.bf16.mxu1 %v24590_v0  ;;  %v18079_v33 = vld [vmem:[#allocation5 + $0xa4] ss:$36 sps:$4 sm:$0xff]  }
  0xbb   : > { %2321 = vmatprep.subr.bf16.mxu1 %v18003_v34  ;;  %2111 = vmatpush1.bf16.msra.mxu0 %v19582_v12  ;;  %v19668_v12 = vld [vmem:[%s19558_s29 + $0x48] ss:$12 sps:$4 sm:$0xff]   ;;  %v18077_v34 = vld [vmem:[#allocation5 + $0xa0] ss:$36 sps:$4 sm:$0xff]  }
  0xbc   : > { %2112 = vmatprep.subr.bf16.mxu0 %v19586_v14  ;;  %v18018_v14 = vld [vmem:[#allocation5 + $0x3f8] ss:$36 sps:$4 sm:$0xff]  }
  0xbe   : > { %2322 = vmatpush1.bf16.msra.mxu1 %v18001_v35  ;;  %v18085_v35 = vld [vmem:[#allocation5 + $0xec] ss:$36 sps:$4 sm:$0xff]  }
  0xbf   : > { %2323 = vmatprep.subr.bf16.mxu1 %v18010_v4  ;;  %2113 = vmatpush1.bf16.msra.mxu0 %v19589_v16  ;;  %v18021_v16 = vld [vmem:[#allocation5 + $0x440] ss:$36 sps:$4 sm:$0xff]   ;;  %v18083_v4 = vld [vmem:[#allocation5 + $0xe8] ss:$36 sps:$4 sm:$0xff]  }
  0xc0   : > { %1966 = vmatmul.mubr.bf16.gmra.mrb[8].mxu0 %v19654_v6  ;;  %2114 = vmatprep.subr.bf16.mxu0 %v19592_v18  ;;  %v18063_v18 = vld [vmem:[#allocation5 + $0x48c] ss:$36 sps:$4 sm:$0xff]  }
  0xc1   : > { %2279 = vmatmul.mubr.bf16.gmra.mrb[24].mxu1 %v18007_v36  ;;  %1975 = vmatprep.mubr.bf16.mxu0 %v19660_v8  ;;  %v19789_v36 = vld [vmem:[%s19558_s29 + $0x38] ss:$12 sps:$4 sm:$0xff]  }
  0xc2   : > { %2324 = vmatpush1.bf16.msra.mxu1 %v18008_v37  ;;  %2288 = vmatprep.mubr.bf16.mxu1 %v24590_v0  ;;  %24862 = vst [vmem:[#allocation12_spill] sm:$0xff] %v19789_v36  ;;  %v18090_v37 = vld [vmem:[#allocation5 + $0x130] ss:$36 sps:$4 sm:$0xff]  }
  0xc3   : > { %2325 = vmatprep.subr.bf16.mxu1 %v18013_v38  ;;  %2115 = vmatpush1.bf16.msra.mxu0 %v19594_v20  ;;  %v18061_v20 = vld [vmem:[#allocation5 + $0x488] ss:$36 sps:$4 sm:$0xff]   ;;  %v18096_v38 = vld [vmem:[#allocation5 + $0x178] ss:$36 sps:$4 sm:$0xff]  }
  0xc4   : > { %2116 = vmatprep.subr.bf16.mxu0 %v19598_v22  ;;  %v18066_v22 = vld [vmem:[#allocation5 + $0x14] ss:$36 sps:$4 sm:$0xff]  }
  0xc6   : > { %2326 = vmatpush1.bf16.msra.mxu1 %v18011_v39  ;;  %v18105_v39 = vld [vmem:[#allocation5 + $0x1c4] ss:$36 sps:$4 sm:$0xff]  }
  0xc7   : > { %2327 = vmatprep.subr.bf16.mxu1 %v18020_v10  ;;  %2117 = vmatpush1.bf16.msra.mxu0 %v19601_v24  ;;  %v18067_v24 = vld [vmem:[#allocation5 + $0x4d0] ss:$36 sps:$4 sm:$0xff]  }
  0xc8   : > { %1976 = vmatmul.mubr.bf16.gmra.mrb[12].mxu0 %v19668_v12  ;;  %2118 = vmatprep.subr.bf16.mxu0 %v19604_v26  ;;  %v18076_v26 = vld [vmem:[#allocation5 + $0x51c] ss:$36 sps:$4 sm:$0xff]  }
  0xc9   : > { %2289 = vmatmul.mubr.bf16.gmra.mrb[28].mxu1 %v18017_v40  ;;  %1985 = vmatprep.mubr.bf16.mxu0 %v19673_v41  ;;  %v19796_v10 = vld [vmem:[%s19558_s29 + $0x50] ss:$12 sps:$4 sm:$0xff]  }
  0xca   : > { %2328 = vmatpush1.bf16.msra.mxu1 %v18018_v14  ;;  %2331 = vmatprep.mubr.bf16.mxu1 %v19623_v56  ;;  %v18102_v56 = vld [vmem:[#allocation5 + $0x63c] ss:$36 sps:$4 sm:$0xff]   ;;  %24863 = vst [vmem:[#allocation13_spill] sm:$0xff] %v19796_v10  ;;  %v18111_v40 = vld [vmem:[#allocation5 + $0x20c] ss:$36 sps:$4 sm:$0xff]  }
  0xcb   : > { %2329 = vmatprep.subr.bf16.mxu1 %v18023_v42  ;;  %2119 = vmatpush1.bf16.msra.mxu0 %v19607_v28  ;;  %v18080_v28 = vld [vmem:[#allocation5 + $0x560] ss:$36 sps:$4 sm:$0xff]   ;;  %v18109_v14 = vld [vmem:[#allocation5 + $0x208] ss:$36 sps:$4 sm:$0xff]  }
  0xcc   : > { %2120 = vmatprep.subr.bf16.mxu0 %v19610_v30  ;;  %v18089_v30 = vld [vmem:[#allocation5 + $0x5ac] ss:$36 sps:$4 sm:$0xff]   ;;  %v19803_v42 = vld [vmem:[%s19558_s29 + $0x68] ss:$12 sps:$4 sm:$0xff]  }
  0xcd   : > { %24864 = vst [vmem:[#allocation14_spill] sm:$0xff] %v19803_v42 }
  0xce   : > { %2330 = vmatpush1.bf16.msra.mxu1 %v18021_v16  ;;  %v18113_v16 = vld [vmem:[#allocation5 + $0x250] ss:$36 sps:$4 sm:$0xff]  }
  0xcf   : > { %2492 = vmatprep.subr.bf16.mxu1 %v18063_v18  ;;  %2121 = vmatpush1.bf16.msra.mxu0 %v19612_v32  ;;  %v18087_v32 = vld [vmem:[#allocation5 + $0x5a8] ss:$36 sps:$4 sm:$0xff]   ;;  %v18118_v18 = vld [vmem:[#allocation5 + $0x29c] ss:$36 sps:$4 sm:$0xff]  }
  0xd0   : > { %1986 = vmatmul.mubr.bf16.gmra.mrb[16].mxu0 %v19681_v43  ;;  %2685 = vmatprep.subr.bf16.mxu0 %v18066_v22  ;;  %v18143_v22 = vld [vmem:[#allocation5 + $0x60] ss:$36 sps:$4 sm:$0xff]  }
  0xd1   : > { %2332 = vmatmul.mubr.bf16.vlgmr.msra.gmra.mrb[32].mxu1 %v19630_v15  ;;  %1995 = vmatprep.mubr.bf16.mxu0 %v19685_v44  ;;  %v19748_v15 = vld [vmem:[%s19558_s29 + $0x138] ss:$12 sps:$4 sm:$0xff]  }
  0xd2   : > { %2341 = vmatprep.mubr.bf16.mxu1 %v19634_v21  ;;  %2493 = vmatpush1.bf16.msra.mxu1 %v18061_v20  ;;  %v19761_v21 = vld [vmem:[%s19558_s29 + $0x16c] ss:$12 sps:$4 sm:$0xff]  }
  0xd3   : > { %2494 = vmatprep.subr.bf16.mxu1 %v18069_v45  ;;  %v18116_v20 = vld [vmem:[#allocation5 + $0x298] ss:$36 sps:$4 sm:$0xff]   ;;  %v18122_v45 = vld [vmem:[#allocation5 + $0x2e4] ss:$36 sps:$4 sm:$0xff]  }
  0xd6   : > { %2495 = vmatpush1.bf16.msra.mxu1 %v18067_v24  ;;  %v19810_v24 = vld [vmem:[%s19558_s29 + $0x80] ss:$12 sps:$4 sm:$0xff]  }
  0xd7   : > { %2496 = vmatprep.subr.bf16.mxu1 %v18076_v26  ;;  %24865 = vst [vmem:[#allocation15_spill] sm:$0xff] %v19810_v24  ;;  %v18120_v26 = vld [vmem:[#allocation5 + $0x2e0] ss:$36 sps:$4 sm:$0xff]  }
  0xd8   : > { %1996 = vmatmul.mubr.bf16.gmra.mrb[20].mxu0 %v18029_v46 }
  0xd9   : > { %2342 = vmatmul.mubr.bf16.gmra.mrb[36].mxu1 %v19641_v29  ;;  %2005 = vmatprep.mubr.bf16.mxu0 %v18030_v47  ;;  %v18072_v29 = vld [vmem:[#allocation5 + $0x5c] ss:$36 sps:$4 sm:$0xff]  }
  0xda   : > { %2351 = vmatprep.mubr.bf16.mxu1 %v19647_v2  ;;  %2497 = vmatpush1.bf16.msra.mxu1 %v18074_v48  ;;  %v19782_v2 = vld [vmem:[%s19558_s29 + $0x20] ss:$12 sps:$4 sm:$0xff]  }
  0xdb   : > { %2498 = vmatprep.subr.bf16.mxu1 %v18082_v49  ;;  %v18146_v48 = vld [vmem:[#allocation5 + $0xa8] ss:$36 sps:$4 sm:$0xff]  }
  0xdc   : > { %v18123_v49 = vld [vmem:[#allocation5 + $0x328] ss:$36 sps:$4 sm:$0xff]  }
  0xde   : > { %2499 = vmatpush1.bf16.msra.mxu1 %v18080_v28  ;;  %v18151_v28 = vld [vmem:[#allocation5 + $0xf4] ss:$36 sps:$4 sm:$0xff]  }
  0xdf   : > { %2500 = vmatprep.subr.bf16.mxu1 %v18089_v30  ;;  %v18129_v30 = vld [vmem:[#allocation5 + $0x374] ss:$36 sps:$4 sm:$0xff]  }
  0xe0   : > { %2006 = vmatmul.mubr.bf16.gmra.mrb[24].mxu0 %v18032_v50 }
  0xe1   : > { %2352 = vmatmul.mubr.bf16.gmra.mrb[40].mxu1 %v19654_v6  ;;  %2015 = vmatprep.mubr.bf16.mxu0 %v18033_v51  ;;  %v18092_v6 = vld [vmem:[#allocation5 + $0x134] ss:$36 sps:$4 sm:$0xff]  }
  0xe2   : > { %2361 = vmatprep.mubr.bf16.mxu1 %v19660_v8  ;;  %2501 = vmatpush1.bf16.msra.mxu1 %v18087_v32  ;;  %v18098_v8 = vld [vmem:[#allocation5 + $0x17c] ss:$36 sps:$4 sm:$0xff]  }
  0xe3   : > { %2502 = vmatprep.subr.bf16.mxu1 %v18095_v52  ;;  %v18132_v32 = vld [vmem:[#allocation5 + $0x3bc] ss:$36 sps:$4 sm:$0xff]   ;;  %v18149_v52 = vld [vmem:[#allocation5 + $0xf0] ss:$36 sps:$4 sm:$0xff]  }
  0xe6   : > { %2503 = vmatpush1.bf16.msra.mxu1 %v18093_v54  ;;  %v18130_v54 = vld [vmem:[#allocation5 + $0x3b8] ss:$36 sps:$4 sm:$0xff]  }
  0xe7   : > { %2504 = vmatprep.subr.bf16.mxu1 %v18102_v56 }
  0xe8   : > { %2016 = vmatmul.mubr.bf16.gmra.mrb[28].mxu0 %v18035_v53 }
  0xe9   : > { %2362 = vmatmul.mubr.bf16.gmra.mrb[44].mxu1 %v19668_v12  ;;  %2025 = vmatprep.mubr.bf16.mxu0 %v18036_v55  ;;  %v18103_v12 = vld [vmem:[#allocation5 + $0x1c0] ss:$36 sps:$4 sm:$0xff]  }
  0xea   : > { %2371 = vmatprep.mubr.bf16.mxu1 %v19673_v41  ;;  %2505 = vmatpush1.bf16.msra.mxu1 %v18100_v57  ;;  %v18115_v41 = vld [vmem:[#allocation5 + $0x254] ss:$36 sps:$4 sm:$0xff]  }
  0xeb   : > { %2506 = vmatprep.subr.bf16.mxu1 %v18108_v58  ;;  %v18152_v57 = vld [vmem:[#allocation5 + $0x138] ss:$36 sps:$4 sm:$0xff]  }
  0xee   : > { %2507 = vmatpush1.bf16.msra.mxu1 %v18106_v60 }
  0xef   : > { %3071 = vmatprep.subr.bf16.mxu1 %v18142_v13  ;;  %v18134_v13 = vld [vmem:[#allocation5 + $0x400] ss:$36 sps:$4 sm:$0xff]  }
  0xf0   : > { %2026 = vmatmul.mubr.bf16.gmra.mrb[32].mxu0 %v18038_v59 }
  0xf1   : > { %2372 = vmatmul.mubr.bf16.gmra.mrb[48].mxu1 %v19681_v43  ;;  %2035 = vmatprep.mubr.bf16.mxu0 %v19709_v61  ;;  %v18140_v43 = vld [vmem:[#allocation5 + $0x18] ss:$36 sps:$4 sm:$0xff]  }
  0xf2   : > { %2381 = vmatprep.mubr.bf16.mxu1 %v19685_v44  ;;  %v18145_v44 = vld [vmem:[#allocation5 + $0x64] ss:$36 sps:$4 sm:$0xff]  }
  0xf8   : > { %2036 = vmatmul.mubr.bf16.gmra.mrb[36].mxu0 %v19715_v62 }
  0xf9   : > { %2382 = vmatmul.mubr.bf16.gmra.mrb[52].mxu1 %v18029_v46  ;;  %2045 = vmatprep.mubr.bf16.mxu0 %v19718_v63  ;;  %v18125_v46 = vld [vmem:[#allocation5 + $0x32c] ss:$36 sps:$4 sm:$0xff]  }
  0xfa   : > { %2391 = vmatprep.mubr.bf16.mxu1 %v18030_v47  ;;  %v18148_v47 = vld [vmem:[#allocation5 + $0xac] ss:$36 sps:$4 sm:$0xff]  }
 0x100   : > { %2046 = vmatmul.mubr.bf16.gmra.mrb[40].mxu0 %v19723_v1 }
 0x101   : > { %2392 = vmatmul.mubr.bf16.gmra.mrb[56].mxu1 %v18032_v50  ;;  %2055 = vmatprep.mubr.bf16.mxu0 %v19726_v3  ;;  %v19817_v50 = vld [vmem:[%s19558_s29 + $0x98] ss:$12 sps:$4 sm:$0xff]  }
 0x102   : > { %2401 = vmatprep.mubr.bf16.mxu1 %v18033_v51  ;;  %24866 = vst [vmem:[#allocation16_spill] sm:$0xff] %v19817_v50  ;;  %v18127_v51 = vld [vmem:[#allocation5 + $0x370] ss:$36 sps:$4 sm:$0xff]  }
 0x108   : > { %2056 = vmatmul.mubr.bf16.gmra.mrb[44].mxu0 %v19731_v5 }
 0x109   : > { %2402 = vmatmul.mubr.bf16.gmra.mrb[60].mxu1 %v18035_v53  ;;  %2065 = vmatprep.mubr.bf16.mxu0 %v19734_v7  ;;  %v18154_v53 = vld [vmem:[#allocation5 + $0x13c] ss:$36 sps:$4 sm:$0xff]  }
 0x10a   : > { %2411 = vmatprep.mubr.bf16.mxu1 %v18036_v55  ;;  %v18136_v55 = vld [vmem:[#allocation5 + $0x404] ss:$36 sps:$4 sm:$0xff]  }
 0x110   : > { %2066 = vmatmul.mubr.bf16.gmra.mrb[48].mxu0 %v19739_v9 }
 0x111   : > { %2412 = vmatmul.mubr.bf16.gmra.mrb[64].mxu1 %v18038_v59  ;;  %2075 = vmatprep.mubr.bf16.mxu0 %v19742_v11  ;;  %v19828_v59 = vld [vmem:[%s19558_s29 + $0xb0] ss:$12 sps:$4 sm:$0xff]  }
 0x112   : > { %2421 = vmatprep.mubr.bf16.mxu1 %v19709_v61  ;;  %24867 = vst [vmem:[#allocation17_spill] sm:$0xff] %v19828_v59 }
 0x118   : > { %2076 = vmatmul.mubr.bf16.gmra.mrb[52].mxu0 %v19748_v15 }
 0x119   : > { %2422 = vmatmul.mubr.bf16.gmra.mrb[68].mxu1 %v19715_v62  ;;  %2085 = vmatprep.mubr.bf16.mxu0 %v19751_v17 }
 0x11a   : > { %2431 = vmatprep.mubr.bf16.mxu1 %v19718_v63 }
 0x120   : > { %2086 = vmatmul.mubr.bf16.gmra.mrb[56].mxu0 %v19758_v19 }
 0x121   : > { %2432 = vmatmul.mubr.bf16.gmra.mrb[72].mxu1 %v19723_v1  ;;  %2095 = vmatprep.mubr.bf16.mxu0 %v19761_v21 }
 0x122   : > { %2441 = vmatprep.mubr.bf16.mxu1 %v19726_v3 }
 0x128   : > { %2096 = vmatmul.mubr.bf16.gmra.mrb[60].mxu0 %v19768_v23 }
 0x129   : > { %2442 = vmatmul.mubr.bf16.gmra.mrb[76].mxu1 %v19731_v5  ;;  %2138 = vmatprep.mubr.bf16.mxu0 %v24590_v0 }
 0x12a   : > { %2451 = vmatprep.mubr.bf16.mxu1 %v19734_v7 }
 0x130   : > { %2139 = vmatmul.mubr.bf16.vlgmr.msra.gmra.mrb[0].mxu0 %v19775_v25 }
 0x131   : > { %2452 = vmatmul.mubr.bf16.gmra.mrb[80].mxu1 %v19739_v9  ;;  %2686 = vmatpush1.bf16.msra.mxu0 %v18064_v27 }
 0x132   : > { %2148 = vmatprep.mubr.bf16.mxu0 %v24590_v0  ;;  %2687 = vmatprep.subr.bf16.mxu0 %v18072_v29  ;;  %v18139_v29 = vld [vmem:[#allocation5 + $0x44c] ss:$36 sps:$4 sm:$0xff]  }
 0x133   : > { %2461 = vmatprep.mubr.bf16.mxu1 %v19742_v11 }
 0x135   : > { %2688 = vmatpush1.bf16.msra.mxu0 %v18070_v31  ;;  %v18157_v31 = vld [vmem:[#allocation5 + $0x184] ss:$36 sps:$4 sm:$0xff]  }
 0x136   : > { %2689 = vmatprep.subr.bf16.mxu0 %v18079_v33  ;;  %v18155_v33 = vld [vmem:[#allocation5 + $0x180] ss:$36 sps:$4 sm:$0xff]  }
 0x138   : > { %2149 = vmatmul.mubr.bf16.gmra.mrb[4].mxu0 %v19782_v2 }
 0x139   : > { %2462 = vmatmul.mubr.bf16.gmra.mrb[84].mxu1 %v19748_v15  ;;  %2690 = vmatpush1.bf16.msra.mxu0 %v18077_v34  ;;  %v18137_v34 = vld [vmem:[#allocation5 + $0x448] ss:$36 sps:$4 sm:$0xff]  }
 0x13a   : > { %2158 = vmatprep.mubr.bf16.mxu0 %v24590_v0  ;;  %2691 = vmatprep.subr.bf16.mxu0 %v18085_v35  ;;  %v18160_v35 = vld [vmem:[#allocation5 + $0x1cc] ss:$36 sps:$4 sm:$0xff]  }
 0x13b   : > { %2471 = vmatprep.mubr.bf16.mxu1 %v19751_v17 }
 0x13d   : > { %2692 = vmatpush1.bf16.msra.mxu0 %v18083_v4  ;;  %v19838_v4 = vld [vmem:[%s19558_s29 + $0x4] ss:$12 sps:$4 sm:$0xff]  }
 0x13e   : > { %2693 = vmatprep.subr.bf16.mxu0 %v18092_v6  ;;  %v18190_v6 = vld [vmem:[#allocation5 + $0x494] ss:$36 sps:$4 sm:$0xff]  }
 0x140   : > { %2159 = vmatmul.mubr.bf16.gmra.mrb[8].mxu0 %v19789_v36 }
 0x141   : > { %2472 = vmatmul.mubr.bf16.gmra.mrb[88].mxu1 %v19758_v19  ;;  %2694 = vmatpush1.bf16.msra.mxu0 %v18090_v37 }
 0x142   : > { %2168 = vmatprep.mubr.bf16.mxu0 %v24590_v0  ;;  %2695 = vmatprep.subr.bf16.mxu0 %v18098_v8 }
 0x143   : > { %2481 = vmatprep.mubr.bf16.mxu1 %v19761_v21 }
 0x145   : > { %2696 = vmatpush1.bf16.msra.mxu0 %v18096_v38 }
 0x146   : > { %2697 = vmatprep.subr.bf16.mxu0 %v18105_v39 }
 0x148   : > { %2169 = vmatmul.mubr.bf16.gmra.mrb[12].mxu0 %v19796_v10 }
 0x149   : > { %2482 = vmatmul.mubr.bf16.gmra.mrb[92].mxu1 %v19768_v23  ;;  %2698 = vmatpush1.bf16.msra.mxu0 %v18103_v12  ;;  %v18158_v12 = vld [vmem:[#allocation5 + $0x1c8] ss:$36 sps:$4 sm:$0xff]  }
 0x14a   : > { %2178 = vmatprep.mubr.bf16.mxu0 %v24590_v0  ;;  %2699 = vmatprep.subr.bf16.mxu0 %v18111_v40  ;;  %v18188_v40 = vld [vmem:[#allocation5 + $0x490] ss:$36 sps:$4 sm:$0xff]  }
 0x14b   : > { %2524 = vmatprep.mubr.bf16.mxu1 %v24590_v0 }
 0x14d   : > { %2700 = vmatpush1.bf16.msra.mxu0 %v18109_v14  ;;  %v18163_v14 = vld [vmem:[#allocation5 + $0x214] ss:$36 sps:$4 sm:$0xff]  }
 0x14e   : > { %2701 = vmatprep.subr.bf16.mxu0 %v18115_v41  ;;  %v18193_v41 = vld [vmem:[#allocation5 + $0x4dc] ss:$36 sps:$4 sm:$0xff]  }
 0x150   : > { %2179 = vmatmul.mubr.bf16.gmra.mrb[16].mxu0 %v19803_v42 }
 0x151   : > { %2525 = vmatmul.mubr.bf16.vlgmr.msra.gmra.mrb[32].mxu1 %v19775_v25  ;;  %2702 = vmatpush1.bf16.msra.mxu0 %v18113_v16  ;;  %v19851_v16 = vld [vmem:[%s19558_s29] ss:$12 sps:$4 sm:$0xff]  }
 0x152   : > { %2188 = vmatprep.mubr.bf16.mxu0 %v24590_v0  ;;  %2703 = vmatprep.subr.bf16.mxu0 %v18118_v18  ;;  %v19856_v18 = vld [vmem:[%s19558_s29 + $0x1c] ss:$12 sps:$4 sm:$0xff]  }
 0x153   : > { %2534 = vmatprep.mubr.bf16.mxu1 %v24590_v0  ;;  %3072 = vmatpush1.bf16.msra.mxu1 %v18140_v43  ;;  %v18161_v43 = vld [vmem:[#allocation5 + $0x210] ss:$36 sps:$4 sm:$0xff]  }
 0x154   : > { %3073 = vmatprep.subr.bf16.mxu1 %v18145_v44  ;;  %v18191_v44 = vld [vmem:[#allocation5 + $0x4d8] ss:$36 sps:$4 sm:$0xff]  }
 0x155   : > { %2704 = vmatpush1.bf16.msra.mxu0 %v18116_v20 }
 0x156   : > { %2705 = vmatprep.subr.bf16.mxu0 %v18122_v45  ;;  %v18166_v45 = vld [vmem:[#allocation5 + $0x25c] ss:$36 sps:$4 sm:$0xff]  }
 0x157   : > { %3074 = vmatpush1.bf16.msra.mxu1 %v18143_v22  ;;  %v18196_v22 = vld [vmem:[#allocation5 + $0x524] ss:$36 sps:$4 sm:$0xff]  }
 0x158   : > { %2189 = vmatmul.mubr.bf16.gmra.mrb[20].mxu0 %v19810_v24  ;;  %3075 = vmatprep.subr.bf16.mxu1 %v18148_v47 }
 0x159   : > { %2535 = vmatmul.mubr.bf16.gmra.mrb[36].mxu1 %v19782_v2  ;;  %2706 = vmatpush1.bf16.msra.mxu0 %v18120_v26 }
 0x15a   : > { %2198 = vmatprep.mubr.bf16.mxu0 %v24590_v0  ;;  %2707 = vmatprep.subr.bf16.mxu0 %v18125_v46 }
 0x15b   : > { %2544 = vmatprep.mubr.bf16.mxu1 %v24590_v0  ;;  %3076 = vmatpush1.bf16.msra.mxu1 %v18146_v48  ;;  %v18164_v48 = vld [vmem:[#allocation5 + $0x258] ss:$36 sps:$4 sm:$0xff]  }
 0x15c   : > { %3077 = vmatprep.subr.bf16.mxu1 %v18151_v28  ;;  %v18169_v28 = vld [vmem:[#allocation5 + $0x2a4] ss:$36 sps:$4 sm:$0xff]  }
 0x15d   : > { %2708 = vmatpush1.bf16.msra.mxu0 %v18123_v49  ;;  %v18194_v49 = vld [vmem:[#allocation5 + $0x520] ss:$36 sps:$4 sm:$0xff]  }
 0x15e   : > { %2709 = vmatprep.subr.bf16.mxu0 %v18129_v30  ;;  %v18199_v30 = vld [vmem:[#allocation5 + $0x56c] ss:$36 sps:$4 sm:$0xff]  }
 0x15f   : > { %3078 = vmatpush1.bf16.msra.mxu1 %v18149_v52  ;;  %v18167_v52 = vld [vmem:[#allocation5 + $0x2a0] ss:$36 sps:$4 sm:$0xff]  }
 0x160   : > { %2199 = vmatmul.mubr.bf16.gmra.mrb[24].mxu0 %v19817_v50  ;;  %3079 = vmatprep.subr.bf16.mxu1 %v18154_v53  ;;  %v18197_v53 = vld [vmem:[#allocation5 + $0x568] ss:$36 sps:$4 sm:$0xff]  }
 0x161   : > { %2545 = vmatmul.mubr.bf16.gmra.mrb[40].mxu1 %v19789_v36  ;;  %2710 = vmatpush1.bf16.msra.mxu0 %v18127_v51  ;;  %v19869_v51 = vld [vmem:[%s19558_s29 + $0x18] ss:$12 sps:$4 sm:$0xff]   ;;  %v19968_v36 = vld [vmem:[%s19558_s29 + $0x90] ss:$12 sps:$4 sm:$0xff]  }
 0x162   : > { %2208 = vmatprep.mubr.bf16.mxu0 %v24590_v0  ;;  %2711 = vmatprep.subr.bf16.mxu0 %v18132_v32  ;;  %v19874_v32 = vld [vmem:[%s19558_s29 + $0x34] ss:$12 sps:$4 sm:$0xff]   ;;  %24877 = vst [vmem:[#allocation26_spill] sm:$0xff] %v19968_v36 }
 0x163   : > { %2554 = vmatprep.mubr.bf16.mxu1 %v24590_v0  ;;  %3080 = vmatpush1.bf16.msra.mxu1 %v18152_v57  ;;  %v18202_v57 = vld [vmem:[#allocation5 + $0x5b4] ss:$36 sps:$4 sm:$0xff]  }
 0x164   : > { %v19823_v56 = vpop.f32.mrb[0].mxu1  ;;  %3081 = vmatprep.subr.bf16.mxu1 %v18157_v31 }
 0x165   : > { %v19825_v58 = vpop.f32.mrb[1].mxu1  ;;  %2712 = vmatpush1.bf16.msra.mxu0 %v18130_v54 }
 0x166   : > { %v19830_v60 = vpop.f32.mrb[2].mxu1  ;;  %2713 = vmatprep.subr.bf16.mxu0 %v18136_v55  ;;  %v18172_v55 = vld [vmem:[#allocation5 + $0x2ec] ss:$36 sps:$4 sm:$0xff]  }
 0x167   : > { %v19832_v27 = vpop.f32.mrb[3].mxu1  ;;  %3082 = vmatpush1.bf16.msra.mxu1 %v18155_v33  ;;  %v18170_v33 = vld [vmem:[#allocation5 + $0x2e8] ss:$36 sps:$4 sm:$0xff]  }
 0x168   : > { %2209 = vmatmul.mubr.bf16.gmra.mrb[28].mxu0 %v19828_v59  ;;  %3083 = vmatprep.subr.bf16.mxu1 %v18160_v35  ;;  %v18175_v35 = vld [vmem:[#allocation5 + $0x334] ss:$36 sps:$4 sm:$0xff]  }
 0x169   : > { %2555 = vmatmul.mubr.bf16.gmra.mrb[44].mxu1 %v19796_v10  ;;  %2714 = vmatpush1.bf16.msra.mxu0 %v18134_v13  ;;  %v19964_v10 = vld [vmem:[%s19558_s29 + $0xf8] ss:$12 sps:$4 sm:$0xff]  }
 0x16a   : > { %2564 = vmatprep.mubr.bf16.mxu1 %v24590_v0  ;;  %2715 = vmatprep.subr.bf16.mxu0 %v18139_v29  ;;  %24876 = vst [vmem:[#allocation25_spill] sm:$0xff] %v19964_v10 }
 0x16b   : > { %2717 = vmatprep.mubr.bf16.mxu0 %v19838_v4  ;;  %3084 = vmatpush1.bf16.msra.mxu1 %v18158_v12  ;;  %v19887_v12 = vld [vmem:[%s19558_s29 + $0x30] ss:$12 sps:$4 sm:$0xff]  }
 0x16c   : > { %v19841_v37 = vpop.f32.mrb[4].mxu1  ;;  %3085 = vmatprep.subr.bf16.mxu1 %v18163_v14  ;;  %v18173_v14 = vld [vmem:[#allocation5 + $0x330] ss:$36 sps:$4 sm:$0xff]  }
 0x16d   : > { %v19843_v8 = vpop.f32.mrb[5].mxu1  ;;  %2716 = vmatpush1.bf16.msra.mxu0 %v18137_v34  ;;  %v18200_v34 = vld [vmem:[#allocation5 + $0x5b0] ss:$36 sps:$4 sm:$0xff]  }
 0x16e   : > { %v19845_v38 = vpop.f32.mrb[6].mxu1  ;;  %2878 = vmatprep.subr.bf16.mxu0 %v18190_v6  ;;  %v18205_v6 = vld [vmem:[#allocation5 + $0x5fc] ss:$36 sps:$4 sm:$0xff]  }
 0x16f   : > { %v19847_v39 = vpop.f32.mrb[7].mxu1  ;;  %3086 = vmatpush1.bf16.msra.mxu1 %v18161_v43 }
 0x170   : > { %2718 = vmatmul.mubr.bf16.vlgmr.msra.gmra.mrb[64].mxu0 %v19851_v16  ;;  %3087 = vmatprep.subr.bf16.mxu1 %v18166_v45  ;;  %v18208_v45 = vld [vmem:[#allocation5 + $0x644] ss:$36 sps:$4 sm:$0xff]  }
 0x171   : > { %2565 = vmatmul.mubr.bf16.gmra.mrb[48].mxu1 %v19803_v42  ;;  %2727 = vmatprep.mubr.bf16.mxu0 %v19856_v18 }
 0x172   : > { %2574 = vmatprep.mubr.bf16.mxu1 %v24590_v0  ;;  %2879 = vmatpush1.bf16.msra.mxu0 %v18188_v40  ;;  %v19892_v40 = vld [vmem:[%s19558_s29 + $0x4c] ss:$12 sps:$4 sm:$0xff]  }
 0x173   : > { %2880 = vmatprep.subr.bf16.mxu0 %v18193_v41  ;;  %3088 = vmatpush1.bf16.msra.mxu1 %v18164_v48  ;;  %v18203_v41 = vld [vmem:[#allocation5 + $0x5f8] ss:$36 sps:$4 sm:$0xff]  }
 0x174   : > { %v19859_v20 = vpop.f32.mrb[8].mxu1  ;;  %3089 = vmatprep.subr.bf16.mxu1 %v18169_v28  ;;  %v18176_v28 = vld [vmem:[#allocation5 + $0x378] ss:$36 sps:$4 sm:$0xff]  }
 0x175   : > { %v19861_v26 = vpop.f32.mrb[9].mxu1 }
 0x176   : > { %v19863_v46 = vpop.f32.mrb[10].mxu1  ;;  %2881 = vmatpush1.bf16.msra.mxu0 %v18191_v44  ;;  %v18178_v44 = vld [vmem:[#allocation5 + $0x37c] ss:$36 sps:$4 sm:$0xff]  }
 0x177   : > { %v19865_v47 = vpop.f32.mrb[11].mxu1  ;;  %2882 = vmatprep.subr.bf16.mxu0 %v18196_v22  ;;  %3090 = vmatpush1.bf16.msra.mxu1 %v18167_v52  ;;  %v18181_v52 = vld [vmem:[#allocation5 + $0x3c4] ss:$36 sps:$4 sm:$0xff]  }
 0x178   : > { %2728 = vmatmul.mubr.bf16.gmra.mrb[68].mxu0 %v19869_v51  ;;  %3091 = vmatprep.subr.bf16.mxu1 %v18172_v55  ;;  %v19905_v55 = vld [vmem:[%s19558_s29 + $0x48] ss:$12 sps:$4 sm:$0xff]  }
 0x179   : > { %2575 = vmatmul.mubr.bf16.gmra.mrb[52].mxu1 %v19810_v24  ;;  %2737 = vmatprep.mubr.bf16.mxu0 %v19874_v32 }
 0x17a   : > { %2584 = vmatprep.mubr.bf16.mxu1 %v24590_v0  ;;  %2883 = vmatpush1.bf16.msra.mxu0 %v18194_v49 }
 0x17b   : > { %2884 = vmatprep.subr.bf16.mxu0 %v18199_v30  ;;  %3092 = vmatpush1.bf16.msra.mxu1 %v18170_v33  ;;  %v18206_v30 = vld [vmem:[#allocation5 + $0x640] ss:$36 sps:$4 sm:$0xff]  }
 0x17c   : > { %v19877_v54 = vpop.f32.mrb[12].mxu1  ;;  %3093 = vmatprep.subr.bf16.mxu1 %v18175_v35  ;;  %v18179_v33 = vld [vmem:[#allocation5 + $0x3c0] ss:$36 sps:$4 sm:$0xff]  }
 0x17d   : > { %v19879_v13 = vpop.f32.mrb[13].mxu1 }
 0x17e   : > { %v19881_v29 = vpop.f32.mrb[14].mxu1  ;;  %2885 = vmatpush1.bf16.msra.mxu0 %v18197_v53  ;;  %v18211_v53 = vld [vmem:[#allocation5 + $0x68c] ss:$36 sps:$4 sm:$0xff]  }
 0x17f   : > { %v19883_v31 = vpop.f32.mrb[15].mxu1  ;;  %2886 = vmatprep.subr.bf16.mxu0 %v18202_v57  ;;  %3094 = vmatpush1.bf16.msra.mxu1 %v18173_v14  ;;  %v19910_v57 = vld [vmem:[%s19558_s29 + $0x64] ss:$12 sps:$4 sm:$0xff]  }
 0x180   : > { %2738 = vmatmul.mubr.bf16.gmra.mrb[72].mxu0 %v19887_v12  ;;  %3095 = vmatprep.subr.bf16.mxu1 %v18178_v44 }
 0x181   : > { %2585 = vmatmul.mubr.bf16.gmra.mrb[56].mxu1 %v19817_v50  ;;  %2747 = vmatprep.mubr.bf16.mxu0 %v19892_v40  ;;  %v19947_v50 = vld [vmem:[%s19558_s29 + $0x78] ss:$12 sps:$4 sm:$0xff]  }
 0x182   : > { %2594 = vmatprep.mubr.bf16.mxu1 %v24590_v0  ;;  %2887 = vmatpush1.bf16.msra.mxu0 %v18200_v34  ;;  %v18209_v34 = vld [vmem:[#allocation5 + $0x688] ss:$36 sps:$4 sm:$0xff]  }
 0x183   : > { %2888 = vmatprep.subr.bf16.mxu0 %v18205_v6  ;;  %3096 = vmatpush1.bf16.msra.mxu1 %v18176_v28  ;;  %v18184_v6 = vld [vmem:[#allocation5 + $0x40c] ss:$36 sps:$4 sm:$0xff]   ;;  %v18187_v28 = vld [vmem:[#allocation5 + $0x454] ss:$36 sps:$4 sm:$0xff]  }
 0x184   : > { %v19895_v43 = vpop.f32.mrb[16].mxu1  ;;  %3097 = vmatprep.subr.bf16.mxu1 %v18181_v52  ;;  %v19926_v52 = vld [vmem:[%s19558_s29 + $0x60] ss:$12 sps:$4 sm:$0xff]  }
 0x185   : > { %v19897_v22 = vpop.f32.mrb[17].mxu1 }
 0x186   : > { %v19899_v48 = vpop.f32.mrb[18].mxu1  ;;  %2889 = vmatpush1.bf16.msra.mxu0 %v18203_v41 }
 0x187   : > { %v19901_v49 = vpop.f32.mrb[19].mxu1  ;;  %2890 = vmatprep.subr.bf16.mxu0 %v18208_v45  ;;  %3098 = vmatpush1.bf16.msra.mxu1 %v18179_v33  ;;  %v18182_v45 = vld [vmem:[#allocation5 + $0x408] ss:$36 sps:$4 sm:$0xff]   ;;  %v18185_v33 = vld [vmem:[#allocation5 + $0x450] ss:$36 sps:$4 sm:$0xff]  }
 0x188   : > { %2748 = vmatmul.mubr.bf16.gmra.mrb[76].mxu0 %v19905_v55  ;;  %3099 = vmatprep.subr.bf16.mxu1 %v18184_v6 }
 0x189   : > { %2595 = vmatmul.mubr.bf16.gmra.mrb[60].mxu1 %v19828_v59  ;;  %2757 = vmatprep.mubr.bf16.mxu0 %v19910_v57 }
 0x18a   : > { %2604 = vmatprep.mubr.bf16.mxu1 %v24590_v0  ;;  %2891 = vmatpush1.bf16.msra.mxu0 %v18206_v30  ;;  %v19922_v30 = vld [vmem:[%s19558_s29 + $0xc8] ss:$12 sps:$4 sm:$0xff]  }
 0x18b   : > { %2892 = vmatprep.subr.bf16.mxu0 %v18211_v53  ;;  %24868 = vst [vmem:[#allocation18_spill] sm:$0xff] %v19922_v30  ;;  %v19931_v53 = vld [vmem:[%s19558_s29 + $0x7c] ss:$12 sps:$4 sm:$0xff]   ;;  %3100 = vmatpush1.bf16.msra.mxu1 %v18182_v45  ;;  %v24870_v45 = vmov 0  }
 0x18c   : > { %v19913_v35 = vpop.f32.mrb[20].mxu1  ;;  %3101 = vmatprep.subr.bf16.mxu1 %v18187_v28  ;;  %v19952_v28 = vld [vmem:[%s19558_s29 + $0x94] ss:$12 sps:$4 sm:$0xff]  }
 0x18d   : > { %v19915_v14 = vpop.f32.mrb[21].mxu1  ;;  %24871 = vst [vmem:[#allocation20_spill] sm:$0xff] %v19952_v28 }
 0x18e   : > { %v19917_v41 = vpop.f32.mrb[22].mxu1  ;;  %2893 = vmatpush1.bf16.msra.mxu0 %v18209_v34 }
 0x18f   : > { %v19919_v44 = vpop.f32.mrb[23].mxu1  ;;  %3102 = vmatpush1.bf16.msra.mxu1 %v18185_v33 }
 0x190   : > { %2758 = vmatmul.mubr.bf16.gmra.mrb[80].mxu0 %v19926_v52 }
 0x191   : > { %2605 = vmatmul.mubr.bf16.gmra.mrb[64].mxu1 %v19922_v30  ;;  %2767 = vmatprep.mubr.bf16.mxu0 %v19931_v53 }
 0x192   : > { %2614 = vmatprep.mubr.bf16.mxu1 %v24590_v0  ;;  %v19943_v0 = vld [vmem:[%s19558_s29 + $0xe0] ss:$12 sps:$4 sm:$0xff]  }
 0x193   : > { %24869 = vst [vmem:[#allocation19_spill] sm:$0xff] %v19943_v0 }
 0x194   : > { %v19934_v34 = vpop.f32.mrb[24].mxu1 }
 0x195   : > { %v19936_v6 = vpop.f32.mrb[25].mxu1 }
 0x196   : > { %v19938_v30 = vpop.f32.mrb[26].mxu1 }
 0x197   : > { %v19940_v59 = vpop.f32.mrb[27].mxu1 }
 0x198   : > { %2768 = vmatmul.mubr.bf16.gmra.mrb[84].mxu0 %v19947_v50 }
 0x199   : > { %2615 = vmatmul.mubr.bf16.gmra.mrb[68].mxu1 %v19943_v0  ;;  %2777 = vmatprep.mubr.bf16.mxu0 %v19952_v28  ;;  %v20018_v28 = vld [vmem:[%s19558_s29 + $0x170] ss:$12 sps:$4 sm:$0xff]  }
 0x19a   : > { %2624 = vmatprep.mubr.bf16.mxu1 %v24870_v45 }
 0x19c   : > { %v19955_v24 = vpop.f32.mrb[28].mxu1 }
 0x19d   : > { %24872 = vst [vmem:[#allocation21_spill] sm:$0xff] %v19955_v24  ;;  %v19957_v33 = vpop.f32.mrb[29].mxu1  ;;  %v19973_v24 = vld [vmem:[%s19558_s29 + $0xac] ss:$12 sps:$4 sm:$0xff]  }
 0x19e   : > { %24873 = vst [vmem:[#allocation22_spill] sm:$0xff] %v19957_v33  ;;  %v19959_v42 = vpop.f32.mrb[30].mxu1  ;;  %24878 = vst [vmem:[#allocation27_spill] sm:$0xff] %v19973_v24  ;;  %v19990_v33 = vld [vmem:[%s19558_s29 + $0x128] ss:$12 sps:$4 sm:$0xff]  }
 0x19f   : > { %24874 = vst [vmem:[#allocation23_spill] sm:$0xff] %v19959_v42  ;;  %v19961_v0 = vpop.f32.mrb[31].mxu1  ;;  %v19977_v42 = vld [vmem:[%s19558_s29 + $0x110] ss:$12 sps:$4 sm:$0xff]   ;;  %24882 = vst [vmem:[#allocation31_spill] sm:$0xff] %v19990_v33 }
 0x1a0   : > { %24875 = vst [vmem:[#allocation24_spill] sm:$0xff] %v19961_v0  ;;  %2778 = vmatmul.mubr.bf16.gmra.mrb[88].mxu0 %v19968_v36  ;;  %24879 = vst [vmem:[#allocation28_spill] sm:$0xff] %v19977_v42  ;;  %v19981_v0 = vld [vmem:[%s19558_s29 + $0xa8] ss:$12 sps:$4 sm:$0xff]   ;;  %v18214_v36 = vld [vmem:[#allocation5 + $0x49c] ss:$36 sps:$4 sm:$0xff]  }
 0x1a1   : > { %2625 = vmatmul.mubr.bf16.gmra.mrb[72].mxu1 %v19964_v10  ;;  %2787 = vmatprep.mubr.bf16.mxu0 %v19973_v24  ;;  %24880 = vst [vmem:[#allocation29_spill] sm:$0xff] %v19981_v0  ;;  %v19986_v10 = vld [vmem:[%s19558_s29 + $0xc4] ss:$12 sps:$4 sm:$0xff]   ;;  %v19994_v24 = vld [vmem:[%s19558_s29 + $0xc0] ss:$12 sps:$4 sm:$0xff]  }
 0x1a2   : > { %2634 = vmatprep.mubr.bf16.mxu1 %v24870_v45  ;;  %24881 = vst [vmem:[#allocation30_spill] sm:$0xff] %v19986_v10  ;;  %24883 = vst [vmem:[#allocation32_spill] sm:$0xff] %v19994_v24  ;;  %3264 = vmatprep.subr.bf16.mxu1 %v18214_v36 }
 0x1a8   : > { %2788 = vmatmul.mubr.bf16.gmra.mrb[92].mxu0 %v19981_v0 }
 0x1a9   : > { %2635 = vmatmul.mubr.bf16.gmra.mrb[76].mxu1 %v19977_v42  ;;  %2797 = vmatprep.mubr.bf16.mxu0 %v19986_v10  ;;  %v20000_v42 = vld [vmem:[%s19558_s29 + $0x140] ss:$12 sps:$4 sm:$0xff]  }
 0x1aa   : > { %2644 = vmatprep.mubr.bf16.mxu1 %v24870_v45  ;;  %24884 = vst [vmem:[#allocation33_spill] sm:$0xff] %v20000_v42 }
 0x1b0   : > { %2798 = vmatmul.mubr.bf16.gmra.mrb[96].mxu0 %v19994_v24 }
 0x1b1   : > { %2645 = vmatmul.mubr.bf16.gmra.mrb[80].mxu1 %v19990_v33  ;;  %2807 = vmatprep.mubr.bf16.mxu0 %v19709_v61  ;;  %v20007_v33 = vld [vmem:[%s19558_s29 + $0x158] ss:$12 sps:$4 sm:$0xff]  }
 0x1b2   : > { %2654 = vmatprep.mubr.bf16.mxu1 %v24870_v45 }
 0x1b8   : > { %2808 = vmatmul.mubr.bf16.gmra.mrb[100].mxu0 %v19715_v62 }
 0x1b9   : > { %2655 = vmatmul.mubr.bf16.gmra.mrb[84].mxu1 %v20000_v42  ;;  %2817 = vmatprep.mubr.bf16.mxu0 %v19718_v63 }
 0x1ba   : > { %2664 = vmatprep.mubr.bf16.mxu1 %v24870_v45 }
 0x1c0   : > { %2818 = vmatmul.mubr.bf16.gmra.mrb[104].mxu0 %v19723_v1 }
 0x1c1   : > { %2665 = vmatmul.mubr.bf16.gmra.mrb[88].mxu1 %v20007_v33  ;;  %2827 = vmatprep.mubr.bf16.mxu0 %v19726_v3  ;;  %v18233_v3 = vld [vmem:[#allocation5 + $0x260] ss:$36 sps:$4 sm:$0xff]  }
 0x1c2   : > { %2674 = vmatprep.mubr.bf16.mxu1 %v24870_v45  ;;  %15252 = vmatprep.subr.bf16.mxu0 %v18233_v3 }
 0x1c3   : > { %v2027_v61 = vpop.f32.mrb[32].mxu0 }
 0x1c4   : > { %v2029_v36 = vpop.f32.mrb[33].mxu0  ;;  %v2221_v42 = vadd.f32 %v19823_v56, %v2027_v61 }
 0x1c5   : > { %v2031_v62 = vpop.f32.mrb[34].mxu0  ;;  %v2223_v24 = vadd.f32 %v19825_v58, %v2029_v36 }
 0x1c6   : > { %v2033_v10 = vpop.f32.mrb[35].mxu0  ;;  %v2225_v63 = vadd.f32 %v19830_v60, %v2031_v62  ;;  %v18212_v62 = vld [vmem:[#allocation5 + $0x498] ss:$36 sps:$4 sm:$0xff]  }
 0x1c7   : > { %v2227_v0 = vadd.f32 %v19832_v27, %v2033_v10 }
 0x1c8   : > { %2828 = vmatmul.mubr.bf16.gmra.mrb[108].mxu0 %v19731_v5  ;;  %v20022_v1 = vpack.c.bf16 %v2225_v63, %v2221_v42 }
 0x1c9   : > { %2675 = vmatmul.mubr.bf16.gmra.mrb[92].mxu1 %v20018_v28  ;;  %2837 = vmatprep.mubr.bf16.mxu0 %v19734_v7  ;;  %v20026_v56 = vpack.c.bf16 %v2227_v0, %v2223_v24  ;;  %v18217_v7 = vld [vmem:[#allocation5 + $0x4e4] ss:$36 sps:$4 sm:$0xff]  }
 0x1ca   : > { %3103 = vmatprep.mubr.bf16.mxu1 %v19838_v4  ;;  %v18215_v4 = vld [vmem:[#allocation5 + $0x4e0] ss:$36 sps:$4 sm:$0xff]  }
 0x1cb   : > { %24885 = vst [vmem:[#allocation34_spill] sm:$0xff] %v20026_v56  ;;  %v2037_v58 = vpop.f32.mrb[36].mxu0 }
 0x1cc   : > { %v2039_v60 = vpop.f32.mrb[37].mxu0  ;;  %v2231_v10 = vadd.f32 %v19841_v37, %v2037_v58  ;;  %v18218_v58 = vld [vmem:[#allocation5 + $0x528] ss:$36 sps:$4 sm:$0xff]  }
 0x1cd   : > { %v2233_v27 = vadd.f32 %v19843_v8, %v2039_v60  ;;  %v2041_v61 = vpop.f32.mrb[38].mxu0  ;;  %v18220_v8 = vld [vmem:[#allocation5 + $0x52c] ss:$36 sps:$4 sm:$0xff]  }
 0x1ce   : > { %v2043_v36 = vpop.f32.mrb[39].mxu0  ;;  %v2235_v5 = vadd.f32 %v19845_v38, %v2041_v61 }
 0x1cf   : > { %v2237_v42 = vadd.f32 %v19847_v39, %v2043_v36 }
 0x1d0   : > { %2838 = vmatmul.mubr.bf16.gmra.mrb[112].mxu0 %v19739_v9  ;;  %v20034_v0 = vpack.c.bf16 %v2235_v5, %v2231_v10 }
 0x1d1   : > { %3104 = vmatmul.mubr.bf16.vlgmr.msra.gmra.mrb[96].mxu1 %v19851_v16  ;;  %v20036_v24 = vpack.c.bf16 %v2237_v42, %v2233_v27  ;;  %2847 = vmatprep.mubr.bf16.mxu0 %v19742_v11  ;;  %v18223_v11 = vld [vmem:[#allocation5 + $0x574] ss:$36 sps:$4 sm:$0xff]  }
 0x1d2   : > { %24886 = vst [vmem:[#allocation35_spill] sm:$0xff] %v20034_v0  ;;  %3113 = vmatprep.mubr.bf16.mxu1 %v19856_v18  ;;  %3265 = vmatpush1.bf16.msra.mxu1 %v18212_v62  ;;  %v18224_v42 = vld [vmem:[#allocation5 + $0x5b8] ss:$36 sps:$4 sm:$0xff]  }
 0x1d3   : > { %24887 = vst [vmem:[#allocation36_spill] sm:$0xff] %v20036_v24  ;;  %v2047_v37 = vpop.f32.mrb[40].mxu0  ;;  %3266 = vmatprep.subr.bf16.mxu1 %v18217_v7 }
 0x1d4   : > { %v2049_v38 = vpop.f32.mrb[41].mxu0  ;;  %v2241_v39 = vadd.f32 %v19859_v20, %v2047_v37 }
 0x1d5   : > { %v2051_v63 = vpop.f32.mrb[42].mxu0  ;;  %v2243_v9 = vadd.f32 %v19861_v26, %v2049_v38  ;;  %v18221_v26 = vld [vmem:[#allocation5 + $0x570] ss:$36 sps:$4 sm:$0xff]  }
 0x1d6   : > { %v2053_v3 = vpop.f32.mrb[43].mxu0  ;;  %3267 = vmatpush1.bf16.msra.mxu1 %v18215_v4  ;;  %v2245_v60 = vadd.f32 %v19863_v46, %v2051_v63  ;;  %v18226_v46 = vld [vmem:[#allocation5 + $0x5bc] ss:$36 sps:$4 sm:$0xff]   ;;  %v18229_v4 = vld [vmem:[#allocation5 + $0x604] ss:$36 sps:$4 sm:$0xff]  }
 0x1d7   : > { %3268 = vmatprep.subr.bf16.mxu1 %v18220_v8  ;;  %v2247_v10 = vadd.f32 %v19865_v47, %v2053_v3 }
 0x1d8   : > { %2848 = vmatmul.mubr.bf16.gmra.mrb[116].mxu0 %v19748_v15  ;;  %v20046_v27 = vpack.c.bf16 %v2245_v60, %v2241_v39 }
 0x1d9   : > { %3114 = vmatmul.mubr.bf16.gmra.mrb[100].mxu1 %v19869_v51  ;;  %2857 = vmatprep.mubr.bf16.mxu0 %v19751_v17  ;;  %v20050_v20 = vpack.c.bf16 %v2247_v10, %v2243_v9  ;;  %v18230_v9 = vld [vmem:[#allocation5 + $0x648] ss:$36 sps:$4 sm:$0xff]  }
 0x1da   : > { %24888 = vst [vmem:[#allocation37_spill] sm:$0xff] %v20046_v27  ;;  %3123 = vmatprep.mubr.bf16.mxu1 %v19874_v32  ;;  %3269 = vmatpush1.bf16.msra.mxu1 %v18218_v58 }
 0x1db   : > { %24889 = vst [vmem:[#allocation38_spill] sm:$0xff] %v20050_v20  ;;  %v2057_v61 = vpop.f32.mrb[44].mxu0  ;;  %3270 = vmatprep.subr.bf16.mxu1 %v18223_v11 }
 0x1dc   : > { %v2059_v36 = vpop.f32.mrb[45].mxu0  ;;  %v2251_v47 = vadd.f32 %v19877_v54, %v2057_v61  ;;  %v18227_v54 = vld [vmem:[#allocation5 + $0x600] ss:$36 sps:$4 sm:$0xff]  }
 0x1dd   : > { %v2253_v15 = vadd.f32 %v19879_v13, %v2059_v36  ;;  %v2061_v62 = vpop.f32.mrb[46].mxu0 }
 0x1de   : > { %v2063_v5 = vpop.f32.mrb[47].mxu0  ;;  %3271 = vmatpush1.bf16.msra.mxu1 %v18221_v26  ;;  %v2255_v17 = vadd.f32 %v19881_v29, %v2061_v62  ;;  %v18232_v29 = vld [vmem:[#allocation5 + $0x64c] ss:$36 sps:$4 sm:$0xff]  }
 0x1df   : > { %v2257_v7 = vadd.f32 %v19883_v31, %v2063_v5  ;;  %3272 = vmatprep.subr.bf16.mxu1 %v18226_v46  ;;  %v18237_v46 = vld [vmem:[#allocation5 + $0x20] ss:$36 sps:$4 sm:$0xff]  }
 0x1e0   : > { %2858 = vmatmul.mubr.bf16.gmra.mrb[120].mxu0 %v19758_v19  ;;  %v20058_v37 = vpack.c.bf16 %v2255_v17, %v2251_v47 }
 0x1e1   : > { %3124 = vmatmul.mubr.bf16.gmra.mrb[104].mxu1 %v19887_v12  ;;  %v20060_v8 = vpack.c.bf16 %v2257_v7, %v2253_v15  ;;  %2867 = vmatprep.mubr.bf16.mxu0 %v19761_v21  ;;  %v18236_v21 = vld [vmem:[#allocation5 + $0x694] ss:$36 sps:$4 sm:$0xff]   ;;  %v18238_v15 = vld [vmem:[#allocation5 + $0x2a8] ss:$36 sps:$4 sm:$0xff]  }
 0x1e2   : > { %3133 = vmatprep.mubr.bf16.mxu1 %v19892_v40  ;;  %3273 = vmatpush1.bf16.msra.mxu1 %v18224_v42 }
 0x1e3   : > { %24890 = vst [vmem:[#allocation39_spill] sm:$0xff] %v20060_v8  ;;  %v2067_v13 = vpop.f32.mrb[48].mxu0  ;;  %3274 = vmatprep.subr.bf16.mxu1 %v18229_v4  ;;  %v20196_v8 = vld [vmem:[%s19558_s29 + $0x120] ss:$12 sps:$4 sm:$0xff]  }
 0x1e4   : > { %v2069_v31 = vpop.f32.mrb[49].mxu0  ;;  %v2261_v38 = vadd.f32 %v19895_v43, %v2067_v13 }
 0x1e5   : > { %v2071_v39 = vpop.f32.mrb[50].mxu0  ;;  %v2263_v19 = vadd.f32 %v19897_v22, %v2069_v31  ;;  %v18234_v22 = vld [vmem:[#allocation5 + $0x690] ss:$36 sps:$4 sm:$0xff]  }
 0x1e6   : > { %v2073_v63 = vpop.f32.mrb[51].mxu0  ;;  %3275 = vmatpush1.bf16.msra.mxu1 %v18227_v54  ;;  %v2265_v3 = vadd.f32 %v19899_v48, %v2071_v39  ;;  %v20076_v48 = vld [vmem:[#allocation5 + $0x4a0] ss:$36 sps:$4 sm:$0xff]   ;;  %v18242_v54 = vld [vmem:[#allocation5 + $0xb0] ss:$36 sps:$4 sm:$0xff]  }
 0x1e7   : > { %3276 = vmatprep.subr.bf16.mxu1 %v18232_v29  ;;  %v2267_v58 = vadd.f32 %v19901_v49, %v2073_v63  ;;  %v18244_v29 = vld [vmem:[#allocation5 + $0x338] ss:$36 sps:$4 sm:$0xff]   ;;  %v18247_v39 = vld [vmem:[#allocation5 + $0x380] ss:$36 sps:$4 sm:$0xff]  }
 0x1e8   : > { %2868 = vmatmul.mubr.bf16.gmra.mrb[124].mxu0 %v19768_v23  ;;  %v20070_v60 = vpack.c.bf16 %v2265_v3, %v2261_v38 }
 0x1e9   : > { %3134 = vmatmul.mubr.bf16.gmra.mrb[108].mxu1 %v19905_v55  ;;  %2910 = vmatprep.mubr.bf16.mxu0 %v24870_v45  ;;  %v20074_v43 = vpack.c.bf16 %v2267_v58, %v2263_v19 }
 0x1ea   : > { %24891 = vst [vmem:[#allocation40_spill] sm:$0xff] %v20070_v60  ;;  %3143 = vmatprep.mubr.bf16.mxu1 %v19910_v57  ;;  %3277 = vmatpush1.bf16.msra.mxu1 %v18230_v9  ;;  %v24899_v9 = vld [vmem:[#allocation22_spill] sm:$0xff]  ;;  %v24941_v60 = vld [vmem:[#allocation31_spill] sm:$0xff] }
 0x1eb   : > { %24892 = vst [vmem:[#allocation41_spill] sm:$0xff] %v20074_v43  ;;  %v2077_v11 = vpop.f32.mrb[52].mxu0  ;;  %3278 = vmatprep.subr.bf16.mxu1 %v18236_v21  ;;  %v24928_v43 = vld [vmem:[#allocation18_spill] sm:$0xff] }
 0x1ec   : > { %v2079_v10 = vpop.f32.mrb[53].mxu0  ;;  %v2271_v49 = vadd.f32 %v19913_v35, %v2077_v11  ;;  %v18248_v11 = vld [vmem:[#allocation5 + $0x140] ss:$36 sps:$4 sm:$0xff]  }
 0x1ed   : > { %v2273_v23 = vadd.f32 %v19915_v14, %v2079_v10  ;;  %v2081_v26 = vpop.f32.mrb[54].mxu0  ;;  %v18239_v14 = vld [vmem:[#allocation5 + $0x68] ss:$36 sps:$4 sm:$0xff]   ;;  %v24901_v10 = vld [vmem:[#allocation24_spill] sm:$0xff] }
 0x1ee   : > { %v2083_v61 = vpop.f32.mrb[55].mxu0  ;;  %3279 = vmatpush1.bf16.msra.mxu1 %v18234_v22  ;;  %v2275_v36 = vadd.f32 %v19917_v41, %v2081_v26 }
 0x1ef   : > { %v2277_v47 = vadd.f32 %v19919_v44, %v2083_v61  ;;  %15892 = vmatprep.subr.bf16.mxu1 %v20076_v48  ;;  %v18241_v44 = vld [vmem:[#allocation5 + $0x2f0] ss:$36 sps:$4 sm:$0xff]   ;;  %v24903_v61 = vld [vmem:[#allocation12_spill] sm:$0xff] }
 0x1f0   : > { %2911 = vmatmul.mubr.bf16.vlgmr.msra.gmra.mrb[64].mxu0 %v19775_v25  ;;  %v20085_v62 = vpack.c.bf16 %v2275_v36, %v2271_v49 }
 0x1f1   : > { %3144 = vmatmul.mubr.bf16.gmra.mrb[112].mxu1 %v19926_v52  ;;  %v20087_v35 = vpack.c.bf16 %v2277_v47, %v2273_v23  ;;  %2920 = vmatprep.mubr.bf16.mxu0 %v24870_v45  ;;  %v18250_v23 = vld [vmem:[#allocation5 + $0x3c8] ss:$36 sps:$4 sm:$0xff]   ;;  %v24906_v47 = vld [vmem:[#allocation27_spill] sm:$0xff] }
 0x1f2   : > { %24893 = vst [vmem:[#allocation42_spill] sm:$0xff] %v20085_v62  ;;  %3153 = vmatprep.mubr.bf16.mxu1 %v19931_v53  ;;  %15253 = vmatpush3.bf16.msra.mxu0 %v18237_v46  ;;  %v24904_v46 = vld [vmem:[#allocation26_spill] sm:$0xff] }
 0x1f3   : > { %24894 = vst [vmem:[#allocation43_spill] sm:$0xff] %v20087_v35  ;;  %v2087_v41 = vpop.f32.mrb[56].mxu0  ;;  %15254 = vmatprep.subr.bf16.mxu0 %v18238_v15  ;;  %v18251_v15 = vld [vmem:[#allocation5 + $0x188] ss:$36 sps:$4 sm:$0xff]  }
 0x1f4   : > { %v2281_v5 = vadd.f32 %v19934_v34, %v2087_v41  ;;  %v2089_v42 = vpop.f32.mrb[57].mxu0  ;;  %v18253_v41 = vld [vmem:[#allocation5 + $0x410] ss:$36 sps:$4 sm:$0xff]  }
 0x1f5   : > { %v2283_v25 = vadd.f32 %v19936_v6, %v2089_v42  ;;  %v2091_v17 = vpop.f32.mrb[58].mxu0  ;;  %v24897_v6 = vld [vmem:[#allocation20_spill] sm:$0xff] }
 0x1f6   : > { %v2285_v7 = vadd.f32 %v19938_v30, %v2091_v17  ;;  %v2093_v4 = vpop.f32.mrb[59].mxu0  ;;  %15255 = vmatpush3.bf16.msra.mxu0 %v18239_v14  ;;  %v18245_v30 = vld [vmem:[#allocation5 + $0xf8] ss:$36 sps:$4 sm:$0xff]   ;;  %v18254_v17 = vld [vmem:[#allocation5 + $0x1d0] ss:$36 sps:$4 sm:$0xff]  }
 0x1f7   : > { %v2287_v13 = vadd.f32 %v19940_v59, %v2093_v4  ;;  %15256 = vmatprep.subr.bf16.mxu0 %v18241_v44  ;;  %v24898_v59 = vld [vmem:[#allocation21_spill] sm:$0xff] }
 0x1f8   : > { %v20095_v31 = vpack.c.bf16 %v2285_v7, %v2281_v5  ;;  %2921 = vmatmul.mubr.bf16.gmra.mrb[68].mxu0 %v19782_v2  ;;  %v24900_v2 = vld [vmem:[#allocation23_spill] sm:$0xff] }
 0x1f9   : > { %3154 = vmatmul.mubr.bf16.gmra.mrb[116].mxu1 %v19947_v50  ;;  %v20099_v34 = vpack.c.bf16 %v2287_v13, %v2283_v25  ;;  %2930 = vmatprep.mubr.bf16.mxu0 %v24870_v45  ;;  %v18256_v7 = vld [vmem:[#allocation5 + $0x458] ss:$36 sps:$4 sm:$0xff]   ;;  %v24909_v13 = vld [vmem:[#allocation29_spill] sm:$0xff] }
 0x1fa   : > { %24895 = vst [vmem:[#allocation44_spill] sm:$0xff] %v20095_v31  ;;  %3163 = vmatprep.mubr.bf16.mxu1 %v24897_v6  ;;  %15257 = vmatpush3.bf16.msra.mxu0 %v18242_v54  ;;  %v24908_v54 = vld [vmem:[#allocation13_spill] sm:$0xff]  ;;  %v20236_v31 = vld [vmem:[%s19558_s29 + $0x150] ss:$12 sps:$4 sm:$0xff]  }
 0x1fb   : > { %24896 = vst [vmem:[#allocation45_spill] sm:$0xff] %v20099_v34  ;;  %v2097_v38 = vpop.f32.mrb[60].mxu0  ;;  %15258 = vmatprep.subr.bf16.mxu0 %v18244_v29  ;;  %v24910_v29 = vld [vmem:[#allocation30_spill] sm:$0xff] }
 0x1fc   : > { %v2291_v19 = vadd.f32 %v24898_v59, %v2097_v38  ;;  %v2099_v63 = vpop.f32.mrb[61].mxu0 }
 0x1fd   : > { %v2293_v3 = vadd.f32 %v24899_v9, %v2099_v63  ;;  %v2101_v21 = vpop.f32.mrb[62].mxu0 }
 0x1fe   : > { %v2295_v58 = vadd.f32 %v24900_v2, %v2101_v21  ;;  %v2103_v22 = vpop.f32.mrb[63].mxu0  ;;  %15259 = vmatpush3.bf16.msra.mxu0 %v18245_v30  ;;  %v18257_v30 = vld [vmem:[#allocation5 + $0x218] ss:$36 sps:$4 sm:$0xff]   ;;  %v24914_v21 = vld [vmem:[#allocation32_spill] sm:$0xff] }
 0x1ff   : > { %v2297_v49 = vadd.f32 %v24901_v10, %v2103_v22  ;;  %15260 = vmatprep.subr.bf16.mxu0 %v18247_v39  ;;  %v20135_v2 = vld [vmem:[%s19558_s29 + $0xdc] ss:$12 sps:$4 sm:$0xff]  }
 0x200   : > { %v20107_v26 = vpack.c.bf16 %v2295_v58, %v2291_v19  ;;  %2931 = vmatmul.mubr.bf16.gmra.mrb[72].mxu0 %v24903_v61  ;;  %v24917_v61 = vld [vmem:[#allocation15_spill] sm:$0xff] }
 0x201   : > { %3164 = vmatmul.mubr.bf16.gmra.mrb[120].mxu1 %v24904_v46  ;;  %v20111_v36 = vpack.c.bf16 %v2297_v49, %v2293_v3  ;;  %2940 = vmatprep.mubr.bf16.mxu0 %v24870_v45  ;;  %v24913_v3 = vld [vmem:[#allocation14_spill] sm:$0xff] }
 0x202   : > { %24902 = vst [vmem:[#allocation20_spill] sm:$0xff] %v20107_v26  ;;  %3173 = vmatprep.mubr.bf16.mxu1 %v24906_v47  ;;  %15261 = vmatpush3.bf16.msra.mxu0 %v18248_v11  ;;  %v24936_v26 = vld [vmem:[#allocation25_spill] sm:$0xff] }
 0x203   : > { %24905 = vst [vmem:[#allocation21_spill] sm:$0xff] %v20111_v36  ;;  %v2140_v14 = vpop.f32.mrb[0].mxu0  ;;  %15262 = vmatprep.subr.bf16.mxu0 %v18250_v23 }
 0x204   : > { %v2142_v44 = vpop.f32.mrb[1].mxu0 }
 0x205   : > { %v2144_v5 = vpop.f32.mrb[2].mxu0 }
 0x206   : > { %v2146_v42 = vpop.f32.mrb[3].mxu0  ;;  %v20115_v25 = vpack.c.bf16 %v2144_v5, %v2140_v14  ;;  %15263 = vmatpush3.bf16.msra.mxu0 %v18251_v15  ;;  %v20144_v15 = vld [vmem:[%s19558_s29 + $0xd8] ss:$12 sps:$4 sm:$0xff]   ;;  %v20149_v14 = vld [vmem:[%s19558_s29 + $0xf4] ss:$12 sps:$4 sm:$0xff]  }
 0x207   : > { %15264 = vmatprep.subr.bf16.mxu0 %v18253_v41  ;;  %v20117_v4 = vpack.c.bf16 %v2146_v42, %v2142_v44 }
 0x208   : > { %2941 = vmatmul.mubr.bf16.gmra.mrb[76].mxu0 %v24908_v54  ;;  %5059 = vrot.lane.b32.xlu0 %v20115_v25, %s19347_s21  ;;  %v24920_v54 = vld [vmem:[#allocation16_spill] sm:$0xff] }
 0x209   : > { %24907 = vst [vmem:[#allocation22_spill] sm:$0xff] %v20117_v4  ;;  %3174 = vmatmul.mubr.bf16.gmra.mrb[124].mxu1 %v24909_v13  ;;  %2950 = vmatprep.mubr.bf16.mxu0 %v24870_v45 }
 0x20a   : > { %3183 = vmatprep.mubr.bf16.mxu1 %v24910_v29  ;;  %15265 = vmatpush3.bf16.msra.mxu0 %v18254_v17 }
 0x20b   : > { %v2150_v38 = vpop.f32.mrb[4].mxu0  ;;  %15266 = vmatprep.subr.bf16.mxu0 %v18256_v7 }
 0x20c   : > { %v2152_v39 = vpop.f32.mrb[5].mxu0 }
 0x20d   : > { %v2154_v59 = vpop.f32.mrb[6].mxu0 }
 0x20e   : > { %v2156_v19 = vpop.f32.mrb[7].mxu0  ;;  %v20125_v63 = vpack.c.bf16 %v2154_v59, %v2150_v38  ;;  %15267 = vmatpush3.bf16.msra.mxu0 %v18257_v30  ;;  %v20158_v30 = vld [vmem:[%s19558_s29 + $0xf0] ss:$12 sps:$4 sm:$0xff]   ;;  %v20163_v38 = vld [vmem:[%s19558_s29 + $0x10c] ss:$12 sps:$4 sm:$0xff]  }
 0x20f   : > { %v20127_v9 = vpack.c.bf16 %v2156_v19, %v2152_v39 }
 0x210   : > { %24911 = vst [vmem:[#allocation23_spill] sm:$0xff] %v20125_v63  ;;  %2951 = vmatmul.mubr.bf16.gmra.mrb[80].mxu0 %v24913_v3  ;;  %5061 = vrot.lane.b32.xlu1 %v20125_v63, %s19347_s21  ;;  %v20315_v63 = vld [vmem:[%s19558_s29 + $0x68] ss:$12 sps:$4 sm:$0xff]  }
 0x211   : > { %24912 = vst [vmem:[#allocation24_spill] sm:$0xff] %v20127_v9  ;;  %3184 = vmatmul.mubr.bf16.gmra.mrb[128].mxu1 %v24914_v21  ;;  %2960 = vmatprep.mubr.bf16.mxu0 %v24870_v45 }
 0x212   : > { %3193 = vmatprep.mubr.bf16.mxu1 %v20135_v2 }
 0x213   : > { %v2160_v58 = vpop.f32.mrb[8].mxu0 }
 0x214   : > { %v2162_v22 = vpop.f32.mrb[9].mxu0 }
 0x215   : > { %v2164_v11 = vpop.f32.mrb[10].mxu0 }
 0x216   : > { %v2166_v10 = vpop.f32.mrb[11].mxu0  ;;  %v20138_v49 = vpack.c.bf16 %v2164_v11, %v2160_v58 }
 0x217   : > { %v20140_v23 = vpack.c.bf16 %v2166_v10, %v2162_v22 }
 0x218   : > { %24915 = vst [vmem:[#allocation12_spill] sm:$0xff] %v20138_v49  ;;  %2961 = vmatmul.mubr.bf16.gmra.mrb[84].mxu0 %v24917_v61 }
 0x219   : > { %24916 = vst [vmem:[#allocation26_spill] sm:$0xff] %v20140_v23  ;;  %3194 = vmatmul.mubr.bf16.gmra.mrb[132].mxu1 %v20144_v15  ;;  %2970 = vmatprep.mubr.bf16.mxu0 %v24870_v45 }
 0x21a   : > { %3203 = vmatprep.mubr.bf16.mxu1 %v20149_v14 }
 0x21b   : > { %v2170_v41 = vpop.f32.mrb[12].mxu0 }
 0x21c   : > { %v2172_v44 = vpop.f32.mrb[13].mxu0 }
 0x21d   : > { %v2174_v5 = vpop.f32.mrb[14].mxu0 }
 0x21e   : > { %v2176_v42 = vpop.f32.mrb[15].mxu0  ;;  %v20152_v17 = vpack.c.bf16 %v2174_v5, %v2170_v41 }
 0x21f   : > { %v20154_v7 = vpack.c.bf16 %v2176_v42, %v2172_v44  ;;  %v24924_v42 = vld [vmem:[#allocation17_spill] sm:$0xff] }
 0x220   : > { %24918 = vst [vmem:[#allocation27_spill] sm:$0xff] %v20152_v17  ;;  %2971 = vmatmul.mubr.bf16.gmra.mrb[88].mxu0 %v24920_v54  ;;  %v20176_v54 = vld [vmem:[%s19558_s29 + $0x108] ss:$12 sps:$4 sm:$0xff]   ;;  %v20279_v17 = vld [vmem:[%s19558_s29 + $0x20] ss:$12 sps:$4 sm:$0xff]  }
 0x221   : > { %24919 = vst [vmem:[#allocation13_spill] sm:$0xff] %v20154_v7  ;;  %3204 = vmatmul.mubr.bf16.gmra.mrb[136].mxu1 %v20158_v30  ;;  %2980 = vmatprep.mubr.bf16.mxu0 %v24870_v45  ;;  %v20216_v7 = vld [vmem:[%s19558_s29 + $0x138] ss:$12 sps:$4 sm:$0xff]  }
 0x222   : > { %3213 = vmatprep.mubr.bf16.mxu1 %v20163_v38 }
 0x223   : > { %v2180_v39 = vpop.f32.mrb[16].mxu0 }
 0x224   : > { %v2526_v59 = vpop.f32.mrb[32].mxu1  ;;  %v2182_v19 = vpop.f32.mrb[17].mxu0 }
 0x225   : > { %v2528_v3 = vpop.f32.mrb[33].mxu1  ;;  %v2184_v58 = vpop.f32.mrb[18].mxu0 }
 0x226   : > { %v2530_v22 = vpop.f32.mrb[34].mxu1  ;;  %v2186_v11 = vpop.f32.mrb[19].mxu0  ;;  %v20166_v61 = vpack.c.bf16 %v2184_v58, %v2180_v39  ;;  %v20183_v39 = vld [vmem:[%s19558_s29 + $0x124] ss:$12 sps:$4 sm:$0xff]  }
 0x227   : > { %v2532_v10 = vpop.f32.mrb[35].mxu1  ;;  %v20168_v41 = vpack.c.bf16 %v2530_v22, %v2526_v59  ;;  %v20172_v5 = vpack.c.bf16 %v2186_v11, %v2182_v19 }
 0x228   : > { %24921 = vst [vmem:[#allocation29_spill] sm:$0xff] %v20166_v61  ;;  %v20170_v44 = vpack.c.bf16 %v2532_v10, %v2528_v3  ;;  %2981 = vmatmul.mubr.bf16.gmra.mrb[92].mxu0 %v24924_v42  ;;  %v24944_v61 = vld [vmem:[#allocation33_spill] sm:$0xff] }
 0x229   : > { %24922 = vst [vmem:[#allocation30_spill] sm:$0xff] %v20168_v41  ;;  %24923 = vst [vmem:[#allocation14_spill] sm:$0xff] %v20172_v5  ;;  %3214 = vmatmul.mubr.bf16.gmra.mrb[140].mxu1 %v20176_v54  ;;  %2990 = vmatprep.mubr.bf16.mxu0 %v24870_v45  ;;  %v24932_v5 = vld [vmem:[#allocation19_spill] sm:$0xff] }
 0x22a   : > { %5071 = vrot.lane.b32.xlu0 %v20170_v44, %s19347_s21  ;;  %3223 = vmatprep.mubr.bf16.mxu1 %v20183_v39 }
 0x22b   : > { %v2190_v59 = vpop.f32.mrb[20].mxu0 }
 0x22c   : > { %v2536_v3 = vpop.f32.mrb[36].mxu1  ;;  %v2192_v19 = vpop.f32.mrb[21].mxu0 }
 0x22d   : > { %v2538_v58 = vpop.f32.mrb[37].mxu1  ;;  %v2194_v22 = vpop.f32.mrb[22].mxu0 }
 0x22e   : > { %v2540_v11 = vpop.f32.mrb[38].mxu1  ;;  %v2196_v42 = vpop.f32.mrb[23].mxu0  ;;  %v20188_v36 = vpack.c.bf16 %v2194_v22, %v2190_v59 }
 0x22f   : > { %v20186_v10 = vpack.c.bf16 %v2540_v11, %v2536_v3  ;;  %v2542_v41 = vpop.f32.mrb[39].mxu1  ;;  %v20190_v34 = vpack.c.bf16 %v2196_v42, %v2192_v19  ;;  %v20203_v3 = vld [vmem:[%s19558_s29 + $0x13c] ss:$12 sps:$4 sm:$0xff]  }
 0x230   : > { %24926 = vst [vmem:[#allocation15_spill] sm:$0xff] %v20188_v36  ;;  %v20192_v35 = vpack.c.bf16 %v2542_v41, %v2538_v58  ;;  %2991 = vmatmul.mubr.bf16.gmra.mrb[96].mxu0 %v24928_v43  ;;  %v18249_v36 = vld [vmem:[#allocation5 + $0x578] ss:$36 sps:$4 sm:$0xff]  }
 0x231   : > { %24925 = vst [vmem:[#allocation32_spill] sm:$0xff] %v20186_v10  ;;  %24927 = vst [vmem:[#allocation16_spill] sm:$0xff] %v20190_v34  ;;  %3224 = vmatmul.mubr.bf16.gmra.mrb[144].mxu1 %v20196_v8  ;;  %3000 = vmatprep.mubr.bf16.mxu0 %v24870_v45 }
 0x232   : > { %5073 = vrot.lane.b32.xlu1 %v20192_v35, %s19347_s21  ;;  %3233 = vmatprep.mubr.bf16.mxu1 %v20203_v3 }
 0x233   : > { %v2200_v59 = vpop.f32.mrb[24].mxu0 }
 0x234   : > { %v2546_v19 = vpop.f32.mrb[40].mxu1  ;;  %v2202_v41 = vpop.f32.mrb[25].mxu0 }
 0x235   : > { %v2548_v58 = vpop.f32.mrb[41].mxu1  ;;  %v2204_v22 = vpop.f32.mrb[26].mxu0 }
 0x236   : > { %v2550_v11 = vpop.f32.mrb[42].mxu1  ;;  %v2206_v10 = vpop.f32.mrb[27].mxu0  ;;  %v20208_v24 = vpack.c.bf16 %v2204_v22, %v2200_v59 }
 0x237   : > { %v20206_v42 = vpack.c.bf16 %v2550_v11, %v2546_v19  ;;  %v2552_v20 = vpop.f32.mrb[43].mxu1  ;;  %v20212_v34 = vpack.c.bf16 %v2206_v10, %v2202_v41  ;;  %v20223_v19 = vld [vmem:[%s19558_s29 + $0x154] ss:$12 sps:$4 sm:$0xff]  }
 0x238   : > { %24930 = vst [vmem:[#allocation18_spill] sm:$0xff] %v20208_v24  ;;  %v20210_v56 = vpack.c.bf16 %v2552_v20, %v2548_v58  ;;  %3001 = vmatmul.mubr.bf16.gmra.mrb[100].mxu0 %v24932_v5 }
 0x239   : > { %24929 = vst [vmem:[#allocation17_spill] sm:$0xff] %v20206_v42  ;;  %24931 = vst [vmem:[#allocation46_spill] sm:$0xff] %v20212_v34  ;;  %3234 = vmatmul.mubr.bf16.gmra.mrb[148].mxu1 %v20216_v7  ;;  %3010 = vmatprep.mubr.bf16.mxu0 %v24870_v45 }
 0x23a   : > { %5075 = vrot.lane.b32.xlu0 %v20210_v56, %s19347_s21  ;;  %3243 = vmatprep.mubr.bf16.mxu1 %v20223_v19 }
 0x23b   : > { %v2210_v20 = vpop.f32.mrb[28].mxu0 }
 0x23c   : > { %v2556_v59 = vpop.f32.mrb[44].mxu1  ;;  %v2212_v10 = vpop.f32.mrb[29].mxu0 }
 0x23d   : > { %v2558_v41 = vpop.f32.mrb[45].mxu1  ;;  %v2214_v58 = vpop.f32.mrb[30].mxu0 }
 0x23e   : > { %v2560_v22 = vpop.f32.mrb[46].mxu1  ;;  %v2216_v42 = vpop.f32.mrb[31].mxu0  ;;  %v20228_v23 = vpack.c.bf16 %v2214_v58, %v2210_v20 }
 0x23f   : > { %v20226_v11 = vpack.c.bf16 %v2560_v22, %v2556_v59  ;;  %v2562_v34 = vpop.f32.mrb[47].mxu1  ;;  %v20230_v9 = vpack.c.bf16 %v2216_v42, %v2212_v10  ;;  %v20243_v59 = vld [vmem:[%s19558_s29 + $0x16c] ss:$12 sps:$4 sm:$0xff]   ;;  %v24938_v22 = vld [vmem:[#allocation28_spill] sm:$0xff] }
 0x240   : > { %24934 = vst [vmem:[#allocation47_spill] sm:$0xff] %v20228_v23  ;;  %v20232_v4 = vpack.c.bf16 %v2562_v34, %v2558_v41  ;;  %3011 = vmatmul.mubr.bf16.gmra.mrb[104].mxu0 %v24936_v26  ;;  %v20265_v23 = vld [vmem:[%s19558_s29 + $0x8] ss:$12 sps:$4 sm:$0xff]  }
 0x241   : > { %24933 = vst [vmem:[#allocation19_spill] sm:$0xff] %v20226_v11  ;;  %24935 = vst [vmem:[#allocation48_spill] sm:$0xff] %v20230_v9  ;;  %3244 = vmatmul.mubr.bf16.gmra.mrb[152].mxu1 %v20236_v31  ;;  %3020 = vmatprep.mubr.bf16.mxu0 %v24870_v45  ;;  %v20252_v11 = vld [vmem:[%s19558_s29 + $0x168] ss:$12 sps:$4 sm:$0xff]  }
 0x242   : > { %5077 = vrot.lane.b32.xlu0 %v20232_v4, %s19347_s21  ;;  %3253 = vmatprep.mubr.bf16.mxu1 %v20243_v59 }
 0x244   : > { %v2566_v42 = vpop.f32.mrb[48].mxu1 }
 0x245   : > { %v2568_v20 = vpop.f32.mrb[49].mxu1 }
 0x246   : > { %v2570_v10 = vpop.f32.mrb[50].mxu1 }
 0x247   : > { %v20246_v34 = vpack.c.bf16 %v2570_v10, %v2566_v42  ;;  %v2572_v41 = vpop.f32.mrb[51].mxu1 }
 0x248   : > { %v20248_v58 = vpack.c.bf16 %v2572_v41, %v2568_v20  ;;  %3021 = vmatmul.mubr.bf16.gmra.mrb[108].mxu0 %v24938_v22  ;;  %v18243_v41 = vld [vmem:[#allocation5 + $0x4e8] ss:$36 sps:$4 sm:$0xff]  }
 0x249   : > { %24937 = vst [vmem:[#allocation25_spill] sm:$0xff] %v20246_v34  ;;  %3254 = vmatmul.mubr.bf16.gmra.mrb[156].mxu1 %v20252_v11  ;;  %3030 = vmatprep.mubr.bf16.mxu0 %v24870_v45 }
 0x24a   : > { %5184 = vrot.lane.b32.xlu1 %v20248_v58, %s19347_s21  ;;  %3296 = vmatprep.mubr.bf16.mxu1 %v24870_v45 }
 0x24c   : > { %v2576_v9 = vpop.f32.mrb[52].mxu1 }
 0x24d   : > { %v2578_v42 = vpop.f32.mrb[53].mxu1 }
 0x24e   : > { %v2580_v10 = vpop.f32.mrb[54].mxu1 }
 0x24f   : > { %v20259_v34 = vpack.c.bf16 %v2580_v10, %v2576_v9  ;;  %v2582_v20 = vpop.f32.mrb[55].mxu1  ;;  %v18246_v9 = vld [vmem:[#allocation5 + $0x530] ss:$36 sps:$4 sm:$0xff]  }
 0x250   : > { %v20261_v62 = vpack.c.bf16 %v2582_v20, %v2578_v42  ;;  %3031 = vmatmul.mubr.bf16.gmra.mrb[112].mxu0 %v24941_v60 }
 0x251   : > { %24939 = vst [vmem:[#allocation28_spill] sm:$0xff] %v20259_v34  ;;  %3297 = vmatmul.mubr.bf16.vlgmr.msra.gmra.mrb[96].mxu1 %v20265_v23  ;;  %3040 = vmatprep.mubr.bf16.mxu0 %v24870_v45 }
 0x252   : > { %24940 = vst [vmem:[#allocation49_spill] sm:$0xff] %v20261_v62  ;;  %15893 = vmatpush3.bf16.msra.mxu1 %v20076_v48  ;;  %5186 = vrot.lane.b32.xlu1 %v20261_v62, %s19347_s21  ;;  %v18255_v62 = vld [vmem:[#allocation5 + $0x608] ss:$36 sps:$4 sm:$0xff]  }
 0x253   : > { %15894 = vmatprep.subr.bf16.mxu1 %v18243_v41  ;;  %3306 = vmatprep.mubr.bf16.mxu1 %v24870_v45 }
 0x254   : > { %v2586_v10 = vpop.f32.mrb[56].mxu1 }
 0x255   : > { %v2588_v42 = vpop.f32.mrb[57].mxu1 }
 0x256   : > { %15895 = vmatpush3.bf16.msra.mxu1 %v18243_v41  ;;  %v2590_v20 = vpop.f32.mrb[58].mxu1  ;;  %v18252_v41 = vld [vmem:[#allocation5 + $0x5c0] ss:$36 sps:$4 sm:$0xff]  }
 0x257   : > { %v20273_v34 = vpack.c.bf16 %v2590_v20, %v2586_v10  ;;  %v2592_v24 = vpop.f32.mrb[59].mxu1  ;;  %15896 = vmatprep.subr.bf16.mxu1 %v18246_v9 }
 0x258   : > { %v20275_v48 = vpack.c.bf16 %v2592_v24, %v2588_v42  ;;  %3041 = vmatmul.mubr.bf16.gmra.mrb[116].mxu0 %v24944_v61 }
 0x259   : > { %24942 = vst [vmem:[#allocation31_spill] sm:$0xff] %v20273_v34  ;;  %3307 = vmatmul.mubr.bf16.gmra.mrb[100].mxu1 %v20279_v17  ;;  %3050 = vmatprep.mubr.bf16.mxu0 %v24870_v45 }
 0x25a   : > { %24943 = vst [vmem:[#allocation50_spill] sm:$0xff] %v20275_v48  ;;  %15897 = vmatpush3.bf16.msra.mxu1 %v18246_v9  ;;  %5188 = vrot.lane.b32.xlu0 %v20275_v48, %s19347_s21  ;;  %v20292_v48 = vld [vmem:[%s19558_s29 + $0x38] ss:$12 sps:$4 sm:$0xff]  }
 0x25b   : > { %15898 = vmatprep.subr.bf16.mxu1 %v18249_v36  ;;  %3316 = vmatprep.mubr.bf16.mxu1 %v24870_v45 }
 0x25c   : > { %v2596_v10 = vpop.f32.mrb[60].mxu1 }
 0x25d   : > { %v2598_v24 = vpop.f32.mrb[61].mxu1 }
 0x25e   : > { %15899 = vmatpush3.bf16.msra.mxu1 %v18249_v36  ;;  %v2600_v42 = vpop.f32.mrb[62].mxu1  ;;  %v18258_v36 = vld [vmem:[#allocation5 + $0x650] ss:$36 sps:$4 sm:$0xff]  }
 0x25f   : > { %v20286_v20 = vpack.c.bf16 %v2600_v42, %v2596_v10  ;;  %v2602_v34 = vpop.f32.mrb[63].mxu1  ;;  %15900 = vmatprep.subr.bf16.mxu1 %v18252_v41 }
 0x260   : > { %v20288_v9 = vpack.c.bf16 %v2602_v34, %v2598_v24  ;;  %3051 = vmatmul.mubr.bf16.gmra.mrb[120].mxu0 %v20007_v33 }
 0x261   : > { %24945 = vst [vmem:[#allocation33_spill] sm:$0xff] %v20286_v20  ;;  %3317 = vmatmul.mubr.bf16.gmra.mrb[104].mxu1 %v20292_v48  ;;  %3060 = vmatprep.mubr.bf16.mxu0 %v24870_v45 }
 0x262   : > { %24946 = vst [vmem:[#allocation51_spill] sm:$0xff] %v20288_v9  ;;  %15901 = vmatpush3.bf16.msra.mxu1 %v18252_v41  ;;  %3326 = vmatprep.mubr.bf16.mxu1 %v24870_v45  ;;  %v18259_v9 = vld [vmem:[#allocation5 + $0x698] ss:$36 sps:$4 sm:$0xff]  }
 0x263   : > { %15902 = vmatprep.subr.bf16.mxu1 %v18255_v62  ;;  %v20301_v41 = vld [vmem:[%s19558_s29 + $0x50] ss:$12 sps:$4 sm:$0xff]  }
 0x264   : > { %v2606_v10 = vpop.f32.mrb[64].mxu1 }
 0x265   : > { %v2608_v42 = vpop.f32.mrb[65].mxu1 }
 0x266   : > { %15903 = vmatpush3.bf16.msra.mxu1 %v18255_v62  ;;  %v2610_v20 = vpop.f32.mrb[66].mxu1 }
 0x267   : > { %v20297_v34 = vpack.c.bf16 %v2610_v20, %v2606_v10  ;;  %v2612_v24 = vpop.f32.mrb[67].mxu1  ;;  %15904 = vmatprep.subr.bf16.mxu1 %v18258_v36  ;;  %v19168_v20 = vld [vmem:[%s19558_s29 + $0x4] ss:$12 sps:$4 sm:$0xff]  }
 0x268   : > { %v3854_v49 = vpack.c.bf16 %v2612_v24, %v2608_v42  ;;  %3061 = vmatmul.mubr.bf16.gmra.mrb[124].mxu0 %v20018_v28 }
 0x269   : > { %24947 = vst [vmem:[#allocation52_spill] sm:$0xff] %v20297_v34  ;;  %3327 = vmatmul.mubr.bf16.gmra.mrb[108].mxu1 %v20301_v41  ;;  %3489 = vmatprep.mubr.bf16.mxu0 %v19168_v20 }
 0x26a   : > { %15905 = vmatpush3.bf16.msra.mxu1 %v18258_v36  ;;  %17716 = vmatprep.subr.msk.bf16.mxu0 %vm3942_vm0, %v3854_v49  ;;  %v4134_v20 = vsel %vm3942_vm0, %v3854_v49, 0 }
 0x26b   : > { %5297 = vrot.lane.b32.xlu1 %v3854_v49, %s19347_s21  ;;  %15906 = vmatprep.subr.bf16.mxu1 %v18259_v9 }
 0x26c   : > { %v2616_v62 = vpop.f32.mrb[68].mxu1  ;;  %3336 = vmatprep.mubr.bf16.mxu1 %v24870_v45 }
 0x26d   : > { %v2618_v10 = vpop.f32.mrb[69].mxu1 }
 0x26e   : > { %15907 = vmatpush3.bf16.msra.mxu1 %v18259_v9  ;;  %v2620_v42 = vpop.f32.mrb[70].mxu1 }
 0x26f   : > { %v20308_v24 = vpack.c.bf16 %v2620_v42, %v2616_v62  ;;  %17708 = vmatprep.subr.msk.bf16.mxu1 %vm3942_vm0, %v20170_v44  ;;  %v2622_v34 = vpop.f32.mrb[71].mxu1 }
 0x270   : > { %v20312_v36 = vpack.c.bf16 %v2622_v34, %v2618_v10  ;;  %3490 = vmatmul.mubr.bf16.vlgmr.msra.gmra.mrb[128].mxu0 %v19851_v16  ;;  %v20329_v16 = vld [vmem:[%s19558_s29 + $0x80] ss:$12 sps:$4 sm:$0xff]  }
 0x271   : > { %24948 = vst [vmem:[#allocation53_spill] sm:$0xff] %v20308_v24  ;;  %3337 = vmatmul.mubr.bf16.gmra.mrb[112].mxu1 %v20315_v63  ;;  %15973 = vmatpush3.bf16.xpose.msra.mxu0 %v4134_v20 }
 0x272   : > { %3346 = vmatprep.mubr.bf16.mxu1 %v24870_v45  ;;  %17717 = vmatprep.subr.msk.bf16.mxu0 %vm3942_vm0, %v20312_v36  ;;  %v4137_v49 = vsel %vm3942_vm0, %v20312_v36, 0 }
 0x273   : > { %3497 = vmatprep.mubr.bf16.mxu0 %v19856_v18 }
 0x274   : > { %v2626_v9 = vpop.f32.mrb[72].mxu1 }
 0x275   : > { %v2628_v62 = vpop.f32.mrb[73].mxu1 }
 0x276   : > { %v2630_v34 = vpop.f32.mrb[74].mxu1 }
 0x277   : > { %v20324_v10 = vpack.c.bf16 %v2630_v34, %v2626_v9  ;;  %v2632_v42 = vpop.f32.mrb[75].mxu1 }
 0x278   : > { %v20326_v24 = vpack.c.bf16 %v2632_v42, %v2628_v62  ;;  %3498 = vmatmul.mubr.bf16.gmra.mrb[132].mxu0 %v19869_v51  ;;  %v20344_v51 = vld [vmem:[%s19558_s29 + $0x98] ss:$12 sps:$4 sm:$0xff]  }
 0x279   : > { %24949 = vst [vmem:[#allocation54_spill] sm:$0xff] %v20324_v10  ;;  %3347 = vmatmul.mubr.bf16.gmra.mrb[116].mxu1 %v20329_v16  ;;  %15975 = vmatpush3.bf16.xpose.msra.mxu0 %v4137_v49 }
 0x27a   : > { %24950 = vst [vmem:[#allocation55_spill] sm:$0xff] %v20326_v24  ;;  %3356 = vmatprep.mubr.bf16.mxu1 %v24870_v45  ;;  %17718 = vmatprep.subr.msk.bf16.mxu0 %vm3942_vm0, %v20326_v24  ;;  %v4140_v49 = vsel %vm3942_vm0, %v20326_v24, 0 }
 0x27b   : > { %3505 = vmatprep.mubr.bf16.mxu0 %v19874_v32 }
 0x27c   : > { %v2636_v18 = vpop.f32.mrb[76].mxu1 }
 0x27d   : > { %v2638_v20 = vpop.f32.mrb[77].mxu1 }
 0x27e   : > { %v2640_v9 = vpop.f32.mrb[78].mxu1 }
 0x27f   : > { %v20339_v62 = vpack.c.bf16 %v2640_v9, %v2636_v18  ;;  %v2642_v34 = vpop.f32.mrb[79].mxu1 }
 0x280   : > { %v20341_v42 = vpack.c.bf16 %v2642_v34, %v2638_v20  ;;  %3506 = vmatmul.mubr.bf16.gmra.mrb[136].mxu0 %v19887_v12  ;;  %v20359_v12 = vld [vmem:[%s19558_s29 + $0xb0] ss:$12 sps:$4 sm:$0xff]  }
 0x281   : > { %24951 = vst [vmem:[#allocation56_spill] sm:$0xff] %v20339_v62  ;;  %3357 = vmatmul.mubr.bf16.gmra.mrb[120].mxu1 %v20344_v51  ;;  %15977 = vmatpush3.bf16.xpose.msra.mxu0 %v4140_v49 }
 0x282   : > { %24952 = vst [vmem:[#allocation57_spill] sm:$0xff] %v20341_v42  ;;  %3366 = vmatprep.mubr.bf16.mxu1 %v24870_v45  ;;  %17719 = vmatprep.subr.msk.bf16.mxu0 %vm3942_vm0, %v20341_v42  ;;  %v4143_v49 = vsel %vm3942_vm0, %v20341_v42, 0 }
 0x283   : > { %3513 = vmatprep.mubr.bf16.mxu0 %v19892_v40 }
 0x284   : > { %v2646_v32 = vpop.f32.mrb[80].mxu1 }
 0x285   : > { %v2648_v18 = vpop.f32.mrb[81].mxu1 }
 0x286   : > { %v2650_v20 = vpop.f32.mrb[82].mxu1 }
 0x287   : > { %v20354_v9 = vpack.c.bf16 %v2650_v20, %v2646_v32  ;;  %v2652_v34 = vpop.f32.mrb[83].mxu1 }
 0x288   : > { %v20356_v62 = vpack.c.bf16 %v2652_v34, %v2648_v18  ;;  %3514 = vmatmul.mubr.bf16.gmra.mrb[140].mxu0 %v19905_v55 }
 0x289   : > { %24953 = vst [vmem:[#allocation58_spill] sm:$0xff] %v20354_v9  ;;  %3367 = vmatmul.mubr.bf16.gmra.mrb[124].mxu1 %v20359_v12  ;;  %15979 = vmatpush3.bf16.xpose.msra.mxu0 %v4143_v49 }
 0x28a   : > { %3376 = vmatprep.mubr.bf16.mxu1 %v24870_v45  ;;  %3521 = vmatprep.mubr.bf16.mxu0 %v19910_v57 }
 0x28c   : > { %v2656_v40 = vpop.f32.mrb[84].mxu1 }
 0x28d   : > { %v2658_v32 = vpop.f32.mrb[85].mxu1 }
 0x28e   : > { %v2660_v20 = vpop.f32.mrb[86].mxu1 }
 0x28f   : > { %v20367_v10 = vpack.c.bf16 %v2660_v20, %v2656_v40  ;;  %v2662_v18 = vpop.f32.mrb[87].mxu1 }
 0x290   : > { %v20369_v34 = vpack.c.bf16 %v2662_v18, %v2658_v32  ;;  %3522 = vmatmul.mubr.bf16.gmra.mrb[144].mxu0 %v19926_v52  ;;  %v19175_v18 = vld [vmem:[%s19558_s29 + $0xf8] ss:$12 sps:$4 sm:$0xff]  }
 0x291   : > { %24954 = vst [vmem:[#allocation59_spill] sm:$0xff] %v20367_v10  ;;  %3377 = vmatmul.mubr.bf16.gmra.mrb[128].mxu1 %v24928_v43  ;;  %3529 = vmatprep.mubr.bf16.mxu0 %v19931_v53 }
 0x292   : > { %24955 = vst [vmem:[#allocation60_spill] sm:$0xff] %v20369_v34  ;;  %3386 = vmatprep.mubr.bf16.mxu1 %v24870_v45 }
 0x294   : > { %v2666_v55 = vpop.f32.mrb[88].mxu1 }
 0x295   : > { %v2668_v49 = vpop.f32.mrb[89].mxu1 }
 0x296   : > { %v2670_v9 = vpop.f32.mrb[90].mxu1 }
 0x297   : > { %v20375_v57 = vpack.c.bf16 %v2670_v9, %v2666_v55  ;;  %v2672_v42 = vpop.f32.mrb[91].mxu1 }
 0x298   : > { %v20377_v24 = vpack.c.bf16 %v2672_v42, %v2668_v49  ;;  %3530 = vmatmul.mubr.bf16.gmra.mrb[148].mxu0 %v19947_v50 }
 0x299   : > { %24956 = vst [vmem:[#allocation61_spill] sm:$0xff] %v20375_v57  ;;  %3387 = vmatmul.mubr.bf16.gmra.mrb[132].mxu1 %v24932_v5  ;;  %3537 = vmatprep.mubr.bf16.mxu0 %v24897_v6 }
 0x29a   : > { %3396 = vmatprep.mubr.bf16.mxu1 %v24870_v45  ;;  %v4229_v10 = vsel %vm3942_vm0, %v20377_v24, 0 }
 0x29c   : > { %v2676_v52 = vpop.f32.mrb[92].mxu1 }
 0x29d   : > { %v2678_v43 = vpop.f32.mrb[93].mxu1 }
 0x29e   : > { %v2680_v40 = vpop.f32.mrb[94].mxu1 }
 0x29f   : > { %v20383_v53 = vpack.c.bf16 %v2680_v40, %v2676_v52  ;;  %v2682_v32 = vpop.f32.mrb[95].mxu1 }
 0x2a0   : > { %v20385_v20 = vpack.c.bf16 %v2682_v32, %v2678_v43  ;;  %3538 = vmatmul.mubr.bf16.gmra.mrb[152].mxu0 %v24904_v46 }
 0x2a1   : > { %24957 = vst [vmem:[#allocation62_spill] sm:$0xff] %v20383_v53  ;;  %3397 = vmatmul.mubr.bf16.gmra.mrb[136].mxu1 %v24936_v26  ;;  %3545 = vmatprep.mubr.bf16.mxu0 %v24906_v47 }
 0x2a2   : > { %24958 = vst [vmem:[#allocation63_spill] sm:$0xff] %v20385_v20  ;;  %3406 = vmatprep.mubr.bf16.mxu1 %v24870_v45 }
 0x2a8   : > { %3546 = vmatmul.mubr.bf16.gmra.mrb[156].mxu0 %v24909_v13 }
 0x2a9   : > { %3407 = vmatmul.mubr.bf16.gmra.mrb[140].mxu1 %v24938_v22  ;;  %3553 = vmatprep.mubr.bf16.mxu0 %v24910_v29 }
 0x2aa   : > { %3416 = vmatprep.mubr.bf16.mxu1 %v24870_v45 }
 0x2b0   : > { %3554 = vmatmul.mubr.bf16.gmra.mrb[160].mxu0 %v24914_v21 }
 0x2b1   : > { %3417 = vmatmul.mubr.bf16.gmra.mrb[144].mxu1 %v24941_v60  ;;  %3561 = vmatprep.mubr.bf16.mxu0 %v20135_v2 }
 0x2b2   : > { %3426 = vmatprep.mubr.bf16.mxu1 %v24870_v45 }
 0x2b8   : > { %3562 = vmatmul.mubr.bf16.gmra.mrb[164].mxu0 %v20144_v15 }
 0x2b9   : > { %3427 = vmatmul.mubr.bf16.gmra.mrb[148].mxu1 %v24944_v61  ;;  %3569 = vmatprep.mubr.bf16.mxu0 %v20149_v14 }
 0x2ba   : > { %3436 = vmatprep.mubr.bf16.mxu1 %v24870_v45 }
 0x2c0   : > { %3570 = vmatmul.mubr.bf16.gmra.mrb[168].mxu0 %v20158_v30 }
 0x2c1   : > { %3437 = vmatmul.mubr.bf16.gmra.mrb[152].mxu1 %v20007_v33  ;;  %3577 = vmatprep.mubr.bf16.mxu0 %v20163_v38 }
 0x2c2   : > { %3446 = vmatprep.mubr.bf16.mxu1 %v24870_v45 }
 0x2c3   : > { %v2912_v50 = vpop.f32.mrb[64].mxu0 }
 0x2c4   : > { %v2914_v60 = vpop.f32.mrb[65].mxu0 }
 0x2c5   : > { %v2916_v6 = vpop.f32.mrb[66].mxu0 }
 0x2c6   : > { %v20407_v26 = vpack.c.bf16 %v2916_v6, %v2912_v50  ;;  %v2918_v46 = vpop.f32.mrb[67].mxu0  ;;  %v19176_v50 = vld [vmem:[%s19558_s29 + $0x110] ss:$12 sps:$4 sm:$0xff]  }
 0x2c7   : > { %v20409_v47 = vpack.c.bf16 %v2918_v46, %v2914_v60  ;;  %v19177_v60 = vld [vmem:[%s19558_s29 + $0x128] ss:$12 sps:$4 sm:$0xff]  }
 0x2c8   : > { %24959 = vst [vmem:[#allocation64_spill] sm:$0xff] %v20407_v26  ;;  %3578 = vmatmul.mubr.bf16.gmra.mrb[172].mxu0 %v20176_v54 }
 0x2c9   : > { %24960 = vst [vmem:[#allocation65_spill] sm:$0xff] %v20409_v47  ;;  %3447 = vmatmul.mubr.bf16.gmra.mrb[156].mxu1 %v20018_v28  ;;  %3585 = vmatprep.mubr.bf16.mxu0 %v20183_v39  ;;  %v3956_v28 = vsel %vm3942_vm0, %v20170_v44, 0 }
 0x2ca   : > { %15908 = vmatprep.mubr.bf16.mxu1 %v20265_v23 }
 0x2cb   : > { %v2922_v33 = vpop.f32.mrb[68].mxu0 }
 0x2cc   : > { %v2924_v13 = vpop.f32.mrb[69].mxu0 }
 0x2cd   : > { %v2926_v29 = vpop.f32.mrb[70].mxu0 }
 0x2ce   : > { %v20415_v21 = vpack.c.bf16 %v2926_v29, %v2922_v33  ;;  %v2928_v2 = vpop.f32.mrb[71].mxu0 }
 0x2cf   : > { %v20417_v15 = vpack.c.bf16 %v2928_v2, %v2924_v13 }
 0x2d0   : > { %24961 = vst [vmem:[#allocation66_spill] sm:$0xff] %v20415_v21  ;;  %3586 = vmatmul.mubr.bf16.gmra.mrb[176].mxu0 %v20196_v8 }
 0x2d1   : > { %24962 = vst [vmem:[#allocation67_spill] sm:$0xff] %v20417_v15  ;;  %15909 = vmatmul.mubr.bf16.vlgmr.msra.gmra.mrb[160].mxu1 %v20279_v17  ;;  %3593 = vmatprep.mubr.bf16.mxu0 %v20203_v3  ;;  %v3959_v17 = vsel %vm3942_vm0, %v20192_v35, 0 }
 0x2d2   : > { %15941 = vmatpush3.bf16.xpose.msra.mxu1 %v3956_v28  ;;  %15912 = vmatprep.mubr.bf16.mxu1 %v20292_v48  ;;  %v19178_v28 = vld [vmem:[%s19558_s29 + $0x140] ss:$12 sps:$4 sm:$0xff]  }
 0x2d3   : > { %17709 = vmatprep.subr.msk.bf16.mxu1 %vm3942_vm0, %v20192_v35  ;;  %v2932_v23 = vpop.f32.mrb[72].mxu0  ;;  %v3962_v35 = vsel %vm3942_vm0, %v20210_v56, 0 }
 0x2d4   : > { %v2934_v14 = vpop.f32.mrb[73].mxu0 }
 0x2d5   : > { %v2936_v30 = vpop.f32.mrb[74].mxu0 }
 0x2d6   : > { %v20427_v38 = vpack.c.bf16 %v2936_v30, %v2932_v23  ;;  %v2938_v61 = vpop.f32.mrb[75].mxu0  ;;  %v19179_v23 = vld [vmem:[%s19558_s29 + $0x158] ss:$12 sps:$4 sm:$0xff]  }
 0x2d7   : > { %v20429_v8 = vpack.c.bf16 %v2938_v61, %v2934_v14 }
 0x2d8   : > { %24963 = vst [vmem:[#allocation68_spill] sm:$0xff] %v20427_v38  ;;  %3594 = vmatmul.mubr.bf16.gmra.mrb[180].mxu0 %v20216_v7 }
 0x2d9   : > { %24964 = vst [vmem:[#allocation69_spill] sm:$0xff] %v20429_v8  ;;  %15913 = vmatmul.mubr.bf16.gmra.mrb[164].mxu1 %v20301_v41  ;;  %3601 = vmatprep.mubr.bf16.mxu0 %v20223_v19 }
 0x2da   : > { %15943 = vmatpush3.bf16.xpose.msra.mxu1 %v3959_v17  ;;  %15916 = vmatprep.mubr.bf16.mxu1 %v20315_v63 }
 0x2db   : > { %17710 = vmatprep.subr.msk.bf16.mxu1 %vm3942_vm0, %v20210_v56  ;;  %v2942_v44 = vpop.f32.mrb[76].mxu0  ;;  %v3965_v56 = vsel %vm3942_vm0, %v20232_v4, 0 }
 0x2dc   : > { %v2944_v5 = vpop.f32.mrb[77].mxu0 }
 0x2dd   : > { %v2946_v54 = vpop.f32.mrb[78].mxu0 }
 0x2de   : > { %v20439_v39 = vpack.c.bf16 %v2946_v54, %v2942_v44  ;;  %v2948_v3 = vpop.f32.mrb[79].mxu0  ;;  %v19180_v54 = vld [vmem:[%s19558_s29 + $0x170] ss:$12 sps:$4 sm:$0xff]  }
 0x2df   : > { %v20441_v7 = vpack.c.bf16 %v2948_v3, %v2944_v5 }
 0x2e0   : > { %24965 = vst [vmem:[#allocation70_spill] sm:$0xff] %v20439_v39  ;;  %3602 = vmatmul.mubr.bf16.gmra.mrb[184].mxu0 %v20236_v31 }
 0x2e1   : > { %24966 = vst [vmem:[#allocation71_spill] sm:$0xff] %v20441_v7  ;;  %15917 = vmatmul.mubr.bf16.gmra.mrb[168].mxu1 %v20329_v16  ;;  %3609 = vmatprep.mubr.bf16.mxu0 %v20243_v59  ;;  %v19173_v59 = vld [vmem:[%s19558_s29 + $0xc8] ss:$12 sps:$4 sm:$0xff]  }
 0x2e2   : > { %15945 = vmatpush3.bf16.xpose.msra.mxu1 %v3962_v35  ;;  %15920 = vmatprep.mubr.bf16.mxu1 %v20344_v51 }
 0x2e3   : > { %17711 = vmatprep.subr.msk.bf16.mxu1 %vm3942_vm0, %v20232_v4  ;;  %v2952_v63 = vpop.f32.mrb[80].mxu0  ;;  %v19174_v4 = vld [vmem:[%s19558_s29 + $0xe0] ss:$12 sps:$4 sm:$0xff]  }
 0x2e4   : > { %v2954_v19 = vpop.f32.mrb[81].mxu0 }
 0x2e5   : > { %v2956_v22 = vpop.f32.mrb[82].mxu0 }
 0x2e6   : > { %v20451_v48 = vpack.c.bf16 %v2956_v22, %v2952_v63  ;;  %v2958_v31 = vpop.f32.mrb[83].mxu0 }
 0x2e7   : > { %v20453_v41 = vpack.c.bf16 %v2958_v31, %v2954_v19 }
 0x2e8   : > { %24967 = vst [vmem:[#allocation72_spill] sm:$0xff] %v20451_v48  ;;  %3610 = vmatmul.mubr.bf16.gmra.mrb[188].mxu0 %v20252_v11 }
 0x2e9   : > { %24968 = vst [vmem:[#allocation73_spill] sm:$0xff] %v20453_v41  ;;  %15921 = vmatmul.mubr.bf16.gmra.mrb[172].mxu1 %v20359_v12  ;;  %15980 = vmatprep.mubr.msk.bf16.mxu0 %vm3942_vm0, %v20022_v1 }
 0x2ea   : > { %15947 = vmatpush3.bf16.xpose.msra.mxu1 %v3965_v56  ;;  %15924 = vmatprep.mubr.bf16.mxu1 %v19173_v59  ;;  %v24979_v56 = vld [vmem:[#allocation23_spill] sm:$0xff]  ;;  %v4045_v59 = vsel %vm3942_vm0, %v20248_v58, 0 }
 0x2eb   : > { %17712 = vmatprep.subr.msk.bf16.mxu1 %vm3942_vm0, %v20248_v58  ;;  %v2962_v16 = vpop.f32.mrb[84].mxu0 }
 0x2ec   : > { %v2964_v42 = vpop.f32.mrb[85].mxu0 }
 0x2ed   : > { %v2966_v51 = vpop.f32.mrb[86].mxu0 }
 0x2ee   : > { %v20464_v11 = vpack.c.bf16 %v2966_v51, %v2962_v16  ;;  %v2968_v9 = vpop.f32.mrb[87].mxu0  ;;  %v24980_v16 = vld [vmem:[#allocation12_spill] sm:$0xff] }
 0x2ef   : > { %v20466_v12 = vpack.c.bf16 %v2968_v9, %v2964_v42  ;;  %v24981_v42 = vld [vmem:[#allocation49_spill] sm:$0xff] }
 0x2f0   : > { %24969 = vst [vmem:[#allocation74_spill] sm:$0xff] %v20464_v11  ;;  %15981 = vmatmul.mubr.msk.bf16.vlgmr.msra.gmra.mrb[192].mxu0 %vm3942_vm0, %v20034_v0  ;;  %v4048_v58 = vsel %vm3942_vm0, %v24981_v42, 0 }
 0x2f1   : > { %24970 = vst [vmem:[#allocation75_spill] sm:$0xff] %v20466_v12  ;;  %15925 = vmatmul.mubr.bf16.gmra.mrb[176].mxu1 %v19174_v4  ;;  %15984 = vmatprep.mubr.msk.bf16.mxu0 %vm3942_vm0, %v20046_v27  ;;  %v4232_v12 = vsel %vm3942_vm0, %v20385_v20, 0 }
 0x2f2   : > { %15928 = vmatprep.mubr.bf16.mxu1 %v19175_v18 }
 0x2f3   : > { %v2972_v55 = vpop.f32.mrb[88].mxu0 }
 0x2f4   : > { %v2974_v49 = vpop.f32.mrb[89].mxu0 }
 0x2f5   : > { %v2976_v52 = vpop.f32.mrb[90].mxu0 }
 0x2f6   : > { %v20474_v43 = vpack.c.bf16 %v2976_v52, %v2972_v55  ;;  %v2978_v40 = vpop.f32.mrb[91].mxu0  ;;  %v24985_v52 = vld [vmem:[#allocation29_spill] sm:$0xff] }
 0x2f7   : > { %v20476_v32 = vpack.c.bf16 %v2978_v40, %v2974_v49  ;;  %v24984_v49 = vld [vmem:[#allocation27_spill] sm:$0xff]  ;;  %v24986_v40 = vld [vmem:[#allocation50_spill] sm:$0xff] }
 0x2f8   : > { %24971 = vst [vmem:[#allocation76_spill] sm:$0xff] %v20474_v43  ;;  %15985 = vmatmul.mubr.msk.bf16.gmra.mrb[196].mxu0 %vm3942_vm0, %v20058_v37 }
 0x2f9   : > { %24972 = vst [vmem:[#allocation77_spill] sm:$0xff] %v20476_v32  ;;  %15929 = vmatmul.mubr.bf16.gmra.mrb[180].mxu1 %v19176_v50 }
 0x2fa   : > { %15932 = vmatprep.mubr.bf16.mxu1 %v19177_v60 }
 0x2fb   : > { %v2982_v6 = vpop.f32.mrb[92].mxu0 }
 0x2fc   : > { %v2984_v46 = vpop.f32.mrb[93].mxu0 }
 0x2fd   : > { %v2986_v33 = vpop.f32.mrb[94].mxu0 }
 0x2fe   : > { %v20482_v13 = vpack.c.bf16 %v2986_v33, %v2982_v6  ;;  %v2988_v29 = vpop.f32.mrb[95].mxu0 }
 0x2ff   : > { %v20484_v2 = vpack.c.bf16 %v2988_v29, %v2984_v46 }
 0x300   : > { %24973 = vst [vmem:[#allocation78_spill] sm:$0xff] %v20482_v13 }
 0x301   : > { %24974 = vst [vmem:[#allocation79_spill] sm:$0xff] %v20484_v2  ;;  %15933 = vmatmul.mubr.bf16.gmra.mrb[184].mxu1 %v19178_v28  ;;  %v4051_v28 = vsel %vm3942_vm0, %v24986_v40, 0 }
 0x302   : > { %15936 = vmatprep.mubr.bf16.mxu1 %v19179_v23  ;;  %v24989_v23 = vld [vmem:[#allocation51_spill] sm:$0xff] }
 0x303   : > { %v2992_v14 = vpop.f32.mrb[96].mxu0 }
 0x304   : > { %v2994_v30 = vpop.f32.mrb[97].mxu0 }
 0x305   : > { %v2996_v61 = vpop.f32.mrb[98].mxu0 }
 0x306   : > { %v20488_v17 = vpack.c.bf16 %v2996_v61, %v2992_v14  ;;  %v2998_v44 = vpop.f32.mrb[99].mxu0 }
 0x307   : > { %v20490_v5 = vpack.c.bf16 %v2998_v44, %v2994_v30 }
 0x308   : > { %24975 = vst [vmem:[#allocation80_spill] sm:$0xff] %v20488_v17 }
 0x309   : > { %24976 = vst [vmem:[#allocation81_spill] sm:$0xff] %v20490_v5  ;;  %15937 = vmatmul.mubr.bf16.gmra.mrb[188].mxu1 %v19180_v54 }
 0x30a   : > { %15948 = vmatprep.mubr.msk.bf16.mxu1 %vm3942_vm0, %v20115_v25 }
 0x30b   : > { %v3002_v3 = vpop.f32.mrb[100].mxu0 }
 0x30c   : > { %v3004_v35 = vpop.f32.mrb[101].mxu0 }
 0x30d   : > { %v3006_v63 = vpop.f32.mrb[102].mxu0 }
 0x30e   : > { %v20495_v19 = vpack.c.bf16 %v3006_v63, %v3002_v3  ;;  %v3008_v22 = vpop.f32.mrb[103].mxu0 }
 0x30f   : > { %v20497_v31 = vpack.c.bf16 %v3008_v22, %v3004_v35 }
 0x310   : > { %24977 = vst [vmem:[#allocation82_spill] sm:$0xff] %v20495_v19 }
 0x311   : > { %24978 = vst [vmem:[#allocation83_spill] sm:$0xff] %v20497_v31  ;;  %15949 = vmatmul.mubr.msk.bf16.vlgmr.msra.gmra.mrb[192].mxu1 %vm3942_vm0, %v24979_v56 }
 0x312   : > { %15957 = vmatpush3.bf16.xpose.msra.mxu1 %v4045_v59  ;;  %15952 = vmatprep.mubr.msk.bf16.mxu1 %vm3942_vm0, %v24980_v16 }
 0x313   : > { %17713 = vmatprep.subr.msk.bf16.mxu1 %vm3942_vm0, %v24981_v42  ;;  %v3012_v25 = vpop.f32.mrb[104].mxu0 }
 0x314   : > { %v3014_v51 = vpop.f32.mrb[105].mxu0 }
 0x315   : > { %v3016_v9 = vpop.f32.mrb[106].mxu0 }
 0x316   : > { %v20507_v4 = vpack.c.bf16 %v3016_v9, %v3012_v25  ;;  %v3018_v18 = vpop.f32.mrb[107].mxu0  ;;  %v4054_v25 = vsel %vm3942_vm0, %v24989_v23, 0 }
 0x317   : > { %v20509_v55 = vpack.c.bf16 %v3018_v18, %v3014_v51 }
 0x318   : > { %24982 = vst [vmem:[#allocation23_spill] sm:$0xff] %v20507_v4 }
 0x319   : > { %24983 = vst [vmem:[#allocation12_spill] sm:$0xff] %v20509_v55  ;;  %15953 = vmatmul.mubr.msk.bf16.gmra.mrb[196].mxu1 %vm3942_vm0, %v24984_v49  ;;  %v25004_v55 = vld [vmem:[#allocation40_spill] sm:$0xff] }
 0x31a   : > { %15959 = vmatpush3.bf16.xpose.msra.mxu1 %v4048_v58  ;;  %15964 = vmatprep.mubr.msk.bf16.mxu1 %vm3942_vm0, %v24985_v52 }
 0x31b   : > { %17714 = vmatprep.subr.msk.bf16.mxu1 %vm3942_vm0, %v24986_v40  ;;  %v3022_v50 = vpop.f32.mrb[108].mxu0 }
 0x31c   : > { %v3024_v60 = vpop.f32.mrb[109].mxu0 }
 0x31d   : > { %v3026_v6 = vpop.f32.mrb[110].mxu0 }
 0x31e   : > { %v20519_v46 = vpack.c.bf16 %v3026_v6, %v3022_v50  ;;  %v3028_v33 = vpop.f32.mrb[111].mxu0 }
 0x31f   : > { %v20521_v29 = vpack.c.bf16 %v3028_v33, %v3024_v60 }
 0x320   : > { %24987 = vst [vmem:[#allocation49_spill] sm:$0xff] %v20519_v46 }
 0x321   : > { %24988 = vst [vmem:[#allocation27_spill] sm:$0xff] %v20521_v29  ;;  %v4226_v29 = vsel %vm3942_vm0, %v20369_v34, 0 }
 0x322   : > { %15961 = vmatpush3.bf16.xpose.msra.mxu1 %v4051_v28 }
 0x323   : > { %17715 = vmatprep.subr.msk.bf16.mxu1 %vm3942_vm0, %v24989_v23  ;;  %v3032_v14 = vpop.f32.mrb[112].mxu0 }
 0x324   : > { %v3298_v30 = vpop.f32.mrb[96].mxu1  ;;  %v3034_v61 = vpop.f32.mrb[113].mxu0 }
 0x325   : > { %v3300_v44 = vpop.f32.mrb[97].mxu1  ;;  %v3036_v54 = vpop.f32.mrb[114].mxu0 }
 0x326   : > { %v3302_v3 = vpop.f32.mrb[98].mxu1  ;;  %v20527_v35 = vpack.c.bf16 %v3036_v54, %v3032_v14  ;;  %v3038_v22 = vpop.f32.mrb[115].mxu0  ;;  %v24998_v54 = vld [vmem:[#allocation18_spill] sm:$0xff] }
 0x327   : > { %v20529_v63 = vpack.c.bf16 %v3302_v3, %v3298_v30  ;;  %v3304_v56 = vpop.f32.mrb[99].mxu1  ;;  %v20531_v59 = vpack.c.bf16 %v3038_v22, %v3034_v61  ;;  %v24997_v61 = vld [vmem:[#allocation15_spill] sm:$0xff] }
 0x328   : > { %24990 = vst [vmem:[#allocation29_spill] sm:$0xff] %v20527_v35  ;;  %v20533_v42 = vpack.c.bf16 %v3304_v56, %v3300_v44  ;;  %v4223_v44 = vsel %vm3942_vm0, %v20356_v62, 0 }
 0x329   : > { %24991 = vst [vmem:[#allocation50_spill] sm:$0xff] %v20531_v59  ;;  %16004 = vmatprep.subr.bf16.mxu0 %v20529_v63 }
 0x32a   : > { %24992 = vst [vmem:[#allocation51_spill] sm:$0xff] %v20533_v42  ;;  %15963 = vmatpush3.bf16.xpose.msra.mxu1 %v4054_v25  ;;  %16005 = vmatpush3.bf16.msra.mxu0 %v20529_v63 }
 0x32b   : > { %17720 = vmatprep.subr.msk.bf16.mxu1 %vm3942_vm0, %v20356_v62  ;;  %v3042_v51 = vpop.f32.mrb[116].mxu0 }
 0x32c   : > { %v3308_v9 = vpop.f32.mrb[100].mxu1  ;;  %v3044_v18 = vpop.f32.mrb[117].mxu0 }
 0x32d   : > { %v3310_v58 = vpop.f32.mrb[101].mxu1  ;;  %v3046_v40 = vpop.f32.mrb[118].mxu0 }
 0x32e   : > { %v3312_v50 = vpop.f32.mrb[102].mxu1  ;;  %v20541_v60 = vpack.c.bf16 %v3046_v40, %v3042_v51  ;;  %v3048_v33 = vpop.f32.mrb[119].mxu0 }
 0x32f   : > { %v20543_v6 = vpack.c.bf16 %v3312_v50, %v3308_v9  ;;  %v3314_v28 = vpop.f32.mrb[103].mxu1  ;;  %v20545_v14 = vpack.c.bf16 %v3048_v33, %v3044_v18 }
 0x330   : > { %24993 = vst [vmem:[#allocation84_spill] sm:$0xff] %v20541_v60  ;;  %v20547_v30 = vpack.c.bf16 %v3314_v28, %v3310_v58 }
 0x331   : > { %24994 = vst [vmem:[#allocation85_spill] sm:$0xff] %v20543_v6  ;;  %24995 = vst [vmem:[#allocation86_spill] sm:$0xff] %v20545_v14  ;;  %15965 = vmatmul.mubr.msk.bf16.vlgmr.msra.gmra.mrb[200].mxu1 %vm3942_vm0, %v24997_v61  ;;  %16006 = vmatprep.subr.bf16.mxu0 %v20543_v6 }
 0x332   : > { %24996 = vst [vmem:[#allocation87_spill] sm:$0xff] %v20547_v30  ;;  %15968 = vmatprep.mubr.msk.bf16.mxu1 %vm3942_vm0, %v24998_v54  ;;  %15989 = vmatpush3.bf16.xpose.msra.mxu1 %v4223_v44  ;;  %v25003_v44 = vld [vmem:[#allocation47_spill] sm:$0xff] }
 0x333   : > { %17721 = vmatprep.subr.msk.bf16.mxu1 %vm3942_vm0, %v20369_v34  ;;  %16007 = vmatpush3.bf16.msra.mxu0 %v20543_v6  ;;  %v3052_v3 = vpop.f32.mrb[120].mxu0 }
 0x334   : > { %v3318_v22 = vpop.f32.mrb[104].mxu1  ;;  %v3054_v56 = vpop.f32.mrb[121].mxu0 }
 0x335   : > { %v3320_v25 = vpop.f32.mrb[105].mxu1  ;;  %v3056_v51 = vpop.f32.mrb[122].mxu0 }
 0x336   : > { %v3322_v9 = vpop.f32.mrb[106].mxu1  ;;  %v20559_v18 = vpack.c.bf16 %v3056_v51, %v3052_v3  ;;  %v3058_v40 = vpop.f32.mrb[123].mxu0 }
 0x337   : > { %v20561_v58 = vpack.c.bf16 %v3322_v9, %v3318_v22  ;;  %v3324_v50 = vpop.f32.mrb[107].mxu1  ;;  %v20563_v33 = vpack.c.bf16 %v3058_v40, %v3054_v56 }
 0x338   : > { %24999 = vst [vmem:[#allocation15_spill] sm:$0xff] %v20559_v18  ;;  %v20565_v28 = vpack.c.bf16 %v3324_v50, %v3320_v25 }
 0x339   : > { %25000 = vst [vmem:[#allocation18_spill] sm:$0xff] %v20561_v58  ;;  %25001 = vst [vmem:[#allocation88_spill] sm:$0xff] %v20563_v33  ;;  %15969 = vmatmul.mubr.msk.bf16.gmra.mrb[204].mxu1 %vm3942_vm0, %v25003_v44  ;;  %16008 = vmatprep.subr.bf16.mxu0 %v20561_v58  ;;  %v25013_v33 = vld [vmem:[#allocation42_spill] sm:$0xff] }
 0x33a   : > { %25002 = vst [vmem:[#allocation89_spill] sm:$0xff] %v20565_v28  ;;  %15991 = vmatpush3.bf16.xpose.msra.mxu1 %v4226_v29  ;;  %15996 = vmatprep.mubr.msk.bf16.mxu1 %vm3942_vm0, %v25004_v55 }
 0x33b   : > { %17722 = vmatprep.subr.msk.bf16.mxu1 %vm3942_vm0, %v20377_v24  ;;  %16009 = vmatpush3.bf16.msra.mxu0 %v20561_v58  ;;  %v3062_v3 = vpop.f32.mrb[124].mxu0 }
 0x33c   : > { %v3328_v22 = vpop.f32.mrb[108].mxu1  ;;  %v3064_v56 = vpop.f32.mrb[125].mxu0 }
 0x33d   : > { %v3330_v25 = vpop.f32.mrb[109].mxu1  ;;  %v3066_v51 = vpop.f32.mrb[126].mxu0 }
 0x33e   : > { %v3332_v9 = vpop.f32.mrb[110].mxu1  ;;  %v20577_v40 = vpack.c.bf16 %v3066_v51, %v3062_v3  ;;  %v3068_v53 = vpop.f32.mrb[127].mxu0 }
 0x33f   : > { %v20579_v50 = vpack.c.bf16 %v3332_v9, %v3328_v22  ;;  %v3334_v29 = vpop.f32.mrb[111].mxu1  ;;  %v20581_v31 = vpack.c.bf16 %v3068_v53, %v3064_v56 }
 0x340   : > { %25005 = vst [vmem:[#allocation40_spill] sm:$0xff] %v20577_v40  ;;  %v20583_v57 = vpack.c.bf16 %v3334_v29, %v3330_v25 }
 0x341   : > { %25006 = vst [vmem:[#allocation90_spill] sm:$0xff] %v20579_v50  ;;  %25007 = vst [vmem:[#allocation91_spill] sm:$0xff] %v20581_v31  ;;  %16010 = vmatprep.subr.bf16.mxu0 %v20579_v50 }
 0x342   : > { %25008 = vst [vmem:[#allocation92_spill] sm:$0xff] %v20583_v57  ;;  %15993 = vmatpush3.bf16.xpose.msra.mxu1 %v4229_v10  ;;  %16011 = vmatpush3.bf16.msra.mxu0 %v20579_v50  ;;  %v25017_v57 = vld [vmem:[#allocation20_spill] sm:$0xff] }
 0x343   : > { %17723 = vmatprep.subr.msk.bf16.mxu1 %vm3942_vm0, %v20385_v20  ;;  %v15268_v22 = vpop.f32.mrb[128].mxu0 }
 0x344   : > { %v3338_v3 = vpop.f32.mrb[112].mxu1  ;;  %v15269_v9 = vpop.f32.mrb[129].mxu0 }
 0x345   : > { %v3340_v51 = vpop.f32.mrb[113].mxu1  ;;  %v20591_v53 = vadd.f32 %v15269_v9, %v15268_v22  ;;  %v15271_v56 = vpop.f32.mrb[130].mxu0 }
 0x346   : > { %v3342_v5 = vpop.f32.mrb[114].mxu1  ;;  %v15272_v2 = vpop.f32.mrb[131].mxu0 }
 0x347   : > { %v20593_v25 = vpack.c.bf16 %v3342_v5, %v3338_v3  ;;  %v3344_v29 = vpop.f32.mrb[115].mxu1  ;;  %v20597_v10 = vadd.f32 %v15272_v2, %v15271_v56 }
 0x348   : > { %v20595_v32 = vpack.c.bf16 %v3344_v29, %v3340_v51 }
 0x349   : > { %25009 = vst [vmem:[#allocation93_spill] sm:$0xff] %v20593_v25 }
 0x34a   : > { %25010 = vst [vmem:[#allocation94_spill] sm:$0xff] %v20595_v32  ;;  %15995 = vmatpush3.bf16.xpose.msra.mxu1 %v4232_v12  ;;  %v25014_v12 = vld [vmem:[#allocation44_spill] sm:$0xff] }
 0x34b   : > { %16020 = vmatprep.subr.bf16.mxu1 %v20593_v25  ;;  %v15274_v7 = vpop.f32.mrb[132].mxu0 }
 0x34c   : > { %v3348_v41 = vpop.f32.mrb[116].mxu1  ;;  %v15275_v22 = vpop.f32.mrb[133].mxu0 }
 0x34d   : > { %v3350_v31 = vpop.f32.mrb[117].mxu1  ;;  %v20602_v8 = vadd.f32 %v15275_v22, %v15274_v7  ;;  %v15277_v5 = vpop.f32.mrb[134].mxu0 }
 0x34e   : > { %v3352_v9 = vpop.f32.mrb[118].mxu1  ;;  %v15278_v29 = vpop.f32.mrb[135].mxu0 }
 0x34f   : > { %v20604_v3 = vpack.c.bf16 %v3352_v9, %v3348_v41  ;;  %v3354_v51 = vpop.f32.mrb[119].mxu1  ;;  %v20608_v56 = vadd.f32 %v15278_v29, %v15277_v5 }
 0x350   : > { %v20606_v2 = vpack.c.bf16 %v3354_v51, %v3350_v31 }
 0x351   : > { %25011 = vst [vmem:[#allocation95_spill] sm:$0xff] %v20604_v3  ;;  %15997 = vmatmul.mubr.msk.bf16.vlgmr.msra.gmra.mrb[208].mxu1 %vm3942_vm0, %v25013_v33 }
 0x352   : > { %25012 = vst [vmem:[#allocation96_spill] sm:$0xff] %v20606_v2  ;;  %16000 = vmatprep.mubr.msk.bf16.mxu1 %vm3942_vm0, %v25014_v12  ;;  %16021 = vmatpush3.bf16.msra.mxu1 %v20593_v25 }
 0x353   : > { %16022 = vmatprep.subr.bf16.mxu1 %v20604_v3  ;;  %v15280_v22 = vpop.f32.mrb[136].mxu0 }
 0x354   : > { %v3358_v7 = vpop.f32.mrb[120].mxu1  ;;  %v15281_v9 = vpop.f32.mrb[137].mxu0 }
 0x355   : > { %v3360_v41 = vpop.f32.mrb[121].mxu1  ;;  %v20617_v51 = vadd.f32 %v15281_v9, %v15280_v22  ;;  %v15283_v5 = vpop.f32.mrb[138].mxu0 }
 0x356   : > { %16023 = vmatpush3.bf16.msra.mxu1 %v20604_v3  ;;  %v3362_v31 = vpop.f32.mrb[122].mxu1  ;;  %v15284_v14 = vpop.f32.mrb[139].mxu0 }
 0x357   : > { %v20619_v29 = vpack.c.bf16 %v3362_v31, %v3358_v7  ;;  %v3364_v15 = vpop.f32.mrb[123].mxu1  ;;  %v20623_v47 = vadd.f32 %v15284_v14, %v15283_v5 }
 0x358   : > { %v20621_v59 = vpack.c.bf16 %v3364_v15, %v3360_v41 }
 0x359   : > { %25015 = vst [vmem:[#allocation44_spill] sm:$0xff] %v20619_v29  ;;  %16001 = vmatmul.mubr.msk.bf16.gmra.mrb[212].mxu1 %vm3942_vm0, %v25017_v57  ;;  %16024 = vmatprep.subr.bf16.mxu1 %v20619_v29 }
 0x35a   : > { %25016 = vst [vmem:[#allocation97_spill] sm:$0xff] %v20621_v59  ;;  %16025 = vmatpush3.bf16.msra.mxu1 %v20619_v29 }
 0x35b   : > { %v15286_v30 = vpop.f32.mrb[140].mxu0 }
 0x35c   : > { %v3368_v28 = vpop.f32.mrb[124].mxu1  ;;  %v15287_v9 = vpop.f32.mrb[141].mxu0 }
 0x35d   : > { %v3370_v22 = vpop.f32.mrb[125].mxu1  ;;  %v20629_v7 = vadd.f32 %v15287_v9, %v15286_v30  ;;  %v15289_v31 = vpop.f32.mrb[142].mxu0 }
 0x35e   : > { %v3372_v42 = vpop.f32.mrb[126].mxu1  ;;  %v15290_v14 = vpop.f32.mrb[143].mxu0 }
 0x35f   : > { %v20631_v40 = vpack.c.bf16 %v3372_v42, %v3368_v28  ;;  %v3374_v15 = vpop.f32.mrb[127].mxu1  ;;  %v20635_v5 = vadd.f32 %v15290_v14, %v15289_v31 }
 0x360   : > { %v20633_v41 = vpack.c.bf16 %v3374_v15, %v3370_v22 }
 0x361   : > { %25018 = vst [vmem:[#allocation98_spill] sm:$0xff] %v20631_v40  ;;  %16026 = vmatprep.subr.bf16.mxu1 %v20631_v40 }
 0x362   : > { %25019 = vst [vmem:[#allocation99_spill] sm:$0xff] %v20633_v41  ;;  %16027 = vmatpush3.bf16.msra.mxu1 %v20631_v40 }
 0x363   : > { %v15292_v60 = vpop.f32.mrb[144].mxu0 }
 0x364   : > { %v3378_v18 = vpop.f32.mrb[128].mxu1  ;;  %v15293_v46 = vpop.f32.mrb[145].mxu0 }
 0x365   : > { %v3380_v35 = vpop.f32.mrb[129].mxu1  ;;  %v20639_v30 = vadd.f32 %v15293_v46, %v15292_v60  ;;  %v15295_v9 = vpop.f32.mrb[146].mxu0 }
 0x366   : > { %v3382_v4 = vpop.f32.mrb[130].mxu1  ;;  %v15296_v19 = vpop.f32.mrb[147].mxu0 }
 0x367   : > { %v20641_v42 = vpack.c.bf16 %v3382_v4, %v3378_v18  ;;  %v3384_v28 = vpop.f32.mrb[131].mxu1  ;;  %v20645_v31 = vadd.f32 %v15296_v19, %v15295_v9 }
 0x368   : > { %v20643_v22 = vpack.c.bf16 %v3384_v28, %v3380_v35 }
 0x369   : > { %16036 = vmatprep.subr.bf16.mxu0 %v20641_v42 }
 0x36a   : > { %25020 = vst [vmem:[#allocation100_spill] sm:$0xff] %v20643_v22 }
 0x36b   : > { %v15298_v14 = vpop.f32.mrb[148].mxu0 }
 0x36c   : > { %v3388_v15 = vpop.f32.mrb[132].mxu1  ;;  %v15299_v13 = vpop.f32.mrb[149].mxu0 }
 0x36d   : > { %v3390_v17 = vpop.f32.mrb[133].mxu1  ;;  %v20648_v11 = vadd.f32 %v15299_v13, %v15298_v14  ;;  %v15301_v46 = vpop.f32.mrb[150].mxu0 }
 0x36e   : > { %v3392_v43 = vpop.f32.mrb[134].mxu1  ;;  %v15302_v18 = vpop.f32.mrb[151].mxu0 }
 0x36f   : > { %v20650_v60 = vpack.c.bf16 %v3392_v43, %v3388_v15  ;;  %v3394_v4 = vpop.f32.mrb[135].mxu1  ;;  %v20654_v35 = vadd.f32 %v15302_v18, %v15301_v46 }
 0x370   : > { %v20652_v48 = vpack.c.bf16 %v3394_v4, %v3390_v17 }
 0x372   : > { %25021 = vst [vmem:[#allocation101_spill] sm:$0xff] %v20652_v48 }
 0x373   : > { %v15304_v9 = vpop.f32.mrb[152].mxu0 }
 0x374   : > { %v3398_v19 = vpop.f32.mrb[136].mxu1  ;;  %v15305_v22 = vpop.f32.mrb[153].mxu0 }
 0x375   : > { %v3400_v28 = vpop.f32.mrb[137].mxu1  ;;  %v20656_v59 = vadd.f32 %v15305_v22, %v15304_v9  ;;  %v15307_v39 = vpop.f32.mrb[154].mxu0 }
 0x376   : > { %v3402_v41 = vpop.f32.mrb[138].mxu1  ;;  %v15308_v14 = vpop.f32.mrb[155].mxu0 }
 0x377   : > { %v20658_v2 = vpack.c.bf16 %v3402_v41, %v3398_v19  ;;  %v3404_v13 = vpop.f32.mrb[139].mxu1  ;;  %v20662_v15 = vadd.f32 %v15308_v14, %v15307_v39 }
 0x378   : > { %v20660_v43 = vpack.c.bf16 %v3404_v13, %v3400_v28 }
 0x37a   : > { %25022 = vst [vmem:[#allocation102_spill] sm:$0xff] %v20660_v43 }
 0x37b   : > { %v15310_v4 = vpop.f32.mrb[156].mxu0 }
 0x37c   : > { %v3408_v17 = vpop.f32.mrb[140].mxu1  ;;  %v15311_v18 = vpop.f32.mrb[157].mxu0 }
 0x37d   : > { %v3410_v46 = vpop.f32.mrb[141].mxu1  ;;  %v20664_v38 = vadd.f32 %v15311_v18, %v15310_v4  ;;  %v15313_v21 = vpop.f32.mrb[158].mxu0 }
 0x37e   : > { %v3412_v48 = vpop.f32.mrb[142].mxu1  ;;  %v15314_v9 = vpop.f32.mrb[159].mxu0 }
 0x37f   : > { %v20666_v26 = vpack.c.bf16 %v3412_v48, %v3408_v17  ;;  %v3414_v22 = vpop.f32.mrb[143].mxu1  ;;  %v20670_v19 = vadd.f32 %v15314_v9, %v15313_v21 }
 0x380   : > { %v20668_v41 = vpack.c.bf16 %v3414_v22, %v3410_v46 }
 0x382   : > { %25023 = vst [vmem:[#allocation103_spill] sm:$0xff] %v20668_v41 }
 0x383   : > { %v15316_v13 = vpop.f32.mrb[160].mxu0 }
 0x384   : > { %v3418_v28 = vpop.f32.mrb[144].mxu1  ;;  %v15317_v14 = vpop.f32.mrb[161].mxu0 }
 0x385   : > { %v3420_v39 = vpop.f32.mrb[145].mxu1  ;;  %v20672_v32 = vadd.f32 %v15317_v14, %v15316_v13  ;;  %v15319_v45 = vpop.f32.mrb[162].mxu0 }
 0x386   : > { %v3422_v43 = vpop.f32.mrb[146].mxu1  ;;  %v15320_v18 = vpop.f32.mrb[163].mxu0 }
 0x387   : > { %v20674_v29 = vpack.c.bf16 %v3422_v43, %v3418_v28  ;;  %v3424_v4 = vpop.f32.mrb[147].mxu1  ;;  %v20678_v17 = vadd.f32 %v15320_v18, %v15319_v45 }
 0x388   : > { %v20676_v48 = vpack.c.bf16 %v3424_v4, %v3420_v39 }
 0x389   : > { %25024 = vst [vmem:[#allocation104_spill] sm:$0xff] %v20674_v29  ;;  %16052 = vmatprep.subr.bf16.mxu1 %v20674_v29 }
 0x38a   : > { %25025 = vst [vmem:[#allocation105_spill] sm:$0xff] %v20676_v48 }
 0x38b   : > { %v15322_v46 = vpop.f32.mrb[164].mxu0 }
 0x38c   : > { %v3428_v21 = vpop.f32.mrb[148].mxu1  ;;  %v15323_v9 = vpop.f32.mrb[165].mxu0 }
 0x38d   : > { %v3430_v22 = vpop.f32.mrb[149].mxu1  ;;  %v20681_v50 = vadd.f32 %v15323_v9, %v15322_v46  ;;  %v15325_v13 = vpop.f32.mrb[166].mxu0 }
 0x38e   : > { %v3432_v41 = vpop.f32.mrb[150].mxu1  ;;  %v15326_v28 = vpop.f32.mrb[167].mxu0 }
 0x38f   : > { %v20683_v14 = vpack.c.bf16 %v3432_v41, %v3428_v21  ;;  %v3434_v43 = vpop.f32.mrb[151].mxu1  ;;  %v20687_v39 = vadd.f32 %v15326_v28, %v15325_v13 }
 0x390   : > { %v20685_v6 = vpack.c.bf16 %v3434_v43, %v3430_v22 }
 0x391   : > { %25026 = vst [vmem:[#allocation106_spill] sm:$0xff] %v20683_v14 }
 0x392   : > { %25027 = vst [vmem:[#allocation107_spill] sm:$0xff] %v20685_v6 }
 0x393   : > { %v15328_v4 = vpop.f32.mrb[168].mxu0 }
 0x394   : > { %v3438_v45 = vpop.f32.mrb[152].mxu1  ;;  %v15329_v48 = vpop.f32.mrb[169].mxu0 }
 0x395   : > { %v3440_v18 = vpop.f32.mrb[153].mxu1  ;;  %v20689_v33 = vadd.f32 %v15329_v48, %v15328_v4  ;;  %v15331_v20 = vpop.f32.mrb[170].mxu0 }
 0x396   : > { %v3442_v57 = vpop.f32.mrb[154].mxu1  ;;  %v15332_v9 = vpop.f32.mrb[171].mxu0 }
 0x397   : > { %v20691_v27 = vpack.c.bf16 %v3442_v57, %v3438_v45  ;;  %v3444_v46 = vpop.f32.mrb[155].mxu1  ;;  %v20695_v21 = vadd.f32 %v15332_v9, %v15331_v20 }
 0x398   : > { %v20693_v41 = vpack.c.bf16 %v3444_v46, %v3440_v18 }
 0x399   : > { %25028 = vst [vmem:[#allocation108_spill] sm:$0xff] %v20691_v27 }
 0x39a   : > { %25029 = vst [vmem:[#allocation109_spill] sm:$0xff] %v20693_v41 }
 0x39b   : > { %v15334_v43 = vpop.f32.mrb[172].mxu0 }
 0x39c   : > { %v3448_v22 = vpop.f32.mrb[156].mxu1  ;;  %v15335_v28 = vpop.f32.mrb[173].mxu0 }
 0x39d   : > { %v3450_v13 = vpop.f32.mrb[157].mxu1  ;;  %v20697_v14 = vadd.f32 %v15335_v28, %v15334_v43  ;;  %v15337_v40 = vpop.f32.mrb[174].mxu0 }
 0x39e   : > { %v3452_v6 = vpop.f32.mrb[158].mxu1  ;;  %v15338_v4 = vpop.f32.mrb[175].mxu0 }
 0x39f   : > { %v20699_v29 = vpack.c.bf16 %v3452_v6, %v3448_v22  ;;  %v3454_v48 = vpop.f32.mrb[159].mxu1  ;;  %v20703_v45 = vadd.f32 %v15338_v4, %v15337_v40 }
 0x3a0   : > { %v20701_v57 = vpack.c.bf16 %v3454_v48, %v3450_v13 }
 0x3a1   : > { %25030 = vst [vmem:[#allocation110_spill] sm:$0xff] %v20699_v29 }
 0x3a2   : > { %25031 = vst [vmem:[#allocation111_spill] sm:$0xff] %v20701_v57 }
 0x3a3   : > { %v15340_v46 = vpop.f32.mrb[176].mxu0 }
 0x3a4   : > { %v15910_v18 = vpop.f32.mrb[160].mxu1  ;;  %v15341_v41 = vpop.f32.mrb[177].mxu0 }
 0x3a5   : > { %v3661_v20 = vadd.f32 %v15910_v18, %v20602_v8  ;;  %v3652_v9 = vpop.f32.mrb[161].mxu1  ;;  %v20707_v43 = vadd.f32 %v15341_v41, %v15340_v46  ;;  %v15343_v28 = vpop.f32.mrb[178].mxu0 }
 0x3a6   : > { %v3653_v27 = vadd.f32 %v20591_v53, %v3652_v9  ;;  %v15911_v0 = vpop.f32.mrb[162].mxu1  ;;  %v15344_v29 = vpop.f32.mrb[179].mxu0 }
 0x3a7   : > { %v3664_v6 = vadd.f32 %v15911_v0, %v20608_v56  ;;  %v3655_v22 = vpop.f32.mrb[163].mxu1  ;;  %v20711_v40 = vadd.f32 %v15344_v29, %v15343_v28 }
 0x3a8   : > { %v3656_v13 = vadd.f32 %v20597_v10, %v3655_v22 }
 0x3a9   : > { %v20713_v48 = vpack.c.bf16 %v3664_v6, %v3661_v20 }
 0x3aa   : > { %v20715_v4 = vpack.c.bf16 %v3656_v13, %v3653_v27 }
 0x3ab   : > { %25032 = vst [vmem:[#allocation112_spill] sm:$0xff] %v20713_v48  ;;  %v15346_v18 = vpop.f32.mrb[180].mxu0  ;;  %v3923_v48 = vlaneseq }
 0x3ac   : > { %25033 = vst [vmem:[#allocation113_spill] sm:$0xff] %v20715_v4  ;;  %v15914_v8 = vpop.f32.mrb[164].mxu1  ;;  %v15347_v41 = vpop.f32.mrb[181].mxu0 }
 0x3ad   : > { %v3677_v53 = vadd.f32 %v15914_v8, %v20629_v7  ;;  %v3668_v9 = vpop.f32.mrb[165].mxu1  ;;  %v20719_v0 = vadd.f32 %v15347_v41, %v15346_v18  ;;  %v15349_v56 = vpop.f32.mrb[182].mxu0 }
 0x3ae   : > { %v3669_v46 = vadd.f32 %v20617_v51, %v3668_v9  ;;  %v15915_v57 = vpop.f32.mrb[166].mxu1  ;;  %v15350_v28 = vpop.f32.mrb[183].mxu0 }
 0x3af   : > { %v3680_v10 = vadd.f32 %v15915_v57, %v20635_v5  ;;  %v3671_v29 = vpop.f32.mrb[167].mxu1  ;;  %v20723_v27 = vadd.f32 %v15350_v28, %v15349_v56 }
 0x3b0   : > { %v3672_v20 = vadd.f32 %v20623_v47, %v3671_v29 }
 0x3b1   : > { %v20725_v6 = vpack.c.bf16 %v3680_v10, %v3677_v53 }
 0x3b2   : > { %v20727_v22 = vpack.c.bf16 %v3672_v20, %v3669_v46 }
 0x3b3   : > { %25034 = vst [vmem:[#allocation114_spill] sm:$0xff] %v20725_v6  ;;  %v15352_v13 = vpop.f32.mrb[184].mxu0 }
 0x3b4   : > { %25035 = vst [vmem:[#allocation115_spill] sm:$0xff] %v20727_v22  ;;  %v15918_v7 = vpop.f32.mrb[168].mxu1  ;;  %v15353_v18 = vpop.f32.mrb[185].mxu0 }
 0x3b5   : > { %v3693_v51 = vadd.f32 %v15918_v7, %v20648_v11  ;;  %v3684_v8 = vpop.f32.mrb[169].mxu1  ;;  %v20731_v5 = vadd.f32 %v15353_v18, %v15352_v13  ;;  %v15355_v57 = vpop.f32.mrb[186].mxu0  ;;  %v20739_v11 = vshrl.u32 %v3923_v48, 7 }
 0x3b6   : > { %v3685_v9 = vadd.f32 %v20639_v30, %v3684_v8  ;;  %v15919_v41 = vpop.f32.mrb[170].mxu1  ;;  %v15356_v53 = vpop.f32.mrb[187].mxu0 }
 0x3b7   : > { %v3696_v47 = vadd.f32 %v15919_v41, %v20654_v35  ;;  %v3687_v56 = vpop.f32.mrb[171].mxu1  ;;  %v20735_v10 = vadd.f32 %v15356_v53, %v15355_v57  ;;  %25037 = vst [vmem:[#allocation117_spill] sm:$0xff] %v20739_v11  ;;  %v3926_v57 = vadd.s32 16, %v20739_v11  ;;  %v3928_v22 = vadd.s32 32, %v20739_v11 }
 0x3b8   : > { %v3688_v46 = vadd.f32 %v20645_v31, %v3687_v56  ;;  %v3931_v4 = vadd.s32 56, %v20739_v11 }
 0x3b9   : > { %v20737_v29 = vpack.c.bf16 %v3696_v47, %v3693_v51  ;;  %v3933_v51 = vand.u32 127, %v3923_v48 }
 0x3ba   : > { %v20741_v28 = vpack.c.bf16 %v3688_v46, %v3685_v9 }
 0x3bb   : > { %25036 = vst [vmem:[#allocation116_spill] sm:$0xff] %v20737_v29  ;;  %v15358_v20 = vpop.f32.mrb[188].mxu0  ;;  %vm20755_vm1 = vcmp.le.s32.totalorder %v3933_v51, %v3926_v57  ;;  %vm20763_vm2 = vcmp.le.s32.totalorder %v3933_v51, %v20739_v11  ;;  %vm20815_vm6 = vcmp.le.s32.totalorder %v3933_v51, %v3928_v22  ;;  %vm20819_vm7 = vcmp.le.s32.totalorder %v3933_v51, %v3931_v4 }
 0x3bc   : > { %25038 = vst [vmem:[#allocation118_spill] sm:$0xff] %v20741_v28  ;;  %v15922_v30 = vpop.f32.mrb[172].mxu1  ;;  %v15359_v8 = vpop.f32.mrb[189].mxu0  ;;  %v25064_v4 = vmov 0 }
 0x3bd   : > { %v3709_v7 = vadd.f32 %v15922_v30, %v20664_v38  ;;  %v3700_v13 = vpop.f32.mrb[173].mxu1  ;;  %v20745_v41 = vadd.f32 %v15359_v8, %v15358_v20  ;;  %v15361_v31 = vpop.f32.mrb[190].mxu0  ;;  %v3927_v38 = vadd.s32 24, %v20739_v11  ;;  %v3925_v20 = vadd.s32 8, %v20739_v11 }
 0x3be   : > { %v3701_v35 = vadd.f32 %v20656_v59, %v3700_v13  ;;  %v15923_v18 = vpop.f32.mrb[174].mxu1  ;;  %v15362_v9 = vpop.f32.mrb[191].mxu0  ;;  %v25040_v59 = vmov 0  ;;  %v25044_v8 = vmov 0 }
 0x3bf   : > { %v3712_v47 = vadd.f32 %v15923_v18, %v20670_v19  ;;  %v3703_v56 = vpop.f32.mrb[175].mxu1  ;;  %v20750_v46 = vadd.f32 %v15362_v9, %v15361_v31  ;;  %v25041_v59 = vsel %vm20755_vm1, 4294967295, %v25040_v59  ;;  %v25045_v8 = vsel %vm20763_vm2, 4294967295, %v25044_v8 }
 0x3c0   : > { %v3704_v53 = vadd.f32 %v20662_v15, %v3703_v56  ;;  %25042 = vst [vmem:[#allocation120_spill] sm:$0xff] %v25041_v59  ;;  %25046 = vst [vmem:[#allocation122_spill] sm:$0xff] %v25045_v8  ;;  %vm20767_vm3 = vcmp.le.s32.totalorder %v3933_v51, %v3927_v38  ;;  %v25047_v15 = vmov 0  ;;  %vm20779_vm4 = vcmp.le.s32.totalorder %v3933_v51, %v3925_v20  ;;  %v21003_v8 = vpop.permute.xlu0 %5059 }
 0x3c1   : > { %v20753_v30 = vpack.c.bf16 %v3712_v47, %v3709_v7  ;;  %v25048_v15 = vsel %vm20767_vm3, 4294967295, %v25047_v15  ;;  %v3930_v38 = vadd.s32 48, %v20739_v11  ;;  %25080 = vst [vmem:[#allocation144_spill] sm:$0xff] %v21003_v8 }
 0x3c2   : > { %v20760_v13 = vpack.c.bf16 %v3704_v53, %v3701_v35  ;;  %25049 = vst [vmem:[#allocation123_spill] sm:$0xff] %v25048_v15  ;;  %v25050_v53 = vmov 0 }
 0x3c3   : > { %25039 = vst [vmem:[#allocation119_spill] sm:$0xff] %v20753_v30  ;;  %v15982_v19 = vpop.f32.mrb[192].mxu0  ;;  %v25051_v53 = vsel %vm20779_vm4, 4294967295, %v25050_v53  ;;  %vm20806_vm5 = vcmp.le.s32.totalorder %v3933_v51, %v3930_v38 }
 0x3c4   : > { %25043 = vst [vmem:[#allocation121_spill] sm:$0xff] %v20760_v13  ;;  %v15926_v48 = vpop.f32.mrb[176].mxu1  ;;  %v20774_v18 = vsel %vm20755_vm1, %v15982_v19, -inf  ;;  %v4179_v35 = vpop.f32.mrb[193].mxu0  ;;  %25052 = vst [vmem:[#allocation124_spill] sm:$0xff] %v25051_v53 }
 0x3c5   : > { %v3725_v7 = vadd.f32 %v15926_v48, %v20681_v50  ;;  %v3716_v31 = vpop.f32.mrb[177].mxu1  ;;  %v15983_v56 = vpop.f32.mrb[194].mxu0  ;;  %v4401_v9 = vsel %vm3942_vm0, %v20774_v18, -inf  ;;  %v20786_v50 = vsel %vm20763_vm2, %v4179_v35, -inf }
 0x3c6   : > { %v3717_v57 = vadd.f32 %v20672_v32, %v3716_v31  ;;  %v15927_v47 = vpop.f32.mrb[178].mxu1  ;;  %v20791_v32 = vsel %vm20767_vm3, %v15983_v56, -inf  ;;  %4402 = vmax.xlane.f32.xlu0 %v4401_v9  ;;  %v4182_v31 = vpop.f32.mrb[195].mxu0  ;;  %v25054_v56 = vmov 0 }
 0x3c7   : > { %v3728_v48 = vadd.f32 %v15927_v47, %v20687_v39  ;;  %v3719_v19 = vpop.f32.mrb[179].mxu1  ;;  %v4404_v6 = vsel %vm3942_vm0, %v20791_v32, -inf  ;;  %v20800_v35 = vsel %vm20779_vm4, %v4182_v31, -inf  ;;  %v4395_v47 = vsel %vm3942_vm0, %v20786_v50, -inf }
 0x3c8   : > { %v3720_v20 = vadd.f32 %v20678_v17, %v3719_v19  ;;  %4405 = vmax.xlane.f32.xlu1 %v4404_v6  ;;  %v25055_v56 = vsel %vm20806_vm5, 4294967295, %v25054_v56  ;;  %v3929_v17 = vadd.s32 40, %v20739_v11  ;;  %v4398_v31 = vsel %vm3942_vm0, %v20800_v35, -inf }
 0x3c9   : > { %v20802_v39 = vpack.c.bf16 %v3728_v48, %v3725_v7  ;;  %25056 = vst [vmem:[#allocation126_spill] sm:$0xff] %v25055_v56  ;;  %v25058_v6 = vmov 0  ;;  %v25061_v7 = vmov 0 }
 0x3ca   : > { %v20811_v9 = vpack.c.bf16 %v3720_v20, %v3717_v57  ;;  %4396 = vmax.xlane.f32.xlu0 %v4395_v47  ;;  %v25059_v6 = vsel %vm20815_vm6, 4294967295, %v25058_v6  ;;  %v25062_v7 = vsel %vm20819_vm7, 4294967295, %v25061_v7  ;;  %vm20831_vm8 = vcmp.le.s32.totalorder %v3933_v51, %v3929_v17 }
 0x3cb   : > { %25053 = vst [vmem:[#allocation125_spill] sm:$0xff] %v20802_v39  ;;  %v15986_v30 = vpop.f32.mrb[196].mxu0  ;;  %25060 = vst [vmem:[#allocation128_spill] sm:$0xff] %v25059_v6  ;;  %v25065_v4 = vsel %vm20831_vm8, 4294967295, %v25064_v4 }
 0x3cc   : > { %25057 = vst [vmem:[#allocation127_spill] sm:$0xff] %v20811_v9  ;;  %v15930_v19 = vpop.f32.mrb[180].mxu1  ;;  %25063 = vst [vmem:[#allocation129_spill] sm:$0xff] %v25062_v7  ;;  %v20826_v57 = vsel %vm20806_vm5, %v15986_v30, -inf  ;;  %4399 = vmax.xlane.f32.xlu1 %v4398_v31  ;;  %v4195_v20 = vpop.f32.mrb[197].mxu0 }
 0x3cd   : > { %v3741_v38 = vadd.f32 %v15930_v19, %v20697_v14  ;;  %v3732_v48 = vpop.f32.mrb[181].mxu1  ;;  %v15987_v22 = vpop.f32.mrb[198].mxu0  ;;  %v4413_v39 = vsel %vm3942_vm0, %v20826_v57, -inf  ;;  %25066 = vst [vmem:[#allocation130_spill] sm:$0xff] %v25065_v4  ;;  %v20837_v14 = vsel %vm20815_vm6, %v4195_v20, -inf }
 0x3ce   : > { %v3733_v47 = vadd.f32 %v20689_v33, %v3732_v48  ;;  %v15931_v11 = vpop.f32.mrb[182].mxu1  ;;  %v20842_v19 = vsel %vm20819_vm7, %v15987_v22, -inf  ;;  %4414 = vmax.xlane.f32.xlu0 %v4413_v39  ;;  %v4198_v31 = vpop.f32.mrb[199].mxu0 }
 0x3cf   : > { %v3744_v30 = vadd.f32 %v15931_v11, %v20703_v45  ;;  %v3735_v33 = vpop.f32.mrb[183].mxu1  ;;  %v4416_v51 = vsel %vm3942_vm0, %v20842_v19, -inf  ;;  %v20849_v17 = vsel %vm20831_vm8, %v4198_v31, -inf  ;;  %v4407_v45 = vsel %vm3942_vm0, %v20837_v14, -inf }
 0x3d0   : > { %v3736_v48 = vadd.f32 %v20695_v21, %v3735_v33  ;;  %4417 = vmax.xlane.f32.xlu1 %v4416_v51  ;;  %v4410_v21 = vsel %vm3942_vm0, %v20849_v17, -inf }
 0x3d1   : > { %v20851_v20 = vpack.c.bf16 %v3744_v30, %v3741_v38 }
 0x3d2   : > { %v20855_v11 = vpack.c.bf16 %v3736_v48, %v3733_v47  ;;  %4408 = vmax.xlane.f32.xlu0 %v4407_v45 }
 0x3d3   : > { %25067 = vst [vmem:[#allocation131_spill] sm:$0xff] %v20851_v20 }
 0x3d4   : > { %25068 = vst [vmem:[#allocation132_spill] sm:$0xff] %v20855_v11  ;;  %v15934_v39 = vpop.f32.mrb[184].mxu1  ;;  %4411 = vmax.xlane.f32.xlu1 %v4410_v21 }
 0x3d5   : > { %v3757_v22 = vadd.f32 %v15934_v39, %v20719_v0  ;;  %v3748_v33 = vpop.f32.mrb[185].mxu1 }
 0x3d6   : > { %v3749_v31 = vadd.f32 %v20707_v43, %v3748_v33  ;;  %v15935_v9 = vpop.f32.mrb[186].mxu1 }
 0x3d7   : > { %v3760_v38 = vadd.f32 %v15935_v9, %v20723_v27  ;;  %v3751_v30 = vpop.f32.mrb[187].mxu1 }
 0x3d8   : > { %v3752_v51 = vadd.f32 %v20711_v40, %v3751_v30 }
 0x3d9   : > { %v20863_v20 = vpack.c.bf16 %v3760_v38, %v3757_v22 }
 0x3da   : > { %v20865_v47 = vpack.c.bf16 %v3752_v51, %v3749_v31 }
 0x3db   : > { %25069 = vst [vmem:[#allocation133_spill] sm:$0xff] %v20863_v20 }
 0x3dc   : > { %25070 = vst [vmem:[#allocation134_spill] sm:$0xff] %v20865_v47  ;;  %v15938_v48 = vpop.f32.mrb[188].mxu1 }
 0x3dd   : > { %v3773_v45 = vadd.f32 %v15938_v48, %v20745_v41  ;;  %v3764_v11 = vpop.f32.mrb[189].mxu1 }
 0x3de   : > { %v3765_v0 = vadd.f32 %v20731_v5, %v3764_v11  ;;  %v15939_v39 = vpop.f32.mrb[190].mxu1 }
 0x3df   : > { %v3776_v21 = vadd.f32 %v15939_v39, %v20750_v46  ;;  %v3767_v43 = vpop.f32.mrb[191].mxu1 }
 0x3e0   : > { %v3768_v33 = vadd.f32 %v20735_v10, %v3767_v43 }
 0x3e1   : > { %v20871_v27 = vpack.c.bf16 %v3776_v21, %v3773_v45 }
 0x3e2   : > { %v20873_v9 = vpack.c.bf16 %v3768_v33, %v3765_v0 }
 0x3e3   : > { %25071 = vst [vmem:[#allocation135_spill] sm:$0xff] %v20871_v27 }
 0x3e4   : > { %25072 = vst [vmem:[#allocation136_spill] sm:$0xff] %v20873_v9  ;;  %v15950_v40 = vpop.f32.mrb[192].mxu1 }
 0x3e5   : > { %v4001_v22 = vpop.f32.mrb[193].mxu1  ;;  %v20877_v31 = vsel %vm20755_vm1, %v15950_v40, -inf }
 0x3e6   : > { %v15951_v41 = vpop.f32.mrb[194].mxu1  ;;  %v4353_v5 = vsel %vm3942_vm0, %v20877_v31, -inf  ;;  %v20883_v46 = vsel %vm20763_vm2, %v4001_v22, -inf }
 0x3e7   : > { %v4004_v11 = vpop.f32.mrb[195].mxu1  ;;  %4354 = vmax.xlane.f32.xlu1 %v4353_v5  ;;  %v4347_v10 = vsel %vm3942_vm0, %v20883_v46, -inf  ;;  %v20889_v38 = vsel %vm20767_vm3, %v15951_v41, -inf }
 0x3e8   : > { %4348 = vmax.xlane.f32.xlu0 %v4347_v10  ;;  %v20893_v30 = vsel %vm20779_vm4, %v4004_v11, -inf  ;;  %v4356_v51 = vsel %vm3942_vm0, %v20889_v38, -inf }
 0x3e9   : > { %v4350_v48 = vsel %vm3942_vm0, %v20893_v30, -inf }
 0x3eb   : > { %4357 = vmax.xlane.f32.xlu1 %v4356_v51 }
 0x3ec   : > { %v15954_v45 = vpop.f32.mrb[196].mxu1  ;;  %4351 = vmax.xlane.f32.xlu0 %v4350_v48 }
 0x3ed   : > { %v4017_v0 = vpop.f32.mrb[197].mxu1  ;;  %v20901_v39 = vsel %vm20806_vm5, %v15954_v45, -inf }
 0x3ee   : > { %v15955_v21 = vpop.f32.mrb[198].mxu1  ;;  %v4365_v43 = vsel %vm3942_vm0, %v20901_v39, -inf  ;;  %v20913_v41 = vsel %vm20815_vm6, %v4017_v0, -inf }
 0x3ef   : > { %v4020_v33 = vpop.f32.mrb[199].mxu1  ;;  %v20907_v40 = vsel %vm20819_vm7, %v15955_v21, -inf  ;;  %v4359_v11 = vsel %vm3942_vm0, %v20913_v41, -inf }
 0x3f0   : > { %4366 = vmax.xlane.f32.xlu0 %v4365_v43  ;;  %v4368_v22 = vsel %vm3942_vm0, %v20907_v40, -inf  ;;  %v20917_v5 = vsel %vm20831_vm8, %v4020_v33, -inf }
 0x3f1   : > { %4369 = vmax.xlane.f32.xlu1 %v4368_v22  ;;  %v4362_v10 = vsel %vm3942_vm0, %v20917_v5, -inf }
 0x3f4   : > { %4360 = vmax.xlane.f32.xlu0 %v4359_v11 }
 0x3f5   : > { %4363 = vmax.xlane.f32.xlu1 %v4362_v10 }
 0x404   : > { %v15966_v51 = vpop.f32.mrb[200].mxu1 }
 0x405   : > { %v4090_v48 = vpop.f32.mrb[201].mxu1  ;;  %v20925_v45 = vsel %vm20755_vm1, %v15966_v51, -inf }
 0x406   : > { %v15967_v0 = vpop.f32.mrb[202].mxu1  ;;  %v4377_v21 = vsel %vm3942_vm0, %v20925_v45, -inf  ;;  %v20935_v22 = vsel %vm20763_vm2, %v4090_v48, -inf }
 0x407   : > { %v4093_v43 = vpop.f32.mrb[203].mxu1  ;;  %4378 = vmax.xlane.f32.xlu0 %v4377_v21  ;;  %v20931_v33 = vsel %vm20767_vm3, %v15967_v0, -inf  ;;  %v4371_v51 = vsel %vm3942_vm0, %v20935_v22, -inf }
 0x408   : > { %v4380_v11 = vsel %vm3942_vm0, %v20931_v33, -inf  ;;  %v20941_v10 = vsel %vm20779_vm4, %v4093_v43, -inf }
 0x409   : > { %4381 = vmax.xlane.f32.xlu1 %v4380_v11  ;;  %v4374_v0 = vsel %vm3942_vm0, %v20941_v10, -inf }
 0x40b   : > { %4372 = vmax.xlane.f32.xlu0 %v4371_v51 }
 0x40c   : > { %v15970_v21 = vpop.f32.mrb[204].mxu1 }
 0x40d   : > { %v4106_v27 = vpop.f32.mrb[205].mxu1  ;;  %4375 = vmax.xlane.f32.xlu1 %v4374_v0  ;;  %v20949_v48 = vsel %vm20806_vm5, %v15970_v21, -inf }
 0x40e   : > { %v15971_v9 = vpop.f32.mrb[206].mxu1  ;;  %v4389_v11 = vsel %vm3942_vm0, %v20949_v48, -inf  ;;  %v20959_v51 = vsel %vm20815_vm6, %v4106_v27, -inf }
 0x40f   : > { %v4109_v43 = vpop.f32.mrb[207].mxu1  ;;  %4390 = vmax.xlane.f32.xlu0 %v4389_v11  ;;  %v20955_v20 = vsel %vm20819_vm7, %v15971_v9, -inf  ;;  %25073 = vst [vmem:[#allocation137_spill] sm:$0xff] %v20959_v51  ;;  %v4383_v47 = vsel %vm3942_vm0, %v20959_v51, -inf }
 0x410   : > { %v4392_v0 = vsel %vm3942_vm0, %v20955_v20, -inf  ;;  %v20965_v21 = vsel %vm20831_vm8, %v4109_v43, -inf }
 0x411   : > { %4393 = vmax.xlane.f32.xlu1 %v4392_v0  ;;  %25074 = vst [vmem:[#allocation138_spill] sm:$0xff] %v20965_v21  ;;  %v4386_v9 = vsel %vm3942_vm0, %v20965_v21, -inf }
 0x413   : > { %4384 = vmax.xlane.f32.xlu0 %v4383_v47 }
 0x415   : > { %4387 = vmax.xlane.f32.xlu1 %v4386_v9 }
 0x424   : > { %v15998_v11 = vpop.f32.mrb[208].mxu1 }
 0x425   : > { %v20973_v27 = vsel %vm20755_vm1, %v15998_v11, -inf  ;;  %v4268_v13 = vpop.f32.mrb[209].mxu1 }
 0x426   : > { %25075 = vst [vmem:[#allocation139_spill] sm:$0xff] %v20973_v27  ;;  %v15999_v29 = vpop.f32.mrb[210].mxu1  ;;  %5065 = vrot.lane.b32.xlu1 %v24984_v49, %s19347_s21  ;;  %v4425_v43 = vsel %vm3942_vm0, %v20973_v27, -inf  ;;  %v20981_v47 = vsel %vm20763_vm2, %v4268_v13, -inf }
 0x427   : > { %25076 = vst [vmem:[#allocation140_spill] sm:$0xff] %v20981_v47  ;;  %v4271_v0 = vpop.f32.mrb[211].mxu1  ;;  %4426 = vmax.xlane.f32.xlu0 %v4425_v43  ;;  %v4419_v9 = vsel %vm3942_vm0, %v20981_v47, -inf  ;;  %v20993_v49 = vsel %vm20767_vm3, %v15999_v29, -inf  ;;  %v20997_v43 = vpop.permute.xlu1 %5061 }
 0x428   : > { %25077 = vst [vmem:[#allocation141_spill] sm:$0xff] %v20993_v49  ;;  %v4428_v13 = vsel %vm3942_vm0, %v20993_v49, -inf  ;;  %25078 = vst [vmem:[#allocation142_spill] sm:$0xff] %v20997_v43  ;;  %v21009_v29 = vpop.permute.xlu0 %5071 }
 0x42b   : > { %4420 = vmax.xlane.f32.xlu0 %v4419_v9  ;;  %v21001_v9 = vsel %vm20779_vm4, %v4271_v0, -inf }
 0x42c   : > { %v16002_v11 = vpop.f32.mrb[212].mxu1  ;;  %25079 = vst [vmem:[#allocation143_spill] sm:$0xff] %v21001_v9  ;;  %v4422_v27 = vsel %vm3942_vm0, %v21001_v9, -inf  ;;  %v21013_v49 = vpop.permute.xlu0 %5075 }
 0x42d   : > { %v4284_v28 = vpop.f32.mrb[213].mxu1  ;;  %25083 = vst [vmem:[#allocation147_spill] sm:$0xff] %v21013_v49  ;;  %v21025_v9 = vsel %vm20806_vm5, %v16002_v11, -inf }
 0x42e   : > { %v20985_v59 = vpop.f32.mrb[214].mxu1  ;;  %25088 = vst [vmem:[#allocation152_spill] sm:$0xff] %v21025_v9 }
 0x42f   : > { %v20987_v3 = vpop.f32.mrb[215].mxu1 }
 0x430   : > { %v21017_v53 = vpop.permute.xlu0 %5077 }
 0x431   : > { %25085 = vst [vmem:[#allocation149_spill] sm:$0xff] %v21017_v53 }
 0x441   : > { %5063 = vrot.lane.b32.xlu0 %v24980_v16, %s19347_s21  ;;  %v21007_v16 = vpop.permute.xlu1 %5073 }
 0x442   : > { %25081 = vst [vmem:[#allocation145_spill] sm:$0xff] %v21007_v16 }
 0x445   : > { %v21011_v15 = vpop.permute.xlu1 %5184 }
 0x446   : > { %25082 = vst [vmem:[#allocation146_spill] sm:$0xff] %v21011_v15 }
 0x449   : > { %v21015_v47 = vpop.permute.xlu1 %5186 }
 0x44a   : > { %4429 = vmax.xlane.f32.xlu1 %v4428_v13  ;;  %25084 = vst [vmem:[#allocation148_spill] sm:$0xff] %v21015_v47  ;;  %v21021_v13 = vpop.permute.xlu0 %5188  ;;  %v4437_v47 = vsel %vm3942_vm0, %v21025_v9, -inf }
 0x44b   : > { %25087 = vst [vmem:[#allocation151_spill] sm:$0xff] %v21021_v13 }
 0x44d   : > { %v21019_v0 = vpop.permute.xlu1 %5297 }
 0x44e   : > { %4423 = vmax.xlane.f32.xlu1 %v4422_v27  ;;  %25086 = vst [vmem:[#allocation150_spill] sm:$0xff] %v21019_v0 }
 0x453   : > { %v21029_v27 = vpop.xlane.xlu0 %4402 }
 0x455   : > { %v21027_v43 = vpop.xlane.xlu1 %4405 }
 0x457   : > { %v4397_v53 = vpop.xlane.xlu0 %4396 }
 0x459   : > { %v4400_v15 = vpop.xlane.xlu1 %4399 }
 0x45b   : > { %v21037_v13 = vpop.xlane.xlu0 %4414 }
 0x45d   : > { %v21035_v0 = vpop.xlane.xlu1 %4417 }
 0x45f   : > { %5299 = vrot.lane.b32.xlu1 %v20312_v36, %s19347_s21  ;;  %v21041_v11 = vpop.xlane.xlu0 %4408 }
 0x460   : > { %4438 = vmax.xlane.f32.xlu0 %v4437_v47 }
 0x461   : > { %v21039_v56 = vpop.xlane.xlu1 %4411 }
 0x474   : > { %v4355_v49 = vpop.xlane.xlu1 %4354 }
 0x475   : > { %v4349_v34 = vpop.xlane.xlu0 %4348  ;;  %v4445_v9 = vsub.f32 %v20877_v31, %v4355_v49 }
 0x476   : > { %5190 = vrot.lane.b32.xlu0 %v24989_v23, %s19347_s21  ;;  %v4443_v36 = vsub.f32 %v20883_v46, %v4349_v34  ;;  %v25089_v34 = vld [vmem:[#allocation55_spill] sm:$0xff] }
 0x477   : > { %v4479_v21 = vmul.f32 1.442695, %v4445_v9  ;;  %v4462_v9 = vsub.f32 %v20791_v32, %v21027_v43  ;;  %v4463_v32 = vsub.f32 %v20837_v14, %v21041_v11 }
 0x478   : > { %v4475_v47 = vmul.f32 1.442695, %v4443_v36  ;;  %v4358_v8 = vpop.xlane.xlu1 %4357  ;;  %v4464_v36 = vsub.f32 %v20849_v17, %v21039_v56 }
 0x479   : > { %v4446_v25 = vsub.f32 %v20889_v38, %v4358_v8  ;;  %v4352_v44 = vpop.xlane.xlu0 %4351  ;;  %v21056_v8 = vsel %vm20815_vm6, %v4284_v28, -inf  ;;  %v4513_v17 = vmul.f32 1.442695, %v4462_v9  ;;  %v4515_v11 = vmul.f32 1.442695, %v4463_v32  ;;  %v25100_v32 = vld [vmem:[#allocation137_spill] sm:$0xff] }
 0x47a   : > { %5172 = vrot.lane.b32.xlu0 %v24985_v52, %s19347_s21  ;;  %v4444_v16 = vsub.f32 %v20893_v30, %v4352_v44  ;;  %18356 = vpow2.f32 %v4475_v47  ;;  %v4460_v44 = vsub.f32 %v20800_v35, %v4400_v15  ;;  %v4459_v30 = vsub.f32 %v20786_v50, %v4397_v53 }
 0x47b   : > { %v4481_v58 = vmul.f32 1.442695, %v4446_v25 }
 0x47c   : > { %v4477_v51 = vmul.f32 1.442695, %v4444_v16  ;;  %v4509_v35 = vmul.f32 1.442695, %v4460_v44 }
 0x47d   : > { %18358 = vpow2.f32 %v4481_v58  ;;  %v4367_v23 = vpop.xlane.xlu0 %4366 }
 0x47e   : > { %18360 = vpow2.f32 %v4477_v51  ;;  %5301 = vrot.lane.b32.xlu0 %v25089_v34, %s19347_s21  ;;  %v4449_v31 = vsub.f32 %v20901_v39, %v4367_v23  ;;  %v4370_v46 = vpop.xlane.xlu1 %4369  ;;  %v4431_v51 = vsel %vm3942_vm0, %v21056_v8, -inf  ;;  %v4461_v23 = vsub.f32 %v20774_v18, %v21029_v27 }
 0x47f   : > { %18362 = vpow2.f32 %v4479_v21  ;;  %v4450_v52 = vsub.f32 %v20907_v40, %v4370_v46  ;;  %v21069_v40 = vsel %vm20819_vm7, %v20985_v59, -inf  ;;  %v25090_v21 = vld [vmem:[#allocation57_spill] sm:$0xff]  ;;  %v4517_v18 = vmul.f32 1.442695, %v4464_v36 }
 0x480   : > { %v4487_v25 = vmul.f32 1.442695, %v4449_v31  ;;  %v4440_v49 = vsel %vm3942_vm0, %v21069_v40, -inf  ;;  %v4511_v27 = vmul.f32 1.442695, %v4461_v23  ;;  %v4466_v34 = vsub.f32 %v20842_v19, %v21035_v0 }
 0x481   : > { %v4489_v38 = vmul.f32 1.442695, %v4450_v52  ;;  %v4361_v58 = vpop.xlane.xlu0 %4360  ;;  %v4465_v52 = vsub.f32 %v20826_v57, %v21037_v13 }
 0x482   : > { %5176 = vrot.lane.b32.xlu0 %v24998_v54, %s19347_s21  ;;  %v4447_v39 = vsub.f32 %v20913_v41, %v4361_v58  ;;  %v4364_v28 = vpop.xlane.xlu1 %4363  ;;  %18364 = vpow2.f32 %v4487_v25  ;;  %v4507_v41 = vmul.f32 1.442695, %v4459_v30  ;;  %v4521_v0 = vmul.f32 1.442695, %v4466_v34 }
 0x483   : > { %4432 = vmax.xlane.f32.xlu1 %v4431_v51  ;;  %v4448_v15 = vsub.f32 %v20917_v5, %v4364_v28  ;;  %18366 = vpow2.f32 %v4489_v38  ;;  %v21083_v5 = vsel %vm20831_vm8, %v20987_v3, -inf  ;;  %v4519_v13 = vmul.f32 1.442695, %v4465_v52 }
 0x484   : > { %v4483_v53 = vmul.f32 1.442695, %v4447_v39  ;;  %v21072_v54 = vpop.eup %18356  ;;  %v4434_v56 = vsel %vm3942_vm0, %v21083_v5, -inf }
 0x485   : > { %v4485_v50 = vmul.f32 1.442695, %v4448_v15 }
 0x486   : > { %18368 = vpow2.f32 %v4483_v53  ;;  %5303 = vrot.lane.b32.xlu0 %v25090_v21, %s19347_s21 }
 0x487   : > { %v21078_v59 = vpop.eup %18358  ;;  %18370 = vpow2.f32 %v4485_v50  ;;  %4441 = vmax.xlane.f32.xlu1 %v4440_v49 }
 0x488   : > { %25091 = vst [vmem:[#allocation55_spill] sm:$0xff] %v21078_v59  ;;  %v21087_v16 = vpop.eup %18360  ;;  %18372 = vpow2.f32 %v4509_v35 }
 0x489   : > { %25092 = vst [vmem:[#allocation57_spill] sm:$0xff] %v21087_v16  ;;  %v21091_v47 = vpop.eup %18362  ;;  %v4635_v3 = vpack.c.bf16 %v21087_v16, %v21072_v54  ;;  %18374 = vpow2.f32 %v4507_v41 }
 0x48a   : > { %v4636_v43 = vpack.c.bf16 %v21078_v59, %v21091_v47  ;;  %5285 = vrot.lane.b32.xlu0 %v20022_v1, %s19347_s21  ;;  %18376 = vpow2.f32 %v4513_v17 }
 0x48b   : > { %4435 = vmax.xlane.f32.xlu1 %v4434_v56  ;;  %16012 = vmatprep.mubr.msk.bf16.mxu0 %vm3942_vm0, %v4635_v3  ;;  %18378 = vpow2.f32 %v4517_v18  ;;  %v25101_v56 = vld [vmem:[#allocation18_spill] sm:$0xff] }
 0x48c   : > { %16013 = vmatmul.mubr.msk.bf16.vlgmr.msra.gmra.mrb[200].mxu0 %vm3942_vm0, %v4636_v43  ;;  %v21108_v14 = vpop.eup %18364  ;;  %18380 = vpow2.f32 %v4511_v27  ;;  %v5092_v43 = vsel %vm3942_vm0, %v21009_v29, 0  ;;  %v25103_v27 = vld [vmem:[#allocation138_spill] sm:$0xff] }
 0x48d   : > { %16037 = vmatpush3.bf16.msra.mxu0 %v20641_v42  ;;  %v21113_v1 = vpop.eup %18366  ;;  %18382 = vpow2.f32 %v4515_v11  ;;  %v25104_v11 = vld [vmem:[#allocation145_spill] sm:$0xff] }
 0x48e   : > { %5414 = vrot.lane.b32.xlu0 %v20377_v24, %s19347_s21  ;;  %16038 = vmatprep.subr.bf16.mxu0 %v20650_v60  ;;  %25093 = vst [vmem:[#allocation153_spill] sm:$0xff] %v21113_v1  ;;  %v4638_v57 = vpack.c.bf16 %v21113_v1, %v21108_v14  ;;  %18384 = vpow2.f32 %v4521_v0 }
 0x48f   : > { %18386 = vpow2.f32 %v4519_v13  ;;  %v25109_v13 = vld [vmem:[#allocation60_spill] sm:$0xff] }
 0x490   : > { %v21117_v31 = vpop.eup %18368 }
 0x491   : > { %v21119_v46 = vpop.eup %18370  ;;  %16039 = vmatpush3.bf16.msra.mxu0 %v20650_v60 }
 0x492   : > { %25094 = vst [vmem:[#allocation154_spill] sm:$0xff] %v21119_v46  ;;  %v21124_v24 = vpop.eup %18372  ;;  %5291 = vrot.lane.b32.xlu0 %v20058_v37, %s19347_s21  ;;  %16040 = vmatprep.subr.bf16.mxu0 %v20658_v2  ;;  %v4637_v19 = vpack.c.bf16 %v21119_v46, %v21117_v31 }
 0x493   : > { %25095 = vst [vmem:[#allocation155_spill] sm:$0xff] %v21124_v24  ;;  %v21131_v44 = vpop.eup %18374 }
 0x494   : > { %v4379_v25 = vpop.xlane.xlu0 %4378  ;;  %16016 = vmatprep.mubr.msk.bf16.mxu0 %vm3942_vm0, %v4637_v19  ;;  %v4643_v37 = vpack.c.bf16 %v21124_v24, %v21131_v44  ;;  %v21146_v51 = vpop.eup %18376  ;;  %v25106_v19 = vld [vmem:[#allocation93_spill] sm:$0xff] }
 0x495   : > { %16041 = vmatpush3.bf16.msra.mxu0 %v20658_v2  ;;  %v4453_v30 = vsub.f32 %v20925_v45, %v4379_v25  ;;  %25096 = vst [vmem:[#allocation156_spill] sm:$0xff] %v21146_v51  ;;  %v25108_v25 = vld [vmem:[#allocation144_spill] sm:$0xff] }
 0x496   : > { %5398 = vrot.lane.b32.xlu0 %v25004_v55, %s19347_s21  ;;  %16017 = vmatmul.mubr.msk.bf16.gmra.mrb[204].mxu0 %vm3942_vm0, %v4638_v57  ;;  %v4382_v38 = vpop.xlane.xlu1 %4381  ;;  %v21150_v55 = vpop.eup %18378 }
 0x497   : > { %16042 = vmatprep.subr.bf16.mxu0 %v20666_v26  ;;  %v4454_v58 = vsub.f32 %v20931_v33, %v4382_v38  ;;  %16044 = vmatprep.mubr.msk.bf16.mxu0 %vm3942_vm0, %v4643_v37  ;;  %25097 = vst [vmem:[#allocation157_spill] sm:$0xff] %v21150_v55  ;;  %v21156_v35 = vpop.eup %18380  ;;  %v4495_v41 = vmul.f32 1.442695, %v4453_v30  ;;  %v5095_v38 = vsel %vm3942_vm0, %v25104_v11, 0  ;;  %v25111_v30 = vld [vmem:[#allocation95_spill] sm:$0xff] }
 0x498   : > { %v4373_v39 = vpop.xlane.xlu0 %4372  ;;  %v21159_v50 = vpop.eup %18382 }
 0x499   : > { %v4497_v28 = vmul.f32 1.442695, %v4454_v58  ;;  %v4451_v15 = vsub.f32 %v20935_v22, %v4373_v39  ;;  %16043 = vmatpush3.bf16.msra.mxu0 %v20666_v26  ;;  %25098 = vst [vmem:[#allocation158_spill] sm:$0xff] %v21159_v50  ;;  %v4644_v22 = vpack.c.bf16 %v21146_v51, %v21156_v35  ;;  %v4645_v49 = vpack.c.bf16 %v21150_v55, %v21159_v50 }
 0x49a   : > { %5402 = vrot.lane.b32.xlu0 %v25014_v12, %s19347_s21  ;;  %17724 = vmatprep.subr.msk.bf16.mxu0 %vm3942_vm0, %v21009_v29  ;;  %v4376_v33 = vpop.xlane.xlu1 %4375 }
 0x49b   : > { %v4491_v45 = vmul.f32 1.442695, %v4451_v15  ;;  %v4452_v53 = vsub.f32 %v20941_v10, %v4376_v33  ;;  %18388 = vpow2.f32 %v4497_v28  ;;  %v25112_v15 = vld [vmem:[#allocation147_spill] sm:$0xff] }
 0x49c   : > { %v4391_v21 = vpop.xlane.xlu0 %4390  ;;  %5174 = vrot.lane.b32.xlu1 %v24997_v61, %s19347_s21  ;;  %v21174_v61 = vpop.eup %18384  ;;  %v25113_v33 = vld [vmem:[#allocation35_spill] sm:$0xff] }
 0x49d   : > { %v4493_v12 = vmul.f32 1.442695, %v4452_v53  ;;  %18390 = vpow2.f32 %v4491_v45  ;;  %25099 = vst [vmem:[#allocation159_spill] sm:$0xff] %v21174_v61  ;;  %v4457_v23 = vsub.f32 %v20949_v48, %v4391_v21  ;;  %v21182_v17 = vpop.eup %18386  ;;  %v25105_v48 = vld [vmem:[#allocation47_spill] sm:$0xff]  ;;  %v25114_v45 = vld [vmem:[#allocation104_spill] sm:$0xff]  ;;  %v25115_v53 = vld [vmem:[#allocation98_spill] sm:$0xff] }
 0x49e   : > { %5847 = vrot.lane.b32.xlu0 %v20529_v63, %s19347_s21  ;;  %16045 = vmatmul.mubr.msk.bf16.vlgmr.msra.gmra.mrb[208].mxu0 %vm3942_vm0, %v4644_v22  ;;  %v4394_v10 = vpop.xlane.xlu1 %4393  ;;  %25102 = vst [vmem:[#allocation137_spill] sm:$0xff] %v21182_v17  ;;  %v4646_v34 = vpack.c.bf16 %v21174_v61, %v21182_v17 }
 0x49f   : > { %18392 = vpow2.f32 %v4493_v12  ;;  %v4458_v9 = vsub.f32 %v20955_v20, %v4394_v10  ;;  %16048 = vmatprep.mubr.msk.bf16.mxu0 %vm3942_vm0, %v4645_v49  ;;  %v4503_v29 = vmul.f32 1.442695, %v4457_v23  ;;  %v25118_v12 = vld [vmem:[#allocation37_spill] sm:$0xff]  ;;  %v5098_v10 = vsel %vm3942_vm0, %v25112_v15, 0  ;;  %v25120_v23 = vld [vmem:[#allocation108_spill] sm:$0xff] }
 0x4a0   : > { %18394 = vpow2.f32 %v4495_v41  ;;  %v4385_v36 = vpop.xlane.xlu0 %4384  ;;  %5410 = vrot.lane.b32.xlu1 %v20356_v62, %s19347_s21  ;;  %v25117_v41 = vld [vmem:[#allocation106_spill] sm:$0xff] }
 0x4a1   : > { %v4505_v3 = vmul.f32 1.442695, %v4458_v9  ;;  %v4455_v63 = vsub.f32 %v25100_v32, %v4385_v36  ;;  %v25122_v32 = vld [vmem:[#allocation63_spill] sm:$0xff] }
 0x4a2   : > { %5851 = vrot.lane.b32.xlu0 %v25101_v56, %s19347_s21  ;;  %16069 = vmatpush3.bf16.xpose.msra.mxu0 %v5092_v43  ;;  %v4388_v20 = vpop.xlane.xlu1 %4387  ;;  %v25123_v43 = vld [vmem:[#allocation110_spill] sm:$0xff] }
 0x4a3   : > { %v4499_v18 = vmul.f32 1.442695, %v4455_v63  ;;  %v4456_v62 = vsub.f32 %v25103_v27, %v4388_v20  ;;  %17725 = vmatprep.subr.msk.bf16.mxu0 %vm3942_vm0, %v25104_v11  ;;  %18396 = vpow2.f32 %v4505_v3  ;;  %v25121_v3 = vld [vmem:[#allocation149_spill] sm:$0xff]  ;;  %v25124_v56 = vld [vmem:[#allocation42_spill] sm:$0xff] }
 0x4a4   : > { %5178 = vrot.lane.b32.xlu1 %v25105_v48, %s19347_s21  ;;  %v5101_v20 = vsel %vm3942_vm0, %v25121_v3, 0  ;;  %v25125_v27 = vld [vmem:[#allocation146_spill] sm:$0xff]  ;;  %v25128_v11 = vld [vmem:[#allocation85_spill] sm:$0xff] }
 0x4a5   : > { %v4501_v52 = vmul.f32 1.442695, %v4456_v62  ;;  %18398 = vpow2.f32 %v4499_v18  ;;  %v21194_v0 = vpop.eup %18388  ;;  %v25126_v62 = vld [vmem:[#allocation150_spill] sm:$0xff] }
 0x4a6   : > { %5940 = vrot.lane.b32.xlu0 %v25106_v19, %s19347_s21  ;;  %16049 = vmatmul.mubr.msk.bf16.gmra.mrb[212].mxu0 %vm3942_vm0, %v4646_v34  ;;  %25107 = vst [vmem:[#allocation18_spill] sm:$0xff] %v21194_v0  ;;  %v25129_v34 = vld [vmem:[#allocation142_spill] sm:$0xff]  ;;  %v5066_v19 = vpop.permute.xlu1 %5065 }
 0x4a7   : > { %18400 = vpow2.f32 %v4501_v52  ;;  %16076 = vmatprep.mubr.msk.bf16.mxu0 %vm3942_vm0, %v25108_v25  ;;  %v21198_v57 = vpop.eup %18390  ;;  %v25130_v52 = vld [vmem:[#allocation90_spill] sm:$0xff]  ;;  %v25131_v25 = vld [vmem:[#allocation44_spill] sm:$0xff] }
 0x4a8   : > { %5412 = vrot.lane.b32.xlu1 %v25109_v13, %s19347_s21  ;;  %18402 = vpow2.f32 %v4503_v29  ;;  %v5318_v29 = vsel %vm3942_vm0, %v25126_v62, 0  ;;  %v25132_v13 = vld [vmem:[#allocation140_spill] sm:$0xff] }
 0x4a9   : > { %v21202_v37 = vpop.eup %18392 }
 0x4aa   : > { %25110 = vst [vmem:[#allocation138_spill] sm:$0xff] %v21202_v37  ;;  %v21206_v58 = vpop.eup %18394  ;;  %5942 = vrot.lane.b32.xlu0 %v25111_v30, %s19347_s21  ;;  %16071 = vmatpush3.bf16.xpose.msra.mxu0 %v5095_v38  ;;  %v4639_v39 = vpack.c.bf16 %v21202_v37, %v21198_v57 }
 0x4ab   : > { %v4640_v28 = vpack.c.bf16 %v21194_v0, %v21206_v58  ;;  %17726 = vmatprep.subr.msk.bf16.mxu0 %vm3942_vm0, %v25112_v15  ;;  %v25134_v15 = vld [vmem:[#allocation139_spill] sm:$0xff] }
 0x4ac   : > { %5287 = vrot.lane.b32.xlu1 %v25113_v33, %s19347_s21  ;;  %16028 = vmatprep.mubr.msk.bf16.mxu1 %vm3942_vm0, %v4639_v39  ;;  %v25133_v39 = vld [vmem:[#allocation141_spill] sm:$0xff] }
 0x4ad   : > { %16029 = vmatmul.mubr.msk.bf16.vlgmr.msra.gmra.mrb[216].mxu1 %vm3942_vm0, %v4640_v28  ;;  %v21223_v22 = vpop.eup %18396 }
 0x4ae   : > { %16053 = vmatpush3.bf16.msra.mxu1 %v25114_v45  ;;  %5946 = vrot.lane.b32.xlu0 %v25115_v53, %s19347_s21  ;;  %25116 = vst [vmem:[#allocation145_spill] sm:$0xff] %v21223_v22 }
 0x4af   : > { %16054 = vmatprep.subr.bf16.mxu1 %v25117_v41  ;;  %v21226_v21 = vpop.eup %18398 }
 0x4b0   : > { %5289 = vrot.lane.b32.xlu1 %v25118_v12, %s19347_s21 }
 0x4b1   : > { %v21230_v49 = vpop.eup %18400 }
 0x4b2   : > { %25119 = vst [vmem:[#allocation47_spill] sm:$0xff] %v21230_v49  ;;  %16055 = vmatpush3.bf16.msra.mxu1 %v25117_v41  ;;  %6035 = vrot.lane.b32.xlu0 %v20650_v60, %s19347_s21  ;;  %v4641_v9 = vpack.c.bf16 %v21230_v49, %v21226_v21  ;;  %v21239_v36 = vpop.eup %18402 }
 0x4b3   : > { %16056 = vmatprep.subr.bf16.mxu1 %v25120_v23  ;;  %16073 = vmatpush3.bf16.xpose.msra.mxu0 %v5098_v10  ;;  %v4642_v60 = vpack.c.bf16 %v21223_v22, %v21239_v36 }
 0x4b4   : > { %17727 = vmatprep.subr.msk.bf16.mxu0 %vm3942_vm0, %v25121_v3  ;;  %5416 = vrot.lane.b32.xlu1 %v25122_v32, %s19347_s21  ;;  %v4427_v63 = vpop.xlane.xlu0 %4426 }
 0x4b5   : > { %16032 = vmatprep.mubr.msk.bf16.mxu1 %vm3942_vm0, %v4641_v9  ;;  %v4469_v33 = vsub.f32 %v25134_v15, %v4427_v63  ;;  %v25135_v9 = vld [vmem:[#allocation143_spill] sm:$0xff] }
 0x4b6   : > { %16033 = vmatmul.mubr.msk.bf16.gmra.mrb[220].mxu1 %vm3942_vm0, %v4642_v60  ;;  %6039 = vrot.lane.b32.xlu0 %v20666_v26, %s19347_s21  ;;  %v25127_v26 = vld [vmem:[#allocation20_spill] sm:$0xff] }
 0x4b7   : > { %16057 = vmatpush3.bf16.msra.mxu1 %v25120_v23  ;;  %v4527_v32 = vmul.f32 1.442695, %v4469_v33 }
 0x4b8   : > { %16058 = vmatprep.subr.bf16.mxu1 %v25123_v43  ;;  %5400 = vrot.lane.b32.xlu1 %v25124_v56, %s19347_s21  ;;  %v4421_v18 = vpop.xlane.xlu0 %4420 }
 0x4b9   : > { %v4467_v38 = vsub.f32 %v25132_v13, %v4421_v18 }
 0x4bb   : > { %16059 = vmatpush3.bf16.msra.mxu1 %v25123_v43  ;;  %16075 = vmatpush3.bf16.xpose.msra.mxu0 %v5101_v20  ;;  %v4523_v53 = vmul.f32 1.442695, %v4467_v38 }
 0x4bc   : > { %17728 = vmatprep.subr.msk.bf16.mxu1 %vm3942_vm0, %v25125_v27  ;;  %17732 = vmatprep.subr.msk.bf16.mxu0 %vm3942_vm0, %v25126_v62  ;;  %v5064_v48 = vpop.permute.xlu0 %5063 }
 0x4bd   : > { %5404 = vrot.lane.b32.xlu1 %v25127_v26, %s19347_s21  ;;  %18404 = vpow2.f32 %v4523_v53 }
 0x4c1   : > { %5849 = vrot.lane.b32.xlu1 %v25128_v11, %s19347_s21 }
 0x4c2   : > { %16077 = vmatmul.mubr.msk.bf16.vlgmr.msra.gmra.mrb[216].mxu0 %vm3942_vm0, %v25129_v34  ;;  %v25140_v34 = vld [vmem:[#allocation148_spill] sm:$0xff] }
 0x4c3   : > { %16080 = vmatprep.mubr.msk.bf16.mxu0 %vm3942_vm0, %v5064_v48  ;;  %16101 = vmatpush3.bf16.xpose.msra.mxu0 %v5318_v29  ;;  %v5205_v48 = vsel %vm3942_vm0, %v25125_v27, 0 }
 0x4c5   : > { %5853 = vrot.lane.b32.xlu1 %v25130_v52, %s19347_s21 }
 0x4c7   : > { %v21287_v56 = vpop.eup %18404 }
 0x4c8   : > { %25136 = vst [vmem:[#allocation93_spill] sm:$0xff] %v21287_v56 }
 0x4c9   : > { %5944 = vrot.lane.b32.xlu1 %v25131_v25, %s19347_s21  ;;  %v25141_v25 = vld [vmem:[#allocation151_spill] sm:$0xff] }
 0x4ca   : > { %16081 = vmatmul.mubr.msk.bf16.gmra.mrb[220].mxu0 %vm3942_vm0, %v5066_v19  ;;  %v5208_v19 = vsel %vm3942_vm0, %v25140_v34, 0 }
 0x4cd   : > { %6033 = vrot.lane.b32.xlu1 %v20641_v42, %s19347_s21 }
 0x4d1   : > { %6037 = vrot.lane.b32.xlu1 %v20658_v2, %s19347_s21 }
 0x4d7   : > { %v4430_v30 = vpop.xlane.xlu1 %4429 }
 0x4d8   : > { %v4470_v28 = vsub.f32 %v25133_v39, %v4430_v30  ;;  %v5211_v30 = vsel %vm3942_vm0, %v25141_v25, 0 }
 0x4da   : > { %v4529_v12 = vmul.f32 1.442695, %v4470_v28 }
 0x4db   : > { %v4424_v10 = vpop.xlane.xlu1 %4423 }
 0x4dc   : > { %v4468_v3 = vsub.f32 %v25135_v9, %v4424_v10  ;;  %18406 = vpow2.f32 %v4529_v12 }
 0x4de   : > { %v4525_v60 = vmul.f32 1.442695, %v4468_v3 }
 0x4df   : > { %v5300_v42 = vpop.permute.xlu1 %5299 }
 0x4e0   : > { %18408 = vpow2.f32 %v4525_v60  ;;  %17733 = vmatprep.subr.msk.bf16.mxu0 %vm3942_vm0, %v5300_v42  ;;  %v5321_v2 = vsel %vm3942_vm0, %v5300_v42, 0 }
 0x4e1   : > { %18410 = vpow2.f32 %v4527_v32  ;;  %16103 = vmatpush3.bf16.xpose.msra.mxu0 %v5321_v2  ;;  %v25142_v2 = vld [vmem:[#allocation152_spill] sm:$0xff] }
 0x4e6   : > { %v21289_v63 = vpop.eup %18406 }
 0x4e7   : > { %25137 = vst [vmem:[#allocation144_spill] sm:$0xff] %v21289_v63 }
 0x4ea   : > { %v21291_v20 = vpop.eup %18408 }
 0x4eb   : > { %25138 = vst [vmem:[#allocation60_spill] sm:$0xff] %v21291_v20  ;;  %v21293_v18 = vpop.eup %18410  ;;  %v4647_v62 = vpack.c.bf16 %v21291_v20, %v21287_v56 }
 0x4ec   : > { %25139 = vst [vmem:[#allocation95_spill] sm:$0xff] %v21293_v18  ;;  %v4648_v26 = vpack.c.bf16 %v21289_v63, %v21293_v18 }
 0x4ed   : > { %v4439_v11 = vpop.xlane.xlu0 %4438  ;;  %16060 = vmatprep.mubr.msk.bf16.mxu1 %vm3942_vm0, %v4647_v62 }
 0x4ee   : > { %16061 = vmatmul.mubr.msk.bf16.vlgmr.msra.gmra.mrb[224].mxu1 %vm3942_vm0, %v4648_v26  ;;  %v4473_v62 = vsub.f32 %v25142_v2, %v4439_v11 }
 0x4ef   : > { %16085 = vmatpush3.bf16.xpose.msra.mxu1 %v5205_v48 }
 0x4f0   : > { %17729 = vmatprep.subr.msk.bf16.mxu1 %vm3942_vm0, %v25140_v34 }
 0x4f1   : > { %v5191_v29 = vpop.permute.xlu0 %5190 }
 0x4f2   : > { %v5214_v33 = vsel %vm3942_vm0, %v5191_v29, 0 }
 0x4f5   : > { %v5173_v52 = vpop.permute.xlu0 %5172 }
 0x4f7   : > { %16087 = vmatpush3.bf16.xpose.msra.mxu1 %v5208_v19 }
 0x4f8   : > { %17730 = vmatprep.subr.msk.bf16.mxu1 %vm3942_vm0, %v25141_v25  ;;  %v4535_v25 = vmul.f32 1.442695, %v4473_v62 }
 0x4f9   : > { %v5302_v13 = vpop.permute.xlu0 %5301 }
 0x4fa   : > { %17734 = vmatprep.subr.msk.bf16.mxu0 %vm3942_vm0, %v5302_v13  ;;  %v5324_v38 = vsel %vm3942_vm0, %v5302_v13, 0 }
 0x4fb   : > { %16105 = vmatpush3.bf16.xpose.msra.mxu0 %v5324_v38 }
 0x4fd   : > { %v5177_v27 = vpop.permute.xlu0 %5176 }
 0x4ff   : > { %16089 = vmatpush3.bf16.xpose.msra.mxu1 %v5211_v30 }
 0x500   : > { %17731 = vmatprep.subr.msk.bf16.mxu1 %vm3942_vm0, %v5191_v29 }
 0x501   : > { %v5304_v39 = vpop.permute.xlu0 %5303 }
 0x502   : > { %17735 = vmatprep.subr.msk.bf16.mxu0 %vm3942_vm0, %v5304_v39  ;;  %v5327_v28 = vsel %vm3942_vm0, %v5304_v39, 0 }
 0x503   : > { %16107 = vmatpush3.bf16.xpose.msra.mxu0 %v5327_v28 }
 0x505   : > { %v5286_v15 = vpop.permute.xlu0 %5285 }
 0x506   : > { %16108 = vmatprep.mubr.msk.bf16.mxu0 %vm3942_vm0, %v5286_v15 }
 0x507   : > { %16091 = vmatpush3.bf16.xpose.msra.mxu1 %v5214_v33 }
 0x509   : > { %v5415_v53 = vpop.permute.xlu0 %5414 }
 0x50d   : > { %v5292_v12 = vpop.permute.xlu0 %5291 }
 0x510   : > { %v4433_v10 = vpop.xlane.xlu1 %4432 }
 0x511   : > { %v5399_v9 = vpop.permute.xlu0 %5398  ;;  %v4471_v3 = vsub.f32 %v21056_v8, %v4433_v10 }
 0x513   : > { %v4531_v26 = vmul.f32 1.442695, %v4471_v3 }
 0x514   : > { %v4442_v32 = vpop.xlane.xlu1 %4441 }
 0x515   : > { %v4474_v60 = vsub.f32 %v21069_v40, %v4442_v32  ;;  %v21320_v42 = vpop.permute.xlu0 %5402  ;;  %18412 = vpow2.f32 %v4531_v26 }
 0x517   : > { %v4537_v48 = vmul.f32 1.442695, %v4474_v60 }
 0x518   : > { %v4436_v34 = vpop.xlane.xlu1 %4435 }
 0x519   : > { %v4472_v29 = vsub.f32 %v21083_v5, %v4436_v34  ;;  %v5848_v19 = vpop.permute.xlu0 %5847  ;;  %18414 = vpow2.f32 %v4537_v48 }
 0x51a   : > { %16132 = vmatprep.subr.bf16.mxu0 %v5848_v19 }
 0x51b   : > { %v4533_v13 = vmul.f32 1.442695, %v4472_v29 }
 0x51c   : > { %v5175_v38 = vpop.permute.xlu1 %5174 }
 0x51d   : > { %18416 = vpow2.f32 %v4533_v13  ;;  %v5852_v48 = vpop.permute.xlu0 %5851 }
 0x51e   : > { %18418 = vpow2.f32 %v4535_v25 }
 0x51f   : > { %v21325_v30 = vpop.eup %18412 }
 0x520   : > { %v5411_v8 = vpop.permute.xlu1 %5410  ;;  %25143 = vst [vmem:[#allocation147_spill] sm:$0xff] %v21325_v30 }
 0x521   : > { %17736 = vmatprep.subr.msk.bf16.mxu1 %vm3942_vm0, %v5411_v8  ;;  %v5431_v32 = vsel %vm3942_vm0, %v5411_v8, 0  ;;  %v5941_v29 = vpop.permute.xlu0 %5940 }
 0x523   : > { %v21327_v11 = vpop.eup %18414 }
 0x524   : > { %v5179_v40 = vpop.permute.xlu1 %5178  ;;  %25144 = vst [vmem:[#allocation35_spill] sm:$0xff] %v21327_v11 }
 0x527   : > { %v21329_v39 = vpop.eup %18416 }
 0x528   : > { %25145 = vst [vmem:[#allocation104_spill] sm:$0xff] %v21329_v39  ;;  %v21331_v5 = vpop.eup %18418  ;;  %v5413_v28 = vpop.permute.xlu1 %5412  ;;  %v4649_v15 = vpack.c.bf16 %v21329_v39, %v21325_v30 }
 0x529   : > { %25146 = vst [vmem:[#allocation98_spill] sm:$0xff] %v21331_v5  ;;  %v4650_v33 = vpack.c.bf16 %v21327_v11, %v21331_v5  ;;  %v5434_v2 = vsel %vm3942_vm0, %v5413_v28, 0 }
 0x52a   : > { %16064 = vmatprep.mubr.msk.bf16.mxu1 %vm3942_vm0, %v4649_v15 }
 0x52b   : > { %16065 = vmatmul.mubr.msk.bf16.gmra.mrb[228].mxu1 %vm3942_vm0, %v4650_v33 }
 0x52c   : > { %16092 = vmatprep.mubr.msk.bf16.mxu1 %vm3942_vm0, %v5173_v52  ;;  %v5288_v10 = vpop.permute.xlu1 %5287 }
 0x52d   : > { %16109 = vmatmul.mubr.msk.bf16.vlgmr.msra.gmra.mrb[224].mxu0 %vm3942_vm0, %v5288_v10 }
 0x52e   : > { %16133 = vmatpush3.bf16.msra.mxu0 %v5848_v19 }
 0x530   : > { %v5290_v3 = vpop.permute.xlu1 %5289 }
 0x531   : > { %16112 = vmatprep.mubr.msk.bf16.mxu0 %vm3942_vm0, %v5290_v3 }
 0x533   : > { %16093 = vmatmul.mubr.msk.bf16.vlgmr.msra.gmra.mrb[232].mxu1 %vm3942_vm0, %v5175_v38 }
 0x534   : > { %16117 = vmatpush3.bf16.xpose.msra.mxu1 %v5431_v32  ;;  %16096 = vmatprep.mubr.msk.bf16.mxu1 %vm3942_vm0, %v5177_v27  ;;  %v5417_v60 = vpop.permute.xlu1 %5416  ;;  %v5437_v27 = vsel %vm3942_vm0, %v5415_v53, 0 }
 0x535   : > { %17737 = vmatprep.subr.msk.bf16.mxu1 %vm3942_vm0, %v5413_v28  ;;  %16113 = vmatmul.mubr.msk.bf16.gmra.mrb[228].mxu0 %vm3942_vm0, %v5292_v12 }
 0x538   : > { %v5401_v52 = vpop.permute.xlu1 %5400 }
 0x53b   : > { %16097 = vmatmul.mubr.msk.bf16.gmra.mrb[236].mxu1 %vm3942_vm0, %v5179_v40 }
 0x53c   : > { %16119 = vmatpush3.bf16.xpose.msra.mxu1 %v5434_v2  ;;  %16124 = vmatprep.mubr.msk.bf16.mxu1 %vm3942_vm0, %v5399_v9  ;;  %v5405_v62 = vpop.permute.xlu1 %5404  ;;  %v5440_v9 = vsel %vm3942_vm0, %v5417_v60, 0 }
 0x53d   : > { %17738 = vmatprep.subr.msk.bf16.mxu1 %vm3942_vm0, %v5415_v53  ;;  %v5943_v53 = vpop.permute.xlu0 %5942 }
 0x540   : > { %v5850_v26 = vpop.permute.xlu1 %5849 }
 0x541   : > { %16134 = vmatprep.subr.bf16.mxu0 %v5850_v26  ;;  %v5947_v25 = vpop.permute.xlu0 %5946 }
 0x542   : > { %16135 = vmatpush3.bf16.msra.mxu0 %v5850_v26 }
 0x543   : > { %16136 = vmatprep.subr.bf16.mxu0 %v5852_v48 }
 0x544   : > { %16121 = vmatpush3.bf16.xpose.msra.mxu1 %v5437_v27  ;;  %v5854_v12 = vpop.permute.xlu1 %5853 }
 0x545   : > { %17739 = vmatprep.subr.msk.bf16.mxu1 %vm3942_vm0, %v5417_v60  ;;  %v21545_v37 = vpop.permute.xlu0 %6035 }
 0x546   : > { %16137 = vmatpush3.bf16.msra.mxu0 %v5852_v48 }
 0x547   : > { %16138 = vmatprep.subr.bf16.mxu0 %v5854_v12 }
 0x548   : > { %v5945_v34 = vpop.permute.xlu1 %5944 }
 0x54a   : > { %16139 = vmatpush3.bf16.msra.mxu0 %v5854_v12 }
 0x54c   : > { %16123 = vmatpush3.bf16.xpose.msra.mxu1 %v5440_v9  ;;  %v21354_v19 = vpop.permute.xlu1 %6033 }
 0x54d   : > { %16148 = vmatprep.subr.bf16.mxu1 %v5941_v29  ;;  %16164 = vmatprep.subr.bf16.mxu0 %v21354_v19 }
 0x553   : > { %16125 = vmatmul.mubr.msk.bf16.vlgmr.msra.gmra.mrb[240].mxu1 %vm3942_vm0, %v5401_v52 }
 0x554   : > { %16128 = vmatprep.mubr.msk.bf16.mxu1 %vm3942_vm0, %v21320_v42  ;;  %16149 = vmatpush3.bf16.msra.mxu1 %v5941_v29 }
 0x555   : > { %16150 = vmatprep.subr.bf16.mxu1 %v5943_v53 }
 0x558   : > { %16151 = vmatpush3.bf16.msra.mxu1 %v5943_v53 }
 0x559   : > { %16152 = vmatprep.subr.bf16.mxu1 %v5945_v34 }
 0x55b   : > { %16129 = vmatmul.mubr.msk.bf16.gmra.mrb[244].mxu1 %vm3942_vm0, %v5405_v62 }
 0x55c   : > { %16153 = vmatpush3.bf16.msra.mxu1 %v5945_v34 }
 0x55d   : > { %16154 = vmatprep.subr.bf16.mxu1 %v5947_v25 }
 0x55f   : > { %v21361_v13 = vpop.f32.mrb[200].mxu0 }
 0x560   : > { %25147 = vst [vmem:[#allocation106_spill] sm:$0xff] %v21361_v13  ;;  %16155 = vmatpush3.bf16.msra.mxu1 %v5947_v25  ;;  %v21363_v38 = vpop.f32.mrb[201].mxu0 }
 0x561   : > { %25148 = vst [vmem:[#allocation37_spill] sm:$0xff] %v21363_v38  ;;  %v21365_v8 = vpop.f32.mrb[202].mxu0 }
 0x562   : > { %25149 = vst [vmem:[#allocation108_spill] sm:$0xff] %v21365_v8  ;;  %v21367_v40 = vpop.f32.mrb[203].mxu0 }
 0x563   : > { %25150 = vst [vmem:[#allocation149_spill] sm:$0xff] %v21367_v40 }
 0x569   : > { %v21369_v28 = vpop.f32.mrb[204].mxu0 }
 0x56a   : > { %25151 = vst [vmem:[#allocation63_spill] sm:$0xff] %v21369_v28  ;;  %v21371_v42 = vpop.f32.mrb[205].mxu0 }
 0x56b   : > { %25152 = vst [vmem:[#allocation110_spill] sm:$0xff] %v21371_v42  ;;  %v21373_v15 = vpop.f32.mrb[206].mxu0 }
 0x56c   : > { %25153 = vst [vmem:[#allocation42_spill] sm:$0xff] %v21373_v15  ;;  %v21375_v33 = vpop.f32.mrb[207].mxu0 }
 0x56d   : > { %25154 = vst [vmem:[#allocation146_spill] sm:$0xff] %v21375_v33 }
 0x571   : > { %v21377_v10 = vpop.f32.mrb[208].mxu0 }
 0x572   : > { %25155 = vst [vmem:[#allocation150_spill] sm:$0xff] %v21377_v10  ;;  %v21379_v3 = vpop.f32.mrb[209].mxu0 }
 0x573   : > { %25156 = vst [vmem:[#allocation20_spill] sm:$0xff] %v21379_v3  ;;  %v21381_v32 = vpop.f32.mrb[210].mxu0 }
 0x574   : > { %25157 = vst [vmem:[#allocation85_spill] sm:$0xff] %v21381_v32  ;;  %v21383_v60 = vpop.f32.mrb[211].mxu0 }
 0x575   : > { %25158 = vst [vmem:[#allocation142_spill] sm:$0xff] %v21383_v60 }
 0x579   : > { %v21385_v52 = vpop.f32.mrb[212].mxu0 }
 0x57a   : > { %25159 = vst [vmem:[#allocation90_spill] sm:$0xff] %v21385_v52  ;;  %v21387_v2 = vpop.f32.mrb[213].mxu0 }
 0x57b   : > { %25160 = vst [vmem:[#allocation44_spill] sm:$0xff] %v21387_v2  ;;  %v21389_v62 = vpop.f32.mrb[214].mxu0 }
 0x57c   : > { %25161 = vst [vmem:[#allocation140_spill] sm:$0xff] %v21389_v62  ;;  %v21391_v26 = vpop.f32.mrb[215].mxu0 }
 0x57d   : > { %25162 = vst [vmem:[#allocation141_spill] sm:$0xff] %v21391_v26 }
 0x580   : > { %v21393_v48 = vpop.f32.mrb[216].mxu1 }
 0x581   : > { %25163 = vst [vmem:[#allocation139_spill] sm:$0xff] %v21393_v48  ;;  %v21395_v27 = vpop.f32.mrb[217].mxu1 }
 0x582   : > { %25164 = vst [vmem:[#allocation143_spill] sm:$0xff] %v21395_v27  ;;  %v21397_v12 = vpop.f32.mrb[218].mxu1 }
 0x583   : > { %25165 = vst [vmem:[#allocation148_spill] sm:$0xff] %v21397_v12  ;;  %v21399_v34 = vpop.f32.mrb[219].mxu1 }
 0x584   : > { %25166 = vst [vmem:[#allocation151_spill] sm:$0xff] %v21399_v34 }
 0x589   : > { %v21401_v9 = vpop.f32.mrb[220].mxu1 }
 0x58a   : > { %25167 = vst [vmem:[#allocation152_spill] sm:$0xff] %v21401_v9  ;;  %v21403_v29 = vpop.f32.mrb[221].mxu1 }
 0x58b   : > { %25168 = vst [vmem:[#allocation160_spill] sm:$0xff] %v21403_v29  ;;  %v21405_v53 = vpop.f32.mrb[222].mxu1 }
 0x58c   : > { %25169 = vst [vmem:[#allocation161_spill] sm:$0xff] %v21405_v53  ;;  %v21407_v25 = vpop.f32.mrb[223].mxu1 }
 0x58d   : > { %25170 = vst [vmem:[#allocation162_spill] sm:$0xff] %v21407_v25 }
 0x595   : > { %v16078_v52 = vpop.f32.mrb[216].mxu0 }
 0x596   : > { %v21411_v26 = vsel %vm20755_vm1, %v16078_v52, -inf  ;;  %v5137_v2 = vpop.f32.mrb[217].mxu0 }
 0x597   : > { %v16079_v32 = vpop.f32.mrb[218].mxu0  ;;  %v5545_v10 = vsel %vm3942_vm0, %v21411_v26, -inf  ;;  %v21417_v3 = vsel %vm20763_vm2, %v5137_v2, -inf }
 0x598   : > { %5546 = vmax.xlane.f32.xlu0 %v5545_v10  ;;  %v5140_v9 = vpop.f32.mrb[219].mxu0  ;;  %v5539_v52 = vsel %vm3942_vm0, %v21417_v3, -inf  ;;  %v21429_v48 = vsel %vm20767_vm3, %v16079_v32, -inf }
 0x599   : > { %v21421_v53 = vsel %vm20779_vm4, %v5140_v9, -inf  ;;  %v5548_v27 = vsel %vm3942_vm0, %v21429_v48, -inf }
 0x59a   : > { %v5542_v25 = vsel %vm3942_vm0, %v21421_v53, -inf }
 0x59b   : > { %5543 = vmax.xlane.f32.xlu1 %v5542_v25 }
 0x59c   : > { %5540 = vmax.xlane.f32.xlu0 %v5539_v52 }
 0x59d   : > { %v16082_v2 = vpop.f32.mrb[220].mxu0 }
 0x59e   : > { %v5153_v34 = vpop.f32.mrb[221].mxu0  ;;  %v21435_v15 = vsel %vm20806_vm5, %v16082_v2, -inf }
 0x59f   : > { %v16083_v10 = vpop.f32.mrb[222].mxu0  ;;  %v5557_v33 = vsel %vm3942_vm0, %v21435_v15, -inf  ;;  %v21451_v2 = vsel %vm20815_vm6, %v5153_v34, -inf }
 0x5a0   : > { %v21439_v25 = vsel %vm20819_vm7, %v16083_v10, -inf  ;;  %5549 = vmax.xlane.f32.xlu0 %v5548_v27  ;;  %v5156_v28 = vpop.f32.mrb[223].mxu0  ;;  %v5551_v10 = vsel %vm3942_vm0, %v21451_v2, -inf }
 0x5a1   : > { %v5560_v32 = vsel %vm3942_vm0, %v21439_v25, -inf  ;;  %v21445_v52 = vsel %vm20831_vm8, %v5156_v28, -inf }
 0x5a2   : > { %5561 = vmax.xlane.f32.xlu1 %v5560_v32  ;;  %v5554_v27 = vsel %vm3942_vm0, %v21445_v52, -inf }
 0x5a4   : > { %5558 = vmax.xlane.f32.xlu0 %v5557_v33 }
 0x5a6   : > { %5555 = vmax.xlane.f32.xlu1 %v5554_v27 }
 0x5a8   : > { %5552 = vmax.xlane.f32.xlu0 %v5551_v10 }
 0x5c1   : > { %v21457_v42 = vpop.f32.mrb[224].mxu1 }
 0x5c2   : > { %25176 = vst [vmem:[#allocation163_spill] sm:$0xff] %v21457_v42  ;;  %v21459_v28 = vpop.f32.mrb[225].mxu1 }
 0x5c3   : > { %25177 = vst [vmem:[#allocation164_spill] sm:$0xff] %v21459_v28  ;;  %v21461_v32 = vpop.f32.mrb[226].mxu1 }
 0x5c4   : > { %25178 = vst [vmem:[#allocation165_spill] sm:$0xff] %v21461_v32  ;;  %v21463_v8 = vpop.f32.mrb[227].mxu1 }
 0x5c5   : > { %25179 = vst [vmem:[#allocation166_spill] sm:$0xff] %v21463_v8 }
 0x5fe   : > { %v21465_v13 = vpop.f32.mrb[228].mxu1 }
 0x5ff   : > { %25180 = vst [vmem:[#allocation167_spill] sm:$0xff] %v21465_v13  ;;  %v21467_v34 = vpop.f32.mrb[229].mxu1 }
 0x600   : > { %25181 = vst [vmem:[#allocation168_spill] sm:$0xff] %v21467_v34  ;;  %v21469_v33 = vpop.f32.mrb[230].mxu1  ;;  %v16110_v40 = vpop.f32.mrb[224].mxu0 }
 0x601   : > { %25182 = vst [vmem:[#allocation169_spill] sm:$0xff] %v21469_v33  ;;  %v21473_v27 = vsel %vm20755_vm1, %v16110_v40, -inf  ;;  %v21475_v10 = vpop.f32.mrb[231].mxu1  ;;  %v5363_v42 = vpop.f32.mrb[225].mxu0 }
 0x602   : > { %25183 = vst [vmem:[#allocation170_spill] sm:$0xff] %v21475_v10  ;;  %v21479_v28 = vsel %vm20763_vm2, %v5363_v42, -inf  ;;  %v16111_v32 = vpop.f32.mrb[226].mxu0  ;;  %v5593_v13 = vsel %vm3942_vm0, %v21473_v27, -inf }
 0x603   : > { %v21485_v34 = vsel %vm20767_vm3, %v16111_v32, -inf  ;;  %5594 = vmax.xlane.f32.xlu1 %v5593_v13  ;;  %v5366_v33 = vpop.f32.mrb[227].mxu0  ;;  %v5587_v40 = vsel %vm3942_vm0, %v21479_v28, -inf }
 0x604   : > { %5588 = vmax.xlane.f32.xlu0 %v5587_v40  ;;  %v5596_v8 = vsel %vm3942_vm0, %v21485_v34, -inf  ;;  %v21493_v42 = vsel %vm20779_vm4, %v5366_v33, -inf }
 0x605   : > { %v5590_v20 = vsel %vm3942_vm0, %v21493_v42, -inf }
 0x606   : > { %v16094_v10 = vpop.f32.mrb[232].mxu1 }
 0x607   : > { %v5250_v38 = vpop.f32.mrb[233].mxu1  ;;  %5597 = vmax.xlane.f32.xlu1 %v5596_v8  ;;  %v21527_v0 = vsel %vm20755_vm1, %v16094_v10, -inf }
 0x608   : > { %v16095_v11 = vpop.f32.mrb[234].mxu1  ;;  %v16114_v39 = vpop.f32.mrb[228].mxu0  ;;  %v21509_v55 = vsel %vm20763_vm2, %v5250_v38, -inf }
 0x609   : > { %v5253_v32 = vpop.f32.mrb[235].mxu1  ;;  %v5379_v63 = vpop.f32.mrb[229].mxu0  ;;  %v21499_v40 = vsel %vm20806_vm5, %v16114_v39, -inf  ;;  %v5563_v22 = vsel %vm3942_vm0, %v21509_v55, -inf }
 0x60a   : > { %v16115_v13 = vpop.f32.mrb[230].mxu0  ;;  %v5605_v24 = vsel %vm3942_vm0, %v21499_v40, -inf  ;;  %v21515_v39 = vsel %vm20815_vm6, %v5379_v63, -inf }
 0x60b   : > { %v21503_v61 = vsel %vm20819_vm7, %v16115_v13, -inf  ;;  %5591 = vmax.xlane.f32.xlu1 %v5590_v20  ;;  %v5382_v33 = vpop.f32.mrb[231].mxu0 }
 0x60c   : > { %v5608_v8 = vsel %vm3942_vm0, %v21503_v61, -inf  ;;  %v21521_v49 = vsel %vm20831_vm8, %v5382_v33, -inf  ;;  %v5569_v33 = vsel %vm3942_vm0, %v21527_v0, -inf }
 0x60d   : > { %5609 = vmax.xlane.f32.xlu0 %v5608_v8  ;;  %v5599_v8 = vsel %vm3942_vm0, %v21515_v39, -inf }
 0x60e   : > { %v16098_v51 = vpop.f32.mrb[236].mxu1 }
 0x60f   : > { %v5266_v13 = vpop.f32.mrb[237].mxu1  ;;  %5606 = vmax.xlane.f32.xlu1 %v5605_v24  ;;  %v5602_v24 = vsel %vm3942_vm0, %v21521_v49, -inf }
 0x610   : > { %v16099_v20 = vpop.f32.mrb[238].mxu1  ;;  %v21533_v63 = vsel %vm20815_vm6, %v5266_v13, -inf  ;;  %v21549_v13 = vsel %vm20779_vm4, %v5253_v32, -inf  ;;  %v21565_v32 = vpop.permute.xlu1 %6037 }
 0x611   : > { %v5269_v38 = vpop.f32.mrb[239].mxu1  ;;  %5564 = vmax.xlane.f32.xlu0 %v5563_v22  ;;  %v21539_v22 = vsel %vm20767_vm3, %v16095_v11, -inf  ;;  %v5575_v10 = vsel %vm3942_vm0, %v21533_v63, -inf  ;;  %v21555_v11 = vsel %vm20806_vm5, %v16098_v51, -inf  ;;  %v21563_v5 = vsel %vm20819_vm7, %v16099_v20, -inf }
 0x612   : > { %v5584_v1 = vsel %vm3942_vm0, %v21563_v5, -inf  ;;  %v21571_v51 = vsel %vm20831_vm8, %v5269_v38, -inf }
 0x613   : > { %5600 = vmax.xlane.f32.xlu1 %v5599_v8  ;;  %v5572_v8 = vsel %vm3942_vm0, %v21539_v22, -inf  ;;  %v5578_v17 = vsel %vm3942_vm0, %v21571_v51, -inf }
 0x615   : > { %5603 = vmax.xlane.f32.xlu0 %v5602_v24  ;;  %v5566_v24 = vsel %vm3942_vm0, %v21549_v13, -inf }
 0x617   : > { %5570 = vmax.xlane.f32.xlu1 %v5569_v33  ;;  %v21557_v33 = vpop.permute.xlu0 %6039 }
 0x619   : > { %5576 = vmax.xlane.f32.xlu0 %v5575_v10  ;;  %v5581_v10 = vsel %vm3942_vm0, %v21555_v11, -inf }
 0x61b   : > { %5573 = vmax.xlane.f32.xlu1 %v5572_v8 }
 0x61f   : > { %5567 = vmax.xlane.f32.xlu1 %v5566_v24 }
 0x623   : > { %5582 = vmax.xlane.f32.xlu1 %v5581_v10 }
 0x625   : > { %v5547_v8 = vpop.xlane.xlu0 %5546 }
 0x626   : > { %v16126_v30 = vpop.f32.mrb[240].mxu1  ;;  %v5637_v59 = vsub.f32 %v21411_v26, %v5547_v8 }
 0x627   : > { %v5476_v24 = vpop.f32.mrb[241].mxu1  ;;  %5585 = vmax.xlane.f32.xlu1 %v5584_v1  ;;  %v21586_v50 = vsel %vm20755_vm1, %v16126_v30, -inf }
 0x628   : > { %v16127_v46 = vpop.f32.mrb[242].mxu1  ;;  %v5544_v18 = vpop.xlane.xlu1 %5543 }
 0x629   : > { %v21576_v20 = vsel %vm20767_vm3, %v16127_v46, -inf  ;;  %v5636_v10 = vsub.f32 %v21421_v53, %v5544_v18  ;;  %v5541_v56 = vpop.xlane.xlu0 %5540  ;;  %v5479_v16 = vpop.f32.mrb[243].mxu1  ;;  %v5671_v53 = vmul.f32 1.442695, %v5637_v59 }
 0x62a   : > { %v5635_v38 = vsub.f32 %v21417_v3, %v5541_v56  ;;  %v5620_v1 = vsel %vm3942_vm0, %v21576_v20, -inf  ;;  %v21590_v46 = vsel %vm20779_vm4, %v5479_v16, -inf  ;;  %v5617_v56 = vsel %vm3942_vm0, %v21586_v50, -inf }
 0x62b   : > { %v5669_v26 = vmul.f32 1.442695, %v5636_v10  ;;  %5621 = vmax.xlane.f32.xlu0 %v5620_v1  ;;  %5579 = vmax.xlane.f32.xlu1 %v5578_v17  ;;  %v5614_v3 = vsel %vm3942_vm0, %v21590_v46, -inf  ;;  %v21599_v16 = vsel %vm20763_vm2, %v5476_v24, -inf }
 0x62c   : > { %v5667_v18 = vmul.f32 1.442695, %v5635_v38 }
 0x62d   : > { %18420 = vpow2.f32 %v5669_v26  ;;  %v5550_v8 = vpop.xlane.xlu0 %5549 }
 0x62e   : > { %18422 = vpow2.f32 %v5667_v18  ;;  %v5638_v30 = vsub.f32 %v21429_v48, %v5550_v8  ;;  %v16130_v10 = vpop.f32.mrb[244].mxu1  ;;  %v5611_v18 = vsel %vm3942_vm0, %v21599_v16, -inf }
 0x62f   : > { %5615 = vmax.xlane.f32.xlu0 %v5614_v3  ;;  %v5492_v17 = vpop.f32.mrb[245].mxu1  ;;  %v5562_v38 = vpop.xlane.xlu1 %5561  ;;  %5618 = vmax.xlane.f32.xlu1 %v5617_v56  ;;  %18424 = vpow2.f32 %v5671_v53  ;;  %v21606_v8 = vsel %vm20806_vm5, %v16130_v10, -inf }
 0x630   : > { %v5673_v59 = vmul.f32 1.442695, %v5638_v30  ;;  %v16131_v1 = vpop.f32.mrb[246].mxu1  ;;  %v5642_v3 = vsub.f32 %v21439_v25, %v5562_v38  ;;  %v5629_v29 = vsel %vm3942_vm0, %v21606_v8, -inf }
 0x631   : > { %v5559_v26 = vpop.xlane.xlu0 %5558  ;;  %v5495_v12 = vpop.f32.mrb[247].mxu1 }
 0x632   : > { %18426 = vpow2.f32 %v5673_v59  ;;  %v5641_v48 = vsub.f32 %v21435_v15, %v5559_v26  ;;  %v21615_v15 = vsel %vm20815_vm6, %v5492_v17, -inf  ;;  %v5681_v26 = vmul.f32 1.442695, %v5642_v3 }
 0x633   : > { %v5556_v24 = vpop.xlane.xlu1 %5555  ;;  %5612 = vmax.xlane.f32.xlu1 %v5611_v18  ;;  %v5623_v38 = vsel %vm3942_vm0, %v21615_v15, -inf }
 0x634   : > { %v5679_v56 = vmul.f32 1.442695, %v5641_v48  ;;  %v5640_v30 = vsub.f32 %v21445_v52, %v5556_v24 }
 0x635   : > { %v5553_v53 = vpop.xlane.xlu0 %5552 }
 0x636   : > { %v5677_v62 = vmul.f32 1.442695, %v5640_v30  ;;  %v5639_v59 = vsub.f32 %v21451_v2, %v5553_v53  ;;  %18428 = vpow2.f32 %v5679_v56 }
 0x637   : > { %v18421_v60 = vpop.eup %18420  ;;  %5630 = vmax.xlane.f32.xlu1 %v5629_v29 }
 0x638   : > { %v21617_v10 = vpop.eup %18422  ;;  %v5675_v25 = vmul.f32 1.442695, %v5639_v59  ;;  %18430 = vpow2.f32 %v5677_v62 }
 0x639   : > { %v5827_v52 = vpack.c.bf16 %v18421_v60, %v21617_v10  ;;  %v21622_v18 = vpop.eup %18424 }
 0x63a   : > { %18432 = vpow2.f32 %v5675_v25 }
 0x63b   : > { %16140 = vmatprep.mubr.msk.bf16.mxu0 %vm3942_vm0, %v5827_v52  ;;  %5624 = vmax.xlane.f32.xlu1 %v5623_v38  ;;  %18434 = vpow2.f32 %v5681_v26 }
 0x63c   : > { %v21625_v2 = vpop.eup %18426 }
 0x63d   : > { %v5828_v29 = vpack.c.bf16 %v21625_v2, %v21622_v18 }
 0x63f   : > { %16141 = vmatmul.mubr.msk.bf16.vlgmr.msra.gmra.mrb[232].mxu0 %vm3942_vm0, %v5828_v29 }
 0x640   : > { %16165 = vmatpush3.bf16.msra.mxu0 %v21354_v19  ;;  %v21632_v62 = vpop.eup %18428 }
 0x641   : > { %16166 = vmatprep.subr.bf16.mxu0 %v21545_v37 }
 0x642   : > { %v18431_v17 = vpop.eup %18430 }
 0x644   : > { %v21634_v48 = vpop.eup %18432  ;;  %16167 = vmatpush3.bf16.msra.mxu0 %v21545_v37  ;;  %v21653_v37 = vsel %vm20819_vm7, %v16131_v1, -inf }
 0x645   : > { %16168 = vmatprep.subr.bf16.mxu0 %v21565_v32  ;;  %6128 = vrot.lane.b32.xlu0 %v25117_v41, %s19347_s21  ;;  %v5829_v24 = vpack.c.bf16 %v18431_v17, %v21634_v48  ;;  %v18435_v3 = vpop.eup %18434  ;;  %v5632_v41 = vsel %vm3942_vm0, %v21653_v37, -inf }
 0x646   : > { %v5830_v19 = vpack.c.bf16 %v18435_v3, %v21632_v62  ;;  %v5752_v1 = vsel %vm3942_vm0, %v18435_v3, 0.0 }
 0x647   : > { %16144 = vmatprep.mubr.msk.bf16.mxu0 %vm3942_vm0, %v5829_v24 }
 0x648   : > { %16169 = vmatpush3.bf16.msra.mxu0 %v21565_v32  ;;  %v21659_v32 = vsel %vm20831_vm8, %v5495_v12, -inf }
 0x649   : > { %16145 = vmatmul.mubr.msk.bf16.gmra.mrb[236].mxu0 %vm3942_vm0, %v5830_v19  ;;  %16170 = vmatprep.subr.bf16.mxu0 %v21557_v33 }
 0x64a   : > { %6130 = vrot.lane.b32.xlu0 %v25120_v23, %s19347_s21  ;;  %v5626_v23 = vsel %vm3942_vm0, %v21659_v32, -inf }
 0x64c   : > { %16171 = vmatpush3.bf16.msra.mxu0 %v21557_v33  ;;  %6126 = vrot.lane.b32.xlu1 %v25114_v45, %s19347_s21  ;;  %v5734_v33 = vsel %vm3942_vm0, %v18421_v60, 0.0  ;;  %v5746_v45 = vsel %vm3942_vm0, %v18431_v17, 0.0 }
 0x669   : > { %5633 = vmax.xlane.f32.xlu0 %v5632_v41 }
 0x66d   : > { %5627 = vmax.xlane.f32.xlu0 %v5626_v23 }
 0x670   : > { %5735 = vadd.xlane.f32.xlu1 %v5734_v33 }
 0x674   : > { %5747 = vadd.xlane.f32.xlu1 %v5746_v45 }
 0x678   : > { %5753 = vadd.xlane.f32.xlu1 %v5752_v1 }
 0x683   : > { %6132 = vrot.lane.b32.xlu0 %v25123_v43, %s19347_s21 }
 0x690   : > { %v5595_v56 = vpop.xlane.xlu1 %5594 }
 0x691   : > { %v5589_v12 = vpop.xlane.xlu0 %5588  ;;  %v5653_v26 = vsub.f32 %v21473_v27, %v5595_v56 }
 0x692   : > { %v5651_v30 = vsub.f32 %v21479_v28, %v5589_v12 }
 0x693   : > { %v5703_v29 = vmul.f32 1.442695, %v5653_v26 }
 0x694   : > { %v5598_v53 = vpop.xlane.xlu1 %5597  ;;  %v5699_v60 = vmul.f32 1.442695, %v5651_v30 }
 0x695   : > { %v5654_v59 = vsub.f32 %v21485_v34, %v5598_v53 }
 0x696   : > { %18436 = vpow2.f32 %v5699_v60 }
 0x697   : > { %v5705_v25 = vmul.f32 1.442695, %v5654_v59 }
 0x698   : > { %v5592_v52 = vpop.xlane.xlu1 %5591 }
 0x699   : > { %v5652_v38 = vsub.f32 %v21493_v42, %v5592_v52  ;;  %18438 = vpow2.f32 %v5705_v25  ;;  %v5731_v42 = vsel %vm3942_vm0, %v21617_v10, 0.0  ;;  %v5740_v52 = vsel %vm3942_vm0, %v21625_v2, 0.0 }
 0x69a   : > { %v5610_v17 = vpop.xlane.xlu0 %5609 }
 0x69b   : > { %v5701_v24 = vmul.f32 1.442695, %v5652_v38  ;;  %v5658_v43 = vsub.f32 %v21503_v61, %v5610_v17  ;;  %v18262_v17 = vld [vmem:[#allocation7 + $0x64] ss:$12 sps:$4 sm:$0xff]  }
 0x69c   : > { %v5607_v3 = vpop.xlane.xlu1 %5606  ;;  %6424 = vmatprep.subr.bf16.mxu0 %v18262_v17 }
 0x69d   : > { %18440 = vpow2.f32 %v5701_v24  ;;  %v5657_v28 = vsub.f32 %v21499_v40, %v5607_v3  ;;  %v5713_v19 = vmul.f32 1.442695, %v5658_v43  ;;  %v5743_v3 = vsel %vm3942_vm0, %v21634_v48, 0.0 }
 0x69e   : > { %18442 = vpow2.f32 %v5703_v29  ;;  %v5565_v34 = vpop.xlane.xlu0 %5564  ;;  %v18260_v29 = vld [vmem:[#allocation7 + $0x60] ss:$12 sps:$4 sm:$0xff]  }
 0x69f   : > { %v5643_v27 = vsub.f32 %v21509_v55, %v5565_v34  ;;  %v5711_v23 = vmul.f32 1.442695, %v5657_v28  ;;  %18444 = vpow2.f32 %v5713_v19  ;;  %v5737_v55 = vsel %vm3942_vm0, %v21622_v18, 0.0 }
 0x6a0   : > { %v5601_v41 = vpop.xlane.xlu1 %5600  ;;  %v21679_v12 = vpop.eup %18436 }
 0x6a1   : > { %v5655_v33 = vsub.f32 %v21515_v39, %v5601_v41  ;;  %v5683_v56 = vmul.f32 1.442695, %v5643_v27  ;;  %18446 = vpow2.f32 %v5711_v23  ;;  %v18265_v41 = vld [vmem:[#allocation7 + $0x7c] ss:$12 sps:$4 sm:$0xff]  }
 0x6a2   : > { %5732 = vadd.xlane.f32.xlu0 %v5731_v42  ;;  %v5604_v45 = vpop.xlane.xlu0 %5603  ;;  %v18263_v42 = vld [vmem:[#allocation7 + $0x78] ss:$12 sps:$4 sm:$0xff]  }
 0x6a3   : > { %v5707_v1 = vmul.f32 1.442695, %v5655_v33  ;;  %v5656_v61 = vsub.f32 %v21521_v49, %v5604_v45  ;;  %v21684_v10 = vpop.eup %18438 }
 0x6a4   : > { %v5571_v40 = vpop.xlane.xlu1 %5570 }
 0x6a5   : > { %v5709_v30 = vmul.f32 1.442695, %v5656_v61  ;;  %v5645_v53 = vsub.f32 %v21527_v0, %v5571_v40  ;;  %18448 = vpow2.f32 %v5707_v1  ;;  %v18268_v40 = vld [vmem:[#allocation7 + $0x94] ss:$12 sps:$4 sm:$0xff]  }
 0x6a6   : > { %5738 = vadd.xlane.f32.xlu0 %v5737_v55  ;;  %v5577_v39 = vpop.xlane.xlu0 %5576 }
 0x6a7   : > { %v21686_v59 = vpop.eup %18440  ;;  %18450 = vpow2.f32 %v5709_v30  ;;  %v5647_v49 = vsub.f32 %v21533_v63, %v5577_v39  ;;  %v5687_v60 = vmul.f32 1.442695, %v5645_v53  ;;  %v18266_v30 = vld [vmem:[#allocation7 + $0x90] ss:$12 sps:$4 sm:$0xff]   ;;  %v25184_v53 = vmov 0  }
 0x6a8   : > { %v21689_v26 = vpop.eup %18442  ;;  %18452 = vpow2.f32 %v5683_v56  ;;  %v5574_v25 = vpop.xlane.xlu1 %5573  ;;  %v5835_v18 = vpack.c.bf16 %v21686_v59, %v21679_v12 }
 0x6a9   : > { %v5836_v0 = vpack.c.bf16 %v21684_v10, %v21689_v26  ;;  %v5646_v38 = vsub.f32 %v21539_v22, %v5574_v25  ;;  %v5691_v63 = vmul.f32 1.442695, %v5647_v49  ;;  %18454 = vpow2.f32 %v5687_v60  ;;  %v21703_v2 = vpop.eup %18444  ;;  %v18272_v60 = vld [vmem:[#allocation7 + $0xac] ss:$12 sps:$4 sm:$0xff]  }
 0x6aa   : > { %5741 = vadd.xlane.f32.xlu0 %v5740_v52  ;;  %16172 = vmatprep.mubr.msk.bf16.mxu0 %vm3942_vm0, %v5835_v18 }
 0x6ab   : > { %16173 = vmatmul.mubr.msk.bf16.vlgmr.msra.gmra.mrb[240].mxu0 %vm3942_vm0, %v5836_v0  ;;  %v5689_v24 = vmul.f32 1.442695, %v5646_v38  ;;  %v21705_v22 = vpop.eup %18446  ;;  %18456 = vpow2.f32 %v5691_v63 }
 0x6ac   : > { %v5568_v43 = vpop.xlane.xlu1 %5567  ;;  %6425 = vmatpush1.bf16.msra.mxu0 %v18260_v29  ;;  %v5838_v61 = vpack.c.bf16 %v21703_v2, %v21705_v22 }
 0x6ad   : > { %v5644_v28 = vsub.f32 %v21549_v13, %v5568_v43  ;;  %18458 = vpow2.f32 %v5689_v24  ;;  %v5749_v13 = vsel %vm3942_vm0, %v21632_v62, 0.0  ;;  %6426 = vmatprep.subr.bf16.mxu0 %v18265_v41 }
 0x6ae   : > { %5744 = vadd.xlane.f32.xlu0 %v5743_v3 }
 0x6af   : > { %v5685_v34 = vmul.f32 1.442695, %v5644_v28  ;;  %v21707_v19 = vpop.eup %18448  ;;  %v18277_v28 = vld [vmem:[#allocation7 + $0x4] ss:$12 sps:$4 sm:$0xff]  }
 0x6b0   : > { %v5583_v27 = vpop.xlane.xlu1 %5582  ;;  %6427 = vmatpush1.bf16.msra.mxu0 %v18263_v42 }
 0x6b1   : > { %v21709_v23 = vpop.eup %18450  ;;  %18460 = vpow2.f32 %v5685_v34  ;;  %v5649_v48 = vsub.f32 %v21555_v11, %v5583_v27  ;;  %6428 = vmatprep.subr.bf16.mxu0 %v18268_v40 }
 0x6b2   : > { %v18453_v33 = vpop.eup %18452  ;;  %5750 = vadd.xlane.f32.xlu0 %v5749_v13  ;;  %v5837_v45 = vpack.c.bf16 %v21709_v23, %v21707_v19 }
 0x6b3   : > { %v5695_v1 = vmul.f32 1.442695, %v5649_v48  ;;  %v5755_v62 = vsel %vm3942_vm0, %v18453_v33, 0.0  ;;  %v18455_v55 = vpop.eup %18454 }
 0x6b4   : > { %16176 = vmatprep.mubr.msk.bf16.mxu0 %vm3942_vm0, %v5837_v45  ;;  %v5586_v56 = vpop.xlane.xlu1 %5585  ;;  %6429 = vmatpush1.bf16.msra.mxu0 %v18266_v30  ;;  %v5761_v0 = vsel %vm3942_vm0, %v18455_v55, 0.0 }
 0x6b5   : > { %18462 = vpow2.f32 %v5695_v1  ;;  %v5650_v11 = vsub.f32 %v21563_v5, %v5586_v56  ;;  %16177 = vmatmul.mubr.msk.bf16.gmra.mrb[244].mxu0 %vm3942_vm0, %v5838_v61  ;;  %v18457_v25 = vpop.eup %18456  ;;  %v18270_v5 = vld [vmem:[#allocation7 + $0xa8] ss:$12 sps:$4 sm:$0xff]   ;;  %6430 = vmatprep.subr.bf16.mxu0 %v18272_v60  ;;  %v5779_v56 = vsel %vm3942_vm0, %v21679_v12, 0.0 }
 0x6b6   : > { %5756 = vadd.xlane.f32.xlu0 %v5755_v62  ;;  %6456 = vmatprep.mubr.bf16.mxu0 %v25184_v53  ;;  %v5767_v41 = vsel %vm3942_vm0, %v18457_v25, 0.0 }
 0x6b7   : > { %v5697_v18 = vmul.f32 1.442695, %v5650_v11  ;;  %v18459_v38 = vpop.eup %18458 }
 0x6b8   : > { %v21723_v39 = vpop.xlane.xlu0 %5621  ;;  %v5580_v49 = vpop.xlane.xlu1 %5579  ;;  %6431 = vmatpush1.bf16.msra.mxu0 %v18270_v5  ;;  %v5832_v34 = vpack.c.bf16 %v18459_v38, %v18455_v55  ;;  %v5764_v42 = vsel %vm3942_vm0, %v18459_v38, 0.0 }
 0x6b9   : > { %v5648_v52 = vsub.f32 %v21571_v51, %v5580_v49  ;;  %18464 = vpow2.f32 %v5697_v18  ;;  %6890 = vmatprep.subr.bf16.mxu0 %v18277_v28  ;;  %v5662_v38 = vsub.f32 %v21576_v20, %v21723_v39  ;;  %v5788_v20 = vsel %vm3942_vm0, %v21684_v10, 0.0 }
 0x6ba   : > { %5762 = vadd.xlane.f32.xlu0 %v5761_v0  ;;  %v5800_v28 = vsel %vm3942_vm0, %v21703_v2, 0.0  ;;  %v4545_v2 = vsel %vm3942_vm0, %v21091_v47, 0.0 }
 0x6bb   : > { %v18461_v63 = vpop.eup %18460  ;;  %v5693_v29 = vmul.f32 1.442695, %v5648_v52 }
 0x6bc   : > { %v5616_v17 = vpop.xlane.xlu0 %5615  ;;  %v5619_v24 = vpop.xlane.xlu1 %5618  ;;  %v5758_v43 = vsel %vm3942_vm0, %v18461_v63, 0.0  ;;  %v5831_v3 = vpack.c.bf16 %v18461_v63, %v18453_v33 }
 0x6bd   : > { %v5660_v27 = vsub.f32 %v21590_v46, %v5616_v17  ;;  %5759 = vadd.xlane.f32.xlu1 %v5758_v43  ;;  %18466 = vpow2.f32 %v5693_v29  ;;  %v5661_v1 = vsub.f32 %v21586_v50, %v5619_v24  ;;  %v5797_v29 = vsel %vm3942_vm0, %v21705_v22, 0.0 }
 0x6be   : > { %5768 = vadd.xlane.f32.xlu0 %v5767_v41  ;;  %16156 = vmatprep.mubr.msk.bf16.mxu1 %vm3942_vm0, %v5831_v3  ;;  %v5721_v24 = vmul.f32 1.442695, %v5662_v38  ;;  %v25188_v38 = vld [vmem:[#allocation93_spill] sm:$0xff] }
 0x6bf   : > { %v18463_v51 = vpop.eup %18462  ;;  %16157 = vmatmul.mubr.msk.bf16.vlgmr.msra.gmra.mrb[248].mxu1 %vm3942_vm0, %v5832_v34  ;;  %v5717_v13 = vmul.f32 1.442695, %v5660_v27  ;;  %v5719_v11 = vmul.f32 1.442695, %v5661_v1 }
 0x6c0   : > { %v5613_v48 = vpop.xlane.xlu1 %5612  ;;  %v5773_v33 = vsel %vm3942_vm0, %v18463_v51, 0.0  ;;  %v6129_v52 = vpop.permute.xlu0 %6128 }
 0x6c1   : > { %v5659_v45 = vsub.f32 %v21599_v16, %v5613_v48  ;;  %5765 = vadd.xlane.f32.xlu1 %v5764_v42  ;;  %18468 = vpow2.f32 %v5717_v13  ;;  %v5785_v16 = vsel %vm3942_vm0, %v21689_v26, 0.0  ;;  %v4539_v13 = vsel %vm3942_vm0, %v21072_v54, 0.0 }
 0x6c2   : > { %5774 = vadd.xlane.f32.xlu0 %v5773_v33  ;;  %v4551_v48 = vsel %vm3942_vm0, %v21117_v31, 0.0  ;;  %v4557_v42 = vsel %vm3942_vm0, %v21108_v14, 0.0  ;;  %v4563_v33 = vsel %vm3942_vm0, %v21198_v57, 0.0  ;;  %v4575_v14 = vsel %vm3942_vm0, %v21226_v21, 0.0 }
 0x6c3   : > { %v5715_v46 = vmul.f32 1.442695, %v5659_v45  ;;  %v18465_v40 = vpop.eup %18464  ;;  %v4587_v21 = vsel %vm3942_vm0, %v21131_v44, 0.0  ;;  %v25185_v44 = vld [vmem:[#allocation158_spill] sm:$0xff] }
 0x6c4   : > { %v5631_v61 = vpop.xlane.xlu1 %5630  ;;  %v5834_v50 = vpack.c.bf16 %v18465_v40, %v18463_v51  ;;  %v5776_v26 = vsel %vm3942_vm0, %v18465_v40, 0.0  ;;  %v6131_v17 = vpop.permute.xlu0 %6130 }
 0x6c5   : > { %18470 = vpow2.f32 %v5715_v46  ;;  %v5665_v12 = vsub.f32 %v21606_v8, %v5631_v61  ;;  %v4569_v46 = vsel %vm3942_vm0, %v21206_v58, 0.0  ;;  %v4581_v58 = vsel %vm3942_vm0, %v21239_v36, 0.0  ;;  %v18278_v36 = vld [vmem:[#allocation7 + $0xb0] ss:$12 sps:$4 sm:$0xff]  }
 0x6c6   : > { %5780 = vadd.xlane.f32.xlu0 %v5779_v56  ;;  %18472 = vpow2.f32 %v5719_v11  ;;  %v18269_v56 = vld [vmem:[#allocation7 + $0x68] ss:$12 sps:$4 sm:$0xff]  }
 0x6c7   : > { %v18467_v62 = vpop.eup %18466  ;;  %v5727_v8 = vmul.f32 1.442695, %v5665_v12  ;;  %v25186_v12 = vld [vmem:[#allocation137_spill] sm:$0xff] }
 0x6c8   : > { %v5625_v30 = vpop.xlane.xlu1 %5624  ;;  %v5770_v49 = vsel %vm3942_vm0, %v18467_v62, 0.0  ;;  %v5833_v60 = vpack.c.bf16 %v18467_v62, %v18457_v25 }
 0x6c9   : > { %v5663_v55 = vsub.f32 %v21615_v15, %v5625_v30  ;;  %5771 = vadd.xlane.f32.xlu1 %v5770_v49  ;;  %v5791_v15 = vsel %vm3942_vm0, %v21707_v19, 0.0  ;;  %v5782_v19 = vsel %vm3942_vm0, %v21686_v59, 0.0  ;;  %v5794_v59 = vsel %vm3942_vm0, %v21709_v23, 0.0 }
 0x6ca   : > { %5786 = vadd.xlane.f32.xlu0 %v5785_v16  ;;  %16160 = vmatprep.mubr.msk.bf16.mxu1 %vm3942_vm0, %v5833_v60  ;;  %v4593_v30 = vsel %vm3942_vm0, %v21156_v35, 0.0  ;;  %v4599_v60 = vsel %vm3942_vm0, %v25185_v44, 0.0 }
 0x6cb   : > { %v5723_v18 = vmul.f32 1.442695, %v5663_v55  ;;  %16161 = vmatmul.mubr.msk.bf16.gmra.mrb[252].mxu1 %vm3942_vm0, %v5834_v50  ;;  %v18469_v25 = vpop.eup %18468  ;;  %v21799_v50 = vld [vmem:[#allocation7 + $0x8] ss:$12 sps:$4 sm:$0xff]  }
 0x6cc   : > { %v6127_v0 = vpop.permute.xlu1 %6126  ;;  %v5806_v27 = vsel %vm3942_vm0, %v18469_v25, 0.0 }
 0x6cd   : > { %16180 = vmatprep.subr.bf16.mxu1 %v6127_v0  ;;  %5777 = vadd.xlane.f32.xlu1 %v5776_v26  ;;  %18474 = vpow2.f32 %v5723_v18  ;;  %v4605_v18 = vsel %vm3942_vm0, %v25186_v12, 0.0  ;;  %v18279_v12 = vld [vmem:[#allocation7 + $0x18] ss:$12 sps:$4 sm:$0xff]  }
 0x6ce   : > { %5792 = vadd.xlane.f32.xlu0 %v5791_v15  ;;  %16181 = vmatpush3.bf16.msra.mxu1 %v6127_v0  ;;  %18476 = vpow2.f32 %v5727_v8  ;;  %v4611_v8 = vsel %vm3942_vm0, %v25188_v38, 0.0 }
 0x6cf   : > { %v18471_v5 = vpop.eup %18470  ;;  %16182 = vmatprep.subr.bf16.mxu1 %v6129_v52  ;;  %18478 = vpow2.f32 %v5721_v24  ;;  %v25191_v24 = vld [vmem:[#allocation154_spill] sm:$0xff] }
 0x6d0   : > { %v5839_v63 = vpack.c.bf16 %v18469_v25, %v18471_v5  ;;  %v5803_v39 = vsel %vm3942_vm0, %v18471_v5, 0.0  ;;  %v18473_v43 = vpop.eup %18472 }
 0x6d1   : > { %5783 = vadd.xlane.f32.xlu1 %v5782_v19  ;;  %v5809_v22 = vsel %vm3942_vm0, %v18473_v43, 0.0  ;;  %v25190_v19 = vld [vmem:[#allocation95_spill] sm:$0xff] }
 0x6d2   : > { %5798 = vadd.xlane.f32.xlu0 %v5797_v29  ;;  %16183 = vmatpush3.bf16.msra.mxu1 %v6129_v52  ;;  %v25187_v52 = vld [vmem:[#allocation57_spill] sm:$0xff] }
 0x6d3   : > { %16188 = vmatprep.mubr.msk.bf16.mxu1 %vm3942_vm0, %v5839_v63  ;;  %16184 = vmatprep.subr.bf16.mxu1 %v6131_v17  ;;  %v4542_v15 = vsel %vm3942_vm0, %v25187_v52, 0.0  ;;  %v25189_v63 = vld [vmem:[#allocation55_spill] sm:$0xff] }
 0x6d4   : > { %v4548_v29 = vsel %vm3942_vm0, %v25189_v63, 0.0  ;;  %v18282_v63 = vld [vmem:[#allocation7 + $0x30] ss:$12 sps:$4 sm:$0xff]  }
 0x6d5   : > { %5789 = vadd.xlane.f32.xlu1 %v5788_v20  ;;  %v4554_v20 = vsel %vm3942_vm0, %v25191_v24, 0.0 }
 0x6d6   : > { %5804 = vadd.xlane.f32.xlu0 %v5803_v39  ;;  %16185 = vmatpush3.bf16.msra.mxu1 %v6131_v17  ;;  %v4617_v17 = vsel %vm3942_vm0, %v25190_v19, 0.0 }
 0x6d7   : > { %v21761_v3 = vpop.eup %18474 }
 0x6d8   : > { %v5815_v10 = vsel %vm3942_vm0, %v21761_v3, 0.0  ;;  %v18477_v34 = vpop.eup %18476 }
 0x6d9   : > { %5795 = vadd.xlane.f32.xlu1 %v5794_v59  ;;  %v5821_v41 = vsel %vm3942_vm0, %v18477_v34, 0.0  ;;  %v18479_v23 = vpop.eup %18478  ;;  %v25192_v59 = vld [vmem:[#allocation147_spill] sm:$0xff] }
 0x6da   : > { %5810 = vadd.xlane.f32.xlu0 %v5809_v22  ;;  %v5812_v51 = vsel %vm3942_vm0, %v18479_v23, 0.0  ;;  %v5840_v57 = vpack.c.bf16 %v18479_v23, %v18473_v43  ;;  %v4623_v22 = vsel %vm3942_vm0, %v25192_v59, 0.0  ;;  %v25195_v23 = vld [vmem:[#allocation138_spill] sm:$0xff] }
 0x6dd   : > { %5801 = vadd.xlane.f32.xlu1 %v5800_v28  ;;  %v25193_v28 = vld [vmem:[#allocation153_spill] sm:$0xff] }
 0x6de   : > { %5816 = vadd.xlane.f32.xlu0 %v5815_v10  ;;  %v4560_v10 = vsel %vm3942_vm0, %v25193_v28, 0.0 }
 0x6e1   : > { %5807 = vadd.xlane.f32.xlu1 %v5806_v27  ;;  %v25194_v27 = vld [vmem:[#allocation98_spill] sm:$0xff] }
 0x6e2   : > { %5822 = vadd.xlane.f32.xlu0 %v5821_v41  ;;  %v4629_v41 = vsel %vm3942_vm0, %v25194_v27, 0.0 }
 0x6e5   : > { %5813 = vadd.xlane.f32.xlu1 %v5812_v51  ;;  %v4566_v51 = vsel %vm3942_vm0, %v25195_v23, 0.0 }
 0x6e6   : > { %4540 = vadd.xlane.f32.xlu0 %v4539_v13  ;;  %v25196_v13 = vld [vmem:[#allocation18_spill] sm:$0xff] }
 0x6ea   : > { %4546 = vadd.xlane.f32.xlu0 %v4545_v2  ;;  %v4572_v2 = vsel %vm3942_vm0, %v25196_v13, 0.0  ;;  %v18290_v13 = vld [vmem:[#allocation7 + $0x38] ss:$12 sps:$4 sm:$0xff]  }
 0x6ee   : > { %4552 = vadd.xlane.f32.xlu0 %v4551_v48  ;;  %v25197_v48 = vld [vmem:[#allocation47_spill] sm:$0xff] }
 0x6f2   : > { %4558 = vadd.xlane.f32.xlu0 %v4557_v42  ;;  %v4578_v42 = vsel %vm3942_vm0, %v25197_v48, 0.0 }
 0x6f6   : > { %v5634_v45 = vpop.xlane.xlu0 %5633  ;;  %4564 = vadd.xlane.f32.xlu0 %v4563_v33 }
 0x6f7   : > { %v5666_v54 = vsub.f32 %v21653_v37, %v5634_v45  ;;  %v18273_v37 = vld [vmem:[#allocation7 + $0x80] ss:$12 sps:$4 sm:$0xff]  }
 0x6f8   : > { %v25198_v45 = vld [vmem:[#allocation145_spill] sm:$0xff] }
 0x6f9   : > { %v5729_v47 = vmul.f32 1.442695, %v5666_v54  ;;  %v4584_v54 = vsel %vm3942_vm0, %v25198_v45, 0.0 }
 0x6fa   : > { %v5628_v1 = vpop.xlane.xlu0 %5627  ;;  %4570 = vadd.xlane.f32.xlu0 %v4569_v46 }
 0x6fb   : > { %v5664_v31 = vsub.f32 %v21659_v32, %v5628_v1  ;;  %18480 = vpow2.f32 %v5729_v47  ;;  %v18274_v32 = vld [vmem:[#allocation7 + $0x98] ss:$12 sps:$4 sm:$0xff]  }
 0x6fc   : > { %v25199_v47 = vld [vmem:[#allocation155_spill] sm:$0xff] }
 0x6fd   : > { %v5725_v61 = vmul.f32 1.442695, %v5664_v31  ;;  %v5736_v33 = vpop.xlane.xlu1 %5735  ;;  %v4590_v1 = vsel %vm3942_vm0, %v25199_v47, 0.0  ;;  %v25208_v47 = vld [vmem:[#allocation64_spill] sm:$0xff] }
 0x6fe   : > { %v6133_v40 = vpop.permute.xlu0 %6132  ;;  %4576 = vadd.xlane.f32.xlu0 %v4575_v14  ;;  %v25200_v14 = vld [vmem:[#allocation156_spill] sm:$0xff] }
 0x6ff   : > { %18482 = vpow2.f32 %v5725_v61  ;;  %16186 = vmatprep.subr.bf16.mxu1 %v6133_v40 }
 0x700   : > { %16187 = vmatpush3.bf16.msra.mxu1 %v6133_v40  ;;  %18484 = vrcp.f32 %v5736_v33  ;;  %v25207_v33 = vld [vmem:[#allocation35_spill] sm:$0xff] }
 0x701   : > { %16196 = vmatprep.subr.bf16.mxu1 %v18269_v56  ;;  %v5748_v61 = vpop.xlane.xlu1 %5747  ;;  %v4632_v45 = vsel %vm3942_vm0, %v25207_v33, 0.0 }
 0x702   : > { %4582 = vadd.xlane.f32.xlu0 %v4581_v58 }
 0x703   : > { %16189 = vmatmul.mubr.msk.bf16.vlgmr.msra.gmra.mrb[0].mxu1 %vm3942_vm0, %v5840_v57 }
 0x704   : > { %16197 = vmatpush3.bf16.msra.mxu1 %v18269_v56  ;;  %v4596_v56 = vsel %vm3942_vm0, %v25200_v14, 0.0 }
 0x705   : > { %16198 = vmatprep.subr.bf16.mxu1 %v18273_v37  ;;  %v18481_v62 = vpop.eup %18480 }
 0x706   : > { %4588 = vadd.xlane.f32.xlu0 %v4587_v21  ;;  %v5842_v49 = vpack.c.bf16 %v18481_v62, %v18477_v34  ;;  %v5824_v35 = vsel %vm3942_vm0, %v18481_v62, 0.0 }
 0x708   : > { %16199 = vmatpush3.bf16.msra.mxu1 %v18273_v37  ;;  %v25201_v37 = vld [vmem:[#allocation157_spill] sm:$0xff] }
 0x709   : > { %v18483_v11 = vpop.eup %18482  ;;  %16200 = vmatprep.subr.bf16.mxu1 %v18274_v32  ;;  %v4602_v21 = vsel %vm3942_vm0, %v25201_v37, 0.0 }
 0x70a   : > { %v5818_v55 = vsel %vm3942_vm0, %v18483_v11, 0.0  ;;  %4594 = vadd.xlane.f32.xlu0 %v4593_v30  ;;  %v5841_v16 = vpack.c.bf16 %v18483_v11, %v21761_v3  ;;  %v18485_v57 = vpop.eup %18484  ;;  %v5754_v30 = vpop.xlane.xlu1 %5753 }
 0x70b   : > { %5819 = vadd.xlane.f32.xlu1 %v5818_v55 }
 0x70c   : > { %16192 = vmatprep.mubr.msk.bf16.mxu1 %vm3942_vm0, %v5841_v16  ;;  %16201 = vmatpush3.bf16.msra.mxu1 %v18274_v32  ;;  %v18281_v16 = vld [vmem:[#allocation7 + $0x1c] ss:$12 sps:$4 sm:$0xff]  }
 0x70d   : > { %16193 = vmatmul.mubr.msk.bf16.gmra.mrb[4].mxu1 %vm3942_vm0, %v5842_v49  ;;  %16202 = vmatprep.subr.bf16.mxu1 %v18278_v36  ;;  %v25202_v49 = vld [vmem:[#allocation159_spill] sm:$0xff] }
 0x70e   : > { %4600 = vadd.xlane.f32.xlu0 %v4599_v60  ;;  %v4608_v44 = vsel %vm3942_vm0, %v25202_v49, 0.0 }
 0x70f   : > { %5825 = vadd.xlane.f32.xlu1 %v5824_v35 }
 0x710   : > { %16203 = vmatpush3.bf16.msra.mxu1 %v18278_v36  ;;  %v18275_v36 = vld [vmem:[#allocation7] ss:$12 sps:$4 sm:$0xff]  }
 0x711   : > { %16236 = vmatprep.subr.bf16.mxu1 %v21799_v50 }
 0x712   : > { %v21805_v0 = vpop.f32.mrb[232].mxu0  ;;  %4606 = vadd.xlane.f32.xlu0 %v4605_v18  ;;  %v18284_v18 = vld [vmem:[#allocation7 + $0x34] ss:$12 sps:$4 sm:$0xff]  }
 0x713   : > { %4543 = vadd.xlane.f32.xlu1 %v4542_v15  ;;  %v5905_v26 = vpop.f32.mrb[233].mxu0  ;;  %v25203_v15 = vld [vmem:[#allocation60_spill] sm:$0xff] }
 0x714   : > { %v21809_v25 = vpop.f32.mrb[234].mxu0 }
 0x715   : > { %v5908_v5 = vpop.f32.mrb[235].mxu0 }
 0x716   : > { %4612 = vadd.xlane.f32.xlu0 %v4611_v8  ;;  %v6248_v32 = vmul.f32 %v18485_v57, %v5908_v5 }
 0x717   : > { %4549 = vadd.xlane.f32.xlu1 %v4548_v29 }
 0x71a   : > { %4618 = vadd.xlane.f32.xlu0 %v4617_v17  ;;  %v18288_v17 = vld [vmem:[#allocation7 + $0x4c] ss:$12 sps:$4 sm:$0xff]  }
 0x71b   : > { %4555 = vadd.xlane.f32.xlu1 %v4554_v20  ;;  %v25204_v20 = vld [vmem:[#allocation144_spill] sm:$0xff] }
 0x71c   : > { %v21819_v39 = vpop.f32.mrb[236].mxu0  ;;  %v4620_v59 = vsel %vm3942_vm0, %v25204_v20, 0.0 }
 0x71d   : > { %v21821_v43 = vpop.f32.mrb[237].mxu0 }
 0x71e   : > { %v21825_v3 = vpop.f32.mrb[238].mxu0  ;;  %4624 = vadd.xlane.f32.xlu0 %v4623_v22  ;;  %v18289_v22 = vld [vmem:[#allocation7 + $0x20] ss:$12 sps:$4 sm:$0xff]  }
 0x71f   : > { %v21829_v34 = vpop.f32.mrb[239].mxu0  ;;  %4561 = vadd.xlane.f32.xlu1 %v4560_v10 }
 0x722   : > { %4630 = vadd.xlane.f32.xlu0 %v4629_v41 }
 0x723   : > { %4567 = vadd.xlane.f32.xlu1 %v4566_v51  ;;  %v25205_v51 = vld [vmem:[#allocation104_spill] sm:$0xff] }
 0x727   : > { %4573 = vadd.xlane.f32.xlu1 %v4572_v2 }
 0x72b   : > { %4579 = vadd.xlane.f32.xlu1 %v4578_v42  ;;  %v25206_v42 = vld [vmem:[#allocation94_spill] sm:$0xff] }
 0x72f   : > { %v5733_v46 = vpop.xlane.xlu0 %5732  ;;  %4585 = vadd.xlane.f32.xlu1 %v4584_v54  ;;  %v18291_v54 = vld [vmem:[#allocation7 + $0x50] ss:$12 sps:$4 sm:$0xff]  }
 0x730   : > { %18486 = vrcp.f32 %v5733_v46 }
 0x733   : > { %v5739_v31 = vpop.xlane.xlu0 %5738  ;;  %4591 = vadd.xlane.f32.xlu1 %v4590_v1 }
 0x734   : > { %18488 = vrcp.f32 %v5739_v31 }
 0x737   : > { %v5742_v40 = vpop.xlane.xlu0 %5741  ;;  %4597 = vadd.xlane.f32.xlu1 %v4596_v56 }
 0x738   : > { %18490 = vrcp.f32 %v5742_v40 }
 0x739   : > { %18492 = vrcp.f32 %v5748_v61 }
 0x73a   : > { %v18487_v58 = vpop.eup %18486 }
 0x73b   : > { %v6247_v62 = vmul.f32 %v18487_v58, %v5905_v26  ;;  %v5745_v11 = vpop.xlane.xlu0 %5744  ;;  %4603 = vadd.xlane.f32.xlu1 %v4602_v21  ;;  %v4614_v26 = vsel %vm3942_vm0, %v25203_v15, 0.0 }
 0x73c   : > { %18494 = vrcp.f32 %v5745_v11 }
 0x73d   : > { %v6279_v55 = vpack.c.bf16 %v6248_v32, %v6247_v62  ;;  %18496 = vrcp.f32 %v5754_v30 }
 0x73e   : > { %v18489_v35 = vpop.eup %18488 }
 0x73f   : > { %v5751_v60 = vpop.xlane.xlu0 %5750  ;;  %4609 = vadd.xlane.f32.xlu1 %v4608_v44  ;;  %14867 = vmatmul.mubr.msk.bf16.vlgmr.msra.gmra.mrb[248].mxu0 %vm3942_vm0, %v6279_v55  ;;  %v6249_v38 = vmul.f32 %v18489_v35, %v21805_v0 }
 0x740   : > { %18498 = vrcp.f32 %v5751_v60  ;;  %16204 = vmatprep.mubr.msk.bf16.mxu1 %vm3942_vm0, %v6279_v55  ;;  %6891 = vmatpush1.bf16.msra.mxu0 %v18275_v36 }
 0x741   : > { %6892 = vmatprep.subr.bf16.mxu0 %v18281_v16  ;;  %6466 = vmatprep.mubr.bf16.mxu0 %v25184_v53 }
 0x742   : > { %v18491_v52 = vpop.eup %18490 }
 0x743   : > { %v21854_v5 = vpop.xlane.xlu0 %5756  ;;  %4615 = vadd.xlane.f32.xlu1 %v4614_v26  ;;  %v6250_v8 = vmul.f32 %v18491_v52, %v21809_v25  ;;  %v18493_v29 = vpop.eup %18492  ;;  %v18286_v25 = vld [vmem:[#allocation7 + $0x48] ss:$12 sps:$4 sm:$0xff]  }
 0x744   : > { %6893 = vmatpush1.bf16.msra.mxu0 %v18279_v12  ;;  %v6252_v28 = vmul.f32 %v18493_v29, %v21829_v34  ;;  %v4626_v34 = vsel %vm3942_vm0, %v25205_v51, 0.0 }
 0x745   : > { %6894 = vmatprep.subr.bf16.mxu0 %v18284_v18  ;;  %v6280_v19 = vpack.c.bf16 %v6250_v8, %v6249_v38 }
 0x746   : > { %v18495_v24 = vpop.eup %18494 }
 0x747   : > { %v21861_v10 = vpop.xlane.xlu0 %5762  ;;  %4621 = vadd.xlane.f32.xlu1 %v4620_v59  ;;  %14868 = vmatmul.mubr.msk.bf16.gmra.mrb[252].mxu0 %vm3942_vm0, %v6280_v19  ;;  %v6251_v0 = vmul.f32 %v18495_v24, %v21821_v43  ;;  %v18497_v27 = vpop.eup %18496 }
 0x748   : > { %16205 = vmatmul.mubr.msk.bf16.vlgmr.msra.gmra.mrb[8].mxu1 %vm3942_vm0, %v6280_v19  ;;  %6895 = vmatpush1.bf16.msra.mxu0 %v18282_v63  ;;  %v6254_v2 = vmul.f32 %v18497_v27, %v21825_v3 }
 0x749   : > { %16237 = vmatpush3.bf16.msra.mxu1 %v21799_v50  ;;  %6896 = vmatprep.subr.bf16.mxu0 %v18288_v17  ;;  %v6281_v41 = vpack.c.bf16 %v6252_v28, %v6251_v0 }
 0x74a   : > { %v18499_v23 = vpop.eup %18498  ;;  %16238 = vmatprep.subr.bf16.mxu1 %v18289_v22  ;;  %6476 = vmatprep.mubr.bf16.mxu0 %v25184_v53  ;;  %v5760_v46 = vpop.xlane.xlu1 %5759 }
 0x74b   : > { %v6253_v43 = vmul.f32 %v18499_v23, %v21819_v39  ;;  %v21872_v48 = vpop.xlane.xlu0 %5768  ;;  %4627 = vadd.xlane.f32.xlu1 %v4626_v34  ;;  %16208 = vmatprep.mubr.msk.bf16.mxu1 %vm3942_vm0, %v6281_v41 }
 0x74c   : > { %6897 = vmatpush1.bf16.msra.mxu0 %v18286_v25 }
 0x74d   : > { %v6282_v50 = vpack.c.bf16 %v6254_v2, %v6253_v43  ;;  %16239 = vmatpush3.bf16.msra.mxu1 %v18289_v22  ;;  %16356 = vmatprep.subr.bf16.mxu0 %v25206_v42 }
 0x74e   : > { %16240 = vmatprep.subr.bf16.mxu1 %v18290_v13  ;;  %v5766_v31 = vpop.xlane.xlu1 %5765 }
 0x74f   : > { %4633 = vadd.xlane.f32.xlu1 %v4632_v45  ;;  %14869 = vmatmul.mubr.msk.bf16.gmra.mrb[0].mxu0 %vm3942_vm0, %v6281_v41  ;;  %v21879_v3 = vpop.xlane.xlu0 %5774 }
 0x750   : > { %16209 = vmatmul.mubr.msk.bf16.gmra.mrb[12].mxu1 %vm3942_vm0, %v6282_v50  ;;  %6486 = vmatprep.mubr.bf16.mxu0 %v25184_v53 }
 0x751   : > { %16241 = vmatpush3.bf16.msra.mxu1 %v18290_v13 }
 0x752   : > { %16242 = vmatprep.subr.bf16.mxu1 %v18291_v54 }
 0x753   : > { %v5781_v39 = vpop.xlane.xlu0 %5780 }
 0x754   : > { %18500 = vrcp.f32 %v5781_v39 }
 0x755   : > { %16243 = vmatpush3.bf16.msra.mxu1 %v18291_v54 }
 0x756   : > { %17740 = vmatprep.subr.msk.bf16.mxu1 %vm3942_vm0, %v25208_v47  ;;  %v21887_v14 = vpop.xlane.xlu1 %5771 }
 0x757   : > { %14870 = vmatmul.mubr.msk.bf16.gmra.mrb[4].mxu0 %vm3942_vm0, %v6282_v50  ;;  %v5787_v1 = vpop.xlane.xlu0 %5786 }
 0x758   : > { %6496 = vmatprep.mubr.bf16.mxu0 %v25184_v53  ;;  %18502 = vrcp.f32 %v5787_v1 }
 0x75a   : > { %v21889_v40 = vpop.xlane.xlu1 %5777 }
 0x75b   : > { %v5793_v61 = vpop.xlane.xlu0 %5792 }
 0x75e   : > { %v5784_v58 = vpop.xlane.xlu1 %5783  ;;  %v18501_v55 = vpop.eup %18500 }
 0x75f   : > { %v5799_v56 = vpop.xlane.xlu0 %5798 }
 0x762   : > { %v5790_v21 = vpop.xlane.xlu1 %5789  ;;  %v18503_v49 = vpop.eup %18502 }
 0x763   : > { %v21891_v57 = vpop.xlane.xlu0 %5804  ;;  %18504 = vrcp.f32 %v5790_v21 }
 0x764   : > { %18506 = vrcp.f32 %v5784_v58 }
 0x765   : > { %18508 = vrcp.f32 %v5793_v61 }
 0x766   : > { %v5796_v62 = vpop.xlane.xlu1 %5795  ;;  %18510 = vrcp.f32 %v5799_v56 }
 0x767   : > { %v21893_v37 = vpop.xlane.xlu0 %5810 }
 0x76a   : > { %v5802_v30 = vpop.xlane.xlu1 %5801 }
 0x76b   : > { %v21895_v32 = vpop.xlane.xlu0 %5816  ;;  %18512 = vrcp.f32 %v5802_v30 }
 0x76c   : > { %18514 = vrcp.f32 %v5796_v62 }
 0x76d   : > { %v18505_v60 = vpop.eup %18504  ;;  %18516 = vrcp.f32 %v21854_v5 }
 0x76e   : > { %v18507_v12 = vpop.eup %18506  ;;  %18518 = vrcp.f32 %v21861_v10  ;;  %v21913_v5 = vpop.xlane.xlu1 %5807 }
 0x76f   : > { %v21897_v11 = vpop.xlane.xlu0 %5822  ;;  %v18509_v19 = vpop.eup %18508  ;;  %18520 = vrcp.f32 %v5766_v31 }
 0x770   : > { %v18511_v24 = vpop.eup %18510  ;;  %18522 = vrcp.f32 %v5760_v46 }
 0x771   : > { %18524 = vrcp.f32 %v21872_v48 }
 0x772   : > { %v21917_v54 = vpop.xlane.xlu1 %5813  ;;  %18526 = vrcp.f32 %v21879_v3 }
 0x773   : > { %v21899_v36 = vpop.xlane.xlu0 %4540  ;;  %18528 = vrcp.f32 %v21889_v40 }
 0x774   : > { %18530 = vrcp.f32 %v21887_v14 }
 0x775   : > { %v18513_v22 = vpop.eup %18512  ;;  %18532 = vrcp.f32 %v21899_v36 }
 0x776   : > { %v18515_v0 = vpop.eup %18514 }
 0x777   : > { %v21901_v8 = vpop.xlane.xlu0 %4546  ;;  %v18517_v2 = vpop.eup %18516 }
 0x778   : > { %v18519_v50 = vpop.eup %18518 }
 0x779   : > { %v18521_v45 = vpop.eup %18520 }
 0x77a   : > { %v18523_v46 = vpop.eup %18522 }
 0x77b   : > { %v21909_v20 = vpop.xlane.xlu0 %4552 }
 0x77e   : > { %v16174_v16 = vpop.f32.mrb[240].mxu0 }
 0x77f   : > { %v6091_v44 = vpop.f32.mrb[241].mxu0  ;;  %v6265_v18 = vmul.f32 %v18503_v49, %v16174_v16  ;;  %v4559_v10 = vpop.xlane.xlu0 %4558 }
 0x780   : > { %v16175_v35 = vpop.f32.mrb[242].mxu0  ;;  %v6263_v26 = vmul.f32 %v18501_v55, %v6091_v44  ;;  %v18525_v16 = vpop.eup %18524 }
 0x781   : > { %v6266_v52 = vmul.f32 %v18505_v60, %v16175_v35  ;;  %v6094_v15 = vpop.f32.mrb[243].mxu0  ;;  %v18527_v49 = vpop.eup %18526 }
 0x782   : > { %v6264_v38 = vmul.f32 %v18507_v12, %v6094_v15  ;;  %v18529_v60 = vpop.eup %18528 }
 0x783   : > { %v21903_v63 = vpack.c.bf16 %v6266_v52, %v6265_v18  ;;  %v4565_v1 = vpop.xlane.xlu0 %4564  ;;  %v18531_v18 = vpop.eup %18530 }
 0x784   : > { %v21905_v29 = vpack.c.bf16 %v6264_v38, %v6263_v26 }
 0x787   : > { %v4571_v48 = vpop.xlane.xlu0 %4570 }
 0x788   : > { %v16178_v17 = vpop.f32.mrb[244].mxu0 }
 0x789   : > { %v6107_v59 = vpop.f32.mrb[245].mxu0  ;;  %v6269_v25 = vmul.f32 %v18511_v24, %v16178_v17 }
 0x78a   : > { %v16179_v28 = vpop.f32.mrb[246].mxu0  ;;  %v6267_v23 = vmul.f32 %v18509_v19, %v6107_v59 }
 0x78b   : > { %v6270_v27 = vmul.f32 %v18513_v22, %v16179_v28  ;;  %v6110_v41 = vpop.f32.mrb[247].mxu0  ;;  %v4577_v35 = vpop.xlane.xlu0 %4576 }
 0x78c   : > { %v6268_v51 = vmul.f32 %v18515_v0, %v6110_v41  ;;  %v18533_v28 = vpop.eup %18532 }
 0x78d   : > { %v21911_v34 = vpack.c.bf16 %v6270_v27, %v6269_v25  ;;  %v25209_v25 = vld [vmem:[#allocation37_spill] sm:$0xff] }
 0x78e   : > { %v21915_v13 = vpack.c.bf16 %v6268_v51, %v6267_v23  ;;  %v25210_v27 = vld [vmem:[#allocation149_spill] sm:$0xff] }
 0x78f   : > { %v4583_v59 = vpop.xlane.xlu0 %4582 }
 0x792   : > { %v16158_v43 = vpop.f32.mrb[248].mxu1 }
 0x793   : > { %v5998_v33 = vpop.f32.mrb[249].mxu1  ;;  %v6257_v31 = vmul.f32 %v18519_v50, %v16158_v43  ;;  %v4589_v51 = vpop.xlane.xlu0 %4588  ;;  %v25211_v50 = vld [vmem:[#allocation106_spill] sm:$0xff] }
 0x794   : > { %v16159_v39 = vpop.f32.mrb[250].mxu1  ;;  %v6255_v58 = vmul.f32 %v18517_v2, %v5998_v33 }
 0x795   : > { %v6258_v61 = vmul.f32 %v18521_v45, %v16159_v39  ;;  %v6001_v56 = vpop.f32.mrb[251].mxu1  ;;  %v25212_v45 = vld [vmem:[#allocation108_spill] sm:$0xff] }
 0x796   : > { %v6256_v21 = vmul.f32 %v18523_v46, %v6001_v56 }
 0x797   : > { %v6284_v62 = vpack.c.bf16 %v6258_v61, %v6257_v31 }
 0x798   : > { %v6283_v30 = vpack.c.bf16 %v6256_v21, %v6255_v58  ;;  %v21923_v55 = vpop.xlane.xlu1 %5819  ;;  %v25213_v58 = vld [vmem:[#allocation110_spill] sm:$0xff] }
 0x79a   : > { %14871 = vmatmul.mubr.msk.bf16.gmra.mrb[8].mxu0 %vm3942_vm0, %v6283_v30  ;;  %16212 = vmatprep.mubr.msk.bf16.mxu1 %vm3942_vm0, %v6283_v30 }
 0x79b   : > { %16213 = vmatmul.mubr.msk.bf16.gmra.mrb[16].mxu1 %vm3942_vm0, %v6284_v62  ;;  %6506 = vmatprep.mubr.bf16.mxu0 %v25184_v53 }
 0x79c   : > { %v21929_v3 = vpop.xlane.xlu1 %5825 }
 0x79e   : > { %v16162_v40 = vpop.f32.mrb[252].mxu1 }
 0x79f   : > { %v6014_v44 = vpop.f32.mrb[253].mxu1  ;;  %v6261_v52 = vmul.f32 %v18527_v49, %v16162_v40 }
 0x7a0   : > { %v4544_v14 = vpop.xlane.xlu1 %4543  ;;  %v16163_v12 = vpop.f32.mrb[254].mxu1  ;;  %v6259_v38 = vmul.f32 %v18525_v16, %v6014_v44 }
 0x7a1   : > { %18534 = vrcp.f32 %v4544_v14  ;;  %v6262_v15 = vmul.f32 %v18529_v60, %v16163_v12  ;;  %v6017_v26 = vpop.f32.mrb[255].mxu1  ;;  %v25215_v14 = vld [vmem:[#allocation63_spill] sm:$0xff]  ;;  %v25216_v60 = vld [vmem:[#allocation42_spill] sm:$0xff] }
 0x7a2   : > { %14872 = vmatmul.mubr.msk.bf16.gmra.mrb[12].mxu0 %vm3942_vm0, %v6284_v62  ;;  %18536 = vrcp.f32 %v21901_v8  ;;  %v6260_v19 = vmul.f32 %v18531_v18, %v6017_v26  ;;  %v25214_v62 = vld [vmem:[#allocation146_spill] sm:$0xff] }
 0x7a3   : > { %6516 = vmatprep.mubr.bf16.mxu0 %v25184_v53  ;;  %v6286_v36 = vpack.c.bf16 %v6262_v15, %v6261_v52 }
 0x7a4   : > { %v4550_v17 = vpop.xlane.xlu1 %4549  ;;  %v6285_v24 = vpack.c.bf16 %v6260_v19, %v6259_v38  ;;  %v25217_v38 = vld [vmem:[#allocation143_spill] sm:$0xff] }
 0x7a5   : > { %18538 = vrcp.f32 %v4550_v17 }
 0x7a6   : > { %18540 = vrcp.f32 %v21909_v20  ;;  %16216 = vmatprep.mubr.msk.bf16.mxu1 %vm3942_vm0, %v6285_v24  ;;  %v4991_v20 = vmul.f32 %v18533_v28, %v25209_v25 }
 0x7a7   : > { %16217 = vmatmul.mubr.msk.bf16.gmra.mrb[20].mxu1 %vm3942_vm0, %v6286_v36 }
 0x7a8   : > { %v4556_v22 = vpop.xlane.xlu1 %4555  ;;  %16220 = vmatprep.mubr.msk.bf16.mxu1 %vm3942_vm0, %v21905_v29 }
 0x7a9   : > { %18542 = vrcp.f32 %v4556_v22 }
 0x7aa   : > { %14873 = vmatmul.mubr.msk.bf16.gmra.mrb[16].mxu0 %vm3942_vm0, %v6285_v24  ;;  %18544 = vrcp.f32 %v4559_v10 }
 0x7ab   : > { %v18535_v8 = vpop.eup %18534  ;;  %6526 = vmatprep.mubr.bf16.mxu0 %v25184_v53 }
 0x7ac   : > { %v4562_v0 = vpop.xlane.xlu1 %4561  ;;  %v4992_v41 = vmul.f32 %v18535_v8, %v25210_v27  ;;  %v18537_v23 = vpop.eup %18536 }
 0x7ad   : > { %18546 = vrcp.f32 %v4562_v0  ;;  %v4993_v33 = vmul.f32 %v18537_v23, %v25211_v50  ;;  %v25219_v0 = vld [vmem:[#allocation139_spill] sm:$0xff]  ;;  %v25221_v50 = vld [vmem:[#allocation160_spill] sm:$0xff] }
 0x7ae   : > { %v21944_v2 = vpack.c.bf16 %v4992_v41, %v4991_v20  ;;  %18548 = vrcp.f32 %v4565_v1  ;;  %v4595_v1 = vpop.xlane.xlu0 %4594  ;;  %v25220_v20 = vld [vmem:[#allocation148_spill] sm:$0xff] }
 0x7af   : > { %v18539_v43 = vpop.eup %18538  ;;  %16221 = vmatmul.mubr.msk.bf16.gmra.mrb[24].mxu1 %vm3942_vm0, %v21903_v63 }
 0x7b0   : > { %v4994_v39 = vmul.f32 %v18539_v43, %v25212_v45  ;;  %v4568_v46 = vpop.xlane.xlu1 %4567  ;;  %v18541_v10 = vpop.eup %18540  ;;  %16224 = vmatprep.mubr.msk.bf16.mxu1 %vm3942_vm0, %v21915_v13 }
 0x7b1   : > { %18550 = vrcp.f32 %v4568_v46  ;;  %v4995_v21 = vmul.f32 %v18541_v10, %v25213_v58  ;;  %v25224_v58 = vld [vmem:[#allocation161_spill] sm:$0xff] }
 0x7b2   : > { %v21952_v31 = vpack.c.bf16 %v4994_v39, %v4993_v33  ;;  %14874 = vmatmul.mubr.msk.bf16.gmra.mrb[20].mxu0 %vm3942_vm0, %v6286_v36  ;;  %18552 = vrcp.f32 %v4571_v48  ;;  %v4601_v52 = vpop.xlane.xlu0 %4600  ;;  %v25218_v36 = vld [vmem:[#allocation151_spill] sm:$0xff]  ;;  %v25222_v33 = vld [vmem:[#allocation162_spill] sm:$0xff] }
 0x7b3   : > { %v18543_v61 = vpop.eup %18542  ;;  %6536 = vmatprep.mubr.bf16.mxu0 %v25184_v53 }
 0x7b4   : > { %v4574_v56 = vpop.xlane.xlu1 %4573  ;;  %v4996_v30 = vmul.f32 %v18543_v61, %v25214_v62  ;;  %v18545_v16 = vpop.eup %18544 }
 0x7b5   : > { %18554 = vrcp.f32 %v4574_v56  ;;  %v4997_v44 = vmul.f32 %v18545_v16, %v25215_v14  ;;  %v25223_v56 = vld [vmem:[#allocation152_spill] sm:$0xff] }
 0x7b6   : > { %v21958_v40 = vpack.c.bf16 %v4996_v30, %v4995_v21  ;;  %18556 = vrcp.f32 %v4577_v35  ;;  %v4607_v8 = vpop.xlane.xlu0 %4606  ;;  %v25225_v14 = vld [vmem:[#allocation20_spill] sm:$0xff] }
 0x7b7   : > { %v18547_v49 = vpop.eup %18546  ;;  %16225 = vmatmul.mubr.msk.bf16.gmra.mrb[28].mxu1 %vm3942_vm0, %v21911_v34 }
 0x7b8   : > { %v4998_v12 = vmul.f32 %v18547_v49, %v25216_v60  ;;  %v4580_v18 = vpop.xlane.xlu1 %4579  ;;  %v18549_v48 = vpop.eup %18548  ;;  %v25226_v60 = vld [vmem:[#allocation142_spill] sm:$0xff] }
 0x7b9   : > { %18558 = vrcp.f32 %v4580_v18  ;;  %v4999_v19 = vmul.f32 %v18549_v48, %v25217_v38 }
 0x7ba   : > { %v21964_v15 = vpack.c.bf16 %v4998_v12, %v4997_v44  ;;  %14875 = vmatmul.mubr.msk.bf16.gmra.mrb[24].mxu0 %vm3942_vm0, %v21905_v29  ;;  %18560 = vrcp.f32 %v4583_v59  ;;  %v4613_v46 = vpop.xlane.xlu0 %4612 }
 0x7bb   : > { %v18551_v26 = vpop.eup %18550  ;;  %6546 = vmatprep.mubr.bf16.mxu0 %v25184_v53 }
 0x7bc   : > { %v4586_v35 = vpop.xlane.xlu1 %4585  ;;  %v5000_v17 = vmul.f32 %v18551_v26, %v25218_v36  ;;  %v18553_v24 = vpop.eup %18552  ;;  %v25228_v26 = vld [vmem:[#allocation85_spill] sm:$0xff] }
 0x7bd   : > { %18562 = vrcp.f32 %v4586_v35  ;;  %v5001_v25 = vmul.f32 %v18553_v24, %v25219_v0 }
 0x7be   : > { %v21971_v22 = vpack.c.bf16 %v5000_v17, %v4999_v19  ;;  %18564 = vrcp.f32 %v4589_v51  ;;  %v4619_v49 = vpop.xlane.xlu0 %4618 }
 0x7bf   : > { %v18555_v28 = vpop.eup %18554 }
 0x7c0   : > { %v5002_v29 = vmul.f32 %v18555_v28, %v25220_v20  ;;  %v4592_v27 = vpop.xlane.xlu1 %4591  ;;  %v18557_v59 = vpop.eup %18556 }
 0x7c1   : > { %18566 = vrcp.f32 %v4592_v27  ;;  %v5003_v51 = vmul.f32 %v18557_v59, %v25221_v50 }
 0x7c2   : > { %v21975_v41 = vpack.c.bf16 %v5002_v29, %v5001_v25  ;;  %14876 = vmatmul.mubr.msk.bf16.gmra.mrb[32].mxu0 %vm3942_vm0, %v21903_v63  ;;  %18568 = vrcp.f32 %v4595_v1  ;;  %v25230_v25 = vld [vmem:[#allocation141_spill] sm:$0xff] }
 0x7c3   : > { %v18559_v23 = vpop.eup %18558  ;;  %6556 = vmatprep.mubr.bf16.mxu0 %v25184_v53 }
 0x7c4   : > { %v4598_v43 = vpop.xlane.xlu1 %4597  ;;  %v5004_v45 = vmul.f32 %v18559_v23, %v25222_v33  ;;  %v18561_v39 = vpop.eup %18560  ;;  %v25232_v33 = vld [vmem:[#allocation140_spill] sm:$0xff] }
 0x7c5   : > { %18570 = vrcp.f32 %v4598_v43  ;;  %v5005_v63 = vmul.f32 %v18561_v39, %v25223_v56 }
 0x7c6   : > { %v21982_v10 = vpack.c.bf16 %v5004_v45, %v5003_v51  ;;  %18572 = vrcp.f32 %v4601_v52 }
 0x7c7   : > { %v18563_v61 = vpop.eup %18562  ;;  %18574 = vrcp.f32 %v21891_v57 }
 0x7c8   : > { %v5006_v1 = vmul.f32 %v18563_v61, %v25224_v58  ;;  %v4604_v21 = vpop.xlane.xlu1 %4603  ;;  %v18565_v62 = vpop.eup %18564 }
 0x7c9   : > { %18576 = vrcp.f32 %v4604_v21  ;;  %v5007_v44 = vmul.f32 %v18565_v62, %v25225_v14  ;;  %v25233_v14 = vld [vmem:[#allocation164_spill] sm:$0xff] }
 0x7ca   : > { %18578 = vrcp.f32 %v21893_v37  ;;  %v21988_v30 = vpack.c.bf16 %v5006_v1, %v5005_v63  ;;  %14877 = vmatmul.mubr.msk.bf16.gmra.mrb[28].mxu0 %vm3942_vm0, %v21915_v13  ;;  %v25227_v13 = vld [vmem:[#allocation150_spill] sm:$0xff] }
 0x7cb   : > { %v18567_v16 = vpop.eup %18566  ;;  %18580 = vrcp.f32 %v4607_v8  ;;  %6566 = vmatprep.mubr.bf16.mxu0 %v25184_v53  ;;  %v25229_v8 = vld [vmem:[#allocation44_spill] sm:$0xff] }
 0x7cc   : > { %18582 = vrcp.f32 %v21913_v5  ;;  %v4610_v57 = vpop.xlane.xlu1 %4609  ;;  %v5008_v12 = vmul.f32 %v18567_v16, %v25226_v60  ;;  %v18569_v18 = vpop.eup %18568  ;;  %v25234_v60 = vld [vmem:[#allocation166_spill] sm:$0xff] }
 0x7cd   : > { %18584 = vrcp.f32 %v4610_v57  ;;  %v5009_v52 = vmul.f32 %v18569_v18, %v25227_v13  ;;  %v4625_v5 = vpop.xlane.xlu0 %4624 }
 0x7ce   : > { %18586 = vrcp.f32 %v21917_v54  ;;  %v21997_v37 = vpack.c.bf16 %v5008_v12, %v5007_v44 }
 0x7cf   : > { %v18571_v48 = vpop.eup %18570  ;;  %18588 = vrcp.f32 %v4613_v46 }
 0x7d0   : > { %v5010_v35 = vmul.f32 %v18571_v48, %v25228_v26  ;;  %v4616_v38 = vpop.xlane.xlu1 %4615  ;;  %v18573_v19 = vpop.eup %18572 }
 0x7d1   : > { %18590 = vrcp.f32 %v4616_v38  ;;  %v18575_v36 = vpop.eup %18574  ;;  %v5011_v0 = vmul.f32 %v18573_v19, %v25229_v8  ;;  %v4631_v23 = vpop.xlane.xlu0 %4630  ;;  %v25236_v19 = vld [vmem:[#allocation165_spill] sm:$0xff] }
 0x7d2   : > { %18592 = vrcp.f32 %v21895_v32  ;;  %v22002_v17 = vpack.c.bf16 %v5010_v35, %v5009_v52  ;;  %14878 = vmatmul.mubr.msk.bf16.gmra.mrb[36].mxu0 %vm3942_vm0, %v21911_v34  ;;  %v25235_v35 = vld [vmem:[#allocation163_spill] sm:$0xff] }
 0x7d3   : > { %v18577_v54 = vpop.eup %18576  ;;  %18594 = vrcp.f32 %v4619_v49  ;;  %6576 = vmatprep.mubr.bf16.mxu0 %v25184_v53 }
 0x7d4   : > { %v18579_v24 = vpop.eup %18578  ;;  %18596 = vrcp.f32 %v21897_v11  ;;  %v4622_v28 = vpop.xlane.xlu1 %4621  ;;  %v5012_v20 = vmul.f32 %v18577_v54, %v25230_v25  ;;  %v25231_v11 = vld [vmem:[#allocation90_spill] sm:$0xff] }
 0x7d5   : > { %v18581_v29 = vpop.eup %18580  ;;  %18598 = vrcp.f32 %v4622_v28 }
 0x7d6   : > { %v18583_v32 = vpop.eup %18582  ;;  %18600 = vrcp.f32 %v21923_v55  ;;  %v16190_v27 = vpop.f32.mrb[0].mxu1  ;;  %v22011_v59 = vpack.c.bf16 %v5012_v20, %v5011_v0  ;;  %v5013_v51 = vmul.f32 %v18581_v29, %v25231_v11 }
 0x7d7   : > { %v18585_v34 = vpop.eup %18584  ;;  %18602 = vrcp.f32 %v4625_v5  ;;  %v6184_v43 = vpop.f32.mrb[1].mxu1  ;;  %v6273_v56 = vmul.f32 %v18579_v24, %v16190_v27 }
 0x7d8   : > { %v18587_v50 = vpop.eup %18586  ;;  %18604 = vrcp.f32 %v21929_v3  ;;  %v5014_v45 = vmul.f32 %v18585_v34, %v25232_v33  ;;  %v16191_v39 = vpop.f32.mrb[2].mxu1  ;;  %v6271_v1 = vmul.f32 %v18575_v36, %v6184_v43 }
 0x7d9   : > { %v4628_v46 = vpop.xlane.xlu1 %4627  ;;  %v18589_v61 = vpop.eup %18588  ;;  %v6274_v63 = vmul.f32 %v18587_v50, %v16191_v39  ;;  %v25238_v50 = vld [vmem:[#allocation170_spill] sm:$0xff] }
 0x7da   : > { %18606 = vrcp.f32 %v4628_v46  ;;  %v6187_v55 = vpop.f32.mrb[3].mxu1  ;;  %v22016_v58 = vpack.c.bf16 %v5014_v45, %v5013_v51  ;;  %v5015_v44 = vmul.f32 %v18589_v61, %v25233_v14  ;;  %v25239_v61 = vld [vmem:[#allocation167_spill] sm:$0xff]  ;;  %v25244_v14 = vld [vmem:[#allocation70_spill] sm:$0xff] }
 0x7db   : > { %v6272_v21 = vmul.f32 %v18583_v32, %v6187_v55  ;;  %v18591_v62 = vpop.eup %18590  ;;  %18608 = vrcp.f32 %v4631_v23  ;;  %v6292_v16 = vpack.c.bf16 %v6274_v63, %v6273_v56  ;;  %v25237_v23 = vld [vmem:[#allocation168_spill] sm:$0xff]  ;;  %v25240_v63 = vld [vmem:[#allocation169_spill] sm:$0xff] }
 0x7dc   : > { %v18593_v49 = vpop.eup %18592  ;;  %v5016_v12 = vmul.f32 %v18591_v62, %v25234_v60  ;;  %v25241_v62 = vld [vmem:[#allocation66_spill] sm:$0xff]  ;;  %v7266_v60 = vsel %vm3942_vm0, %v25244_v14, 0 }
 0x7dd   : > { %v6291_v3 = vpack.c.bf16 %v6272_v21, %v6271_v1  ;;  %v4634_v57 = vpop.xlane.xlu1 %4633  ;;  %v18595_v18 = vpop.eup %18594  ;;  %v7257_v21 = vsel %vm3942_vm0, %v25208_v47, 0 }
 0x7de   : > { %18610 = vrcp.f32 %v4634_v57  ;;  %v18597_v48 = vpop.eup %18596  ;;  %v22022_v13 = vpack.c.bf16 %v5016_v12, %v5015_v44  ;;  %v5017_v38 = vmul.f32 %v18595_v18, %v25235_v35  ;;  %v25246_v44 = vld [vmem:[#allocation99_spill] sm:$0xff]  ;;  %v25247_v12 = vld [vmem:[#allocation72_spill] sm:$0xff]  ;;  %v25252_v18 = vld [vmem:[#allocation74_spill] sm:$0xff] }
 0x7df   : > { %14879 = vmatmul.mubr.msk.bf16.gmra.mrb[40].mxu0 %vm3942_vm0, %v6291_v3  ;;  %16228 = vmatprep.mubr.msk.bf16.mxu1 %vm3942_vm0, %v6291_v3  ;;  %v18599_v52 = vpop.eup %18598  ;;  %v25243_v3 = vld [vmem:[#allocation96_spill] sm:$0xff]  ;;  %v25256_v35 = vld [vmem:[#allocation78_spill] sm:$0xff] }
 0x7e0   : > { %16229 = vmatmul.mubr.msk.bf16.gmra.mrb[32].mxu1 %vm3942_vm0, %v6292_v16  ;;  %6586 = vmatprep.mubr.bf16.mxu0 %v25184_v53  ;;  %v18601_v26 = vpop.eup %18600  ;;  %v5018_v5 = vmul.f32 %v18599_v52, %v25236_v19  ;;  %v16194_v36 = vpop.f32.mrb[4].mxu1  ;;  %v25254_v52 = vld [vmem:[#allocation14_spill] sm:$0xff]  ;;  %v25257_v19 = vld [vmem:[#allocation80_spill] sm:$0xff] }
 0x7e1   : > { %v18603_v54 = vpop.eup %18602  ;;  %v6200_v24 = vpop.f32.mrb[5].mxu1  ;;  %v6277_v20 = vmul.f32 %v18597_v48, %v16194_v36  ;;  %v7349_v48 = vsel %vm3942_vm0, %v25252_v18, 0  ;;  %v25260_v36 = vld [vmem:[#allocation82_spill] sm:$0xff] }
 0x7e2   : > { %v18605_v28 = vpop.eup %18604  ;;  %v22028_v8 = vpack.c.bf16 %v5018_v5, %v5017_v38  ;;  %v16195_v0 = vpop.f32.mrb[6].mxu1  ;;  %v6275_v27 = vmul.f32 %v18593_v49, %v6200_v24  ;;  %v5019_v43 = vmul.f32 %v18603_v54, %v25237_v23  ;;  %v25242_v49 = vld [vmem:[#allocation68_spill] sm:$0xff]  ;;  %v7355_v38 = vsel %vm3942_vm0, %v25256_v35, 0  ;;  %v25259_v5 = vld [vmem:[#allocation46_spill] sm:$0xff]  ;;  %v25270_v23 = vld [vmem:[#allocation41_spill] sm:$0xff] }
 0x7e3   : > { %v6278_v29 = vmul.f32 %v18605_v28, %v16195_v0  ;;  %v6203_v32 = vpop.f32.mrb[7].mxu1  ;;  %v7263_v57 = vsel %vm3942_vm0, %v25242_v49, 0  ;;  %v7438_v54 = vsel %vm3942_vm0, %v25260_v36, 0  ;;  %v25262_v24 = vld [vmem:[#allocation34_spill] sm:$0xff]  ;;  %v25263_v28 = vld [vmem:[#allocation23_spill] sm:$0xff]  ;;  %v25264_v0 = vld [vmem:[#allocation49_spill] sm:$0xff] }
 0x7e4   : > { %v18607_v25 = vpop.eup %18606  ;;  %v6276_v34 = vmul.f32 %v18601_v26, %v6203_v32  ;;  %v25255_v26 = vld [vmem:[#allocation76_spill] sm:$0xff] }
 0x7e5   : > { %v5020_v11 = vmul.f32 %v18607_v25, %v25238_v50  ;;  %v18609_v51 = vpop.eup %18608  ;;  %v6294_v33 = vpack.c.bf16 %v6278_v29, %v6277_v20  ;;  %v7444_v25 = vsel %vm3942_vm0, %v25264_v0, 0  ;;  %v25265_v20 = vld [vmem:[#allocation29_spill] sm:$0xff]  ;;  %v25267_v29 = vld [vmem:[#allocation38_spill] sm:$0xff]  ;;  %v25268_v32 = vld [vmem:[#allocation84_spill] sm:$0xff] }
 0x7e6   : > { %v6293_v45 = vpack.c.bf16 %v6276_v34, %v6275_v27  ;;  %v5021_v56 = vmul.f32 %v18609_v51, %v25239_v61  ;;  %v25269_v27 = vld [vmem:[#allocation39_spill] sm:$0xff]  ;;  %v7527_v34 = vsel %vm3942_vm0, %v25268_v32, 0  ;;  %v25277_v61 = vld [vmem:[#allocation89_spill] sm:$0xff] }
 0x7e7   : > { %14880 = vmatmul.mubr.msk.bf16.gmra.mrb[44].mxu0 %vm3942_vm0, %v6292_v16  ;;  %v22033_v39 = vpack.c.bf16 %v5020_v11, %v5019_v43  ;;  %v7260_v16 = vsel %vm3942_vm0, %v25241_v62, 0  ;;  %v25271_v43 = vld [vmem:[#allocation15_spill] sm:$0xff]  ;;  %v25272_v11 = vld [vmem:[#allocation40_spill] sm:$0xff] }
 0x7e8   : > { %v18611_v46 = vpop.eup %18610  ;;  %6596 = vmatprep.mubr.bf16.mxu0 %v25184_v53  ;;  %16232 = vmatprep.mubr.msk.bf16.mxu1 %vm3942_vm0, %v6293_v45  ;;  %v7530_v50 = vsel %vm3942_vm0, %v25271_v43, 0  ;;  %v7533_v51 = vsel %vm3942_vm0, %v25272_v11, 0 }
 0x7e9   : > { %v5022_v55 = vmul.f32 %v18611_v46, %v25240_v63  ;;  %16233 = vmatmul.mubr.msk.bf16.gmra.mrb[36].mxu1 %vm3942_vm0, %v6294_v33  ;;  %v25276_v46 = vld [vmem:[#allocation87_spill] sm:$0xff]  ;;  %v25279_v63 = vld [vmem:[#allocation92_spill] sm:$0xff] }
 0x7ea   : > { %16244 = vmatprep.mubr.msk.bf16.mxu1 %vm3942_vm0, %v21944_v2 }
 0x7eb   : > { %v22040_v1 = vpack.c.bf16 %v5022_v55, %v5021_v56  ;;  %v25278_v56 = vld [vmem:[#allocation21_spill] sm:$0xff]  ;;  %v25280_v55 = vld [vmem:[#allocation100_spill] sm:$0xff] }
 0x7ef   : > { %14881 = vmatmul.mubr.msk.bf16.gmra.mrb[48].mxu0 %vm3942_vm0, %v6293_v45  ;;  %v25274_v45 = vld [vmem:[#allocation43_spill] sm:$0xff] }
 0x7f0   : > { %6606 = vmatprep.mubr.bf16.mxu0 %v25184_v53 }
 0x7f1   : > { %16245 = vmatmul.mubr.msk.bf16.vlgmr.msra.gmra.mrb[8].mxu1 %vm3942_vm0, %v21952_v31 }
 0x7f2   : > { %16277 = vmatpush3.bf16.xpose.msra.mxu1 %v7257_v21  ;;  %16248 = vmatprep.mubr.msk.bf16.mxu1 %vm3942_vm0, %v21958_v40 }
 0x7f3   : > { %17741 = vmatprep.subr.msk.bf16.mxu1 %vm3942_vm0, %v25241_v62 }
 0x7f7   : > { %14882 = vmatmul.mubr.msk.bf16.gmra.mrb[52].mxu0 %vm3942_vm0, %v6294_v33  ;;  %v25273_v33 = vld [vmem:[#allocation51_spill] sm:$0xff] }
 0x7f8   : > { %6922 = vmatprep.mubr.bf16.mxu0 %v25184_v53 }
 0x7f9   : > { %16249 = vmatmul.mubr.msk.bf16.gmra.mrb[12].mxu1 %vm3942_vm0, %v21964_v15 }
 0x7fa   : > { %16279 = vmatpush3.bf16.xpose.msra.mxu1 %v7260_v16  ;;  %16252 = vmatprep.mubr.msk.bf16.mxu1 %vm3942_vm0, %v21971_v22 }
 0x7fb   : > { %17742 = vmatprep.subr.msk.bf16.mxu1 %vm3942_vm0, %v25242_v49 }
 0x7ff   : > { %14911 = vmatmul.mubr.msk.bf16.vlgmr.msra.gmra.mrb[248].mxu0 %vm3942_vm0, %v21944_v2  ;;  %v25245_v2 = vld [vmem:[#allocation97_spill] sm:$0xff] }
 0x800   : > { %16357 = vmatpush3.bf16.msra.mxu0 %v25206_v42  ;;  %6932 = vmatprep.mubr.bf16.mxu0 %v25184_v53 }
 0x801   : > { %16358 = vmatprep.subr.bf16.mxu0 %v25243_v3  ;;  %16253 = vmatmul.mubr.msk.bf16.gmra.mrb[16].mxu1 %vm3942_vm0, %v21975_v41 }
 0x802   : > { %16281 = vmatpush3.bf16.xpose.msra.mxu1 %v7263_v57  ;;  %16256 = vmatprep.mubr.msk.bf16.mxu1 %vm3942_vm0, %v21982_v10 }
 0x803   : > { %17743 = vmatprep.subr.msk.bf16.mxu1 %vm3942_vm0, %v25244_v14 }
 0x804   : > { %16359 = vmatpush3.bf16.msra.mxu0 %v25243_v3 }
 0x805   : > { %16360 = vmatprep.subr.bf16.mxu0 %v25245_v2 }
 0x807   : > { %14912 = vmatmul.mubr.msk.bf16.gmra.mrb[252].mxu0 %vm3942_vm0, %v21952_v31  ;;  %v25248_v31 = vld [vmem:[#allocation105_spill] sm:$0xff] }
 0x808   : > { %16361 = vmatpush3.bf16.msra.mxu0 %v25245_v2  ;;  %6942 = vmatprep.mubr.bf16.mxu0 %v25184_v53 }
 0x809   : > { %16362 = vmatprep.subr.bf16.mxu0 %v25246_v44  ;;  %16257 = vmatmul.mubr.msk.bf16.gmra.mrb[20].mxu1 %vm3942_vm0, %v21988_v30 }
 0x80a   : > { %16283 = vmatpush3.bf16.xpose.msra.mxu1 %v7266_v60  ;;  %16260 = vmatprep.mubr.msk.bf16.mxu1 %vm3942_vm0, %v21997_v37 }
 0x80b   : > { %17744 = vmatprep.subr.msk.bf16.mxu1 %vm3942_vm0, %v25247_v12 }
 0x80c   : > { %16363 = vmatpush3.bf16.msra.mxu0 %v25246_v44 }
 0x80d   : > { %16388 = vmatprep.subr.bf16.mxu0 %v25248_v31 }
 0x80f   : > { %14913 = vmatmul.mubr.msk.bf16.gmra.mrb[0].mxu0 %vm3942_vm0, %v21958_v40  ;;  %v25249_v40 = vld [vmem:[#allocation22_spill] sm:$0xff] }
 0x810   : > { %6952 = vmatprep.mubr.bf16.mxu0 %v25184_v53 }
 0x811   : > { %16261 = vmatmul.mubr.msk.bf16.gmra.mrb[24].mxu1 %vm3942_vm0, %v22002_v17 }
 0x812   : > { %16264 = vmatprep.mubr.msk.bf16.mxu1 %vm3942_vm0, %v22011_v59 }
 0x817   : > { %14914 = vmatmul.mubr.msk.bf16.gmra.mrb[4].mxu0 %vm3942_vm0, %v21964_v15  ;;  %v25250_v15 = vld [vmem:[#allocation24_spill] sm:$0xff] }
 0x818   : > { %6962 = vmatprep.mubr.bf16.mxu0 %v25184_v53 }
 0x819   : > { %16265 = vmatmul.mubr.msk.bf16.gmra.mrb[28].mxu1 %vm3942_vm0, %v22016_v58 }
 0x81a   : > { %16268 = vmatprep.mubr.msk.bf16.mxu1 %vm3942_vm0, %v22022_v13 }
 0x81f   : > { %14915 = vmatmul.mubr.msk.bf16.gmra.mrb[8].mxu0 %vm3942_vm0, %v21971_v22  ;;  %v7346_v22 = vsel %vm3942_vm0, %v25247_v12, 0 }
 0x820   : > { %6972 = vmatprep.mubr.bf16.mxu0 %v25184_v53 }
 0x821   : > { %16269 = vmatmul.mubr.msk.bf16.gmra.mrb[32].mxu1 %vm3942_vm0, %v22028_v8 }
 0x822   : > { %16272 = vmatprep.mubr.msk.bf16.mxu1 %vm3942_vm0, %v22033_v39 }
 0x827   : > { %14916 = vmatmul.mubr.msk.bf16.gmra.mrb[12].mxu0 %vm3942_vm0, %v21975_v41  ;;  %v25251_v41 = vld [vmem:[#allocation26_spill] sm:$0xff] }
 0x828   : > { %6982 = vmatprep.mubr.bf16.mxu0 %v25184_v53 }
 0x829   : > { %16273 = vmatmul.mubr.msk.bf16.gmra.mrb[36].mxu1 %vm3942_vm0, %v22040_v1 }
 0x82a   : > { %16284 = vmatprep.mubr.msk.bf16.mxu1 %vm3942_vm0, %v25249_v40 }
 0x82f   : > { %14917 = vmatmul.mubr.msk.bf16.gmra.mrb[16].mxu0 %vm3942_vm0, %v21982_v10  ;;  %v25253_v10 = vld [vmem:[#allocation13_spill] sm:$0xff] }
 0x830   : > { %6992 = vmatprep.mubr.bf16.mxu0 %v25184_v53 }
 0x831   : > { %16285 = vmatmul.mubr.msk.bf16.vlgmr.msra.gmra.mrb[40].mxu1 %vm3942_vm0, %v25250_v15 }
 0x832   : > { %16293 = vmatpush3.bf16.xpose.msra.mxu1 %v7346_v22  ;;  %16288 = vmatprep.mubr.msk.bf16.mxu1 %vm3942_vm0, %v25251_v41 }
 0x833   : > { %17745 = vmatprep.subr.msk.bf16.mxu1 %vm3942_vm0, %v25252_v18 }
 0x837   : > { %14918 = vmatmul.mubr.msk.bf16.gmra.mrb[20].mxu0 %vm3942_vm0, %v21988_v30  ;;  %v7352_v30 = vsel %vm3942_vm0, %v25255_v26, 0 }
 0x838   : > { %7002 = vmatprep.mubr.bf16.mxu0 %v25184_v53 }
 0x839   : > { %16289 = vmatmul.mubr.msk.bf16.gmra.mrb[44].mxu1 %vm3942_vm0, %v25253_v10 }
 0x83a   : > { %16295 = vmatpush3.bf16.xpose.msra.mxu1 %v7349_v48  ;;  %16300 = vmatprep.mubr.msk.bf16.mxu1 %vm3942_vm0, %v25254_v52 }
 0x83b   : > { %17746 = vmatprep.subr.msk.bf16.mxu1 %vm3942_vm0, %v25255_v26 }
 0x83f   : > { %14919 = vmatmul.mubr.msk.bf16.gmra.mrb[24].mxu0 %vm3942_vm0, %v21997_v37  ;;  %v25258_v37 = vld [vmem:[#allocation16_spill] sm:$0xff] }
 0x840   : > { %7012 = vmatprep.mubr.bf16.mxu0 %v25184_v53 }
 0x842   : > { %16297 = vmatpush3.bf16.xpose.msra.mxu1 %v7352_v30 }
 0x843   : > { %17747 = vmatprep.subr.msk.bf16.mxu1 %vm3942_vm0, %v25256_v35 }
 0x847   : > { %14920 = vmatmul.mubr.msk.bf16.gmra.mrb[32].mxu0 %vm3942_vm0, %v22002_v17  ;;  %v7435_v17 = vsel %vm3942_vm0, %v25257_v19, 0 }
 0x848   : > { %7022 = vmatprep.mubr.bf16.mxu0 %v25184_v53 }
 0x84a   : > { %16299 = vmatpush3.bf16.xpose.msra.mxu1 %v7355_v38 }
 0x84b   : > { %17748 = vmatprep.subr.msk.bf16.mxu1 %vm3942_vm0, %v25257_v19 }
 0x84f   : > { %14921 = vmatmul.mubr.msk.bf16.gmra.mrb[28].mxu0 %vm3942_vm0, %v22011_v59  ;;  %v25261_v59 = vld [vmem:[#allocation48_spill] sm:$0xff] }
 0x850   : > { %7032 = vmatprep.mubr.bf16.mxu0 %v25184_v53 }
 0x851   : > { %16301 = vmatmul.mubr.msk.bf16.vlgmr.msra.gmra.mrb[48].mxu1 %vm3942_vm0, %v25258_v37 }
 0x852   : > { %16304 = vmatprep.mubr.msk.bf16.mxu1 %vm3942_vm0, %v25259_v5  ;;  %16309 = vmatpush3.bf16.xpose.msra.mxu1 %v7435_v17 }
 0x853   : > { %17749 = vmatprep.subr.msk.bf16.mxu1 %vm3942_vm0, %v25260_v36 }
 0x857   : > { %14922 = vmatmul.mubr.msk.bf16.gmra.mrb[36].mxu0 %vm3942_vm0, %v22016_v58  ;;  %v7441_v58 = vsel %vm3942_vm0, %v25263_v28, 0 }
 0x858   : > { %7042 = vmatprep.mubr.bf16.mxu0 %v25184_v53 }
 0x859   : > { %16305 = vmatmul.mubr.msk.bf16.gmra.mrb[52].mxu1 %vm3942_vm0, %v25261_v59 }
 0x85a   : > { %16311 = vmatpush3.bf16.xpose.msra.mxu1 %v7438_v54  ;;  %16316 = vmatprep.mubr.msk.bf16.mxu1 %vm3942_vm0, %v25262_v24 }
 0x85b   : > { %17750 = vmatprep.subr.msk.bf16.mxu1 %vm3942_vm0, %v25263_v28 }
 0x85f   : > { %14923 = vmatmul.mubr.msk.bf16.gmra.mrb[40].mxu0 %vm3942_vm0, %v22022_v13  ;;  %v25266_v13 = vld [vmem:[#allocation36_spill] sm:$0xff] }
 0x860   : > { %7052 = vmatprep.mubr.bf16.mxu0 %v25184_v53 }
 0x862   : > { %16313 = vmatpush3.bf16.xpose.msra.mxu1 %v7441_v58 }
 0x863   : > { %17751 = vmatprep.subr.msk.bf16.mxu1 %vm3942_vm0, %v25264_v0 }
 0x867   : > { %14924 = vmatmul.mubr.msk.bf16.gmra.mrb[44].mxu0 %vm3942_vm0, %v22028_v8  ;;  %v7524_v8 = vsel %vm3942_vm0, %v25265_v20, 0 }
 0x868   : > { %7062 = vmatprep.mubr.bf16.mxu0 %v25184_v53 }
 0x86a   : > { %16315 = vmatpush3.bf16.xpose.msra.mxu1 %v7444_v25 }
 0x86b   : > { %17752 = vmatprep.subr.msk.bf16.mxu1 %vm3942_vm0, %v25265_v20 }
 0x86f   : > { %14925 = vmatmul.mubr.msk.bf16.gmra.mrb[48].mxu0 %vm3942_vm0, %v22033_v39  ;;  %v25275_v39 = vld [vmem:[#allocation45_spill] sm:$0xff] }
 0x870   : > { %7072 = vmatprep.mubr.bf16.mxu0 %v25184_v53 }
 0x871   : > { %16317 = vmatmul.mubr.msk.bf16.vlgmr.msra.gmra.mrb[56].mxu1 %vm3942_vm0, %v25266_v13 }
 0x872   : > { %16320 = vmatprep.mubr.msk.bf16.mxu1 %vm3942_vm0, %v25267_v29  ;;  %16325 = vmatpush3.bf16.xpose.msra.mxu1 %v7524_v8 }
 0x873   : > { %17753 = vmatprep.subr.msk.bf16.mxu1 %vm3942_vm0, %v25268_v32 }
 0x877   : > { %14926 = vmatmul.mubr.msk.bf16.gmra.mrb[52].mxu0 %vm3942_vm0, %v22040_v1 }
 0x879   : > { %16321 = vmatmul.mubr.msk.bf16.gmra.mrb[60].mxu1 %vm3942_vm0, %v25269_v27 }
 0x87a   : > { %16327 = vmatpush3.bf16.xpose.msra.mxu1 %v7527_v34  ;;  %16332 = vmatprep.mubr.msk.bf16.mxu1 %vm3942_vm0, %v25270_v23 }
 0x87b   : > { %17754 = vmatprep.subr.msk.bf16.mxu1 %vm3942_vm0, %v25271_v43 }
 0x882   : > { %16329 = vmatpush3.bf16.xpose.msra.mxu1 %v7530_v50 }
 0x883   : > { %17755 = vmatprep.subr.msk.bf16.mxu1 %vm3942_vm0, %v25272_v11 }
 0x88a   : > { %16331 = vmatpush3.bf16.xpose.msra.mxu1 %v7533_v51 }
 0x88b   : > { %16340 = vmatprep.subr.bf16.mxu1 %v25273_v33 }
 0x891   : > { %16333 = vmatmul.mubr.msk.bf16.vlgmr.msra.gmra.mrb[64].mxu1 %vm3942_vm0, %v25274_v45 }
 0x892   : > { %16336 = vmatprep.mubr.msk.bf16.mxu1 %vm3942_vm0, %v25275_v39  ;;  %16341 = vmatpush3.bf16.msra.mxu1 %v25273_v33 }
 0x893   : > { %16342 = vmatprep.subr.bf16.mxu1 %v25276_v46 }
 0x896   : > { %16343 = vmatpush3.bf16.msra.mxu1 %v25276_v46 }
 0x897   : > { %16344 = vmatprep.subr.bf16.mxu1 %v25277_v61 }
 0x899   : > { %16337 = vmatmul.mubr.msk.bf16.gmra.mrb[68].mxu1 %vm3942_vm0, %v25278_v56 }
 0x89a   : > { %16345 = vmatpush3.bf16.msra.mxu1 %v25277_v61 }
 0x89b   : > { %16346 = vmatprep.subr.bf16.mxu1 %v25279_v63 }
 0x89e   : > { %16347 = vmatpush3.bf16.msra.mxu1 %v25279_v63 }
 0x89f   : > { %16372 = vmatprep.subr.bf16.mxu1 %v25280_v55 }
 0x904   : > { %v16286_v1 = vpop.f32.mrb[40].mxu1 }
 0x905   : > { %v7302_v21 = vpop.f32.mrb[41].mxu1  ;;  %v22244_v38 = vsel %vm20755_vm1, %v16286_v1, -inf }
 0x906   : > { %v22238_v57 = vsel %vm20763_vm2, %v7302_v21, -inf  ;;  %v16287_v60 = vpop.f32.mrb[42].mxu1  ;;  %v7638_v34 = vsel %vm3942_vm0, %v22244_v38, -inf }
 0x907   : > { %v7632_v22 = vsel %vm3942_vm0, %v22238_v57, -inf  ;;  %v7305_v48 = vpop.f32.mrb[43].mxu1  ;;  %v22254_v8 = vsel %vm20767_vm3, %v16287_v60, -inf }
 0x908   : > { %v22248_v54 = vsel %vm20779_vm4, %v7305_v48, -inf  ;;  %7633 = vmax.xlane.f32.xlu0 %v7632_v22  ;;  %v7641_v51 = vsel %vm3942_vm0, %v22254_v8, -inf }
 0x909   : > { %v7635_v58 = vsel %vm3942_vm0, %v22248_v54, -inf }
 0x90a   : > { %7636 = vmax.xlane.f32.xlu1 %v7635_v58 }
 0x90c   : > { %7639 = vmax.xlane.f32.xlu0 %v7638_v34  ;;  %v16290_v50 = vpop.f32.mrb[44].mxu1 }
 0x90d   : > { %v7318_v1 = vpop.f32.mrb[45].mxu1  ;;  %v22268_v58 = vsel %vm20806_vm5, %v16290_v50, -inf }
 0x90e   : > { %v22262_v21 = vsel %vm20815_vm6, %v7318_v1, -inf  ;;  %7642 = vmax.xlane.f32.xlu1 %v7641_v51  ;;  %v16291_v22 = vpop.f32.mrb[46].mxu1  ;;  %v7650_v1 = vsel %vm3942_vm0, %v22268_v58, -inf }
 0x90f   : > { %v7644_v60 = vsel %vm3942_vm0, %v22262_v21, -inf  ;;  %v7321_v48 = vpop.f32.mrb[47].mxu1  ;;  %v22278_v51 = vsel %vm20819_vm7, %v16291_v22, -inf }
 0x910   : > { %v22272_v34 = vsel %vm20831_vm8, %v7321_v48, -inf  ;;  %7645 = vmax.xlane.f32.xlu0 %v7644_v60  ;;  %v7653_v50 = vsel %vm3942_vm0, %v22278_v51, -inf }
 0x911   : > { %v7647_v2 = vsel %vm3942_vm0, %v22272_v34, -inf }
 0x912   : > { %7648 = vmax.xlane.f32.xlu1 %v7647_v2 }
 0x914   : > { %7651 = vmax.xlane.f32.xlu0 %v7650_v1 }
 0x916   : > { %7654 = vmax.xlane.f32.xlu1 %v7653_v50 }
 0x924   : > { %v16302_v63 = vpop.f32.mrb[48].mxu1 }
 0x925   : > { %v7391_v48 = vpop.f32.mrb[49].mxu1  ;;  %v22292_v2 = vsel %vm20755_vm1, %v16302_v63, -inf }
 0x926   : > { %v22286_v60 = vsel %vm20763_vm2, %v7391_v48, -inf  ;;  %v16303_v46 = vpop.f32.mrb[50].mxu1  ;;  %v7662_v45 = vsel %vm3942_vm0, %v22292_v2, -inf }
 0x927   : > { %v7656_v22 = vsel %vm3942_vm0, %v22286_v60, -inf  ;;  %v7394_v56 = vpop.f32.mrb[51].mxu1  ;;  %v22302_v48 = vsel %vm20767_vm3, %v16303_v46, -inf }
 0x928   : > { %v22296_v1 = vsel %vm20779_vm4, %v7394_v56, -inf  ;;  %7657 = vmax.xlane.f32.xlu0 %v7656_v22  ;;  %v7665_v63 = vsel %vm3942_vm0, %v22302_v48, -inf }
 0x929   : > { %v7659_v50 = vsel %vm3942_vm0, %v22296_v1, -inf }
 0x92a   : > { %7660 = vmax.xlane.f32.xlu1 %v7659_v50 }
 0x92c   : > { %7663 = vmax.xlane.f32.xlu0 %v7662_v45  ;;  %v16306_v11 = vpop.f32.mrb[52].mxu1 }
 0x92d   : > { %v7407_v29 = vpop.f32.mrb[53].mxu1  ;;  %v22316_v50 = vsel %vm20806_vm5, %v16306_v11, -inf }
 0x92e   : > { %v22310_v56 = vsel %vm20815_vm6, %v7407_v29, -inf  ;;  %7666 = vmax.xlane.f32.xlu1 %v7665_v63  ;;  %v16307_v22 = vpop.f32.mrb[54].mxu1  ;;  %v7674_v63 = vsel %vm3942_vm0, %v22316_v50, -inf }
 0x92f   : > { %v7668_v46 = vsel %vm3942_vm0, %v22310_v56, -inf  ;;  %v7410_v13 = vpop.f32.mrb[55].mxu1  ;;  %v22326_v29 = vsel %vm20819_vm7, %v16307_v22, -inf }
 0x930   : > { %v22320_v45 = vsel %vm20831_vm8, %v7410_v13, -inf  ;;  %7669 = vmax.xlane.f32.xlu0 %v7668_v46  ;;  %v7677_v11 = vsel %vm3942_vm0, %v22326_v29, -inf }
 0x931   : > { %v7671_v32 = vsel %vm3942_vm0, %v22320_v45, -inf }
 0x932   : > { %7672 = vmax.xlane.f32.xlu1 %v7671_v32 }
 0x934   : > { %7675 = vmax.xlane.f32.xlu0 %v7674_v63 }
 0x936   : > { %7678 = vmax.xlane.f32.xlu1 %v7677_v11 }
 0x944   : > { %v16318_v59 = vpop.f32.mrb[56].mxu1 }
 0x945   : > { %v7480_v13 = vpop.f32.mrb[57].mxu1  ;;  %v22340_v32 = vsel %vm20755_vm1, %v16318_v59, -inf }
 0x946   : > { %v22334_v46 = vsel %vm20763_vm2, %v7480_v13, -inf  ;;  %v16319_v20 = vpop.f32.mrb[58].mxu1  ;;  %v7686_v36 = vsel %vm3942_vm0, %v22340_v32, -inf }
 0x947   : > { %v7680_v22 = vsel %vm3942_vm0, %v22334_v46, -inf  ;;  %v7483_v44 = vpop.f32.mrb[59].mxu1  ;;  %v22350_v13 = vsel %vm20767_vm3, %v16319_v20, -inf }
 0x948   : > { %v22344_v63 = vsel %vm20779_vm4, %v7483_v44, -inf  ;;  %7681 = vmax.xlane.f32.xlu0 %v7680_v22  ;;  %v7689_v59 = vsel %vm3942_vm0, %v22350_v13, -inf }
 0x949   : > { %v7683_v11 = vsel %vm3942_vm0, %v22344_v63, -inf }
 0x94a   : > { %7684 = vmax.xlane.f32.xlu1 %v7683_v11 }
 0x94c   : > { %7687 = vmax.xlane.f32.xlu0 %v7686_v36  ;;  %v16322_v3 = vpop.f32.mrb[60].mxu1 }
 0x94d   : > { %v7496_v19 = vpop.f32.mrb[61].mxu1  ;;  %v22364_v11 = vsel %vm20806_vm5, %v16322_v3, -inf }
 0x94e   : > { %v22358_v44 = vsel %vm20815_vm6, %v7496_v19, -inf  ;;  %7690 = vmax.xlane.f32.xlu1 %v7689_v59  ;;  %v16323_v22 = vpop.f32.mrb[62].mxu1  ;;  %v7698_v59 = vsel %vm3942_vm0, %v22364_v11, -inf }
 0x94f   : > { %v7692_v20 = vsel %vm3942_vm0, %v22358_v44, -inf  ;;  %v7499_v42 = vpop.f32.mrb[63].mxu1  ;;  %v22374_v19 = vsel %vm20819_vm7, %v16323_v22, -inf }
 0x950   : > { %v22368_v36 = vsel %vm20831_vm8, %v7499_v42, -inf  ;;  %7693 = vmax.xlane.f32.xlu0 %v7692_v20  ;;  %v7701_v3 = vsel %vm3942_vm0, %v22374_v19, -inf }
 0x951   : > { %v7695_v10 = vsel %vm3942_vm0, %v22368_v36, -inf }
 0x952   : > { %7696 = vmax.xlane.f32.xlu1 %v7695_v10 }
 0x954   : > { %7699 = vmax.xlane.f32.xlu0 %v7698_v59 }
 0x956   : > { %7702 = vmax.xlane.f32.xlu1 %v7701_v3 }
 0x964   : > { %v16334_v61 = vpop.f32.mrb[64].mxu1 }
 0x965   : > { %v7569_v42 = vpop.f32.mrb[65].mxu1  ;;  %v22388_v10 = vsel %vm20755_vm1, %v16334_v61, -inf }
 0x966   : > { %v22382_v20 = vsel %vm20763_vm2, %v7569_v42, -inf  ;;  %v16335_v41 = vpop.f32.mrb[66].mxu1  ;;  %v7710_v16 = vsel %vm3942_vm0, %v22388_v10, -inf }
 0x967   : > { %v7704_v22 = vsel %vm3942_vm0, %v22382_v20, -inf  ;;  %v7572_v33 = vpop.f32.mrb[67].mxu1  ;;  %v22398_v42 = vsel %vm20767_vm3, %v16335_v41, -inf }
 0x968   : > { %v22392_v59 = vsel %vm20779_vm4, %v7572_v33, -inf  ;;  %7705 = vmax.xlane.f32.xlu0 %v7704_v22  ;;  %v7713_v61 = vsel %vm3942_vm0, %v22398_v42, -inf }
 0x969   : > { %v7707_v3 = vsel %vm3942_vm0, %v22392_v59, -inf }
 0x96a   : > { %7708 = vmax.xlane.f32.xlu1 %v7707_v3 }
 0x96c   : > { %7711 = vmax.xlane.f32.xlu0 %v7710_v16  ;;  %v16338_v30 = vpop.f32.mrb[68].mxu1 }
 0x96d   : > { %v7585_v17 = vpop.f32.mrb[69].mxu1  ;;  %v22412_v3 = vsel %vm20806_vm5, %v16338_v30, -inf }
 0x96e   : > { %v22406_v33 = vsel %vm20815_vm6, %v7585_v17, -inf  ;;  %7714 = vmax.xlane.f32.xlu1 %v7713_v61  ;;  %v16339_v22 = vpop.f32.mrb[70].mxu1  ;;  %v7722_v61 = vsel %vm3942_vm0, %v22412_v3, -inf }
 0x96f   : > { %v7716_v41 = vsel %vm3942_vm0, %v22406_v33, -inf  ;;  %v7588_v25 = vpop.f32.mrb[71].mxu1  ;;  %v22422_v17 = vsel %vm20819_vm7, %v16339_v22, -inf }
 0x970   : > { %v22416_v16 = vsel %vm20831_vm8, %v7588_v25, -inf  ;;  %7717 = vmax.xlane.f32.xlu0 %v7716_v41  ;;  %v7725_v30 = vsel %vm3942_vm0, %v22422_v17, -inf }
 0x971   : > { %v7719_v6 = vsel %vm3942_vm0, %v22416_v16, -inf }
 0x972   : > { %7720 = vmax.xlane.f32.xlu1 %v7719_v6 }
 0x974   : > { %7723 = vmax.xlane.f32.xlu0 %v7722_v61 }
 0x976   : > { %7726 = vmax.xlane.f32.xlu1 %v7725_v30 }
 0x995   : > { %v7634_v4 = vpop.xlane.xlu0 %7633 }
 0x996   : > { %v7728_v25 = vsub.f32 %v22238_v57, %v7634_v4 }
 0x997   : > { %v7637_v41 = vpop.xlane.xlu1 %7636 }
 0x998   : > { %v7760_v9 = vmul.f32 1.442695, %v7728_v25  ;;  %v7729_v18 = vsub.f32 %v22248_v54, %v7637_v41 }
 0x999   : > { %v7640_v39 = vpop.xlane.xlu0 %7639 }
 0x99a   : > { %v7762_v7 = vmul.f32 1.442695, %v7729_v18  ;;  %v7730_v22 = vsub.f32 %v22244_v38, %v7640_v39  ;;  %18612 = vpow2.f32 %v7760_v9 }
 0x99b   : > { %v7643_v6 = vpop.xlane.xlu1 %7642 }
 0x99c   : > { %18614 = vpow2.f32 %v7762_v7  ;;  %v7764_v12 = vmul.f32 1.442695, %v7730_v22  ;;  %v7731_v61 = vsub.f32 %v22254_v8, %v7643_v6 }
 0x99d   : > { %v7646_v23 = vpop.xlane.xlu0 %7645 }
 0x99e   : > { %18616 = vpow2.f32 %v7764_v12  ;;  %v7766_v30 = vmul.f32 1.442695, %v7731_v61  ;;  %v7732_v14 = vsub.f32 %v22262_v21, %v7646_v23 }
 0x99f   : > { %v7649_v4 = vpop.xlane.xlu1 %7648 }
 0x9a0   : > { %18618 = vpow2.f32 %v7766_v30  ;;  %v7768_v57 = vmul.f32 1.442695, %v7732_v14  ;;  %v7733_v54 = vsub.f32 %v22272_v34, %v7649_v4  ;;  %v25285_v30 = vld [vmem:[#allocation101_spill] sm:$0xff] }
 0x9a1   : > { %v7652_v25 = vpop.xlane.xlu0 %7651 }
 0x9a2   : > { %v7770_v18 = vmul.f32 1.442695, %v7733_v54  ;;  %v7734_v39 = vsub.f32 %v22268_v58, %v7652_v25  ;;  %18620 = vpow2.f32 %v7768_v57 }
 0x9a3   : > { %v7655_v9 = vpop.xlane.xlu1 %7654 }
 0x9a4   : > { %18622 = vpow2.f32 %v7770_v18  ;;  %v7772_v7 = vmul.f32 1.442695, %v7734_v39  ;;  %v7735_v38 = vsub.f32 %v22278_v51, %v7655_v9  ;;  %v18613_v8 = vpop.eup %18612  ;;  %v25286_v9 = vld [vmem:[#allocation102_spill] sm:$0xff] }
 0x9a5   : > { %v7824_v51 = vsel %vm3942_vm0, %v18613_v8, 0.0 }
 0x9a6   : > { %v18615_v12 = vpop.eup %18614  ;;  %18624 = vpow2.f32 %v7772_v7  ;;  %v7774_v41 = vmul.f32 1.442695, %v7735_v38 }
 0x9a7   : > { %v7920_v23 = vpack.c.bf16 %v18615_v12, %v18613_v8  ;;  %v7827_v4 = vsel %vm3942_vm0, %v18615_v12, 0.0 }
 0x9a8   : > { %v18617_v21 = vpop.eup %18616  ;;  %18626 = vpow2.f32 %v7774_v41  ;;  %v25287_v41 = vld [vmem:[#allocation103_spill] sm:$0xff] }
 0x9a9   : > { %16348 = vmatprep.mubr.msk.bf16.mxu1 %vm3942_vm0, %v7920_v23  ;;  %v7830_v14 = vsel %vm3942_vm0, %v18617_v21, 0.0 }
 0x9aa   : > { %v18619_v34 = vpop.eup %18618  ;;  %7831 = vadd.xlane.f32.xlu0 %v7830_v14 }
 0x9ab   : > { %v7921_v58 = vpack.c.bf16 %v18619_v34, %v18617_v21  ;;  %v7833_v22 = vsel %vm3942_vm0, %v18619_v34, 0.0 }
 0x9ac   : > { %7834 = vadd.xlane.f32.xlu1 %v7833_v22  ;;  %v18621_v6 = vpop.eup %18620 }
 0x9ad   : > { %16349 = vmatmul.mubr.msk.bf16.vlgmr.msra.gmra.mrb[72].mxu1 %vm3942_vm0, %v7921_v58  ;;  %v7836_v8 = vsel %vm3942_vm0, %v18621_v6, 0.0 }
 0x9ae   : > { %v18623_v61 = vpop.eup %18622  ;;  %16373 = vmatpush3.bf16.msra.mxu1 %v25280_v55  ;;  %7825 = vadd.xlane.f32.xlu0 %v7824_v51 }
 0x9af   : > { %16374 = vmatprep.subr.bf16.mxu1 %v25285_v30  ;;  %v7922_v57 = vpack.c.bf16 %v18623_v61, %v18621_v6  ;;  %v7839_v21 = vsel %vm3942_vm0, %v18623_v61, 0.0 }
 0x9b0   : > { %v18625_v54 = vpop.eup %18624  ;;  %7828 = vadd.xlane.f32.xlu1 %v7827_v4 }
 0x9b1   : > { %16352 = vmatprep.mubr.msk.bf16.mxu1 %vm3942_vm0, %v7922_v57  ;;  %v7842_v25 = vsel %vm3942_vm0, %v18625_v54, 0.0 }
 0x9b2   : > { %v18627_v18 = vpop.eup %18626  ;;  %16375 = vmatpush3.bf16.msra.mxu1 %v25285_v30  ;;  %7843 = vadd.xlane.f32.xlu0 %v7842_v25 }
 0x9b3   : > { %v7923_v39 = vpack.c.bf16 %v18627_v18, %v18625_v54  ;;  %16376 = vmatprep.subr.bf16.mxu1 %v25286_v9  ;;  %v7845_v7 = vsel %vm3942_vm0, %v18627_v18, 0.0 }
 0x9b4   : > { %7846 = vadd.xlane.f32.xlu1 %v7845_v7 }
 0x9b5   : > { %v7658_v38 = vpop.xlane.xlu0 %7657  ;;  %16353 = vmatmul.mubr.msk.bf16.gmra.mrb[76].mxu1 %vm3942_vm0, %v7923_v39 }
 0x9b6   : > { %v7736_v12 = vsub.f32 %v22286_v60, %v7658_v38  ;;  %16377 = vmatpush3.bf16.msra.mxu1 %v25286_v9  ;;  %7837 = vadd.xlane.f32.xlu0 %v7836_v8 }
 0x9b7   : > { %16378 = vmatprep.subr.bf16.mxu1 %v25287_v41  ;;  %v7661_v23 = vpop.xlane.xlu1 %7660 }
 0x9b8   : > { %v7776_v14 = vmul.f32 1.442695, %v7736_v12  ;;  %v7737_v34 = vsub.f32 %v22296_v1, %v7661_v23  ;;  %7840 = vadd.xlane.f32.xlu1 %v7839_v21 }
 0x9b9   : > { %v7664_v58 = vpop.xlane.xlu0 %7663 }
 0x9ba   : > { %v7778_v22 = vmul.f32 1.442695, %v7737_v34  ;;  %v7738_v51 = vsub.f32 %v22292_v2, %v7664_v58  ;;  %16379 = vmatpush3.bf16.msra.mxu1 %v25287_v41  ;;  %18628 = vpow2.f32 %v7776_v14 }
 0x9bb   : > { %v7667_v60 = vpop.xlane.xlu1 %7666 }
 0x9bc   : > { %18630 = vpow2.f32 %v7778_v22  ;;  %v7780_v6 = vmul.f32 1.442695, %v7738_v51  ;;  %v7739_v4 = vsub.f32 %v22302_v48, %v7667_v60  ;;  %v25288_v60 = vld [vmem:[#allocation107_spill] sm:$0xff] }
 0x9bd   : > { %v7670_v57 = vpop.xlane.xlu0 %7669 }
 0x9be   : > { %18632 = vpow2.f32 %v7780_v6  ;;  %v7782_v54 = vmul.f32 1.442695, %v7739_v4  ;;  %v7740_v61 = vsub.f32 %v22310_v56, %v7670_v57 }
 0x9bf   : > { %v7673_v25 = vpop.xlane.xlu1 %7672 }
 0x9c0   : > { %18634 = vpow2.f32 %v7782_v54  ;;  %v7784_v1 = vmul.f32 1.442695, %v7740_v61  ;;  %v7741_v18 = vsub.f32 %v22320_v45, %v7673_v25 }
 0x9c1   : > { %v7676_v39 = vpop.xlane.xlu0 %7675 }
 0x9c2   : > { %v7786_v2 = vmul.f32 1.442695, %v7741_v18  ;;  %v7742_v7 = vsub.f32 %v22316_v50, %v7676_v39  ;;  %18636 = vpow2.f32 %v7784_v1  ;;  %v25289_v1 = vld [vmem:[#allocation109_spill] sm:$0xff] }
 0x9c3   : > { %v7679_v38 = vpop.xlane.xlu1 %7678 }
 0x9c4   : > { %18638 = vpow2.f32 %v7786_v2  ;;  %v7788_v8 = vmul.f32 1.442695, %v7742_v7  ;;  %v7743_v48 = vsub.f32 %v22326_v29, %v7679_v38  ;;  %v18629_v12 = vpop.eup %18628  ;;  %v25290_v38 = vld [vmem:[#allocation111_spill] sm:$0xff] }
 0x9c5   : > { %v7848_v29 = vsel %vm3942_vm0, %v18629_v12, 0.0 }
 0x9c6   : > { %v18631_v23 = vpop.eup %18630  ;;  %18640 = vpow2.f32 %v7788_v8  ;;  %v7790_v21 = vmul.f32 1.442695, %v7743_v48 }
 0x9c7   : > { %v7924_v56 = vpack.c.bf16 %v18631_v23, %v18629_v12  ;;  %v7851_v6 = vsel %vm3942_vm0, %v18631_v23, 0.0 }
 0x9c8   : > { %v18633_v14 = vpop.eup %18632  ;;  %18642 = vpow2.f32 %v7790_v21 }
 0x9c9   : > { %16364 = vmatprep.mubr.msk.bf16.mxu0 %vm3942_vm0, %v7924_v56  ;;  %v7854_v45 = vsel %vm3942_vm0, %v18633_v14, 0.0 }
 0x9ca   : > { %v18635_v34 = vpop.eup %18634  ;;  %7855 = vadd.xlane.f32.xlu0 %v7854_v45 }
 0x9cb   : > { %v7925_v50 = vpack.c.bf16 %v18635_v34, %v18633_v14  ;;  %v7857_v58 = vsel %vm3942_vm0, %v18635_v34, 0.0 }
 0x9cc   : > { %7858 = vadd.xlane.f32.xlu1 %v7857_v58  ;;  %v18637_v22 = vpop.eup %18636 }
 0x9cd   : > { %16365 = vmatmul.mubr.msk.bf16.vlgmr.msra.gmra.mrb[56].mxu0 %vm3942_vm0, %v7925_v50  ;;  %v7860_v2 = vsel %vm3942_vm0, %v18637_v22, 0.0 }
 0x9ce   : > { %v18639_v51 = vpop.eup %18638  ;;  %16389 = vmatpush3.bf16.msra.mxu0 %v25248_v31  ;;  %7849 = vadd.xlane.f32.xlu0 %v7848_v29 }
 0x9cf   : > { %16390 = vmatprep.subr.bf16.mxu0 %v25288_v60  ;;  %v7926_v4 = vpack.c.bf16 %v18639_v51, %v18637_v22  ;;  %v7863_v48 = vsel %vm3942_vm0, %v18639_v51, 0.0 }
 0x9d0   : > { %v18641_v57 = vpop.eup %18640  ;;  %7852 = vadd.xlane.f32.xlu1 %v7851_v6 }
 0x9d1   : > { %16368 = vmatprep.mubr.msk.bf16.mxu0 %vm3942_vm0, %v7926_v4  ;;  %v7866_v54 = vsel %vm3942_vm0, %v18641_v57, 0.0 }
 0x9d2   : > { %v18643_v61 = vpop.eup %18642  ;;  %16391 = vmatpush3.bf16.msra.mxu0 %v25288_v60  ;;  %7867 = vadd.xlane.f32.xlu0 %v7866_v54 }
 0x9d3   : > { %v7927_v25 = vpack.c.bf16 %v18643_v61, %v18641_v57  ;;  %16392 = vmatprep.subr.bf16.mxu0 %v25289_v1  ;;  %v7869_v18 = vsel %vm3942_vm0, %v18643_v61, 0.0 }
 0x9d4   : > { %7870 = vadd.xlane.f32.xlu1 %v7869_v18 }
 0x9d5   : > { %v7682_v39 = vpop.xlane.xlu0 %7681  ;;  %16369 = vmatmul.mubr.msk.bf16.gmra.mrb[60].mxu0 %vm3942_vm0, %v7927_v25 }
 0x9d6   : > { %v7744_v7 = vsub.f32 %v22334_v46, %v7682_v39  ;;  %16393 = vmatpush3.bf16.msra.mxu0 %v25289_v1  ;;  %7861 = vadd.xlane.f32.xlu0 %v7860_v2 }
 0x9d7   : > { %16394 = vmatprep.subr.bf16.mxu0 %v25290_v38  ;;  %v7685_v8 = vpop.xlane.xlu1 %7684 }
 0x9d8   : > { %v7792_v12 = vmul.f32 1.442695, %v7744_v7  ;;  %v7745_v23 = vsub.f32 %v22344_v63, %v7685_v8  ;;  %7864 = vadd.xlane.f32.xlu1 %v7863_v48 }
 0x9d9   : > { %v7688_v21 = vpop.xlane.xlu0 %7687 }
 0x9da   : > { %v7794_v56 = vmul.f32 1.442695, %v7745_v23  ;;  %v7746_v14 = vsub.f32 %v22340_v32, %v7688_v21  ;;  %16395 = vmatpush3.bf16.msra.mxu0 %v25290_v38  ;;  %18644 = vpow2.f32 %v7792_v12 }
 0x9db   : > { %v7691_v46 = vpop.xlane.xlu1 %7690 }
 0x9dc   : > { %18646 = vpow2.f32 %v7794_v56  ;;  %v7796_v45 = vmul.f32 1.442695, %v7746_v14  ;;  %v7747_v34 = vsub.f32 %v22350_v13, %v7691_v46 }
 0x9dd   : > { %v7694_v50 = vpop.xlane.xlu0 %7693 }
 0x9de   : > { %18648 = vpow2.f32 %v7796_v45  ;;  %v7798_v58 = vmul.f32 1.442695, %v7747_v34  ;;  %v7748_v22 = vsub.f32 %v22358_v44, %v7694_v50 }
 0x9df   : > { %v7697_v29 = vpop.xlane.xlu1 %7696 }
 0x9e0   : > { %18650 = vpow2.f32 %v7798_v58  ;;  %v7800_v63 = vmul.f32 1.442695, %v7748_v22  ;;  %v7749_v51 = vsub.f32 %v22368_v36, %v7697_v29 }
 0x9e1   : > { %v7700_v6 = vpop.xlane.xlu0 %7699 }
 0x9e2   : > { %v7802_v32 = vmul.f32 1.442695, %v7749_v51  ;;  %v7750_v4 = vsub.f32 %v22364_v11, %v7700_v6  ;;  %18652 = vpow2.f32 %v7800_v63  ;;  %v18294_v6 = vld [vmem:[#allocation7 + $0xc4] ss:$12 sps:$4 sm:$0xff]  }
 0x9e3   : > { %v7703_v57 = vpop.xlane.xlu1 %7702  ;;  %8453 = vmatprep.subr.bf16.mxu0 %v18294_v6  ;;  %v18302_v6 = vld [vmem:[#allocation7 + $0xf4] ss:$12 sps:$4 sm:$0xff]  }
 0x9e4   : > { %18654 = vpow2.f32 %v7802_v32  ;;  %v7804_v54 = vmul.f32 1.442695, %v7750_v4  ;;  %v7751_v13 = vsub.f32 %v22374_v19, %v7703_v57  ;;  %v18645_v61 = vpop.eup %18644  ;;  %v18295_v4 = vld [vmem:[#allocation7 + $0xc8] ss:$12 sps:$4 sm:$0xff]  }
 0x9e5   : > { %v7872_v19 = vsel %vm3942_vm0, %v18645_v61, 0.0  ;;  %16404 = vmatprep.subr.bf16.mxu1 %v18295_v4 }
 0x9e6   : > { %v18647_v25 = vpop.eup %18646  ;;  %18656 = vpow2.f32 %v7804_v54  ;;  %v7806_v18 = vmul.f32 1.442695, %v7751_v13 }
 0x9e7   : > { %v7928_v44 = vpack.c.bf16 %v18647_v25, %v18645_v61  ;;  %v7875_v12 = vsel %vm3942_vm0, %v18647_v25, 0.0 }
 0x9e8   : > { %v18649_v39 = vpop.eup %18648  ;;  %18658 = vpow2.f32 %v7806_v18  ;;  %v18299_v18 = vld [vmem:[#allocation7 + $0xe0] ss:$12 sps:$4 sm:$0xff]  }
 0x9e9   : > { %16380 = vmatprep.mubr.msk.bf16.mxu1 %vm3942_vm0, %v7928_v44  ;;  %v7878_v36 = vsel %vm3942_vm0, %v18649_v39, 0.0 }
 0x9ea   : > { %v18651_v2 = vpop.eup %18650  ;;  %7879 = vadd.xlane.f32.xlu0 %v7878_v36 }
 0x9eb   : > { %v7929_v11 = vpack.c.bf16 %v18651_v2, %v18649_v39  ;;  %v7881_v7 = vsel %vm3942_vm0, %v18651_v2, 0.0 }
 0x9ec   : > { %7882 = vadd.xlane.f32.xlu1 %v7881_v7  ;;  %v18653_v8 = vpop.eup %18652 }
 0x9ed   : > { %16381 = vmatmul.mubr.msk.bf16.vlgmr.msra.gmra.mrb[80].mxu1 %vm3942_vm0, %v7929_v11  ;;  %v7884_v50 = vsel %vm3942_vm0, %v18653_v8, 0.0  ;;  %v18303_v11 = vld [vmem:[#allocation7 + $0xf8] ss:$12 sps:$4 sm:$0xff]  }
 0x9ee   : > { %v18655_v48 = vpop.eup %18654  ;;  %7873 = vadd.xlane.f32.xlu0 %v7872_v19  ;;  %16405 = vmatpush3.bf16.msra.mxu1 %v18295_v4 }
 0x9ef   : > { %v7930_v23 = vpack.c.bf16 %v18655_v48, %v18653_v8  ;;  %v7887_v29 = vsel %vm3942_vm0, %v18655_v48, 0.0  ;;  %16406 = vmatprep.subr.bf16.mxu1 %v18299_v18 }
 0x9f0   : > { %v18657_v21 = vpop.eup %18656  ;;  %7876 = vadd.xlane.f32.xlu1 %v7875_v12  ;;  %v18307_v12 = vld [vmem:[#allocation7 + $0x110] ss:$12 sps:$4 sm:$0xff]  }
 0x9f1   : > { %16384 = vmatprep.mubr.msk.bf16.mxu1 %vm3942_vm0, %v7930_v23  ;;  %v7890_v56 = vsel %vm3942_vm0, %v18657_v21, 0.0 }
 0x9f2   : > { %v18659_v14 = vpop.eup %18658  ;;  %7891 = vadd.xlane.f32.xlu0 %v7890_v56  ;;  %16407 = vmatpush3.bf16.msra.mxu1 %v18299_v18  ;;  %v25297_v18 = vld [vmem:[#allocation26_spill] sm:$0xff] }
 0x9f3   : > { %v7931_v46 = vpack.c.bf16 %v18659_v14, %v18657_v21  ;;  %v7893_v45 = vsel %vm3942_vm0, %v18659_v14, 0.0  ;;  %16408 = vmatprep.subr.bf16.mxu1 %v18303_v11 }
 0x9f4   : > { %7894 = vadd.xlane.f32.xlu1 %v7893_v45 }
 0x9f5   : > { %16385 = vmatmul.mubr.msk.bf16.gmra.mrb[84].mxu1 %vm3942_vm0, %v7931_v46  ;;  %v7706_v34 = vpop.xlane.xlu0 %7705  ;;  %v18292_v46 = vld [vmem:[#allocation7 + $0xc0] ss:$12 sps:$4 sm:$0xff]  }
 0x9f6   : > { %v7752_v58 = vsub.f32 %v22382_v20, %v7706_v34  ;;  %7885 = vadd.xlane.f32.xlu0 %v7884_v50  ;;  %16409 = vmatpush3.bf16.msra.mxu1 %v18303_v11  ;;  %v18298_v34 = vld [vmem:[#allocation7 + $0xdc] ss:$12 sps:$4 sm:$0xff]  }
 0x9f7   : > { %v7709_v22 = vpop.xlane.xlu1 %7708  ;;  %16410 = vmatprep.subr.bf16.mxu1 %v18307_v12 }
 0x9f8   : > { %v7808_v63 = vmul.f32 1.442695, %v7752_v58  ;;  %v7753_v51 = vsub.f32 %v22392_v59, %v7709_v22  ;;  %7888 = vadd.xlane.f32.xlu1 %v7887_v29  ;;  %v18296_v29 = vld [vmem:[#allocation7 + $0xd8] ss:$12 sps:$4 sm:$0xff]  }
 0x9f9   : > { %v7712_v32 = vpop.xlane.xlu0 %7711 }
 0x9fa   : > { %v7810_v57 = vmul.f32 1.442695, %v7753_v51  ;;  %v7754_v54 = vsub.f32 %v22388_v10, %v7712_v32  ;;  %18660 = vpow2.f32 %v7808_v63  ;;  %16411 = vmatpush3.bf16.msra.mxu1 %v18307_v12  ;;  %v25305_v12 = vld [vmem:[#allocation29_spill] sm:$0xff] }
 0x9fb   : > { %v7715_v13 = vpop.xlane.xlu1 %7714 }
 0x9fc   : > { %18662 = vpow2.f32 %v7810_v57  ;;  %v7812_v20 = vmul.f32 1.442695, %v7754_v54  ;;  %v7755_v61 = vsub.f32 %v22398_v42, %v7715_v13  ;;  %v18300_v54 = vld [vmem:[#allocation7 + $0xf0] ss:$12 sps:$4 sm:$0xff]  }
 0x9fd   : > { %v7718_v25 = vpop.xlane.xlu0 %7717 }
 0x9fe   : > { %18664 = vpow2.f32 %v7812_v20  ;;  %v7814_v59 = vmul.f32 1.442695, %v7755_v61  ;;  %v7756_v44 = vsub.f32 %v22406_v33, %v7718_v25  ;;  %v18306_v20 = vld [vmem:[#allocation7 + $0x10c] ss:$12 sps:$4 sm:$0xff]   ;;  %v18304_v25 = vld [vmem:[#allocation7 + $0x108] ss:$12 sps:$4 sm:$0xff]  }
 0x9ff   : > { %v7721_v39 = vpop.xlane.xlu1 %7720 }
 0xa00   : > { %18666 = vpow2.f32 %v7814_v59  ;;  %v7816_v36 = vmul.f32 1.442695, %v7756_v44  ;;  %v7757_v10 = vsub.f32 %v22416_v16, %v7721_v39  ;;  %v25298_v44 = vld [vmem:[#allocation89_spill] sm:$0xff] }
 0xa01   : > { %v7724_v2 = vpop.xlane.xlu0 %7723 }
 0xa02   : > { %v7818_v7 = vmul.f32 1.442695, %v7757_v10  ;;  %v7758_v8 = vsub.f32 %v22412_v3, %v7724_v2  ;;  %18668 = vpow2.f32 %v7816_v36  ;;  %v25299_v36 = vld [vmem:[#allocation13_spill] sm:$0xff]  ;;  %v25300_v10 = vld [vmem:[#allocation94_spill] sm:$0xff] }
 0xa03   : > { %v7727_v42 = vpop.xlane.xlu1 %7726 }
 0xa04   : > { %18670 = vpow2.f32 %v7818_v7  ;;  %v7820_v19 = vmul.f32 1.442695, %v7758_v8  ;;  %v7759_v48 = vsub.f32 %v22422_v17, %v7727_v42  ;;  %v18661_v33 = vpop.eup %18660  ;;  %v25301_v7 = vld [vmem:[#allocation80_spill] sm:$0xff]  ;;  %v25303_v42 = vld [vmem:[#allocation82_spill] sm:$0xff] }
 0xa05   : > { %v7896_v58 = vsel %vm3942_vm0, %v18661_v33, 0.0  ;;  %v25302_v8 = vld [vmem:[#allocation96_spill] sm:$0xff] }
 0xa06   : > { %v18663_v23 = vpop.eup %18662  ;;  %18672 = vpow2.f32 %v7820_v19  ;;  %v7822_v21 = vmul.f32 1.442695, %v7759_v48 }
 0xa07   : > { %v7932_v16 = vpack.c.bf16 %v18663_v23, %v18661_v33  ;;  %v7899_v63 = vsel %vm3942_vm0, %v18663_v23, 0.0  ;;  %v25304_v33 = vld [vmem:[#allocation99_spill] sm:$0xff] }
 0xa08   : > { %v18665_v56 = vpop.eup %18664  ;;  %18674 = vpow2.f32 %v7822_v21 }
 0xa09   : > { %16396 = vmatprep.mubr.msk.bf16.mxu0 %vm3942_vm0, %v7932_v16  ;;  %v7902_v3 = vsel %vm3942_vm0, %v18665_v56, 0.0  ;;  %v25306_v16 = vld [vmem:[#allocation48_spill] sm:$0xff] }
 0xa0a   : > { %v18667_v14 = vpop.eup %18666  ;;  %7903 = vadd.xlane.f32.xlu0 %v7902_v3 }
 0xa0b   : > { %v7933_v45 = vpack.c.bf16 %v18667_v14, %v18665_v56  ;;  %v7905_v17 = vsel %vm3942_vm0, %v18667_v14, 0.0 }
 0xa0c   : > { %7906 = vadd.xlane.f32.xlu1 %v7905_v17  ;;  %v18669_v50 = vpop.eup %18668 }
 0xa0d   : > { %16397 = vmatmul.mubr.msk.bf16.vlgmr.msra.gmra.mrb[64].mxu0 %vm3942_vm0, %v7933_v45  ;;  %v7908_v61 = vsel %vm3942_vm0, %v18669_v50, 0.0 }
 0xa0e   : > { %v18671_v22 = vpop.eup %18670  ;;  %7897 = vadd.xlane.f32.xlu0 %v7896_v58  ;;  %8454 = vmatpush1.bf16.msra.mxu0 %v18292_v46 }
 0xa0f   : > { %v7934_v51 = vpack.c.bf16 %v18671_v22, %v18669_v50  ;;  %8455 = vmatprep.subr.bf16.mxu0 %v18298_v34 }
 0xa10   : > { %v18673_v32 = vpop.eup %18672  ;;  %7900 = vadd.xlane.f32.xlu1 %v7899_v63 }
 0xa11   : > { %16400 = vmatprep.mubr.msk.bf16.mxu0 %vm3942_vm0, %v7934_v51  ;;  %v7914_v4 = vsel %vm3942_vm0, %v18673_v32, 0.0 }
 0xa12   : > { %v18675_v57 = vpop.eup %18674  ;;  %7915 = vadd.xlane.f32.xlu0 %v7914_v4  ;;  %8456 = vmatpush1.bf16.msra.mxu0 %v18296_v29 }
 0xa13   : > { %v7935_v13 = vpack.c.bf16 %v18675_v57, %v18673_v32  ;;  %8457 = vmatprep.subr.bf16.mxu0 %v18302_v6 }
 0xa15   : > { %16401 = vmatmul.mubr.msk.bf16.gmra.mrb[68].mxu0 %vm3942_vm0, %v7935_v13 }
 0xa16   : > { %7909 = vadd.xlane.f32.xlu0 %v7908_v61  ;;  %8458 = vmatpush1.bf16.msra.mxu0 %v18300_v54 }
 0xa17   : > { %8459 = vmatprep.subr.bf16.mxu0 %v18306_v20  ;;  %8485 = vmatprep.mubr.bf16.mxu0 %v25184_v53 }
 0xa1a   : > { %8460 = vmatpush1.bf16.msra.mxu0 %v18304_v25 }
 0xa21   : > { %8921 = vrot.lane.b32.xlu1 %v25241_v62, %s19347_s21  ;;  %v7911_v62 = vsel %vm3942_vm0, %v18671_v22, 0.0 }
 0xa25   : > { %8923 = vrot.lane.b32.xlu1 %v25242_v49, %s19347_s21 }
 0xa2c   : > { %8919 = vrot.lane.b32.xlu0 %v25208_v47, %s19347_s21  ;;  %v7917_v47 = vsel %vm3942_vm0, %v18675_v57, 0.0  ;;  %v25308_v57 = vld [vmem:[#allocation36_spill] sm:$0xff] }
 0xa30   : > { %8907 = vrot.lane.b32.xlu0 %v25249_v40, %s19347_s21 }
 0xa34   : > { %8909 = vrot.lane.b32.xlu0 %v25250_v15, %s19347_s21 }
 0xa37   : > { %v7832_v49 = vpop.xlane.xlu0 %7831 }
 0xa38   : > { %9036 = vrot.lane.b32.xlu0 %v25255_v26, %s19347_s21  ;;  %v25292_v26 = vld [vmem:[#allocation41_spill] sm:$0xff]  ;;  %18676 = vrcp.f32 %v7832_v49  ;;  %v25309_v49 = vld [vmem:[#allocation38_spill] sm:$0xff] }
 0xa39   : > { %v7835_v15 = vpop.xlane.xlu1 %7834 }
 0xa3a   : > { %18678 = vrcp.f32 %v7835_v15 }
 0xa3b   : > { %v7826_v40 = vpop.xlane.xlu0 %7825 }
 0xa3c   : > { %9038 = vrot.lane.b32.xlu0 %v25256_v35, %s19347_s21  ;;  %18680 = vrcp.f32 %v7826_v40 }
 0xa3f   : > { %v7844_v35 = vpop.xlane.xlu0 %7843 }
 0xa40   : > { %9020 = vrot.lane.b32.xlu0 %v25254_v52, %s19347_s21  ;;  %v25291_v52 = vld [vmem:[#allocation70_spill] sm:$0xff] }
 0xa42   : > { %v18677_v56 = vpop.eup %18676 }
 0xa44   : > { %9022 = vrot.lane.b32.xlu0 %v25258_v37, %s19347_s21  ;;  %v7829_v37 = vpop.xlane.xlu1 %7828  ;;  %v18679_v14 = vpop.eup %18678 }
 0xa45   : > { %18682 = vrcp.f32 %v7829_v37 }
 0xa46   : > { %18684 = vrcp.f32 %v7844_v35  ;;  %v18681_v17 = vpop.eup %18680 }
 0xa48   : > { %9149 = vrot.lane.b32.xlu0 %v25263_v28, %s19347_s21  ;;  %v25295_v28 = vld [vmem:[#allocation74_spill] sm:$0xff] }
 0xa49   : > { %7918 = vadd.xlane.f32.xlu1 %v7917_v47 }
 0xa4c   : > { %9024 = vrot.lane.b32.xlu0 %v25259_v5, %s19347_s21  ;;  %v25293_v5 = vld [vmem:[#allocation72_spill] sm:$0xff] }
 0xa4d   : > { %7912 = vadd.xlane.f32.xlu1 %v7911_v62 }
 0xa4f   : > { %v18683_v50 = vpop.eup %18682 }
 0xa50   : > { %9151 = vrot.lane.b32.xlu0 %v25264_v0, %s19347_s21  ;;  %v7838_v0 = vpop.xlane.xlu0 %7837  ;;  %v18685_v13 = vpop.eup %18684 }
 0xa54   : > { %9133 = vrot.lane.b32.xlu0 %v25262_v24, %s19347_s21  ;;  %v25294_v24 = vld [vmem:[#allocation45_spill] sm:$0xff] }
 0xa57   : > { %v22567_v59 = vpop.xlane.xlu0 %7855 }
 0xa58   : > { %9262 = vrot.lane.b32.xlu0 %v25271_v43, %s19347_s21  ;;  %v7847_v43 = vpop.xlane.xlu1 %7846 }
 0xa59   : > { %18686 = vrcp.f32 %v7847_v43 }
 0xa5a   : > { %18688 = vrcp.f32 %v7838_v0 }
 0xa5b   : > { %v22575_v2 = vpop.xlane.xlu0 %7849 }
 0xa5c   : > { %9139 = vrot.lane.b32.xlu0 %v25269_v27, %s19347_s21  ;;  %v25296_v27 = vld [vmem:[#allocation51_spill] sm:$0xff]  ;;  %v7841_v39 = vpop.xlane.xlu1 %7840 }
 0xa5d   : > { %18690 = vrcp.f32 %v7841_v39 }
 0xa5e   : > { %8925 = vrot.lane.b32.xlu1 %v25291_v52, %s19347_s21  ;;  %18692 = vrcp.f32 %v22567_v59 }
 0xa5f   : > { %v22585_v19 = vpop.xlane.xlu0 %7867 }
 0xa60   : > { %9246 = vrot.lane.b32.xlu0 %v25292_v26, %s19347_s21  ;;  %v22577_v11 = vpop.xlane.xlu1 %7858 }
 0xa61   : > { %18694 = vrcp.f32 %v22577_v11 }
 0xa62   : > { %9032 = vrot.lane.b32.xlu1 %v25293_v5, %s19347_s21  ;;  %18696 = vrcp.f32 %v22575_v2 }
 0xa63   : > { %v22595_v23 = vpop.xlane.xlu0 %7861  ;;  %v18687_v25 = vpop.eup %18686 }
 0xa64   : > { %9250 = vrot.lane.b32.xlu0 %v25294_v24, %s19347_s21  ;;  %v22587_v48 = vpop.xlane.xlu1 %7852  ;;  %v18689_v62 = vpop.eup %18688 }
 0xa65   : > { %18698 = vrcp.f32 %v22587_v48 }
 0xa66   : > { %9034 = vrot.lane.b32.xlu1 %v25295_v28, %s19347_s21  ;;  %18700 = vrcp.f32 %v22585_v19 }
 0xa67   : > { %v18691_v15 = vpop.eup %18690 }
 0xa68   : > { %9695 = vrot.lane.b32.xlu0 %v25296_v27, %s19347_s21  ;;  %v22597_v21 = vpop.xlane.xlu1 %7870  ;;  %v25310_v27 = vld [vmem:[#allocation40_spill] sm:$0xff]  ;;  %v18693_v48 = vpop.eup %18692 }
 0xa69   : > { %18702 = vrcp.f32 %v22597_v21 }
 0xa6a   : > { %8911 = vrot.lane.b32.xlu1 %v25297_v18, %s19347_s21  ;;  %v25311_v18 = vld [vmem:[#allocation43_spill] sm:$0xff]  ;;  %18704 = vrcp.f32 %v22595_v23 }
 0xa6c   : > { %9699 = vrot.lane.b32.xlu0 %v25298_v44, %s19347_s21  ;;  %v7865_v63 = vpop.xlane.xlu1 %7864 }
 0xa6d   : > { %18706 = vrcp.f32 %v7865_v63 }
 0xa6e   : > { %8913 = vrot.lane.b32.xlu1 %v25299_v36, %s19347_s21  ;;  %v25312_v36 = vld [vmem:[#allocation21_spill] sm:$0xff] }
 0xa70   : > { %9788 = vrot.lane.b32.xlu0 %v25300_v10, %s19347_s21 }
 0xa72   : > { %9145 = vrot.lane.b32.xlu1 %v25301_v7, %s19347_s21 }
 0xa74   : > { %9790 = vrot.lane.b32.xlu0 %v25302_v8, %s19347_s21  ;;  %v25313_v8 = vld [vmem:[#allocation87_spill] sm:$0xff] }
 0xa76   : > { %9147 = vrot.lane.b32.xlu1 %v25303_v42, %s19347_s21  ;;  %v25314_v42 = vld [vmem:[#allocation92_spill] sm:$0xff] }
 0xa77   : > { %v22601_v46 = vpop.xlane.xlu0 %7879 }
 0xa78   : > { %9794 = vrot.lane.b32.xlu0 %v25304_v33, %s19347_s21  ;;  %18708 = vrcp.f32 %v22601_v46 }
 0xa79   : > { %v22609_v20 = vpop.xlane.xlu1 %7882 }
 0xa7a   : > { %9258 = vrot.lane.b32.xlu1 %v25305_v12, %s19347_s21  ;;  %v18695_v12 = vpop.eup %18694  ;;  %18710 = vrcp.f32 %v22609_v20 }
 0xa7b   : > { %v22607_v54 = vpop.xlane.xlu0 %7873  ;;  %v18697_v19 = vpop.eup %18696 }
 0xa7c   : > { %9883 = vrot.lane.b32.xlu0 %v25285_v30, %s19347_s21  ;;  %v25307_v30 = vld [vmem:[#allocation84_spill] sm:$0xff]  ;;  %18712 = vrcp.f32 %v22607_v54 }
 0xa7d   : > { %v22619_v0 = vpop.xlane.xlu1 %7876 }
 0xa7e   : > { %9026 = vrot.lane.b32.xlu1 %v25306_v16, %s19347_s21  ;;  %18714 = vrcp.f32 %v22619_v0 }
 0xa7f   : > { %v22617_v24 = vpop.xlane.xlu0 %7891 }
 0xa80   : > { %v16350_v3 = vpop.f32.mrb[72].mxu1  ;;  %18716 = vrcp.f32 %v22617_v24 }
 0xa81   : > { %v7982_v45 = vpop.f32.mrb[73].mxu1  ;;  %v8278_v58 = vmul.f32 %v18677_v56, %v16350_v3  ;;  %v22631_v39 = vpop.xlane.xlu1 %7894  ;;  %v25315_v56 = vld [vmem:[#allocation97_spill] sm:$0xff] }
 0xa82   : > { %9260 = vrot.lane.b32.xlu1 %v25307_v30, %s19347_s21  ;;  %v16351_v34 = vpop.f32.mrb[74].mxu1  ;;  %v8276_v51 = vmul.f32 %v18681_v17, %v7982_v45  ;;  %18718 = vrcp.f32 %v22631_v39 }
 0xa83   : > { %v8279_v22 = vmul.f32 %v18679_v14, %v16351_v34  ;;  %v7985_v29 = vpop.f32.mrb[75].mxu1  ;;  %v22629_v44 = vpop.xlane.xlu0 %7885 }
 0xa84   : > { %v8277_v6 = vmul.f32 %v18683_v50, %v7985_v29  ;;  %v18699_v14 = vpop.eup %18698  ;;  %18720 = vrcp.f32 %v22629_v44 }
 0xa85   : > { %v8309_v32 = vpack.c.bf16 %v8279_v22, %v8278_v58  ;;  %v22643_v7 = vpop.xlane.xlu1 %7888  ;;  %v18701_v63 = vpop.eup %18700 }
 0xa86   : > { %v8308_v4 = vpack.c.bf16 %v8277_v6, %v8276_v51  ;;  %9135 = vrot.lane.b32.xlu1 %v25308_v57, %s19347_s21  ;;  %18722 = vrcp.f32 %v22643_v7 }
 0xa88   : > { %v16354_v61 = vpop.f32.mrb[76].mxu1  ;;  %14987 = vmatmul.mubr.msk.bf16.vlgmr.msra.gmra.mrb[248].mxu0 %vm3942_vm0, %v8308_v4  ;;  %16412 = vmatprep.mubr.msk.bf16.mxu1 %vm3942_vm0, %v8308_v4 }
 0xa89   : > { %v7998_v47 = vpop.f32.mrb[77].mxu1  ;;  %16413 = vmatmul.mubr.msk.bf16.vlgmr.msra.gmra.mrb[8].mxu1 %vm3942_vm0, %v8309_v32  ;;  %8495 = vmatprep.mubr.bf16.mxu0 %v25184_v53  ;;  %v8282_v52 = vmul.f32 %v18685_v13, %v16354_v61 }
 0xa8a   : > { %9137 = vrot.lane.b32.xlu1 %v25309_v49, %s19347_s21  ;;  %v16355_v40 = vpop.f32.mrb[78].mxu1  ;;  %v8280_v37 = vmul.f32 %v18689_v62, %v7998_v47 }
 0xa8b   : > { %v8283_v26 = vmul.f32 %v18687_v25, %v16355_v40  ;;  %v8001_v35 = vpop.f32.mrb[79].mxu1 }
 0xa8c   : > { %v8281_v5 = vmul.f32 %v18691_v15, %v8001_v35 }
 0xa8d   : > { %v8311_v28 = vpack.c.bf16 %v8283_v26, %v8282_v52 }
 0xa8e   : > { %v8310_v43 = vpack.c.bf16 %v8281_v5, %v8280_v37  ;;  %9264 = vrot.lane.b32.xlu1 %v25310_v27, %s19347_s21 }
 0xa90   : > { %14988 = vmatmul.mubr.msk.bf16.gmra.mrb[252].mxu0 %vm3942_vm0, %v8309_v32  ;;  %16416 = vmatprep.mubr.msk.bf16.mxu1 %vm3942_vm0, %v8310_v43  ;;  %v18703_v32 = vpop.eup %18702 }
 0xa91   : > { %16417 = vmatmul.mubr.msk.bf16.gmra.mrb[12].mxu1 %vm3942_vm0, %v8311_v28  ;;  %8505 = vmatprep.mubr.bf16.mxu0 %v25184_v53  ;;  %v18705_v57 = vpop.eup %18704 }
 0xa92   : > { %9248 = vrot.lane.b32.xlu1 %v25311_v18, %s19347_s21  ;;  %v18707_v61 = vpop.eup %18706 }
 0xa93   : > { %v18709_v46 = vpop.eup %18708 }
 0xa94   : > { %v18711_v54 = vpop.eup %18710 }
 0xa96   : > { %9252 = vrot.lane.b32.xlu1 %v25312_v36, %s19347_s21 }
 0xa97   : > { %v22637_v10 = vpop.xlane.xlu0 %7903 }
 0xa98   : > { %14989 = vmatmul.mubr.msk.bf16.gmra.mrb[0].mxu0 %vm3942_vm0, %v8310_v43  ;;  %v18713_v43 = vpop.eup %18712  ;;  %18724 = vrcp.f32 %v22637_v10 }
 0xa99   : > { %8515 = vmatprep.mubr.bf16.mxu0 %v25184_v53  ;;  %v22650_v11 = vpop.xlane.xlu1 %7906  ;;  %v18715_v18 = vpop.eup %18714 }
 0xa9a   : > { %9697 = vrot.lane.b32.xlu1 %v25313_v8, %s19347_s21  ;;  %v18717_v7 = vpop.eup %18716  ;;  %18726 = vrcp.f32 %v22650_v11 }
 0xa9b   : > { %v22647_v59 = vpop.xlane.xlu0 %7897 }
 0xa9c   : > { %18728 = vrcp.f32 %v22647_v59 }
 0xa9d   : > { %v22664_v23 = vpop.xlane.xlu1 %7900 }
 0xa9e   : > { %9701 = vrot.lane.b32.xlu1 %v25314_v42, %s19347_s21  ;;  %18730 = vrcp.f32 %v22664_v23 }
 0xa9f   : > { %v22655_v2 = vpop.xlane.xlu0 %7915 }
 0xaa0   : > { %v16366_v33 = vpop.f32.mrb[56].mxu0  ;;  %14990 = vmatmul.mubr.msk.bf16.gmra.mrb[4].mxu0 %vm3942_vm0, %v8311_v28  ;;  %18732 = vrcp.f32 %v22655_v2 }
 0xaa1   : > { %v8059_v16 = vpop.f32.mrb[57].mxu0  ;;  %8525 = vmatprep.mubr.bf16.mxu0 %v25184_v53  ;;  %v8286_v21 = vmul.f32 %v18693_v48, %v16366_v33  ;;  %v8922_v13 = vpop.permute.xlu1 %8921 }
 0xaa2   : > { %9792 = vrot.lane.b32.xlu1 %v25315_v56, %s19347_s21  ;;  %v16367_v3 = vpop.f32.mrb[58].mxu0  ;;  %v8284_v34 = vmul.f32 %v18697_v19, %v8059_v16  ;;  %v18719_v16 = vpop.eup %18718 }
 0xaa3   : > { %v8287_v45 = vmul.f32 %v18695_v12, %v16367_v3  ;;  %v22662_v17 = vpop.xlane.xlu0 %7909  ;;  %v8062_v30 = vpop.f32.mrb[59].mxu0 }
 0xaa4   : > { %v8285_v50 = vmul.f32 %v18699_v14, %v8062_v30  ;;  %v18721_v56 = vpop.eup %18720  ;;  %18734 = vrcp.f32 %v22662_v17 }
 0xaa5   : > { %v8313_v58 = vpack.c.bf16 %v8287_v45, %v8286_v21  ;;  %v8924_v26 = vpop.permute.xlu1 %8923  ;;  %v18723_v14 = vpop.eup %18722 }
 0xaa6   : > { %v8312_v22 = vpack.c.bf16 %v8285_v50, %v8284_v34  ;;  %9881 = vrot.lane.b32.xlu1 %v25280_v55, %s19347_s21  ;;  %v8946_v37 = vsel %vm3942_vm0, %v8924_v26, 0  ;;  %v18725_v11 = vpop.eup %18724 }
 0xaa7   : > { %v8920_v29 = vpop.permute.xlu0 %8919 }
 0xaa8   : > { %v16370_v51 = vpop.f32.mrb[60].mxu0  ;;  %16420 = vmatprep.mubr.msk.bf16.mxu1 %vm3942_vm0, %v8312_v22  ;;  %17756 = vmatprep.subr.msk.bf16.mxu1 %vm3942_vm0, %v8920_v29  ;;  %v8940_v6 = vsel %vm3942_vm0, %v8920_v29, 0 }
 0xaa9   : > { %v8075_v4 = vpop.f32.mrb[61].mxu0  ;;  %14991 = vmatmul.mubr.msk.bf16.gmra.mrb[8].mxu0 %vm3942_vm0, %v8312_v22  ;;  %16421 = vmatmul.mubr.msk.bf16.gmra.mrb[16].mxu1 %vm3942_vm0, %v8313_v58  ;;  %v8290_v25 = vmul.f32 %v18701_v63, %v16370_v51 }
 0xaaa   : > { %16445 = vmatpush3.bf16.xpose.msra.mxu1 %v8940_v6  ;;  %9885 = vrot.lane.b32.xlu1 %v25286_v9, %s19347_s21  ;;  %v16371_v55 = vpop.f32.mrb[62].mxu0  ;;  %v8288_v49 = vmul.f32 %v18705_v57, %v8075_v4  ;;  %v8943_v9 = vsel %vm3942_vm0, %v8922_v13, 0  ;;  %v18727_v57 = vpop.eup %18726 }
 0xaab   : > { %v8291_v47 = vmul.f32 %v18703_v32, %v16371_v55  ;;  %17757 = vmatprep.subr.msk.bf16.mxu1 %vm3942_vm0, %v8922_v13  ;;  %v8078_v62 = vpop.f32.mrb[63].mxu0  ;;  %8535 = vmatprep.mubr.bf16.mxu0 %v25184_v53  ;;  %v22683_v35 = vpop.permute.xlu0 %8907 }
 0xaac   : > { %v8289_v40 = vmul.f32 %v18707_v61, %v8078_v62  ;;  %v18729_v55 = vpop.eup %18728 }
 0xaad   : > { %v8315_v15 = vpack.c.bf16 %v8291_v47, %v8290_v25  ;;  %v18731_v17 = vpop.eup %18730 }
 0xaae   : > { %v8314_v52 = vpack.c.bf16 %v8289_v40, %v8288_v49 }
 0xaaf   : > { %v22692_v5 = vpop.permute.xlu0 %8909 }
 0xab0   : > { %16424 = vmatprep.mubr.msk.bf16.mxu1 %vm3942_vm0, %v8314_v52 }
 0xab1   : > { %14992 = vmatmul.mubr.msk.bf16.gmra.mrb[12].mxu0 %vm3942_vm0, %v8313_v58  ;;  %16425 = vmatmul.mubr.msk.bf16.gmra.mrb[20].mxu1 %vm3942_vm0, %v8315_v15 }
 0xab2   : > { %16447 = vmatpush3.bf16.xpose.msra.mxu1 %v8943_v9  ;;  %8545 = vmatprep.mubr.bf16.mxu0 %v25184_v53 }
 0xab3   : > { %17758 = vmatprep.subr.msk.bf16.mxu1 %vm3942_vm0, %v8924_v26  ;;  %v22698_v28 = vpop.permute.xlu0 %9036 }
 0xab7   : > { %v22702_v33 = vpop.permute.xlu0 %9038 }
 0xab9   : > { %14993 = vmatmul.mubr.msk.bf16.gmra.mrb[16].mxu0 %vm3942_vm0, %v8314_v52 }
 0xaba   : > { %16449 = vmatpush3.bf16.xpose.msra.mxu1 %v8946_v37  ;;  %8555 = vmatprep.mubr.bf16.mxu0 %v25184_v53  ;;  %v18733_v37 = vpop.eup %18732 }
 0xabb   : > { %v22708_v58 = vpop.permute.xlu0 %9020 }
 0xabf   : > { %v22714_v63 = vpop.permute.xlu0 %9022 }
 0xac0   : > { %v16382_v20 = vpop.f32.mrb[80].mxu1 }
 0xac1   : > { %v8136_v0 = vpop.f32.mrb[81].mxu1  ;;  %14994 = vmatmul.mubr.msk.bf16.gmra.mrb[20].mxu0 %vm3942_vm0, %v8315_v15  ;;  %v8294_v24 = vmul.f32 %v18709_v46, %v16382_v20  ;;  %v18735_v20 = vpop.eup %18734 }
 0xac2   : > { %v16383_v27 = vpop.f32.mrb[82].mxu1  ;;  %8565 = vmatprep.mubr.bf16.mxu0 %v25184_v53  ;;  %v8292_v8 = vmul.f32 %v18713_v43, %v8136_v0 }
 0xac3   : > { %v8295_v36 = vmul.f32 %v18711_v54, %v16383_v27  ;;  %v8139_v39 = vpop.f32.mrb[83].mxu1  ;;  %v22720_v6 = vpop.permute.xlu0 %9149 }
 0xac4   : > { %v8293_v42 = vmul.f32 %v18715_v18, %v8139_v39 }
 0xac5   : > { %v8317_v44 = vpack.c.bf16 %v8295_v36, %v8294_v24 }
 0xac6   : > { %v8316_v48 = vpack.c.bf16 %v8293_v42, %v8292_v8 }
 0xac7   : > { %v22726_v10 = vpop.permute.xlu0 %9024 }
 0xac8   : > { %v16386_v12 = vpop.f32.mrb[84].mxu1  ;;  %16428 = vmatprep.mubr.msk.bf16.mxu1 %vm3942_vm0, %v8316_v48 }
 0xac9   : > { %v8152_v19 = vpop.f32.mrb[85].mxu1  ;;  %14995 = vmatmul.mubr.msk.bf16.gmra.mrb[24].mxu0 %vm3942_vm0, %v8316_v48  ;;  %16429 = vmatmul.mubr.msk.bf16.gmra.mrb[24].mxu1 %vm3942_vm0, %v8317_v44  ;;  %v8298_v21 = vmul.f32 %v18717_v7, %v16386_v12 }
 0xaca   : > { %v16387_v3 = vpop.f32.mrb[86].mxu1  ;;  %8575 = vmatprep.mubr.bf16.mxu0 %v25184_v53  ;;  %v8296_v34 = vmul.f32 %v18721_v56, %v8152_v19 }
 0xacb   : > { %v8299_v45 = vmul.f32 %v18719_v16, %v16387_v3  ;;  %v8155_v30 = vpop.f32.mrb[87].mxu1  ;;  %v22733_v15 = vpop.permute.xlu0 %9151 }
 0xacc   : > { %v8297_v50 = vmul.f32 %v18723_v14, %v8155_v30 }
 0xacd   : > { %v8319_v22 = vpack.c.bf16 %v8299_v45, %v8298_v21 }
 0xace   : > { %v8318_v29 = vpack.c.bf16 %v8297_v50, %v8296_v34 }
 0xacf   : > { %v22739_v24 = vpop.permute.xlu0 %9133 }
 0xad0   : > { %16432 = vmatprep.mubr.msk.bf16.mxu1 %vm3942_vm0, %v8318_v29 }
 0xad1   : > { %14996 = vmatmul.mubr.msk.bf16.gmra.mrb[32].mxu0 %vm3942_vm0, %v8317_v44  ;;  %16433 = vmatmul.mubr.msk.bf16.gmra.mrb[28].mxu1 %vm3942_vm0, %v8319_v22 }
 0xad2   : > { %8585 = vmatprep.mubr.bf16.mxu0 %v25184_v53 }
 0xad3   : > { %v9263_v16 = vpop.permute.xlu0 %9262 }
 0xad6   : > { %v7919_v51 = vpop.xlane.xlu1 %7918 }
 0xad7   : > { %18736 = vrcp.f32 %v7919_v51  ;;  %v22747_v3 = vpop.permute.xlu0 %9139 }
 0xad9   : > { %14997 = vmatmul.mubr.msk.bf16.gmra.mrb[28].mxu0 %vm3942_vm0, %v8318_v29 }
 0xada   : > { %v7913_v32 = vpop.xlane.xlu1 %7912  ;;  %8595 = vmatprep.mubr.bf16.mxu0 %v25184_v53 }
 0xadb   : > { %18738 = vrcp.f32 %v7913_v32  ;;  %v9247_v45 = vpop.permute.xlu0 %9246  ;;  %v9059_v32 = vsel %vm3942_vm0, %v22698_v28, 0 }
 0xade   : > { %v8926_v4 = vpop.permute.xlu1 %8925 }
 0xadf   : > { %17759 = vmatprep.subr.msk.bf16.mxu1 %vm3942_vm0, %v8926_v4  ;;  %v8949_v59 = vsel %vm3942_vm0, %v8926_v4, 0  ;;  %v9251_v50 = vpop.permute.xlu0 %9250  ;;  %v9285_v4 = vsel %vm3942_vm0, %v9263_v16, 0 }
 0xae0   : > { %v16398_v23 = vpop.f32.mrb[64].mxu0  ;;  %16451 = vmatpush3.bf16.xpose.msra.mxu1 %v8949_v59 }
 0xae1   : > { %v8213_v13 = vpop.f32.mrb[65].mxu0  ;;  %14998 = vmatmul.mubr.msk.bf16.gmra.mrb[36].mxu0 %vm3942_vm0, %v8319_v22  ;;  %v8302_v25 = vmul.f32 %v18725_v11, %v16398_v23  ;;  %v18737_v0 = vpop.eup %18736  ;;  %v9062_v23 = vsel %vm3942_vm0, %v22702_v33, 0 }
 0xae2   : > { %v9033_v2 = vpop.permute.xlu1 %9032  ;;  %v16399_v61 = vpop.f32.mrb[66].mxu0  ;;  %8605 = vmatprep.mubr.bf16.mxu0 %v25184_v53  ;;  %v8300_v49 = vmul.f32 %v18729_v55, %v8213_v13 }
 0xae3   : > { %v8303_v47 = vmul.f32 %v18727_v57, %v16399_v61  ;;  %v8216_v62 = vpop.f32.mrb[67].mxu0  ;;  %17760 = vmatprep.subr.msk.bf16.mxu1 %vm3942_vm0, %v9033_v2  ;;  %v9053_v14 = vsel %vm3942_vm0, %v9033_v2, 0  ;;  %v9696_v51 = vpop.permute.xlu0 %9695 }
 0xae4   : > { %v8301_v40 = vmul.f32 %v18731_v17, %v8216_v62  ;;  %v9175_v62 = vsel %vm3942_vm0, %v22733_v15, 0 }
 0xae5   : > { %v8321_v52 = vpack.c.bf16 %v8303_v47, %v8302_v25  ;;  %v18739_v18 = vpop.eup %18738  ;;  %v9172_v47 = vsel %vm3942_vm0, %v22720_v6, 0 }
 0xae6   : > { %v8320_v9 = vpack.c.bf16 %v8301_v40, %v8300_v49  ;;  %v9035_v26 = vpop.permute.xlu1 %9034 }
 0xae7   : > { %v9700_v11 = vpop.permute.xlu0 %9699 }
 0xae8   : > { %v16402_v46 = vpop.f32.mrb[68].mxu0  ;;  %16436 = vmatprep.mubr.msk.bf16.mxu1 %vm3942_vm0, %v8320_v9 }
 0xae9   : > { %v8229_v54 = vpop.f32.mrb[69].mxu0  ;;  %14999 = vmatmul.mubr.msk.bf16.gmra.mrb[40].mxu0 %vm3942_vm0, %v8320_v9  ;;  %16437 = vmatmul.mubr.msk.bf16.gmra.mrb[32].mxu1 %vm3942_vm0, %v8321_v52  ;;  %v8306_v36 = vmul.f32 %v18733_v37, %v16402_v46 }
 0xaea   : > { %v8912_v43 = vpop.permute.xlu1 %8911  ;;  %v16403_v27 = vpop.f32.mrb[70].mxu0  ;;  %8615 = vmatprep.mubr.bf16.mxu0 %v25184_v53  ;;  %v8304_v42 = vmul.f32 %v18735_v20, %v8229_v54 }
 0xaeb   : > { %v8307_v39 = vmul.f32 %v18737_v0, %v16403_v27  ;;  %v8232_v8 = vpop.f32.mrb[71].mxu0  ;;  %v9789_v13 = vpop.permute.xlu0 %9788 }
 0xaec   : > { %v8305_v44 = vmul.f32 %v18739_v18, %v8232_v8 }
 0xaed   : > { %v8323_v48 = vpack.c.bf16 %v8307_v39, %v8306_v36 }
 0xaee   : > { %v8322_v7 = vpack.c.bf16 %v8305_v44, %v8304_v42  ;;  %v8914_v12 = vpop.permute.xlu1 %8913 }
 0xaef   : > { %v9791_v61 = vpop.permute.xlu0 %9790 }
 0xaf0   : > { %16440 = vmatprep.mubr.msk.bf16.mxu1 %vm3942_vm0, %v8322_v7 }
 0xaf1   : > { %15000 = vmatmul.mubr.msk.bf16.gmra.mrb[44].mxu0 %vm3942_vm0, %v8321_v52  ;;  %16441 = vmatmul.mubr.msk.bf16.gmra.mrb[36].mxu1 %vm3942_vm0, %v8323_v48 }
 0xaf2   : > { %v9146_v19 = vpop.permute.xlu1 %9145  ;;  %16452 = vmatprep.mubr.msk.bf16.mxu1 %vm3942_vm0, %v22683_v35  ;;  %8625 = vmatprep.mubr.bf16.mxu0 %v25184_v53 }
 0xaf3   : > { %v9166_v2 = vsel %vm3942_vm0, %v9146_v19, 0  ;;  %v9795_v25 = vpop.permute.xlu0 %9794 }
 0xaf6   : > { %v9148_v56 = vpop.permute.xlu1 %9147 }
 0xaf9   : > { %15001 = vmatmul.mubr.msk.bf16.gmra.mrb[48].mxu0 %vm3942_vm0, %v8322_v7  ;;  %16453 = vmatmul.mubr.msk.bf16.vlgmr.msra.gmra.mrb[88].mxu1 %vm3942_vm0, %v22692_v5  ;;  %v9056_v5 = vsel %vm3942_vm0, %v9035_v26, 0 }
 0xafa   : > { %16461 = vmatpush3.bf16.xpose.msra.mxu1 %v9053_v14  ;;  %v9259_v21 = vpop.permute.xlu1 %9258  ;;  %16456 = vmatprep.mubr.msk.bf16.mxu1 %vm3942_vm0, %v8912_v43 }
 0xafb   : > { %17761 = vmatprep.subr.msk.bf16.mxu1 %vm3942_vm0, %v9035_v26  ;;  %17768 = vmatprep.subr.msk.bf16.mxu0 %vm3942_vm0, %v9259_v21  ;;  %v9279_v35 = vsel %vm3942_vm0, %v9259_v21, 0 }
 0xafc   : > { %16493 = vmatpush3.bf16.xpose.msra.mxu0 %v9279_v35  ;;  %8635 = vmatprep.mubr.bf16.mxu0 %v25184_v53 }
 0xafe   : > { %v9027_v30 = vpop.permute.xlu1 %9026 }
 0xb01   : > { %15002 = vmatmul.mubr.msk.bf16.gmra.mrb[52].mxu0 %vm3942_vm0, %v8323_v48  ;;  %16457 = vmatmul.mubr.msk.bf16.gmra.mrb[92].mxu1 %vm3942_vm0, %v8914_v12 }
 0xb02   : > { %16463 = vmatpush3.bf16.xpose.msra.mxu1 %v9056_v5  ;;  %v9261_v34 = vpop.permute.xlu1 %9260  ;;  %16468 = vmatprep.mubr.msk.bf16.mxu1 %vm3942_vm0, %v22708_v58 }
 0xb03   : > { %17762 = vmatprep.subr.msk.bf16.mxu1 %vm3942_vm0, %v22698_v28  ;;  %16500 = vmatprep.mubr.msk.bf16.mxu0 %vm3942_vm0, %v9247_v45  ;;  %v9282_v22 = vsel %vm3942_vm0, %v9261_v34, 0 }
 0xb04   : > { %17769 = vmatprep.subr.msk.bf16.mxu0 %vm3942_vm0, %v9261_v34 }
 0xb05   : > { %16495 = vmatpush3.bf16.xpose.msra.mxu0 %v9282_v22 }
 0xb06   : > { %17770 = vmatprep.subr.msk.bf16.mxu0 %vm3942_vm0, %v9263_v16  ;;  %v9136_v29 = vpop.permute.xlu1 %9135 }
 0xb0a   : > { %16465 = vmatpush3.bf16.xpose.msra.mxu1 %v9059_v32  ;;  %v9138_v58 = vpop.permute.xlu1 %9137 }
 0xb0b   : > { %17763 = vmatprep.subr.msk.bf16.mxu1 %vm3942_vm0, %v22702_v33 }
 0xb0d   : > { %16497 = vmatpush3.bf16.xpose.msra.mxu0 %v9285_v4 }
 0xb0e   : > { %v9265_v59 = vpop.permute.xlu1 %9264 }
 0xb0f   : > { %17771 = vmatprep.subr.msk.bf16.mxu0 %vm3942_vm0, %v9265_v59  ;;  %v9288_v28 = vsel %vm3942_vm0, %v9265_v59, 0 }
 0xb12   : > { %16467 = vmatpush3.bf16.xpose.msra.mxu1 %v9062_v23  ;;  %v9249_v57 = vpop.permute.xlu1 %9248 }
 0xb13   : > { %17764 = vmatprep.subr.msk.bf16.mxu1 %vm3942_vm0, %v9146_v19 }
 0xb15   : > { %16499 = vmatpush3.bf16.xpose.msra.mxu0 %v9288_v28 }
 0xb16   : > { %16524 = vmatprep.subr.bf16.mxu0 %v9789_v13  ;;  %v9253_v55 = vpop.permute.xlu1 %9252 }
 0xb19   : > { %16469 = vmatmul.mubr.msk.bf16.vlgmr.msra.gmra.mrb[96].mxu1 %vm3942_vm0, %v22714_v63  ;;  %v9169_v63 = vsel %vm3942_vm0, %v9148_v56, 0 }
 0xb1a   : > { %16472 = vmatprep.mubr.msk.bf16.mxu1 %vm3942_vm0, %v22726_v10  ;;  %16477 = vmatpush3.bf16.xpose.msra.mxu1 %v9166_v2  ;;  %v9698_v33 = vpop.permute.xlu1 %9697 }
 0xb1b   : > { %17765 = vmatprep.subr.msk.bf16.mxu1 %vm3942_vm0, %v9148_v56 }
 0xb1c   : > { %16501 = vmatmul.mubr.msk.bf16.vlgmr.msra.gmra.mrb[72].mxu0 %vm3942_vm0, %v9249_v57 }
 0xb1d   : > { %16504 = vmatprep.mubr.msk.bf16.mxu0 %vm3942_vm0, %v9251_v50  ;;  %16525 = vmatpush3.bf16.msra.mxu0 %v9789_v13 }
 0xb1e   : > { %16526 = vmatprep.subr.bf16.mxu0 %v9791_v61  ;;  %v9702_v17 = vpop.permute.xlu1 %9701 }
 0xb21   : > { %16473 = vmatmul.mubr.msk.bf16.gmra.mrb[100].mxu1 %vm3942_vm0, %v9027_v30  ;;  %16527 = vmatpush3.bf16.msra.mxu0 %v9791_v61 }
 0xb22   : > { %16479 = vmatpush3.bf16.xpose.msra.mxu1 %v9169_v63  ;;  %16484 = vmatprep.mubr.msk.bf16.mxu1 %vm3942_vm0, %v22739_v24  ;;  %v9793_v10 = vpop.permute.xlu1 %9792 }
 0xb23   : > { %17766 = vmatprep.subr.msk.bf16.mxu1 %vm3942_vm0, %v22720_v6  ;;  %16528 = vmatprep.subr.bf16.mxu0 %v9793_v10 }
 0xb24   : > { %16505 = vmatmul.mubr.msk.bf16.gmra.mrb[76].mxu0 %vm3942_vm0, %v9253_v55 }
 0xb25   : > { %16529 = vmatpush3.bf16.msra.mxu0 %v9793_v10 }
 0xb26   : > { %16530 = vmatprep.subr.bf16.mxu0 %v9795_v25  ;;  %v22804_v6 = vpop.permute.xlu1 %9881 }
 0xb29   : > { %16531 = vmatpush3.bf16.msra.mxu0 %v9795_v25 }
 0xb2a   : > { %16481 = vmatpush3.bf16.xpose.msra.mxu1 %v9172_v47 }
 0xb2b   : > { %17767 = vmatprep.subr.msk.bf16.mxu1 %vm3942_vm0, %v22733_v15 }
 0xb32   : > { %16483 = vmatpush3.bf16.xpose.msra.mxu1 %v9175_v62 }
 0xb33   : > { %16508 = vmatprep.subr.bf16.mxu1 %v9696_v51 }
 0xb39   : > { %16485 = vmatmul.mubr.msk.bf16.vlgmr.msra.gmra.mrb[104].mxu1 %vm3942_vm0, %v9136_v29 }
 0xb3a   : > { %16488 = vmatprep.mubr.msk.bf16.mxu1 %vm3942_vm0, %v9138_v58  ;;  %16509 = vmatpush3.bf16.msra.mxu1 %v9696_v51 }
 0xb3b   : > { %16510 = vmatprep.subr.bf16.mxu1 %v9698_v33 }
 0xb3e   : > { %16511 = vmatpush3.bf16.msra.mxu1 %v9698_v33 }
 0xb3f   : > { %16512 = vmatprep.subr.bf16.mxu1 %v9700_v11 }
 0xb41   : > { %16489 = vmatmul.mubr.msk.bf16.gmra.mrb[108].mxu1 %vm3942_vm0, %v22747_v3 }
 0xb42   : > { %16513 = vmatpush3.bf16.msra.mxu1 %v9700_v11 }
 0xb43   : > { %16514 = vmatprep.subr.bf16.mxu1 %v9702_v17 }
 0xb46   : > { %16515 = vmatpush3.bf16.msra.mxu1 %v9702_v17 }
 0xb47   : > { %16540 = vmatprep.subr.bf16.mxu1 %v22804_v6 }
 0xbcc   : > { %v16454_v49 = vpop.f32.mrb[88].mxu1 }
 0xbcd   : > { %v22809_v15 = vsel %vm20755_vm1, %v16454_v49, -inf  ;;  %v8985_v52 = vpop.f32.mrb[89].mxu1 }
 0xbce   : > { %v9393_v9 = vsel %vm3942_vm0, %v22809_v15, -inf  ;;  %v16455_v26 = vpop.f32.mrb[90].mxu1  ;;  %v22815_v46 = vsel %vm20763_vm2, %v8985_v52, -inf }
 0xbcf   : > { %9394 = vmax.xlane.f32.xlu0 %v9393_v9  ;;  %v8988_v20 = vpop.f32.mrb[91].mxu1  ;;  %v9387_v27 = vsel %vm3942_vm0, %v22815_v46, -inf  ;;  %v22827_v24 = vsel %vm20767_vm3, %v16455_v26, -inf }
 0xbd0   : > { %v22819_v0 = vsel %vm20779_vm4, %v8988_v20, -inf  ;;  %v9396_v8 = vsel %vm3942_vm0, %v22827_v24, -inf }
 0xbd1   : > { %v9390_v43 = vsel %vm3942_vm0, %v22819_v0, -inf }
 0xbd2   : > { %9391 = vmax.xlane.f32.xlu1 %v9390_v43 }
 0xbd3   : > { %9388 = vmax.xlane.f32.xlu0 %v9387_v27 }
 0xbd4   : > { %v16458_v36 = vpop.f32.mrb[92].mxu1 }
 0xbd5   : > { %v9001_v39 = vpop.f32.mrb[93].mxu1  ;;  %v22833_v48 = vsel %vm20806_vm5, %v16458_v36, -inf }
 0xbd6   : > { %v16459_v42 = vpop.f32.mrb[94].mxu1  ;;  %v9405_v14 = vsel %vm3942_vm0, %v22833_v48, -inf  ;;  %v22849_v35 = vsel %vm20815_vm6, %v9001_v39, -inf }
 0xbd7   : > { %v22837_v12 = vsel %vm20819_vm7, %v16459_v42, -inf  ;;  %9397 = vmax.xlane.f32.xlu0 %v9396_v8  ;;  %v9004_v16 = vpop.f32.mrb[95].mxu1  ;;  %v9399_v30 = vsel %vm3942_vm0, %v22849_v35, -inf }
 0xbd8   : > { %v9408_v19 = vsel %vm3942_vm0, %v22837_v12, -inf  ;;  %v22843_v3 = vsel %vm20831_vm8, %v9004_v16, -inf }
 0xbd9   : > { %9409 = vmax.xlane.f32.xlu1 %v9408_v19  ;;  %v9402_v45 = vsel %vm3942_vm0, %v22843_v3, -inf }
 0xbdb   : > { %9406 = vmax.xlane.f32.xlu0 %v9405_v14 }
 0xbdd   : > { %9403 = vmax.xlane.f32.xlu1 %v9402_v45 }
 0xbdf   : > { %9400 = vmax.xlane.f32.xlu0 %v9399_v30 }
 0xbec   : > { %v16470_v5 = vpop.f32.mrb[96].mxu1 }
 0xbed   : > { %v9098_v34 = vpop.f32.mrb[97].mxu1  ;;  %v22903_v27 = vsel %vm20755_vm1, %v16470_v5, -inf }
 0xbee   : > { %v16471_v50 = vpop.f32.mrb[98].mxu1  ;;  %v22909_v39 = vsel %vm20763_vm2, %v9098_v34, -inf  ;;  %v9417_v8 = vsel %vm3942_vm0, %v22903_v27, -inf }
 0xbef   : > { %v9101_v22 = vpop.f32.mrb[99].mxu1  ;;  %v16502_v29 = vpop.f32.mrb[72].mxu0  ;;  %v22915_v42 = vsel %vm20767_vm3, %v16471_v50, -inf  ;;  %v9411_v16 = vsel %vm3942_vm0, %v22909_v39, -inf }
 0xbf0   : > { %v22857_v51 = vsel %vm20755_vm1, %v16502_v29, -inf  ;;  %v9324_v32 = vpop.f32.mrb[73].mxu0  ;;  %v9420_v14 = vsel %vm3942_vm0, %v22915_v42, -inf  ;;  %v22927_v45 = vsel %vm20779_vm4, %v9101_v22, -inf }
 0xbf1   : > { %v9465_v58 = vsel %vm3942_vm0, %v22857_v51, -inf  ;;  %v16503_v4 = vpop.f32.mrb[74].mxu0  ;;  %v22863_v59 = vsel %vm20763_vm2, %v9324_v32, -inf  ;;  %v9414_v5 = vsel %vm3942_vm0, %v22927_v45, -inf }
 0xbf2   : > { %v22867_v11 = vsel %vm20767_vm3, %v16503_v4, -inf  ;;  %9466 = vmax.xlane.f32.xlu1 %v9465_v58  ;;  %v9327_v23 = vpop.f32.mrb[75].mxu0  ;;  %v9459_v55 = vsel %vm3942_vm0, %v22863_v59, -inf }
 0xbf3   : > { %v9468_v57 = vsel %vm3942_vm0, %v22867_v11, -inf  ;;  %v22873_v28 = vsel %vm20779_vm4, %v9327_v23, -inf }
 0xbf4   : > { %v16474_v13 = vpop.f32.mrb[100].mxu1  ;;  %9469 = vmax.xlane.f32.xlu0 %v9468_v57  ;;  %v9462_v61 = vsel %vm3942_vm0, %v22873_v28, -inf }
 0xbf5   : > { %v9114_v2 = vpop.f32.mrb[101].mxu1  ;;  %v22935_v34 = vsel %vm20806_vm5, %v16474_v13, -inf }
 0xbf6   : > { %v16475_v33 = vpop.f32.mrb[102].mxu1  ;;  %9460 = vmax.xlane.f32.xlu1 %v9459_v55  ;;  %v22921_v19 = vsel %vm20815_vm6, %v9114_v2, -inf  ;;  %v9429_v29 = vsel %vm3942_vm0, %v22935_v34, -inf }
 0xbf7   : > { %v9117_v17 = vpop.f32.mrb[103].mxu1  ;;  %v16506_v63 = vpop.f32.mrb[76].mxu0  ;;  %v9423_v30 = vsel %vm3942_vm0, %v22921_v19, -inf  ;;  %v22941_v22 = vsel %vm20819_vm7, %v16475_v33, -inf }
 0xbf8   : > { %v22881_v10 = vsel %vm20806_vm5, %v16506_v63, -inf  ;;  %9463 = vmax.xlane.f32.xlu0 %v9462_v61  ;;  %v9340_v25 = vpop.f32.mrb[77].mxu0  ;;  %v9432_v23 = vsel %vm3942_vm0, %v22941_v22, -inf  ;;  %v22947_v57 = vsel %vm20831_vm8, %v9117_v17, -inf }
 0xbf9   : > { %v9477_v47 = vsel %vm3942_vm0, %v22881_v10, -inf  ;;  %v16507_v62 = vpop.f32.mrb[78].mxu0  ;;  %v22887_v49 = vsel %vm20815_vm6, %v9340_v25, -inf  ;;  %v9426_v55 = vsel %vm3942_vm0, %v22947_v57, -inf }
 0xbfa   : > { %v22891_v52 = vsel %vm20819_vm7, %v16507_v62, -inf  ;;  %9478 = vmax.xlane.f32.xlu1 %v9477_v47  ;;  %v9343_v9 = vpop.f32.mrb[79].mxu0  ;;  %v9471_v43 = vsel %vm3942_vm0, %v22887_v49, -inf }
 0xbfb   : > { %v9480_v26 = vsel %vm3942_vm0, %v22891_v52, -inf  ;;  %v22897_v20 = vsel %vm20831_vm8, %v9343_v9, -inf }
 0xbfc   : > { %9481 = vmax.xlane.f32.xlu0 %v9480_v26  ;;  %v9474_v36 = vsel %vm3942_vm0, %v22897_v20, -inf }
 0xbfe   : > { %9472 = vmax.xlane.f32.xlu1 %v9471_v43 }
 0xc00   : > { %9475 = vmax.xlane.f32.xlu0 %v9474_v36 }
 0xc02   : > { %9418 = vmax.xlane.f32.xlu1 %v9417_v8 }
 0xc04   : > { %9412 = vmax.xlane.f32.xlu0 %v9411_v16 }
 0xc06   : > { %9421 = vmax.xlane.f32.xlu1 %v9420_v14 }
 0xc08   : > { %9424 = vmax.xlane.f32.xlu0 %v9423_v30 }
 0xc0a   : > { %9415 = vmax.xlane.f32.xlu1 %v9414_v5 }
 0xc0c   : > { %v16486_v50 = vpop.f32.mrb[104].mxu1 }
 0xc0d   : > { %v9211_v32 = vpop.f32.mrb[105].mxu1  ;;  %v22953_v33 = vsel %vm20755_vm1, %v16486_v50, -inf }
 0xc0e   : > { %v16487_v58 = vpop.f32.mrb[106].mxu1  ;;  %9430 = vmax.xlane.f32.xlu1 %v9429_v29  ;;  %v9441_v25 = vsel %vm3942_vm0, %v22953_v33, -inf  ;;  %v9886_v29 = vpop.permute.xlu1 %9885 }
 0xc0f   : > { %v9214_v4 = vpop.f32.mrb[107].mxu1  ;;  %v22959_v17 = vsel %vm20767_vm3, %v16487_v58, -inf }
 0xc10   : > { %v9444_v47 = vsel %vm3942_vm0, %v22959_v17, -inf  ;;  %v22965_v62 = vsel %vm20779_vm4, %v9214_v4, -inf }
 0xc11   : > { %v9438_v9 = vsel %vm3942_vm0, %v22965_v62, -inf }
 0xc12   : > { %9433 = vmax.xlane.f32.xlu1 %v9432_v23 }
 0xc14   : > { %v16490_v13 = vpop.f32.mrb[108].mxu1 }
 0xc15   : > { %v9227_v2 = vpop.f32.mrb[109].mxu1  ;;  %v22973_v26 = vsel %vm20806_vm5, %v16490_v13, -inf }
 0xc16   : > { %v16491_v61 = vpop.f32.mrb[110].mxu1  ;;  %9427 = vmax.xlane.f32.xlu1 %v9426_v55  ;;  %v9453_v43 = vsel %vm3942_vm0, %v22973_v26, -inf  ;;  %v22979_v36 = vsel %vm20815_vm6, %v9227_v2, -inf }
 0xc17   : > { %v9230_v63 = vpop.f32.mrb[111].mxu1  ;;  %v9447_v8 = vsel %vm3942_vm0, %v22979_v36, -inf  ;;  %v22993_v14 = vsel %vm20819_vm7, %v16491_v61, -inf }
 0xc18   : > { %v9456_v30 = vsel %vm3942_vm0, %v22993_v14, -inf  ;;  %v22999_v5 = vsel %vm20831_vm8, %v9230_v63, -inf }
 0xc19   : > { %v9450_v50 = vsel %vm3942_vm0, %v22999_v5, -inf }
 0xc1a   : > { %9442 = vmax.xlane.f32.xlu1 %v9441_v25 }
 0xc1e   : > { %9445 = vmax.xlane.f32.xlu1 %v9444_v47  ;;  %9887 = vrot.lane.b32.xlu0 %v25287_v41, %s19347_s21  ;;  %v22985_v41 = vsel %vm20763_vm2, %v9211_v32, -inf }
 0xc1f   : > { %v9435_v16 = vsel %vm3942_vm0, %v22985_v41, -inf }
 0xc22   : > { %9439 = vmax.xlane.f32.xlu1 %v9438_v9 }
 0xc26   : > { %9454 = vmax.xlane.f32.xlu1 %v9453_v43 }
 0xc2a   : > { %9448 = vmax.xlane.f32.xlu1 %v9447_v8 }
 0xc3b   : > { %9974 = vrot.lane.b32.xlu1 %v25248_v31, %s19347_s21  ;;  %v9884_v31 = vpop.permute.xlu0 %9883 }
 0xc3d   : > { %9436 = vmax.xlane.f32.xlu0 %v9435_v16 }
 0xc41   : > { %9457 = vmax.xlane.f32.xlu0 %v9456_v30 }
 0xc45   : > { %9451 = vmax.xlane.f32.xlu0 %v9450_v50 }
 0xc5b   : > { %9976 = vrot.lane.b32.xlu0 %v25288_v60, %s19347_s21 }
 0xc5c   : > { %v9395_v32 = vpop.xlane.xlu0 %9394 }
 0xc5d   : > { %v9485_v4 = vsub.f32 %v22809_v15, %v9395_v32 }
 0xc5f   : > { %9978 = vrot.lane.b32.xlu0 %v25289_v1, %s19347_s21  ;;  %v9392_v58 = vpop.xlane.xlu1 %9391  ;;  %v9519_v63 = vmul.f32 1.442695, %v9485_v4 }
 0xc60   : > { %v9484_v23 = vsub.f32 %v22819_v0, %v9392_v58  ;;  %v9389_v13 = vpop.xlane.xlu0 %9388 }
 0xc61   : > { %v9483_v55 = vsub.f32 %v22815_v46, %v9389_v13 }
 0xc62   : > { %v9517_v2 = vmul.f32 1.442695, %v9484_v23 }
 0xc63   : > { %v9515_v61 = vmul.f32 1.442695, %v9483_v55  ;;  %9980 = vrot.lane.b32.xlu0 %v25290_v38, %s19347_s21 }
 0xc64   : > { %18740 = vpow2.f32 %v9517_v2  ;;  %v9398_v60 = vpop.xlane.xlu0 %9397 }
 0xc65   : > { %18742 = vpow2.f32 %v9515_v61  ;;  %v9486_v25 = vsub.f32 %v22827_v24, %v9398_v60 }
 0xc66   : > { %v9410_v1 = vpop.xlane.xlu1 %9409  ;;  %18744 = vpow2.f32 %v9519_v63 }
 0xc67   : > { %v9521_v47 = vmul.f32 1.442695, %v9486_v25  ;;  %v9490_v15 = vsub.f32 %v22837_v12, %v9410_v1 }
 0xc68   : > { %v9407_v0 = vpop.xlane.xlu0 %9406 }
 0xc69   : > { %18746 = vpow2.f32 %v9521_v47  ;;  %v9489_v46 = vsub.f32 %v22833_v48, %v9407_v0  ;;  %v9529_v9 = vmul.f32 1.442695, %v9490_v15 }
 0xc6a   : > { %v9404_v43 = vpop.xlane.xlu1 %9403 }
 0xc6b   : > { %v9488_v8 = vsub.f32 %v22843_v3, %v9404_v43  ;;  %v9527_v38 = vmul.f32 1.442695, %v9489_v46  ;;  %18748 = vpow2.f32 %v9529_v9 }
 0xc6c   : > { %v9401_v16 = vpop.xlane.xlu0 %9400 }
 0xc6d   : > { %v9525_v30 = vmul.f32 1.442695, %v9488_v8  ;;  %v9487_v50 = vsub.f32 %v22849_v35, %v9401_v16 }
 0xc6e   : > { %v18741_v32 = vpop.eup %18740 }
 0xc6f   : > { %v18743_v24 = vpop.eup %18742  ;;  %18750 = vpow2.f32 %v9525_v30  ;;  %v9523_v58 = vmul.f32 1.442695, %v9487_v50  ;;  %v9582_v12 = vsel %vm3942_vm0, %v18741_v32, 0.0 }
 0xc70   : > { %18752 = vpow2.f32 %v9527_v38  ;;  %9583 = vadd.xlane.f32.xlu1 %v9582_v12  ;;  %v9675_v4 = vpack.c.bf16 %v18741_v32, %v18743_v24  ;;  %v18745_v48 = vpop.eup %18744  ;;  %v9579_v47 = vsel %vm3942_vm0, %v18743_v24, 0.0 }
 0xc71   : > { %18754 = vpow2.f32 %v9523_v58  ;;  %v9585_v0 = vsel %vm3942_vm0, %v18745_v48, 0.0 }
 0xc72   : > { %16516 = vmatprep.mubr.msk.bf16.mxu1 %vm3942_vm0, %v9675_v4 }
 0xc73   : > { %v18747_v3 = vpop.eup %18746 }
 0xc74   : > { %v9676_v23 = vpack.c.bf16 %v18747_v3, %v18745_v48 }
 0xc75   : > { %v18749_v35 = vpop.eup %18748 }
 0xc76   : > { %16517 = vmatmul.mubr.msk.bf16.vlgmr.msra.gmra.mrb[112].mxu1 %vm3942_vm0, %v9676_v23  ;;  %v9600_v25 = vsel %vm3942_vm0, %v18749_v35, 0.0 }
 0xc77   : > { %16541 = vmatpush3.bf16.msra.mxu1 %v22804_v6 }
 0xc78   : > { %16542 = vmatprep.subr.bf16.mxu1 %v9884_v31 }
 0xc79   : > { %v18751_v13 = vpop.eup %18750 }
 0xc7a   : > { %v18753_v55 = vpop.eup %18752  ;;  %v9594_v2 = vsel %vm3942_vm0, %v18751_v13, 0.0 }
 0xc7b   : > { %v18755_v61 = vpop.eup %18754  ;;  %16543 = vmatpush3.bf16.msra.mxu1 %v9884_v31  ;;  %9595 = vadd.xlane.f32.xlu1 %v9594_v2  ;;  %v9678_v60 = vpack.c.bf16 %v18749_v35, %v18753_v55  ;;  %v9597_v32 = vsel %vm3942_vm0, %v18753_v55, 0.0 }
 0xc7c   : > { %16544 = vmatprep.subr.bf16.mxu1 %v9886_v29  ;;  %v9677_v63 = vpack.c.bf16 %v18751_v13, %v18755_v61  ;;  %v9591_v38 = vsel %vm3942_vm0, %v18755_v61, 0.0  ;;  %v23047_v61 = vld [vmem:[#allocation7 + $0x128] ss:$12 sps:$4 sm:$0xff]  }
 0xc7e   : > { %16520 = vmatprep.mubr.msk.bf16.mxu1 %vm3942_vm0, %v9677_v63 }
 0xc7f   : > { %16545 = vmatpush3.bf16.msra.mxu1 %v9886_v29  ;;  %v23024_v1 = vpop.xlane.xlu1 %9466  ;;  %9601 = vadd.xlane.f32.xlu1 %v9600_v25  ;;  %v9588_v29 = vsel %vm3942_vm0, %v18747_v3, 0.0 }
 0xc80   : > { %16521 = vmatmul.mubr.msk.bf16.gmra.mrb[116].mxu1 %vm3942_vm0, %v9678_v60 }
 0xc81   : > { %v23027_v6 = vpop.xlane.xlu0 %9469 }
 0xc82   : > { %9580 = vadd.xlane.f32.xlu0 %v9579_v47 }
 0xc83   : > { %v9461_v31 = vpop.xlane.xlu1 %9460 }
 0xc85   : > { %v9464_v15 = vpop.xlane.xlu0 %9463 }
 0xc86   : > { %9586 = vadd.xlane.f32.xlu0 %v9585_v0 }
 0xc87   : > { %v23031_v46 = vpop.xlane.xlu1 %9478 }
 0xc89   : > { %v23033_v9 = vpop.xlane.xlu0 %9481 }
 0xc8a   : > { %9589 = vadd.xlane.f32.xlu0 %v9588_v29 }
 0xc8b   : > { %v23036_v43 = vpop.xlane.xlu1 %9472 }
 0xc8d   : > { %v23038_v8 = vpop.xlane.xlu0 %9475 }
 0xc8e   : > { %9592 = vadd.xlane.f32.xlu0 %v9591_v38  ;;  %v9507_v38 = vsub.f32 %v22863_v59, %v9461_v31 }
 0xc8f   : > { %v9419_v16 = vpop.xlane.xlu1 %9418 }
 0xc90   : > { %v9493_v30 = vsub.f32 %v22903_v27, %v9419_v16 }
 0xc91   : > { %v9413_v50 = vpop.xlane.xlu0 %9412 }
 0xc92   : > { %v9491_v24 = vsub.f32 %v22909_v39, %v9413_v50  ;;  %9598 = vadd.xlane.f32.xlu0 %v9597_v32  ;;  %v9535_v12 = vmul.f32 1.442695, %v9493_v30 }
 0xc93   : > { %v9422_v58 = vpop.xlane.xlu1 %9421 }
 0xc94   : > { %v9531_v4 = vmul.f32 1.442695, %v9491_v24  ;;  %v9494_v48 = vsub.f32 %v22915_v42, %v9422_v58  ;;  %v9563_v58 = vmul.f32 1.442695, %v9507_v38 }
 0xc95   : > { %v9425_v3 = vpop.xlane.xlu0 %9424 }
 0xc96   : > { %18756 = vpow2.f32 %v9531_v4  ;;  %v9537_v23 = vmul.f32 1.442695, %v9494_v48  ;;  %v9495_v35 = vsub.f32 %v22921_v19, %v9425_v3  ;;  %v9508_v19 = vsub.f32 %v22873_v28, %v9464_v15 }
 0xc97   : > { %v9416_v13 = vpop.xlane.xlu1 %9415  ;;  %18758 = vpow2.f32 %v9535_v12 }
 0xc98   : > { %v9539_v2 = vmul.f32 1.442695, %v9495_v35  ;;  %v9492_v27 = vsub.f32 %v22927_v45, %v9416_v13  ;;  %18760 = vpow2.f32 %v9537_v23  ;;  %v9565_v16 = vmul.f32 1.442695, %v9508_v19 }
 0xc99   : > { %v9888_v55 = vpop.permute.xlu0 %9887 }
 0xc9a   : > { %v9533_v39 = vmul.f32 1.442695, %v9492_v27  ;;  %16546 = vmatprep.subr.bf16.mxu1 %v9888_v55  ;;  %18762 = vpow2.f32 %v9539_v2 }
 0xc9b   : > { %v9431_v63 = vpop.xlane.xlu1 %9430  ;;  %16547 = vmatpush3.bf16.msra.mxu1 %v9888_v55 }
 0xc9c   : > { %18764 = vpow2.f32 %v9533_v39  ;;  %v9497_v42 = vsub.f32 %v22935_v34, %v9431_v63  ;;  %16572 = vmatprep.subr.bf16.mxu1 %v23047_v61 }
 0xc9e   : > { %v9543_v60 = vmul.f32 1.442695, %v9497_v42 }
 0xc9f   : > { %v9434_v25 = vpop.xlane.xlu1 %9433 }
 0xca0   : > { %v18757_v47 = vpop.eup %18756  ;;  %18766 = vpow2.f32 %v9543_v60  ;;  %v9498_v45 = vsub.f32 %v22941_v22, %v9434_v25 }
 0xca1   : > { %v9603_v0 = vsel %vm3942_vm0, %v18757_v47, 0.0  ;;  %v18759_v29 = vpop.eup %18758  ;;  %18768 = vpow2.f32 %v9565_v16 }
 0xca2   : > { %9604 = vadd.xlane.f32.xlu0 %v9603_v0  ;;  %v9545_v30 = vmul.f32 1.442695, %v9498_v45  ;;  %v18761_v34 = vpop.eup %18760  ;;  %v9609_v28 = vsel %vm3942_vm0, %v18759_v29, 0.0 }
 0xca3   : > { %v9428_v50 = vpop.xlane.xlu1 %9427  ;;  %v9680_v31 = vpack.c.bf16 %v18761_v34, %v18759_v29  ;;  %v9612_v23 = vsel %vm3942_vm0, %v18761_v34, 0.0 }
 0xca4   : > { %v9496_v32 = vsub.f32 %v22947_v57, %v9428_v50  ;;  %v18763_v24 = vpop.eup %18762  ;;  %18770 = vpow2.f32 %v9545_v30 }
 0xca5   : > { %v9615_v57 = vsel %vm3942_vm0, %v18763_v24, 0.0 }
 0xca6   : > { %v18765_v15 = vpop.eup %18764  ;;  %v9541_v12 = vmul.f32 1.442695, %v9496_v32  ;;  %9610 = vadd.xlane.f32.xlu0 %v9609_v28 }
 0xca7   : > { %v9443_v22 = vpop.xlane.xlu1 %9442  ;;  %v9606_v4 = vsel %vm3942_vm0, %v18765_v15, 0.0  ;;  %v9679_v59 = vpack.c.bf16 %v18765_v15, %v18757_v47  ;;  %v9510_v15 = vsub.f32 %v22867_v11, %v23027_v6 }
 0xca8   : > { %18772 = vpow2.f32 %v9541_v12  ;;  %9607 = vadd.xlane.f32.xlu1 %v9606_v4  ;;  %v9501_v32 = vsub.f32 %v22953_v33, %v9443_v22  ;;  %v9512_v12 = vsub.f32 %v22897_v20, %v23038_v8 }
 0xca9   : > { %16532 = vmatprep.mubr.msk.bf16.mxu0 %vm3942_vm0, %v9679_v59  ;;  %18774 = vpow2.f32 %v9563_v58 }
 0xcaa   : > { %v18767_v48 = vpop.eup %18766  ;;  %16533 = vmatmul.mubr.msk.bf16.vlgmr.msra.gmra.mrb[80].mxu0 %vm3942_vm0, %v9680_v31  ;;  %9616 = vadd.xlane.f32.xlu0 %v9615_v57  ;;  %v9551_v4 = vmul.f32 1.442695, %v9501_v32 }
 0xcab   : > { %v9446_v3 = vpop.xlane.xlu1 %9445  ;;  %v9621_v35 = vsel %vm3942_vm0, %v18767_v48, 0.0  ;;  %v23064_v27 = vpop.eup %18768 }
 0xcac   : > { %9613 = vadd.xlane.f32.xlu1 %v9612_v23  ;;  %v9502_v13 = vsub.f32 %v22959_v17, %v9446_v3  ;;  %v9569_v3 = vmul.f32 1.442695, %v9510_v15  ;;  %v18317_v15 = vld [vmem:[#allocation7 + $0x170] ss:$12 sps:$4 sm:$0xff]  }
 0xcae   : > { %9622 = vadd.xlane.f32.xlu0 %v9621_v35  ;;  %v18771_v39 = vpop.eup %18770  ;;  %v9553_v42 = vmul.f32 1.442695, %v9502_v13 }
 0xcaf   : > { %v9440_v2 = vpop.xlane.xlu1 %9439  ;;  %v9682_v0 = vpack.c.bf16 %v18771_v39, %v18767_v48  ;;  %v9624_v29 = vsel %vm3942_vm0, %v18771_v39, 0.0 }
 0xcb0   : > { %v9500_v55 = vsub.f32 %v22965_v62, %v9440_v2 }
 0xcb2   : > { %v18773_v63 = vpop.eup %18772  ;;  %v9549_v19 = vmul.f32 1.442695, %v9500_v55 }
 0xcb3   : > { %v9455_v60 = vpop.xlane.xlu1 %9454  ;;  %v9618_v25 = vsel %vm3942_vm0, %v18773_v63, 0.0  ;;  %v9681_v47 = vpack.c.bf16 %v18773_v63, %v18763_v24  ;;  %v23068_v45 = vpop.eup %18774  ;;  %v9509_v24 = vsub.f32 %v22857_v51, %v23024_v1  ;;  %v9511_v51 = vsub.f32 %v22887_v49, %v23036_v43  ;;  %v18312_v63 = vld [vmem:[#allocation7 + $0x124] ss:$12 sps:$4 sm:$0xff]  }
 0xcb4   : > { %18776 = vpow2.f32 %v9549_v19  ;;  %9619 = vadd.xlane.f32.xlu1 %v9618_v25  ;;  %v9687_v17 = vpack.c.bf16 %v23064_v27, %v23068_v45  ;;  %v9573_v1 = vmul.f32 1.442695, %v9512_v12  ;;  %v9505_v11 = vsub.f32 %v22973_v26, %v9455_v60  ;;  %v18320_v12 = vld [vmem:[#allocation7 + $0x154] ss:$12 sps:$4 sm:$0xff]  }
 0xcb5   : > { %16536 = vmatprep.mubr.msk.bf16.mxu0 %vm3942_vm0, %v9681_v47  ;;  %18778 = vpow2.f32 %v9553_v42  ;;  %v9567_v57 = vmul.f32 1.442695, %v9509_v24  ;;  %v9571_v8 = vmul.f32 1.442695, %v9511_v51  ;;  %v9513_v26 = vsub.f32 %v22881_v10, %v23031_v46  ;;  %v18309_v10 = vld [vmem:[#allocation7 + $0x140] ss:$12 sps:$4 sm:$0xff]  }
 0xcb6   : > { %16537 = vmatmul.mubr.msk.bf16.gmra.mrb[84].mxu0 %vm3942_vm0, %v9682_v0  ;;  %v9559_v22 = vmul.f32 1.442695, %v9505_v11  ;;  %v18316_v24 = vld [vmem:[#allocation7 + $0x13c] ss:$12 sps:$4 sm:$0xff]   ;;  %v18323_v51 = vld [vmem:[#allocation7 + $0x16c] ss:$12 sps:$4 sm:$0xff]  }
 0xcb7   : > { %v9449_v62 = vpop.xlane.xlu1 %9448  ;;  %16564 = vmatprep.mubr.msk.bf16.mxu0 %vm3942_vm0, %v9687_v17  ;;  %v18310_v17 = vld [vmem:[#allocation7 + $0x120] ss:$12 sps:$4 sm:$0xff]  }
 0xcb8   : > { %9625 = vadd.xlane.f32.xlu1 %v9624_v29  ;;  %v9503_v59 = vsub.f32 %v22979_v36, %v9449_v62 }
 0xcbb   : > { %v9975_v38 = vpop.permute.xlu1 %9974 }
 0xcbc   : > { %16556 = vmatprep.subr.bf16.mxu0 %v9975_v38 }
 0xcbd   : > { %16557 = vmatpush3.bf16.msra.mxu0 %v9975_v38 }
 0xcbe   : > { %v18777_v16 = vpop.eup %18776 }
 0xcbf   : > { %v9630_v30 = vsel %vm3942_vm0, %v18777_v16, 0.0  ;;  %v18779_v50 = vpop.eup %18778 }
 0xcc0   : > { %9631 = vadd.xlane.f32.xlu1 %v9630_v30  ;;  %v9636_v34 = vsel %vm3942_vm0, %v18779_v50, 0.0  ;;  %v18313_v30 = vld [vmem:[#allocation7 + $0x158] ss:$12 sps:$4 sm:$0xff]  }
 0xcc4   : > { %9637 = vadd.xlane.f32.xlu1 %v9636_v34 }
 0xcca   : > { %v9437_v28 = vpop.xlane.xlu0 %9436 }
 0xccb   : > { %v9499_v58 = vsub.f32 %v22985_v41, %v9437_v28  ;;  %v9555_v41 = vmul.f32 1.442695, %v9503_v59  ;;  %v18314_v28 = vld [vmem:[#allocation7 + $0x138] ss:$12 sps:$4 sm:$0xff]  }
 0xccd   : > { %v9547_v31 = vmul.f32 1.442695, %v9499_v58 }
 0xcce   : > { %v9458_v48 = vpop.xlane.xlu0 %9457 }
 0xccf   : > { %18780 = vpow2.f32 %v9547_v31  ;;  %v9506_v33 = vsub.f32 %v22993_v14, %v9458_v48  ;;  %v9514_v14 = vsub.f32 %v22891_v52, %v23033_v9  ;;  %v9575_v9 = vmul.f32 1.442695, %v9513_v26  ;;  %v18318_v48 = vld [vmem:[#allocation7 + $0x150] ss:$12 sps:$4 sm:$0xff]  }
 0xcd0   : > { %18782 = vpow2.f32 %v9551_v4 }
 0xcd1   : > { %18784 = vpow2.f32 %v9567_v57  ;;  %v9561_v20 = vmul.f32 1.442695, %v9506_v33  ;;  %v9577_v35 = vmul.f32 1.442695, %v9514_v14  ;;  %v9651_v57 = vsel %vm3942_vm0, %v23068_v45, 0.0 }
 0xcd2   : > { %v9452_v6 = vpop.xlane.xlu0 %9451  ;;  %18786 = vpow2.f32 %v9569_v3  ;;  %v9654_v33 = vsel %vm3942_vm0, %v23064_v27, 0.0  ;;  %v18321_v45 = vld [vmem:[#allocation7 + $0x168] ss:$12 sps:$4 sm:$0xff]  }
 0xcd3   : > { %v9504_v36 = vsub.f32 %v22999_v5, %v9452_v6  ;;  %18788 = vpow2.f32 %v9573_v1  ;;  %v25324_v1 = vld [vmem:[#allocation65_spill] sm:$0xff] }
 0xcd4   : > { %18790 = vpow2.f32 %v9555_v41 }
 0xcd5   : > { %v9557_v23 = vmul.f32 1.442695, %v9504_v36  ;;  %18792 = vpow2.f32 %v9561_v20  ;;  %v25325_v20 = vld [vmem:[#allocation50_spill] sm:$0xff] }
 0xcd6   : > { %v9977_v49 = vpop.permute.xlu0 %9976 }
 0xcd7   : > { %18794 = vpow2.f32 %v9557_v23  ;;  %16558 = vmatprep.subr.bf16.mxu0 %v9977_v49 }
 0xcd8   : > { %18796 = vpow2.f32 %v9571_v8  ;;  %16559 = vmatpush3.bf16.msra.mxu0 %v9977_v49 }
 0xcd9   : > { %v18781_v43 = vpop.eup %18780  ;;  %18798 = vpow2.f32 %v9559_v22 }
 0xcda   : > { %v18783_v5 = vpop.eup %18782  ;;  %v9979_v13 = vpop.permute.xlu0 %9978  ;;  %v9627_v2 = vsel %vm3942_vm0, %v18781_v43, 0.0  ;;  %v9683_v55 = vpack.c.bf16 %v18777_v16, %v18781_v43  ;;  %18800 = vpow2.f32 %v9577_v35 }
 0xcdb   : > { %v9684_v39 = vpack.c.bf16 %v18779_v50, %v18783_v5  ;;  %9628 = vadd.xlane.f32.xlu0 %v9627_v2  ;;  %16560 = vmatprep.subr.bf16.mxu0 %v9979_v13  ;;  %v23097_v52 = vpop.eup %18784  ;;  %v9633_v60 = vsel %vm3942_vm0, %v18783_v5, 0.0  ;;  %18802 = vpow2.f32 %v9575_v9 }
 0xcdc   : > { %16548 = vmatprep.mubr.msk.bf16.mxu1 %vm3942_vm0, %v9683_v55  ;;  %16561 = vmatpush3.bf16.msra.mxu0 %v9979_v13  ;;  %v23100_v46 = vpop.eup %18786  ;;  %v9657_v11 = vsel %vm3942_vm0, %v23097_v52, 0.0 }
 0xcdd   : > { %16549 = vmatmul.mubr.msk.bf16.vlgmr.msra.gmra.mrb[120].mxu1 %vm3942_vm0, %v9684_v39  ;;  %v23103_v42 = vpop.eup %18788  ;;  %v9688_v29 = vpack.c.bf16 %v23100_v46, %v23097_v52  ;;  %v9660_v41 = vsel %vm3942_vm0, %v23100_v46, 0.0 }
 0xcde   : > { %16573 = vmatpush3.bf16.msra.mxu1 %v23047_v61  ;;  %v9981_v19 = vpop.permute.xlu0 %9980  ;;  %v18791_v25 = vpop.eup %18790  ;;  %v9666_v6 = vsel %vm3942_vm0, %v23103_v42, 0.0 }
 0xcdf   : > { %9634 = vadd.xlane.f32.xlu0 %v9633_v60  ;;  %16562 = vmatprep.subr.bf16.mxu0 %v9981_v19  ;;  %v18793_v47 = vpop.eup %18792  ;;  %v9639_v61 = vsel %vm3942_vm0, %v18791_v25, 0.0 }
 0xce0   : > { %16563 = vmatpush3.bf16.msra.mxu0 %v9981_v19  ;;  %16574 = vmatprep.subr.bf16.mxu1 %v18309_v10  ;;  %v9648_v4 = vsel %vm3942_vm0, %v18793_v47, 0.0 }
 0xce1   : > { %v18795_v0 = vpop.eup %18794  ;;  %10272 = vmatprep.subr.bf16.mxu0 %v18312_v63 }
 0xce2   : > { %v18797_v62 = vpop.eup %18796  ;;  %16575 = vmatpush3.bf16.msra.mxu1 %v18309_v10  ;;  %v9642_v38 = vsel %vm3942_vm0, %v18795_v0, 0.0  ;;  %v9685_v16 = vpack.c.bf16 %v18795_v0, %v18791_v25  ;;  %v11002_v0 = vsel %vm3942_vm0, %v25325_v20, 0 }
 0xce3   : > { %v18799_v50 = vpop.eup %18798  ;;  %9640 = vadd.xlane.f32.xlu0 %v9639_v61  ;;  %9643 = vadd.xlane.f32.xlu1 %v9642_v38  ;;  %v9689_v34 = vpack.c.bf16 %v23103_v42, %v18797_v62  ;;  %v9663_v27 = vsel %vm3942_vm0, %v18797_v62, 0.0  ;;  %v25326_v61 = vld [vmem:[#allocation86_spill] sm:$0xff] }
 0xce4   : > { %v9686_v32 = vpack.c.bf16 %v18793_v47, %v18799_v50  ;;  %16565 = vmatmul.mubr.msk.bf16.vlgmr.msra.gmra.mrb[88].mxu0 %vm3942_vm0, %v9688_v29  ;;  %16552 = vmatprep.mubr.msk.bf16.mxu1 %vm3942_vm0, %v9685_v16  ;;  %v9645_v58 = vsel %vm3942_vm0, %v18799_v50, 0.0  ;;  %v18801_v59 = vpop.eup %18800 }
 0xce5   : > { %16568 = vmatprep.mubr.msk.bf16.mxu0 %vm3942_vm0, %v9689_v34  ;;  %10273 = vmatpush1.bf16.msra.mxu0 %v18310_v17  ;;  %v18803_v31 = vpop.eup %18802  ;;  %v9672_v8 = vsel %vm3942_vm0, %v18801_v59, 0.0  ;;  %v10735_v17 = vsel %vm3942_vm0, %v25324_v1, 0 }
 0xce6   : > { %16576 = vmatprep.subr.bf16.mxu1 %v18313_v30  ;;  %16553 = vmatmul.mubr.msk.bf16.gmra.mrb[124].mxu1 %vm3942_vm0, %v9686_v32  ;;  %v9690_v3 = vpack.c.bf16 %v18801_v59, %v18803_v31  ;;  %v9669_v36 = vsel %vm3942_vm0, %v18803_v31, 0.0  ;;  %v11005_v31 = vsel %vm3942_vm0, %v25326_v61, 0 }
 0xce7   : > { %16577 = vmatpush3.bf16.msra.mxu1 %v18313_v30  ;;  %9646 = vadd.xlane.f32.xlu0 %v9645_v58  ;;  %v25327_v30 = vld [vmem:[#allocation67_spill] sm:$0xff] }
 0xce8   : > { %9649 = vadd.xlane.f32.xlu1 %v9648_v4  ;;  %10274 = vmatprep.subr.bf16.mxu0 %v18316_v24 }
 0xce9   : > { %10275 = vmatpush1.bf16.msra.mxu0 %v18314_v28  ;;  %16578 = vmatprep.subr.bf16.mxu1 %v18317_v15 }
 0xcea   : > { %10276 = vmatprep.subr.bf16.mxu0 %v18320_v12 }
 0xceb   : > { %16579 = vmatpush3.bf16.msra.mxu1 %v18317_v15  ;;  %9652 = vadd.xlane.f32.xlu0 %v9651_v57  ;;  %v10738_v57 = vsel %vm3942_vm0, %v25327_v30, 0 }
 0xcec   : > { %17772 = vmatprep.subr.msk.bf16.mxu1 %vm3942_vm0, %v25324_v1  ;;  %9655 = vadd.xlane.f32.xlu1 %v9654_v33 }
 0xced   : > { %16569 = vmatmul.mubr.msk.bf16.gmra.mrb[92].mxu0 %vm3942_vm0, %v9690_v3  ;;  %v25329_v3 = vld [vmem:[#allocation69_spill] sm:$0xff] }
 0xcee   : > { %10277 = vmatpush1.bf16.msra.mxu0 %v18318_v48  ;;  %10304 = vmatprep.mubr.bf16.mxu0 %v25184_v53  ;;  %v25328_v48 = vld [vmem:[#allocation88_spill] sm:$0xff] }
 0xcef   : > { %9658 = vadd.xlane.f32.xlu0 %v9657_v11  ;;  %10278 = vmatprep.subr.bf16.mxu0 %v18323_v51  ;;  %v11008_v33 = vsel %vm3942_vm0, %v25328_v48, 0  ;;  %v10741_v51 = vsel %vm3942_vm0, %v25329_v3, 0  ;;  %v25330_v11 = vld [vmem:[#allocation91_spill] sm:$0xff] }
 0xcf0   : > { %9661 = vadd.xlane.f32.xlu1 %v9660_v41  ;;  %v11011_v41 = vsel %vm3942_vm0, %v25330_v11, 0 }
 0xcf2   : > { %10279 = vmatpush1.bf16.msra.mxu0 %v18321_v45  ;;  %v25331_v45 = vld [vmem:[#allocation71_spill] sm:$0xff] }
 0xcf3   : > { %17784 = vmatprep.subr.msk.bf16.mxu0 %vm3942_vm0, %v25325_v20  ;;  %9664 = vadd.xlane.f32.xlu0 %v9663_v27  ;;  %v10744_v27 = vsel %vm3942_vm0, %v25331_v45, 0 }
 0xcf4   : > { %9667 = vadd.xlane.f32.xlu1 %v9666_v6 }
 0xcf7   : > { %9670 = vadd.xlane.f32.xlu0 %v9669_v36  ;;  %v25332_v36 = vld [vmem:[#allocation118_spill] sm:$0xff] }
 0xcf8   : > { %9673 = vadd.xlane.f32.xlu1 %v9672_v8 }
 0xcfd   : > { %v9584_v14 = vpop.xlane.xlu1 %9583 }
 0xcfe   : > { %18804 = vrcp.f32 %v9584_v14 }
 0xd08   : > { %v9596_v26 = vpop.xlane.xlu1 %9595  ;;  %v18805_v13 = vpop.eup %18804 }
 0xd0c   : > { %v9602_v5 = vpop.xlane.xlu1 %9601 }
 0xd0f   : > { %v9581_v22 = vpop.xlane.xlu0 %9580 }
 0xd13   : > { %v9587_v23 = vpop.xlane.xlu0 %9586 }
 0xd14   : > { %18806 = vrcp.f32 %v9587_v23 }
 0xd17   : > { %v9590_v49 = vpop.xlane.xlu0 %9589 }
 0xd18   : > { %18808 = vrcp.f32 %v9590_v49 }
 0xd19   : > { %18810 = vrcp.f32 %v9581_v22  ;;  %v25333_v22 = vld [vmem:[#allocation73_spill] sm:$0xff] }
 0xd1a   : > { %18812 = vrcp.f32 %v9596_v26 }
 0xd1b   : > { %v9593_v43 = vpop.xlane.xlu0 %9592  ;;  %18814 = vrcp.f32 %v9602_v5 }
 0xd1e   : > { %v18807_v55 = vpop.eup %18806 }
 0xd1f   : > { %v9599_v35 = vpop.xlane.xlu0 %9598 }
 0xd20   : > { %18816 = vrcp.f32 %v9599_v35 }
 0xd21   : > { %18818 = vrcp.f32 %v9593_v43 }
 0xd22   : > { %v18809_v52 = vpop.eup %18808 }
 0xd23   : > { %v18811_v10 = vpop.eup %18810 }
 0xd24   : > { %v18813_v62 = vpop.eup %18812 }
 0xd25   : > { %v18815_v38 = vpop.eup %18814 }
 0xd2a   : > { %v18817_v50 = vpop.eup %18816 }
 0xd2b   : > { %v18819_v32 = vpop.eup %18818 }
 0xd2f   : > { %v9605_v6 = vpop.xlane.xlu0 %9604 }
 0xd30   : > { %18820 = vrcp.f32 %v9605_v6 }
 0xd33   : > { %v9611_v23 = vpop.xlane.xlu0 %9610 }
 0xd34   : > { %18822 = vrcp.f32 %v9611_v23 }
 0xd35   : > { %v9608_v8 = vpop.xlane.xlu1 %9607 }
 0xd37   : > { %v9617_v49 = vpop.xlane.xlu0 %9616 }
 0xd39   : > { %v9614_v14 = vpop.xlane.xlu1 %9613 }
 0xd3a   : > { %18824 = vrcp.f32 %v9614_v14  ;;  %v18821_v43 = vpop.eup %18820 }
 0xd3b   : > { %18826 = vrcp.f32 %v9608_v8  ;;  %v9623_v5 = vpop.xlane.xlu0 %9622 }
 0xd3c   : > { %18828 = vrcp.f32 %v9617_v49 }
 0xd3d   : > { %18830 = vrcp.f32 %v9623_v5 }
 0xd41   : > { %v9620_v26 = vpop.xlane.xlu1 %9619 }
 0xd49   : > { %v16518_v2 = vpop.f32.mrb[112].mxu1 }
 0xd4a   : > { %v9753_v39 = vpop.f32.mrb[113].mxu1  ;;  %v10097_v46 = vmul.f32 %v18807_v55, %v16518_v2  ;;  %v9626_v2 = vpop.xlane.xlu1 %9625 }
 0xd4b   : > { %v16519_v9 = vpop.f32.mrb[114].mxu1  ;;  %v10095_v19 = vmul.f32 %v18811_v10, %v9753_v39  ;;  %18832 = vrcp.f32 %v9626_v2 }
 0xd4c   : > { %v10098_v63 = vmul.f32 %v18809_v52, %v16519_v9  ;;  %v9756_v42 = vpop.f32.mrb[115].mxu1  ;;  %18834 = vrcp.f32 %v9620_v26 }
 0xd4d   : > { %v10096_v60 = vmul.f32 %v18805_v13, %v9756_v42  ;;  %v18823_v13 = vpop.eup %18822 }
 0xd4e   : > { %v10128_v25 = vpack.c.bf16 %v10098_v63, %v10097_v46  ;;  %v18825_v39 = vpop.eup %18824 }
 0xd4f   : > { %v10127_v47 = vpack.c.bf16 %v10096_v60, %v10095_v19  ;;  %v18827_v9 = vpop.eup %18826 }
 0xd51   : > { %15063 = vmatmul.mubr.msk.bf16.vlgmr.msra.gmra.mrb[248].mxu0 %vm3942_vm0, %v10127_v47  ;;  %16580 = vmatprep.mubr.msk.bf16.mxu1 %vm3942_vm0, %v10127_v47  ;;  %v18829_v47 = vpop.eup %18828 }
 0xd52   : > { %16661 = vmatpush3.bf16.xpose.msra.mxu0 %v11002_v0  ;;  %16581 = vmatmul.mubr.msk.bf16.vlgmr.msra.gmra.mrb[8].mxu1 %vm3942_vm0, %v10128_v25 }
 0xd53   : > { %v16522_v29 = vpop.f32.mrb[116].mxu1  ;;  %16613 = vmatpush3.bf16.xpose.msra.mxu1 %v10735_v17  ;;  %17785 = vmatprep.subr.msk.bf16.mxu0 %vm3942_vm0, %v25326_v61  ;;  %v18831_v17 = vpop.eup %18830 }
 0xd54   : > { %v9769_v16 = vpop.f32.mrb[117].mxu1  ;;  %17773 = vmatprep.subr.msk.bf16.mxu1 %vm3942_vm0, %v25327_v30  ;;  %10314 = vmatprep.mubr.bf16.mxu0 %v25184_v53  ;;  %v10101_v24 = vmul.f32 %v18817_v50, %v16522_v29 }
 0xd55   : > { %v16523_v34 = vpop.f32.mrb[118].mxu1  ;;  %v10099_v58 = vmul.f32 %v18819_v32, %v9769_v16 }
 0xd56   : > { %v10102_v28 = vmul.f32 %v18815_v38, %v16523_v34  ;;  %v9772_v15 = vpop.f32.mrb[119].mxu1  ;;  %v18833_v38 = vpop.eup %18832 }
 0xd57   : > { %v10100_v12 = vmul.f32 %v18813_v62, %v9772_v15  ;;  %v18835_v50 = vpop.eup %18834 }
 0xd58   : > { %v10130_v4 = vpack.c.bf16 %v10102_v28, %v10101_v24  ;;  %v9632_v28 = vpop.xlane.xlu1 %9631 }
 0xd59   : > { %v10129_v59 = vpack.c.bf16 %v10100_v12, %v10099_v58  ;;  %15064 = vmatmul.mubr.msk.bf16.gmra.mrb[252].mxu0 %vm3942_vm0, %v10128_v25  ;;  %18836 = vrcp.f32 %v9632_v28 }
 0xd5a   : > { %16663 = vmatpush3.bf16.xpose.msra.mxu0 %v11005_v31  ;;  %10324 = vmatprep.mubr.bf16.mxu0 %v25184_v53 }
 0xd5b   : > { %16584 = vmatprep.mubr.msk.bf16.mxu1 %vm3942_vm0, %v10129_v59  ;;  %16615 = vmatpush3.bf16.xpose.msra.mxu1 %v10738_v57 }
 0xd5c   : > { %17786 = vmatprep.subr.msk.bf16.mxu0 %vm3942_vm0, %v25328_v48  ;;  %16585 = vmatmul.mubr.msk.bf16.gmra.mrb[12].mxu1 %vm3942_vm0, %v10130_v4  ;;  %v9638_v31 = vpop.xlane.xlu1 %9637 }
 0xd5d   : > { %17774 = vmatprep.subr.msk.bf16.mxu1 %vm3942_vm0, %v25329_v3  ;;  %18838 = vrcp.f32 %v9638_v31 }
 0xd61   : > { %15065 = vmatmul.mubr.msk.bf16.gmra.mrb[0].mxu0 %vm3942_vm0, %v10129_v59 }
 0xd62   : > { %16665 = vmatpush3.bf16.xpose.msra.mxu0 %v11008_v33  ;;  %10334 = vmatprep.mubr.bf16.mxu0 %v25184_v53 }
 0xd63   : > { %16617 = vmatpush3.bf16.xpose.msra.mxu1 %v10741_v51  ;;  %17787 = vmatprep.subr.msk.bf16.mxu0 %vm3942_vm0, %v25330_v11  ;;  %v18837_v26 = vpop.eup %18836 }
 0xd64   : > { %17775 = vmatprep.subr.msk.bf16.mxu1 %vm3942_vm0, %v25331_v45 }
 0xd67   : > { %v18839_v5 = vpop.eup %18838 }
 0xd68   : > { %v9629_v62 = vpop.xlane.xlu0 %9628 }
 0xd69   : > { %15066 = vmatmul.mubr.msk.bf16.gmra.mrb[4].mxu0 %vm3942_vm0, %v10130_v4 }
 0xd6a   : > { %16667 = vmatpush3.bf16.xpose.msra.mxu0 %v11011_v41  ;;  %10344 = vmatprep.mubr.bf16.mxu0 %v25184_v53 }
 0xd6b   : > { %16619 = vmatpush3.bf16.xpose.msra.mxu1 %v10744_v27  ;;  %16692 = vmatprep.subr.bf16.mxu0 %v25332_v36 }
 0xd6c   : > { %17776 = vmatprep.subr.msk.bf16.mxu1 %vm3942_vm0, %v25333_v22  ;;  %v9635_v59 = vpop.xlane.xlu0 %9634 }
 0xd6d   : > { %18840 = vrcp.f32 %v9635_v59 }
 0xd6e   : > { %18842 = vrcp.f32 %v9629_v62 }
 0xd70   : > { %v9641_v57 = vpop.xlane.xlu0 %9640  ;;  %v9644_v33 = vpop.xlane.xlu1 %9643 }
 0xd71   : > { %18844 = vrcp.f32 %v9644_v33 }
 0xd74   : > { %v9647_v51 = vpop.xlane.xlu0 %9646 }
 0xd75   : > { %v9650_v41 = vpop.xlane.xlu1 %9649  ;;  %18846 = vrcp.f32 %v9647_v51 }
 0xd78   : > { %v9653_v27 = vpop.xlane.xlu0 %9652 }
 0xd79   : > { %v9656_v6 = vpop.xlane.xlu1 %9655  ;;  %18848 = vrcp.f32 %v9653_v27 }
 0xd7c   : > { %v9659_v8 = vpop.xlane.xlu0 %9658 }
 0xd7d   : > { %v16534_v35 = vpop.f32.mrb[80].mxu0  ;;  %v9662_v23 = vpop.xlane.xlu1 %9661  ;;  %18850 = vrcp.f32 %v9659_v8 }
 0xd7e   : > { %v9846_v55 = vpop.f32.mrb[81].mxu0  ;;  %v10105_v10 = vmul.f32 %v18823_v13, %v16534_v35  ;;  %18852 = vrcp.f32 %v9662_v23  ;;  %v18841_v13 = vpop.eup %18840 }
 0xd7f   : > { %v16535_v52 = vpop.f32.mrb[82].mxu0  ;;  %v10103_v42 = vmul.f32 %v18821_v43, %v9846_v55  ;;  %18854 = vrcp.f32 %v9656_v6  ;;  %v18843_v55 = vpop.eup %18842 }
 0xd80   : > { %v10106_v46 = vmul.f32 %v18825_v39, %v16535_v52  ;;  %v9849_v63 = vpop.f32.mrb[83].mxu0  ;;  %v9665_v14 = vpop.xlane.xlu0 %9664  ;;  %18856 = vrcp.f32 %v9650_v41 }
 0xd81   : > { %v10104_v19 = vmul.f32 %v18827_v9, %v9849_v63  ;;  %v9668_v49 = vpop.xlane.xlu1 %9667  ;;  %18858 = vrcp.f32 %v9641_v57 }
 0xd82   : > { %v10132_v60 = vpack.c.bf16 %v10106_v46, %v10105_v10  ;;  %18860 = vrcp.f32 %v9665_v14 }
 0xd83   : > { %v10131_v25 = vpack.c.bf16 %v10104_v19, %v10103_v42  ;;  %v18845_v42 = vpop.eup %18844 }
 0xd84   : > { %v9671_v10 = vpop.xlane.xlu0 %9670 }
 0xd85   : > { %15067 = vmatmul.mubr.msk.bf16.gmra.mrb[8].mxu0 %vm3942_vm0, %v10131_v25  ;;  %16588 = vmatprep.mubr.msk.bf16.mxu1 %vm3942_vm0, %v10131_v25  ;;  %v9674_v19 = vpop.xlane.xlu1 %9673  ;;  %v18847_v25 = vpop.eup %18846  ;;  %18862 = vrcp.f32 %v9671_v10 }
 0xd86   : > { %16589 = vmatmul.mubr.msk.bf16.gmra.mrb[16].mxu1 %vm3942_vm0, %v10132_v60  ;;  %10354 = vmatprep.mubr.bf16.mxu0 %v25184_v53  ;;  %18864 = vrcp.f32 %v9674_v19  ;;  %v25335_v19 = vld [vmem:[#allocation32_spill] sm:$0xff] }
 0xd87   : > { %18866 = vrcp.f32 %v9668_v49 }
 0xd89   : > { %v16538_v0 = vpop.f32.mrb[84].mxu0 }
 0xd8a   : > { %v9862_v29 = vpop.f32.mrb[85].mxu0  ;;  %v10109_v34 = vmul.f32 %v18831_v17, %v16538_v0  ;;  %v18849_v0 = vpop.eup %18848 }
 0xd8b   : > { %v16539_v16 = vpop.f32.mrb[86].mxu0  ;;  %v10107_v15 = vmul.f32 %v18829_v47, %v9862_v29  ;;  %v18851_v62 = vpop.eup %18850 }
 0xd8c   : > { %v10110_v32 = vmul.f32 %v18833_v38, %v16539_v16  ;;  %v9865_v24 = vpop.f32.mrb[87].mxu0  ;;  %v18853_v38 = vpop.eup %18852 }
 0xd8d   : > { %v10108_v58 = vmul.f32 %v18835_v50, %v9865_v24  ;;  %15068 = vmatmul.mubr.msk.bf16.gmra.mrb[12].mxu0 %vm3942_vm0, %v10132_v60 }
 0xd8e   : > { %v10134_v12 = vpack.c.bf16 %v10110_v32, %v10109_v34  ;;  %10364 = vmatprep.mubr.bf16.mxu0 %v25184_v53  ;;  %v18855_v34 = vpop.eup %18854 }
 0xd8f   : > { %v10133_v4 = vpack.c.bf16 %v10108_v58, %v10107_v15  ;;  %v18857_v58 = vpop.eup %18856 }
 0xd90   : > { %v18859_v31 = vpop.eup %18858 }
 0xd91   : > { %16592 = vmatprep.mubr.msk.bf16.mxu1 %vm3942_vm0, %v10133_v4  ;;  %v18861_v49 = vpop.eup %18860 }
 0xd92   : > { %16593 = vmatmul.mubr.msk.bf16.gmra.mrb[20].mxu1 %vm3942_vm0, %v10134_v12 }
 0xd95   : > { %15069 = vmatmul.mubr.msk.bf16.gmra.mrb[16].mxu0 %vm3942_vm0, %v10133_v4 }
 0xd96   : > { %10374 = vmatprep.mubr.bf16.mxu0 %v25184_v53 }
 0xd9d   : > { %15070 = vmatmul.mubr.msk.bf16.gmra.mrb[20].mxu0 %vm3942_vm0, %v10134_v12 }
 0xd9e   : > { %10384 = vmatprep.mubr.bf16.mxu0 %v25184_v53 }
 0xdb0   : > { %v16550_v43 = vpop.f32.mrb[120].mxu1 }
 0xdb1   : > { %v9939_v35 = vpop.f32.mrb[121].mxu1  ;;  %v10113_v39 = vmul.f32 %v18841_v13, %v16550_v43  ;;  %v18863_v43 = vpop.eup %18862 }
 0xdb2   : > { %v16551_v2 = vpop.f32.mrb[122].mxu1  ;;  %v10111_v46 = vmul.f32 %v18843_v55, %v9939_v35  ;;  %v18865_v35 = vpop.eup %18864 }
 0xdb3   : > { %v10114_v52 = vmul.f32 %v18839_v5, %v16551_v2  ;;  %v9942_v9 = vpop.f32.mrb[123].mxu1  ;;  %v18867_v2 = vpop.eup %18866 }
 0xdb4   : > { %v10112_v63 = vmul.f32 %v18837_v26, %v9942_v9 }
 0xdb5   : > { %v10136_v60 = vpack.c.bf16 %v10114_v52, %v10113_v39 }
 0xdb6   : > { %v10135_v47 = vpack.c.bf16 %v10112_v63, %v10111_v46 }
 0xdb7   : > { %v16566_v17 = vpop.f32.mrb[88].mxu0 }
 0xdb8   : > { %v10032_v29 = vpop.f32.mrb[89].mxu0  ;;  %15071 = vmatmul.mubr.msk.bf16.gmra.mrb[24].mxu0 %vm3942_vm0, %v10135_v47  ;;  %16596 = vmatprep.mubr.msk.bf16.mxu1 %vm3942_vm0, %v10135_v47  ;;  %v10121_v32 = vmul.f32 %v18851_v62, %v16566_v17  ;;  %v25337_v47 = vld [vmem:[#allocation75_spill] sm:$0xff]  ;;  %v25339_v62 = vld [vmem:[#allocation25_spill] sm:$0xff] }
 0xdb9   : > { %v16554_v16 = vpop.f32.mrb[124].mxu1  ;;  %v16567_v50 = vpop.f32.mrb[90].mxu0  ;;  %16597 = vmatmul.mubr.msk.bf16.gmra.mrb[24].mxu1 %vm3942_vm0, %v10136_v60  ;;  %10394 = vmatprep.mubr.bf16.mxu0 %v25184_v53  ;;  %v10119_v12 = vmul.f32 %v18849_v0, %v10032_v29  ;;  %v25338_v0 = vld [vmem:[#allocation19_spill] sm:$0xff]  ;;  %v10827_v17 = vsel %vm3942_vm0, %v25337_v47, 0  ;;  %v25340_v29 = vld [vmem:[#allocation77_spill] sm:$0xff] }
 0xdba   : > { %v10122_v24 = vmul.f32 %v18853_v38, %v16567_v50  ;;  %v9955_v28 = vpop.f32.mrb[125].mxu1  ;;  %v10035_v15 = vpop.f32.mrb[91].mxu0  ;;  %v10117_v57 = vmul.f32 %v18847_v25, %v16554_v16  ;;  %v25336_v25 = vld [vmem:[#allocation17_spill] sm:$0xff]  ;;  %v10830_v38 = vsel %vm3942_vm0, %v25340_v29, 0  ;;  %v25341_v16 = vld [vmem:[#allocation79_spill] sm:$0xff]  ;;  %v25342_v50 = vld [vmem:[#allocation58_spill] sm:$0xff] }
 0xdbb   : > { %v10120_v4 = vmul.f32 %v18855_v34, %v10035_v15  ;;  %v16555_v59 = vpop.f32.mrb[126].mxu1  ;;  %v10115_v27 = vmul.f32 %v18859_v31, %v9955_v28  ;;  %v10833_v34 = vsel %vm3942_vm0, %v25341_v16, 0  ;;  %v25345_v28 = vld [vmem:[#allocation61_spill] sm:$0xff]  ;;  %v25346_v15 = vld [vmem:[#allocation28_spill] sm:$0xff] }
 0xdbc   : > { %v10140_v33 = vpack.c.bf16 %v10122_v24, %v10121_v32  ;;  %v10118_v51 = vmul.f32 %v18857_v58, %v16555_v59  ;;  %v9958_v41 = vpop.f32.mrb[127].mxu1  ;;  %v25343_v32 = vld [vmem:[#allocation81_spill] sm:$0xff]  ;;  %v25344_v24 = vld [vmem:[#allocation59_spill] sm:$0xff] }
 0xdbd   : > { %v10139_v6 = vpack.c.bf16 %v10120_v4, %v10119_v12  ;;  %v10116_v8 = vmul.f32 %v18845_v42, %v9958_v41  ;;  %v25334_v42 = vld [vmem:[#allocation30_spill] sm:$0xff]  ;;  %v10913_v58 = vsel %vm3942_vm0, %v25343_v32, 0  ;;  %v25347_v12 = vld [vmem:[#allocation116_spill] sm:$0xff]  ;;  %v25348_v4 = vld [vmem:[#allocation31_spill] sm:$0xff] }
 0xdbe   : > { %v10138_v23 = vpack.c.bf16 %v10118_v51, %v10117_v57  ;;  %v25349_v59 = vld [vmem:[#allocation83_spill] sm:$0xff]  ;;  %v25350_v31 = vld [vmem:[#allocation121_spill] sm:$0xff]  ;;  %v25351_v57 = vld [vmem:[#allocation62_spill] sm:$0xff] }
 0xdbf   : > { %v10137_v14 = vpack.c.bf16 %v10116_v8, %v10115_v27  ;;  %v10916_v51 = vsel %vm3942_vm0, %v25349_v59, 0  ;;  %v25353_v41 = vld [vmem:[#allocation119_spill] sm:$0xff]  ;;  %v25354_v27 = vld [vmem:[#allocation52_spill] sm:$0xff]  ;;  %v25356_v8 = vld [vmem:[#allocation134_spill] sm:$0xff] }
 0xdc0   : > { %v16570_v26 = vpop.f32.mrb[92].mxu0  ;;  %15072 = vmatmul.mubr.msk.bf16.gmra.mrb[32].mxu0 %vm3942_vm0, %v10136_v60  ;;  %v10824_v60 = vsel %vm3942_vm0, %v25333_v22, 0 }
 0xdc1   : > { %v10048_v5 = vpop.f32.mrb[93].mxu0  ;;  %16600 = vmatprep.mubr.msk.bf16.mxu1 %vm3942_vm0, %v10137_v14  ;;  %10404 = vmatprep.mubr.bf16.mxu0 %v25184_v53  ;;  %v10125_v55 = vmul.f32 %v18863_v43, %v16570_v26  ;;  %v25358_v26 = vld [vmem:[#allocation113_spill] sm:$0xff] }
 0xdc2   : > { %v16571_v13 = vpop.f32.mrb[94].mxu0  ;;  %16601 = vmatmul.mubr.msk.bf16.gmra.mrb[28].mxu1 %vm3942_vm0, %v10138_v23  ;;  %v10123_v9 = vmul.f32 %v18861_v49, %v10048_v5  ;;  %v25359_v43 = vld [vmem:[#allocation53_spill] sm:$0xff]  ;;  %v25360_v5 = vld [vmem:[#allocation54_spill] sm:$0xff] }
 0xdc3   : > { %v10126_v39 = vmul.f32 %v18865_v35, %v16571_v13  ;;  %v10051_v52 = vpop.f32.mrb[95].mxu0  ;;  %16604 = vmatprep.mubr.msk.bf16.mxu1 %vm3942_vm0, %v10139_v6  ;;  %v25361_v35 = vld [vmem:[#allocation112_spill] sm:$0xff]  ;;  %v25362_v13 = vld [vmem:[#allocation115_spill] sm:$0xff] }
 0xdc4   : > { %v10124_v10 = vmul.f32 %v18867_v2, %v10051_v52  ;;  %v25363_v2 = vld [vmem:[#allocation56_spill] sm:$0xff] }
 0xdc5   : > { %v10142_v46 = vpack.c.bf16 %v10126_v39, %v10125_v55  ;;  %v25364_v55 = vld [vmem:[#allocation114_spill] sm:$0xff]  ;;  %v25365_v39 = vld [vmem:[#allocation127_spill] sm:$0xff] }
 0xdc6   : > { %v10141_v63 = vpack.c.bf16 %v10124_v10, %v10123_v9 }
 0xdc8   : > { %15073 = vmatmul.mubr.msk.bf16.gmra.mrb[28].mxu0 %vm3942_vm0, %v10137_v14  ;;  %v25357_v14 = vld [vmem:[#allocation27_spill] sm:$0xff] }
 0xdc9   : > { %10414 = vmatprep.mubr.bf16.mxu0 %v25184_v53  ;;  %v10922_v49 = vsel %vm3942_vm0, %v25357_v14, 0 }
 0xdca   : > { %16605 = vmatmul.mubr.msk.bf16.gmra.mrb[32].mxu1 %vm3942_vm0, %v10140_v33 }
 0xdcb   : > { %16608 = vmatprep.mubr.msk.bf16.mxu1 %vm3942_vm0, %v10141_v63 }
 0xdd0   : > { %15074 = vmatmul.mubr.msk.bf16.gmra.mrb[36].mxu0 %vm3942_vm0, %v10138_v23 }
 0xdd1   : > { %10424 = vmatprep.mubr.bf16.mxu0 %v25184_v53 }
 0xdd2   : > { %16609 = vmatmul.mubr.msk.bf16.gmra.mrb[36].mxu1 %vm3942_vm0, %v10142_v46 }
 0xdd3   : > { %16620 = vmatprep.mubr.msk.bf16.mxu1 %vm3942_vm0, %v25334_v42 }
 0xdd8   : > { %15075 = vmatmul.mubr.msk.bf16.gmra.mrb[40].mxu0 %vm3942_vm0, %v10139_v6  ;;  %v25355_v6 = vld [vmem:[#allocation12_spill] sm:$0xff] }
 0xdd9   : > { %10434 = vmatprep.mubr.bf16.mxu0 %v25184_v53  ;;  %v10919_v23 = vsel %vm3942_vm0, %v25355_v6, 0 }
 0xdda   : > { %16621 = vmatmul.mubr.msk.bf16.vlgmr.msra.gmra.mrb[128].mxu1 %vm3942_vm0, %v25335_v19 }
 0xddb   : > { %16629 = vmatpush3.bf16.xpose.msra.mxu1 %v10824_v60  ;;  %16624 = vmatprep.mubr.msk.bf16.mxu1 %vm3942_vm0, %v25336_v25 }
 0xddc   : > { %17777 = vmatprep.subr.msk.bf16.mxu1 %vm3942_vm0, %v25337_v47 }
 0xde0   : > { %15076 = vmatmul.mubr.msk.bf16.gmra.mrb[44].mxu0 %vm3942_vm0, %v10140_v33  ;;  %v25352_v33 = vld [vmem:[#allocation33_spill] sm:$0xff] }
 0xde1   : > { %10444 = vmatprep.mubr.bf16.mxu0 %v25184_v53 }
 0xde2   : > { %16625 = vmatmul.mubr.msk.bf16.gmra.mrb[132].mxu1 %vm3942_vm0, %v25338_v0 }
 0xde3   : > { %16631 = vmatpush3.bf16.xpose.msra.mxu1 %v10827_v17  ;;  %16636 = vmatprep.mubr.msk.bf16.mxu1 %vm3942_vm0, %v25339_v62 }
 0xde4   : > { %17778 = vmatprep.subr.msk.bf16.mxu1 %vm3942_vm0, %v25340_v29 }
 0xde8   : > { %15077 = vmatmul.mubr.msk.bf16.gmra.mrb[48].mxu0 %vm3942_vm0, %v10141_v63 }
 0xde9   : > { %10454 = vmatprep.mubr.bf16.mxu0 %v25184_v53 }
 0xdeb   : > { %16633 = vmatpush3.bf16.xpose.msra.mxu1 %v10830_v38 }
 0xdec   : > { %17779 = vmatprep.subr.msk.bf16.mxu1 %vm3942_vm0, %v25341_v16 }
 0xdf0   : > { %15078 = vmatmul.mubr.msk.bf16.gmra.mrb[52].mxu0 %vm3942_vm0, %v10142_v46 }
 0xdf1   : > { %16668 = vmatprep.mubr.msk.bf16.mxu0 %vm3942_vm0, %v25342_v50 }
 0xdf3   : > { %16635 = vmatpush3.bf16.xpose.msra.mxu1 %v10833_v34 }
 0xdf4   : > { %17780 = vmatprep.subr.msk.bf16.mxu1 %vm3942_vm0, %v25343_v32 }
 0xdf8   : > { %16669 = vmatmul.mubr.msk.bf16.vlgmr.msra.gmra.mrb[96].mxu0 %vm3942_vm0, %v25344_v24 }
 0xdf9   : > { %16693 = vmatpush3.bf16.msra.mxu0 %v25332_v36  ;;  %16672 = vmatprep.mubr.msk.bf16.mxu0 %vm3942_vm0, %v25345_v28 }
 0xdfa   : > { %16637 = vmatmul.mubr.msk.bf16.vlgmr.msra.gmra.mrb[136].mxu1 %vm3942_vm0, %v25346_v15  ;;  %16694 = vmatprep.subr.bf16.mxu0 %v25347_v12 }
 0xdfb   : > { %16640 = vmatprep.mubr.msk.bf16.mxu1 %vm3942_vm0, %v25348_v4  ;;  %16645 = vmatpush3.bf16.xpose.msra.mxu1 %v10913_v58 }
 0xdfc   : > { %17781 = vmatprep.subr.msk.bf16.mxu1 %vm3942_vm0, %v25349_v59 }
 0xdfd   : > { %16695 = vmatpush3.bf16.msra.mxu0 %v25347_v12 }
 0xdfe   : > { %16696 = vmatprep.subr.bf16.mxu0 %v25350_v31 }
 0xe00   : > { %16673 = vmatmul.mubr.msk.bf16.gmra.mrb[100].mxu0 %vm3942_vm0, %v25351_v57 }
 0xe01   : > { %16697 = vmatpush3.bf16.msra.mxu0 %v25350_v31 }
 0xe02   : > { %16641 = vmatmul.mubr.msk.bf16.gmra.mrb[140].mxu1 %vm3942_vm0, %v25352_v33  ;;  %16698 = vmatprep.subr.bf16.mxu0 %v25353_v41 }
 0xe03   : > { %16647 = vmatpush3.bf16.xpose.msra.mxu1 %v10916_v51  ;;  %16652 = vmatprep.mubr.msk.bf16.mxu1 %vm3942_vm0, %v25354_v27 }
 0xe04   : > { %17782 = vmatprep.subr.msk.bf16.mxu1 %vm3942_vm0, %v25355_v6 }
 0xe05   : > { %16699 = vmatpush3.bf16.msra.mxu0 %v25353_v41 }
 0xe06   : > { %16724 = vmatprep.subr.bf16.mxu0 %v25356_v8 }
 0xe0b   : > { %16649 = vmatpush3.bf16.xpose.msra.mxu1 %v10919_v23 }
 0xe0c   : > { %17783 = vmatprep.subr.msk.bf16.mxu1 %vm3942_vm0, %v25357_v14 }
 0xe13   : > { %16651 = vmatpush3.bf16.xpose.msra.mxu1 %v10922_v49 }
 0xe14   : > { %16676 = vmatprep.subr.bf16.mxu1 %v25358_v26 }
 0xe1a   : > { %16653 = vmatmul.mubr.msk.bf16.vlgmr.msra.gmra.mrb[144].mxu1 %vm3942_vm0, %v25359_v43 }
 0xe1b   : > { %16656 = vmatprep.mubr.msk.bf16.mxu1 %vm3942_vm0, %v25360_v5  ;;  %16677 = vmatpush3.bf16.msra.mxu1 %v25358_v26 }
 0xe1c   : > { %16678 = vmatprep.subr.bf16.mxu1 %v25361_v35 }
 0xe1f   : > { %16679 = vmatpush3.bf16.msra.mxu1 %v25361_v35 }
 0xe20   : > { %16680 = vmatprep.subr.bf16.mxu1 %v25362_v13 }
 0xe22   : > { %16657 = vmatmul.mubr.msk.bf16.gmra.mrb[148].mxu1 %vm3942_vm0, %v25363_v2 }
 0xe23   : > { %16681 = vmatpush3.bf16.msra.mxu1 %v25362_v13 }
 0xe24   : > { %16682 = vmatprep.subr.bf16.mxu1 %v25364_v55 }
 0xe27   : > { %16683 = vmatpush3.bf16.msra.mxu1 %v25364_v55 }
 0xe28   : > { %16708 = vmatprep.subr.bf16.mxu1 %v25365_v39 }
 0xead   : > { %v16622_v52 = vpop.f32.mrb[128].mxu1 }
 0xeae   : > { %v10780_v9 = vpop.f32.mrb[129].mxu1  ;;  %v23302_v17 = vsel %vm20755_vm1, %v16622_v52, -inf }
 0xeaf   : > { %v23296_v10 = vsel %vm20763_vm2, %v10780_v9, -inf  ;;  %v16623_v46 = vpop.f32.mrb[130].mxu1  ;;  %v11116_v51 = vsel %vm3942_vm0, %v23302_v17, -inf }
 0xeb0   : > { %v11110_v63 = vsel %vm3942_vm0, %v23296_v10, -inf  ;;  %v10783_v60 = vpop.f32.mrb[131].mxu1  ;;  %v23312_v58 = vsel %vm20767_vm3, %v16623_v46, -inf }
 0xeb1   : > { %v23306_v38 = vsel %vm20779_vm4, %v10783_v60, -inf  ;;  %11111 = vmax.xlane.f32.xlu0 %v11110_v63  ;;  %v11119_v49 = vsel %vm3942_vm0, %v23312_v58, -inf }
 0xeb2   : > { %v11113_v34 = vsel %vm3942_vm0, %v23306_v38, -inf }
 0xeb3   : > { %11114 = vmax.xlane.f32.xlu1 %v11113_v34 }
 0xeb5   : > { %11117 = vmax.xlane.f32.xlu0 %v11116_v51  ;;  %v16626_v23 = vpop.f32.mrb[132].mxu1 }
 0xeb6   : > { %v10796_v52 = vpop.f32.mrb[133].mxu1  ;;  %v23326_v34 = vsel %vm20806_vm5, %v16626_v23, -inf }
 0xeb7   : > { %v23320_v9 = vsel %vm20815_vm6, %v10796_v52, -inf  ;;  %11120 = vmax.xlane.f32.xlu1 %v11119_v49  ;;  %v16627_v63 = vpop.f32.mrb[134].mxu1  ;;  %v11128_v52 = vsel %vm3942_vm0, %v23326_v34, -inf }
 0xeb8   : > { %v11122_v46 = vsel %vm3942_vm0, %v23320_v9, -inf  ;;  %v10799_v60 = vpop.f32.mrb[135].mxu1  ;;  %v23336_v49 = vsel %vm20819_vm7, %v16627_v63, -inf }
 0xeb9   : > { %v23330_v51 = vsel %vm20831_vm8, %v10799_v60, -inf  ;;  %11123 = vmax.xlane.f32.xlu0 %v11122_v46  ;;  %v11131_v23 = vsel %vm3942_vm0, %v23336_v49, -inf }
 0xeba   : > { %v11125_v41 = vsel %vm3942_vm0, %v23330_v51, -inf }
 0xebb   : > { %11126 = vmax.xlane.f32.xlu1 %v11125_v41 }
 0xebd   : > { %11129 = vmax.xlane.f32.xlu0 %v11128_v52 }
 0xebf   : > { %11132 = vmax.xlane.f32.xlu1 %v11131_v23 }
 0xecb   : > { %v23342_v12 = vpop.f32.mrb[96].mxu0 }
 0xecc   : > { %v23344_v60 = vpop.f32.mrb[97].mxu0 }
 0xecd   : > { %v16638_v46 = vpop.f32.mrb[136].mxu1  ;;  %v23346_v31 = vpop.f32.mrb[98].mxu0 }
 0xece   : > { %v10869_v55 = vpop.f32.mrb[137].mxu1  ;;  %v23348_v36 = vpop.f32.mrb[99].mxu0  ;;  %v23358_v23 = vsel %vm20755_vm1, %v16638_v46, -inf }
 0xecf   : > { %v23352_v41 = vsel %vm20763_vm2, %v10869_v55, -inf  ;;  %v16639_v63 = vpop.f32.mrb[138].mxu1  ;;  %v11140_v24 = vsel %vm3942_vm0, %v23358_v23, -inf }
 0xed0   : > { %v11134_v52 = vsel %vm3942_vm0, %v23352_v41, -inf  ;;  %v10872_v35 = vpop.f32.mrb[139].mxu1  ;;  %v23368_v55 = vsel %vm20767_vm3, %v16639_v63, -inf }
 0xed1   : > { %v23362_v13 = vsel %vm20779_vm4, %v10872_v35, -inf  ;;  %11135 = vmax.xlane.f32.xlu0 %v11134_v52  ;;  %v11143_v52 = vsel %vm3942_vm0, %v23368_v55, -inf }
 0xed2   : > { %v11137_v57 = vsel %vm3942_vm0, %v23362_v13, -inf }
 0xed3   : > { %11138 = vmax.xlane.f32.xlu1 %v11137_v57  ;;  %v23370_v26 = vpop.f32.mrb[100].mxu0 }
 0xed4   : > { %v23374_v46 = vpop.f32.mrb[101].mxu0 }
 0xed5   : > { %11141 = vmax.xlane.f32.xlu0 %v11140_v24  ;;  %v16642_v28 = vpop.f32.mrb[140].mxu1  ;;  %v23376_v35 = vpop.f32.mrb[102].mxu0 }
 0xed6   : > { %v10885_v11 = vpop.f32.mrb[141].mxu1  ;;  %v11066_v50 = vpop.f32.mrb[103].mxu0  ;;  %v23388_v24 = vsel %vm20806_vm5, %v16642_v28, -inf }
 0xed7   : > { %v23382_v63 = vsel %vm20815_vm6, %v10885_v11, -inf  ;;  %11144 = vmax.xlane.f32.xlu1 %v11143_v52  ;;  %v16643_v57 = vpop.f32.mrb[142].mxu1  ;;  %v11152_v52 = vsel %vm3942_vm0, %v23388_v24, -inf }
 0xed8   : > { %v11146_v2 = vsel %vm3942_vm0, %v23382_v63, -inf  ;;  %v10888_v48 = vpop.f32.mrb[143].mxu1  ;;  %v23398_v11 = vsel %vm20819_vm7, %v16643_v57, -inf }
 0xed9   : > { %v23392_v61 = vsel %vm20831_vm8, %v10888_v48, -inf  ;;  %11147 = vmax.xlane.f32.xlu0 %v11146_v2  ;;  %v11155_v28 = vsel %vm3942_vm0, %v23398_v11, -inf }
 0xeda   : > { %v11149_v5 = vsel %vm3942_vm0, %v23392_v61, -inf }
 0xedb   : > { %11150 = vmax.xlane.f32.xlu1 %v11149_v5 }
 0xedd   : > { %11153 = vmax.xlane.f32.xlu0 %v11152_v52 }
 0xedf   : > { %11156 = vmax.xlane.f32.xlu1 %v11155_v28 }
 0xeed   : > { %v16654_v43 = vpop.f32.mrb[144].mxu1 }
 0xeee   : > { %v10958_v48 = vpop.f32.mrb[145].mxu1  ;;  %v23412_v5 = vsel %vm20755_vm1, %v16654_v43, -inf }
 0xeef   : > { %v23406_v2 = vsel %vm20763_vm2, %v10958_v48, -inf  ;;  %v16655_v20 = vpop.f32.mrb[146].mxu1  ;;  %v11164_v27 = vsel %vm3942_vm0, %v23412_v5, -inf }
 0xef0   : > { %v11158_v57 = vsel %vm3942_vm0, %v23406_v2, -inf  ;;  %v10961_v14 = vpop.f32.mrb[147].mxu1  ;;  %v23422_v48 = vsel %vm20767_vm3, %v16655_v20, -inf }
 0xef1   : > { %v23416_v52 = vsel %vm20779_vm4, %v10961_v14, -inf  ;;  %11159 = vmax.xlane.f32.xlu0 %v11158_v57  ;;  %v11167_v43 = vsel %vm3942_vm0, %v23422_v48, -inf }
 0xef2   : > { %v11161_v28 = vsel %vm3942_vm0, %v23416_v52, -inf }
 0xef3   : > { %11162 = vmax.xlane.f32.xlu1 %v11161_v28 }
 0xef5   : > { %11165 = vmax.xlane.f32.xlu0 %v11164_v27  ;;  %v16658_v33 = vpop.f32.mrb[148].mxu1 }
 0xef6   : > { %v10974_v6 = vpop.f32.mrb[149].mxu1  ;;  %v23436_v28 = vsel %vm20806_vm5, %v16658_v33, -inf  ;;  %v23453_v33 = vsel %vm20763_vm2, %v23344_v60, -inf }
 0xef7   : > { %v23430_v14 = vsel %vm20815_vm6, %v10974_v6, -inf  ;;  %11168 = vmax.xlane.f32.xlu1 %v11167_v43  ;;  %v16659_v57 = vpop.f32.mrb[150].mxu1  ;;  %v11176_v43 = vsel %vm3942_vm0, %v23436_v28, -inf }
 0xef8   : > { %v11170_v20 = vsel %vm3942_vm0, %v23430_v14, -inf  ;;  %v10977_v59 = vpop.f32.mrb[151].mxu1  ;;  %v23446_v6 = vsel %vm20819_vm7, %v16659_v57, -inf  ;;  %v23467_v57 = vsel %vm20755_vm1, %v23342_v12, -inf }
 0xef9   : > { %v23440_v27 = vsel %vm20831_vm8, %v10977_v59, -inf  ;;  %11171 = vmax.xlane.f32.xlu0 %v11170_v20  ;;  %v11179_v59 = vsel %vm3942_vm0, %v23446_v6, -inf  ;;  %v23460_v20 = vsel %vm20779_vm4, %v23348_v36, -inf  ;;  %v11188_v36 = vsel %vm3942_vm0, %v23467_v57, -inf }
 0xefa   : > { %v11173_v4 = vsel %vm3942_vm0, %v23440_v27, -inf  ;;  %v11185_v60 = vsel %vm3942_vm0, %v23460_v20, -inf }
 0xefb   : > { %11174 = vmax.xlane.f32.xlu1 %v11173_v4  ;;  %v11182_v4 = vsel %vm3942_vm0, %v23453_v33, -inf }
 0xefd   : > { %11177 = vmax.xlane.f32.xlu0 %v11176_v43  ;;  %v23474_v43 = vsel %vm20767_vm3, %v23346_v31, -inf }
 0xefe   : > { %v11191_v12 = vsel %vm3942_vm0, %v23474_v43, -inf }
 0xeff   : > { %11180 = vmax.xlane.f32.xlu1 %v11179_v59  ;;  %v23481_v59 = vsel %vm20815_vm6, %v23374_v46, -inf }
 0xf00   : > { %v11194_v31 = vsel %vm3942_vm0, %v23481_v59, -inf }
 0xf01   : > { %11183 = vmax.xlane.f32.xlu0 %v11182_v4  ;;  %v23487_v4 = vsel %vm20831_vm8, %v11066_v50, -inf }
 0xf02   : > { %v11197_v46 = vsel %vm3942_vm0, %v23487_v4, -inf }
 0xf03   : > { %11186 = vmax.xlane.f32.xlu1 %v11185_v60  ;;  %v23494_v60 = vsel %vm20806_vm5, %v23370_v26, -inf }
 0xf04   : > { %v11200_v50 = vsel %vm3942_vm0, %v23494_v60, -inf }
 0xf05   : > { %11189 = vmax.xlane.f32.xlu0 %v11188_v36  ;;  %v23501_v36 = vsel %vm20819_vm7, %v23376_v35, -inf }
 0xf07   : > { %11192 = vmax.xlane.f32.xlu1 %v11191_v12  ;;  %v11203_v12 = vsel %vm3942_vm0, %v23501_v36, -inf }
 0xf09   : > { %11195 = vmax.xlane.f32.xlu0 %v11194_v31 }
 0xf0b   : > { %11198 = vmax.xlane.f32.xlu1 %v11197_v46 }
 0xf0d   : > { %11201 = vmax.xlane.f32.xlu0 %v11200_v50 }
 0xf0f   : > { %11204 = vmax.xlane.f32.xlu1 %v11203_v12 }
 0xf3e   : > { %v11112_v26 = vpop.xlane.xlu0 %11111 }
 0xf3f   : > { %v11206_v31 = vsub.f32 %v23296_v10, %v11112_v26 }
 0xf40   : > { %v11115_v56 = vpop.xlane.xlu1 %11114 }
 0xf41   : > { %v11238_v21 = vmul.f32 1.442695, %v11206_v31  ;;  %v11207_v44 = vsub.f32 %v23306_v38, %v11115_v56 }
 0xf42   : > { %v11118_v18 = vpop.xlane.xlu0 %11117 }
 0xf43   : > { %v11240_v7 = vmul.f32 1.442695, %v11207_v44  ;;  %v11208_v35 = vsub.f32 %v23302_v17, %v11118_v18  ;;  %18868 = vpow2.f32 %v11238_v21 }
 0xf44   : > { %v11121_v46 = vpop.xlane.xlu1 %11120 }
 0xf45   : > { %18870 = vpow2.f32 %v11240_v7  ;;  %v11242_v54 = vmul.f32 1.442695, %v11208_v35  ;;  %v11209_v50 = vsub.f32 %v23312_v58, %v11121_v46 }
 0xf46   : > { %v11124_v37 = vpop.xlane.xlu0 %11123 }
 0xf47   : > { %18872 = vpow2.f32 %v11242_v54  ;;  %v11244_v12 = vmul.f32 1.442695, %v11209_v50  ;;  %v11210_v40 = vsub.f32 %v23320_v9, %v11124_v37 }
 0xf48   : > { %v11127_v10 = vpop.xlane.xlu1 %11126 }
 0xf49   : > { %18874 = vpow2.f32 %v11244_v12  ;;  %v11246_v26 = vmul.f32 1.442695, %v11210_v40  ;;  %v11211_v56 = vsub.f32 %v23330_v51, %v11127_v10  ;;  %v25366_v12 = vld [vmem:[#allocation125_spill] sm:$0xff] }
 0xf4a   : > { %v11130_v38 = vpop.xlane.xlu0 %11129 }
 0xf4b   : > { %v11248_v44 = vmul.f32 1.442695, %v11211_v56  ;;  %v11212_v18 = vsub.f32 %v23326_v34, %v11130_v38  ;;  %18876 = vpow2.f32 %v11246_v26 }
 0xf4c   : > { %v11133_v21 = vpop.xlane.xlu1 %11132 }
 0xf4d   : > { %18878 = vpow2.f32 %v11248_v44  ;;  %v11250_v7 = vmul.f32 1.442695, %v11212_v18  ;;  %v11213_v17 = vsub.f32 %v23336_v49, %v11133_v21  ;;  %v18869_v58 = vpop.eup %18868  ;;  %v25367_v21 = vld [vmem:[#allocation132_spill] sm:$0xff] }
 0xf4e   : > { %v11302_v49 = vsel %vm3942_vm0, %v18869_v58, 0.0 }
 0xf4f   : > { %v18871_v54 = vpop.eup %18870  ;;  %18880 = vpow2.f32 %v11250_v7  ;;  %v11252_v31 = vmul.f32 1.442695, %v11213_v17 }
 0xf50   : > { %v11398_v37 = vpack.c.bf16 %v18871_v54, %v18869_v58  ;;  %v11305_v10 = vsel %vm3942_vm0, %v18871_v54, 0.0 }
 0xf51   : > { %v18873_v9 = vpop.eup %18872  ;;  %18882 = vpow2.f32 %v11252_v31 }
 0xf52   : > { %16684 = vmatprep.mubr.msk.bf16.mxu1 %vm3942_vm0, %v11398_v37  ;;  %v11308_v40 = vsel %vm3942_vm0, %v18873_v9, 0.0  ;;  %v25368_v37 = vld [vmem:[#allocation131_spill] sm:$0xff] }
 0xf53   : > { %v18875_v51 = vpop.eup %18874  ;;  %11309 = vadd.xlane.f32.xlu0 %v11308_v40 }
 0xf54   : > { %v11399_v34 = vpack.c.bf16 %v18875_v51, %v18873_v9  ;;  %v11311_v35 = vsel %vm3942_vm0, %v18875_v51, 0.0 }
 0xf55   : > { %11312 = vadd.xlane.f32.xlu1 %v11311_v35  ;;  %v18877_v46 = vpop.eup %18876 }
 0xf56   : > { %16685 = vmatmul.mubr.msk.bf16.vlgmr.msra.gmra.mrb[152].mxu1 %vm3942_vm0, %v11399_v34  ;;  %v11314_v58 = vsel %vm3942_vm0, %v18877_v46, 0.0 }
 0xf57   : > { %v18879_v50 = vpop.eup %18878  ;;  %16709 = vmatpush3.bf16.msra.mxu1 %v25365_v39  ;;  %11303 = vadd.xlane.f32.xlu0 %v11302_v49 }
 0xf58   : > { %16710 = vmatprep.subr.bf16.mxu1 %v25366_v12  ;;  %v11400_v26 = vpack.c.bf16 %v18879_v50, %v18877_v46  ;;  %v11317_v9 = vsel %vm3942_vm0, %v18879_v50, 0.0 }
 0xf59   : > { %v18881_v56 = vpop.eup %18880  ;;  %11306 = vadd.xlane.f32.xlu1 %v11305_v10 }
 0xf5a   : > { %16688 = vmatprep.mubr.msk.bf16.mxu1 %vm3942_vm0, %v11400_v26  ;;  %v11320_v38 = vsel %vm3942_vm0, %v18881_v56, 0.0 }
 0xf5b   : > { %v18883_v44 = vpop.eup %18882  ;;  %16711 = vmatpush3.bf16.msra.mxu1 %v25366_v12  ;;  %11321 = vadd.xlane.f32.xlu0 %v11320_v38 }
 0xf5c   : > { %v11401_v18 = vpack.c.bf16 %v18883_v44, %v18881_v56  ;;  %16712 = vmatprep.subr.bf16.mxu1 %v25367_v21  ;;  %v11323_v7 = vsel %vm3942_vm0, %v18883_v44, 0.0 }
 0xf5d   : > { %11324 = vadd.xlane.f32.xlu1 %v11323_v7 }
 0xf5e   : > { %v11136_v17 = vpop.xlane.xlu0 %11135  ;;  %16689 = vmatmul.mubr.msk.bf16.gmra.mrb[156].mxu1 %vm3942_vm0, %v11401_v18 }
 0xf5f   : > { %v11214_v54 = vsub.f32 %v23352_v41, %v11136_v17  ;;  %16713 = vmatpush3.bf16.msra.mxu1 %v25367_v21  ;;  %11315 = vadd.xlane.f32.xlu0 %v11314_v58 }
 0xf60   : > { %v11139_v31 = vpop.xlane.xlu1 %11138  ;;  %16714 = vmatprep.subr.bf16.mxu1 %v25368_v37 }
 0xf61   : > { %v11254_v40 = vmul.f32 1.442695, %v11214_v54  ;;  %v11215_v51 = vsub.f32 %v23362_v13, %v11139_v31  ;;  %11318 = vadd.xlane.f32.xlu1 %v11317_v9 }
 0xf62   : > { %v11142_v34 = vpop.xlane.xlu0 %11141 }
 0xf63   : > { %v11256_v35 = vmul.f32 1.442695, %v11215_v51  ;;  %v11216_v49 = vsub.f32 %v23358_v23, %v11142_v34  ;;  %16715 = vmatpush3.bf16.msra.mxu1 %v25368_v37  ;;  %18884 = vpow2.f32 %v11254_v40 }
 0xf64   : > { %v11145_v41 = vpop.xlane.xlu1 %11144 }
 0xf65   : > { %18886 = vpow2.f32 %v11256_v35  ;;  %v11258_v46 = vmul.f32 1.442695, %v11216_v49  ;;  %v11217_v10 = vsub.f32 %v23368_v55, %v11145_v41  ;;  %v25369_v41 = vld [vmem:[#allocation133_spill] sm:$0xff] }
 0xf66   : > { %v11148_v26 = vpop.xlane.xlu0 %11147 }
 0xf67   : > { %18888 = vpow2.f32 %v11258_v46  ;;  %v11260_v56 = vmul.f32 1.442695, %v11217_v10  ;;  %v11218_v50 = vsub.f32 %v23382_v63, %v11148_v26 }
 0xf68   : > { %v11151_v38 = vpop.xlane.xlu1 %11150 }
 0xf69   : > { %18890 = vpow2.f32 %v11260_v56  ;;  %v11262_v13 = vmul.f32 1.442695, %v11218_v50  ;;  %v11219_v44 = vsub.f32 %v23392_v61, %v11151_v38  ;;  %v25370_v38 = vld [vmem:[#allocation136_spill] sm:$0xff] }
 0xf6a   : > { %v11154_v18 = vpop.xlane.xlu0 %11153 }
 0xf6b   : > { %v11264_v23 = vmul.f32 1.442695, %v11219_v44  ;;  %v11220_v7 = vsub.f32 %v23388_v24, %v11154_v18  ;;  %18892 = vpow2.f32 %v11262_v13  ;;  %v25371_v18 = vld [vmem:[#allocation135_spill] sm:$0xff] }
 0xf6c   : > { %v11157_v17 = vpop.xlane.xlu1 %11156 }
 0xf6d   : > { %18894 = vpow2.f32 %v11264_v23  ;;  %v11266_v58 = vmul.f32 1.442695, %v11220_v7  ;;  %v11221_v55 = vsub.f32 %v23398_v11, %v11157_v17  ;;  %v18885_v54 = vpop.eup %18884 }
 0xf6e   : > { %v11326_v11 = vsel %vm3942_vm0, %v18885_v54, 0.0 }
 0xf6f   : > { %v18887_v31 = vpop.eup %18886  ;;  %v11268_v9 = vmul.f32 1.442695, %v11221_v55  ;;  %18896 = vpow2.f32 %v11266_v58 }
 0xf70   : > { %v11402_v63 = vpack.c.bf16 %v18887_v31, %v18885_v54  ;;  %v11329_v46 = vsel %vm3942_vm0, %v18887_v31, 0.0 }
 0xf71   : > { %v18889_v40 = vpop.eup %18888  ;;  %18898 = vpow2.f32 %v11268_v9 }
 0xf72   : > { %16700 = vmatprep.mubr.msk.bf16.mxu0 %vm3942_vm0, %v11402_v63  ;;  %v11332_v61 = vsel %vm3942_vm0, %v18889_v40, 0.0 }
 0xf73   : > { %v18891_v51 = vpop.eup %18890  ;;  %11333 = vadd.xlane.f32.xlu0 %v11332_v61 }
 0xf74   : > { %v11403_v24 = vpack.c.bf16 %v18891_v51, %v18889_v40  ;;  %v11335_v34 = vsel %vm3942_vm0, %v18891_v51, 0.0 }
 0xf75   : > { %11336 = vadd.xlane.f32.xlu1 %v11335_v34  ;;  %v23545_v35 = vpop.eup %18892 }
 0xf76   : > { %16701 = vmatmul.mubr.msk.bf16.vlgmr.msra.gmra.mrb[104].mxu0 %vm3942_vm0, %v11403_v24 }
 0xf77   : > { %v23549_v49 = vpop.eup %18894  ;;  %16725 = vmatpush3.bf16.msra.mxu0 %v25356_v8  ;;  %11327 = vadd.xlane.f32.xlu0 %v11326_v11 }
 0xf78   : > { %16726 = vmatprep.subr.bf16.mxu0 %v25369_v41  ;;  %v11404_v10 = vpack.c.bf16 %v23549_v49, %v23545_v35 }
 0xf79   : > { %11330 = vadd.xlane.f32.xlu1 %v11329_v46  ;;  %v23556_v26 = vpop.eup %18896 }
 0xf7a   : > { %16704 = vmatprep.mubr.msk.bf16.mxu0 %vm3942_vm0, %v11404_v10 }
 0xf7b   : > { %v23559_v56 = vpop.eup %18898  ;;  %16727 = vmatpush3.bf16.msra.mxu0 %v25369_v41 }
 0xf7c   : > { %v11405_v50 = vpack.c.bf16 %v23559_v56, %v23556_v26  ;;  %16728 = vmatprep.subr.bf16.mxu0 %v25370_v38 }
 0xf7e   : > { %v11160_v13 = vpop.xlane.xlu0 %11159  ;;  %16705 = vmatmul.mubr.msk.bf16.gmra.mrb[108].mxu0 %vm3942_vm0, %v11405_v50 }
 0xf7f   : > { %v11222_v44 = vsub.f32 %v23406_v2, %v11160_v13  ;;  %16729 = vmatpush3.bf16.msra.mxu0 %v25370_v38 }
 0xf80   : > { %16730 = vmatprep.subr.bf16.mxu0 %v25371_v18  ;;  %v11163_v23 = vpop.xlane.xlu1 %11162 }
 0xf81   : > { %v11270_v7 = vmul.f32 1.442695, %v11222_v44  ;;  %v11223_v17 = vsub.f32 %v23416_v52, %v11163_v23 }
 0xf82   : > { %v11166_v58 = vpop.xlane.xlu0 %11165 }
 0xf83   : > { %v11272_v55 = vmul.f32 1.442695, %v11223_v17  ;;  %v11224_v54 = vsub.f32 %v23412_v5, %v11166_v58  ;;  %16731 = vmatpush3.bf16.msra.mxu0 %v25371_v18  ;;  %18900 = vpow2.f32 %v11270_v7 }
 0xf84   : > { %v11169_v31 = vpop.xlane.xlu1 %11168 }
 0xf85   : > { %18902 = vpow2.f32 %v11272_v55  ;;  %v11274_v9 = vmul.f32 1.442695, %v11224_v54  ;;  %v11225_v2 = vsub.f32 %v23422_v48, %v11169_v31 }
 0xf86   : > { %v11172_v63 = vpop.xlane.xlu0 %11171 }
 0xf87   : > { %v11276_v40 = vmul.f32 1.442695, %v11225_v2  ;;  %v11226_v61 = vsub.f32 %v23430_v14, %v11172_v63  ;;  %18904 = vpow2.f32 %v11274_v9 }
 0xf88   : > { %v11175_v51 = vpop.xlane.xlu1 %11174 }
 0xf89   : > { %18906 = vpow2.f32 %v11276_v40  ;;  %v11278_v52 = vmul.f32 1.442695, %v11226_v61  ;;  %v11227_v24 = vsub.f32 %v23440_v27, %v11175_v51 }
 0xf8a   : > { %v11178_v34 = vpop.xlane.xlu0 %11177 }
 0xf8b   : > { %v11280_v5 = vmul.f32 1.442695, %v11227_v24  ;;  %v11228_v11 = vsub.f32 %v23436_v28, %v11178_v34  ;;  %18908 = vpow2.f32 %v11278_v52 }
 0xf8c   : > { %v11181_v46 = vpop.xlane.xlu1 %11180 }
 0xf8d   : > { %18910 = vpow2.f32 %v11280_v5  ;;  %v11282_v10 = vmul.f32 1.442695, %v11228_v11  ;;  %v11229_v48 = vsub.f32 %v23446_v6, %v11181_v46  ;;  %v23577_v50 = vpop.eup %18900 }
 0xf8e   : > { %v11184_v13 = vpop.xlane.xlu0 %11183 }
 0xf8f   : > { %v23579_v14 = vpop.eup %18902  ;;  %v11284_v44 = vmul.f32 1.442695, %v11229_v48  ;;  %v11230_v23 = vsub.f32 %v23453_v33, %v11184_v13  ;;  %18912 = vpow2.f32 %v11282_v10 }
 0xf90   : > { %v11187_v27 = vpop.xlane.xlu1 %11186  ;;  %v11406_v7 = vpack.c.bf16 %v23579_v14, %v23577_v50 }
 0xf91   : > { %18914 = vpow2.f32 %v11284_v44  ;;  %v11286_v28 = vmul.f32 1.442695, %v11230_v23  ;;  %v11231_v17 = vsub.f32 %v23460_v20, %v11187_v27  ;;  %v23585_v58 = vpop.eup %18904 }
 0xf92   : > { %v11190_v6 = vpop.xlane.xlu0 %11189  ;;  %16716 = vmatprep.mubr.msk.bf16.mxu1 %vm3942_vm0, %v11406_v7 }
 0xf93   : > { %v23588_v55 = vpop.eup %18906  ;;  %v11288_v54 = vmul.f32 1.442695, %v11231_v17  ;;  %v11232_v31 = vsub.f32 %v23467_v57, %v11190_v6  ;;  %18916 = vpow2.f32 %v11286_v28  ;;  %v18326_v6 = vld [vmem:[#allocation7 + $0x184] ss:$12 sps:$4 sm:$0xff]  }
 0xf94   : > { %v11407_v33 = vpack.c.bf16 %v23588_v55, %v23585_v58  ;;  %v11193_v9 = vpop.xlane.xlu1 %11192  ;;  %11931 = vmatprep.subr.bf16.mxu0 %v18326_v6 }
 0xf95   : > { %18918 = vpow2.f32 %v11288_v54  ;;  %v11290_v2 = vmul.f32 1.442695, %v11232_v31  ;;  %v11233_v63 = vsub.f32 %v23474_v43, %v11193_v9  ;;  %v23594_v20 = vpop.eup %18908  ;;  %v18327_v54 = vld [vmem:[#allocation7 + $0x188] ss:$12 sps:$4 sm:$0xff]  }
 0xf96   : > { %v11196_v40 = vpop.xlane.xlu0 %11195  ;;  %16717 = vmatmul.mubr.msk.bf16.vlgmr.msra.gmra.mrb[160].mxu1 %vm3942_vm0, %v11407_v33  ;;  %v18324_v33 = vld [vmem:[#allocation7 + $0x180] ss:$12 sps:$4 sm:$0xff]   ;;  %16740 = vmatprep.subr.bf16.mxu1 %v18327_v54 }
 0xf97   : > { %v23597_v61 = vpop.eup %18910  ;;  %18920 = vpow2.f32 %v11290_v2  ;;  %v11292_v51 = vmul.f32 1.442695, %v11233_v63  ;;  %v11234_v57 = vsub.f32 %v23481_v59, %v11196_v40  ;;  %16741 = vmatpush3.bf16.msra.mxu1 %v18327_v54  ;;  %v18330_v2 = vld [vmem:[#allocation7 + $0x19c] ss:$12 sps:$4 sm:$0xff]   ;;  %v11350_v54 = vsel %vm3942_vm0, %v23577_v50, 0.0 }
 0xf98   : > { %v11199_v52 = vpop.xlane.xlu1 %11198  ;;  %v11408_v24 = vpack.c.bf16 %v23597_v61, %v23594_v20  ;;  %v11365_v50 = vsel %vm3942_vm0, %v23597_v61, 0.0 }
 0xf99   : > { %18922 = vpow2.f32 %v11292_v51  ;;  %v11294_v34 = vmul.f32 1.442695, %v11234_v57  ;;  %v11235_v5 = vsub.f32 %v23487_v4, %v11199_v52  ;;  %v23603_v43 = vpop.eup %18912  ;;  %v18331_v51 = vld [vmem:[#allocation7 + $0x1a0] ss:$12 sps:$4 sm:$0xff]   ;;  %v18328_v52 = vld [vmem:[#allocation7 + $0x198] ss:$12 sps:$4 sm:$0xff]  }
 0xf9a   : > { %v11202_v11 = vpop.xlane.xlu0 %11201  ;;  %16720 = vmatprep.mubr.msk.bf16.mxu1 %vm3942_vm0, %v11408_v24  ;;  %16742 = vmatprep.subr.bf16.mxu1 %v18331_v51 }
 0xf9b   : > { %v23606_v46 = vpop.eup %18914  ;;  %v11296_v10 = vmul.f32 1.442695, %v11235_v5  ;;  %v11236_v48 = vsub.f32 %v23494_v60, %v11202_v11  ;;  %18924 = vpow2.f32 %v11294_v34  ;;  %16743 = vmatpush3.bf16.msra.mxu1 %v18331_v51  ;;  %v18334_v5 = vld [vmem:[#allocation7 + $0x1b4] ss:$12 sps:$4 sm:$0xff]  }
 0xf9c   : > { %v11409_v59 = vpack.c.bf16 %v23606_v46, %v23603_v43  ;;  %v11205_v13 = vpop.xlane.xlu1 %11204  ;;  %v25391_v51 = vld [vmem:[#allocation112_spill] sm:$0xff] }
 0xf9d   : > { %18926 = vpow2.f32 %v11296_v10  ;;  %v11298_v44 = vmul.f32 1.442695, %v11236_v48  ;;  %v11237_v23 = vsub.f32 %v23501_v36, %v11205_v13  ;;  %v18917_v4 = vpop.eup %18916  ;;  %v11344_v10 = vsel %vm3942_vm0, %v23556_v26, 0.0  ;;  %v18335_v48 = vld [vmem:[#allocation7 + $0x1b8] ss:$12 sps:$4 sm:$0xff]  }
 0xf9e   : > { %16721 = vmatmul.mubr.msk.bf16.gmra.mrb[164].mxu1 %vm3942_vm0, %v11409_v59  ;;  %v11374_v40 = vsel %vm3942_vm0, %v18917_v4, 0.0  ;;  %v18332_v13 = vld [vmem:[#allocation7 + $0x1b0] ss:$12 sps:$4 sm:$0xff]   ;;  %16744 = vmatprep.subr.bf16.mxu1 %v18335_v48 }
 0xf9f   : > { %v18919_v27 = vpop.eup %18918  ;;  %v11300_v7 = vmul.f32 1.442695, %v11237_v23  ;;  %18928 = vpow2.f32 %v11298_v44  ;;  %v11347_v23 = vsel %vm3942_vm0, %v23559_v56, 0.0  ;;  %16745 = vmatpush3.bf16.msra.mxu1 %v18335_v48  ;;  %v18339_v26 = vld [vmem:[#allocation7 + $0x1d0] ss:$12 sps:$4 sm:$0xff]  }
 0xfa0   : > { %v11410_v28 = vpack.c.bf16 %v18919_v27, %v18917_v4  ;;  %v11377_v24 = vsel %vm3942_vm0, %v18919_v27, 0.0  ;;  %v18338_v4 = vld [vmem:[#allocation7 + $0x1cc] ss:$12 sps:$4 sm:$0xff]   ;;  %v11338_v27 = vsel %vm3942_vm0, %v23545_v35, 0.0  ;;  %16746 = vmatprep.subr.bf16.mxu1 %v18339_v26 }
 0xfa1   : > { %v18921_v17 = vpop.eup %18920  ;;  %18930 = vpow2.f32 %v11300_v7  ;;  %v18336_v7 = vld [vmem:[#allocation7 + $0x1c8] ss:$12 sps:$4 sm:$0xff]  }
 0xfa2   : > { %16732 = vmatprep.mubr.msk.bf16.mxu0 %vm3942_vm0, %v11410_v28  ;;  %v11380_v60 = vsel %vm3942_vm0, %v18921_v17, 0.0  ;;  %v11341_v28 = vsel %vm3942_vm0, %v23549_v49, 0.0  ;;  %v11356_v49 = vsel %vm3942_vm0, %v23585_v58, 0.0  ;;  %v11371_v58 = vsel %vm3942_vm0, %v23606_v46, 0.0 }
 0xfa3   : > { %v18923_v31 = vpop.eup %18922  ;;  %11381 = vadd.xlane.f32.xlu0 %v11380_v60  ;;  %16747 = vmatpush3.bf16.msra.mxu1 %v18339_v26  ;;  %v11359_v60 = vsel %vm3942_vm0, %v23588_v55, 0.0  ;;  %v11362_v55 = vsel %vm3942_vm0, %v23594_v20, 0.0  ;;  %v25386_v20 = vld [vmem:[#allocation61_spill] sm:$0xff] }
 0xfa4   : > { %v11411_v36 = vpack.c.bf16 %v18923_v31, %v18921_v17  ;;  %v11383_v9 = vsel %vm3942_vm0, %v18923_v31, 0.0  ;;  %v11353_v31 = vsel %vm3942_vm0, %v23579_v14, 0.0  ;;  %v25385_v14 = vld [vmem:[#allocation91_spill] sm:$0xff] }
 0xfa5   : > { %11384 = vadd.xlane.f32.xlu1 %v11383_v9  ;;  %v18925_v63 = vpop.eup %18924  ;;  %v25389_v9 = vld [vmem:[#allocation62_spill] sm:$0xff] }
 0xfa6   : > { %16733 = vmatmul.mubr.msk.bf16.vlgmr.msra.gmra.mrb[112].mxu0 %vm3942_vm0, %v11411_v36  ;;  %v11386_v35 = vsel %vm3942_vm0, %v18925_v63, 0.0  ;;  %v25388_v36 = vld [vmem:[#allocation113_spill] sm:$0xff] }
 0xfa7   : > { %v18927_v57 = vpop.eup %18926  ;;  %11375 = vadd.xlane.f32.xlu0 %v11374_v40  ;;  %11932 = vmatpush1.bf16.msra.mxu0 %v18324_v33  ;;  %v11368_v33 = vsel %vm3942_vm0, %v23603_v43, 0.0  ;;  %v25387_v43 = vld [vmem:[#allocation59_spill] sm:$0xff] }
 0xfa8   : > { %v11412_v34 = vpack.c.bf16 %v18927_v57, %v18925_v63  ;;  %11933 = vmatprep.subr.bf16.mxu0 %v18330_v2  ;;  %v11389_v6 = vsel %vm3942_vm0, %v18927_v57, 0.0  ;;  %v25390_v63 = vld [vmem:[#allocation115_spill] sm:$0xff]  ;;  %v25392_v57 = vld [vmem:[#allocation118_spill] sm:$0xff] }
 0xfa9   : > { %11378 = vadd.xlane.f32.xlu1 %v11377_v24  ;;  %v18929_v11 = vpop.eup %18928  ;;  %v25393_v24 = vld [vmem:[#allocation114_spill] sm:$0xff] }
 0xfaa   : > { %16736 = vmatprep.mubr.msk.bf16.mxu0 %vm3942_vm0, %v11412_v34  ;;  %v11392_v56 = vsel %vm3942_vm0, %v18929_v11, 0.0 }
 0xfab   : > { %v18931_v59 = vpop.eup %18930  ;;  %11345 = vadd.xlane.f32.xlu0 %v11344_v10  ;;  %11934 = vmatpush1.bf16.msra.mxu0 %v18328_v52  ;;  %v25395_v10 = vld [vmem:[#allocation116_spill] sm:$0xff] }
 0xfac   : > { %v11413_v44 = vpack.c.bf16 %v18931_v59, %v18929_v11  ;;  %11935 = vmatprep.subr.bf16.mxu0 %v18334_v5  ;;  %v11395_v17 = vsel %vm3942_vm0, %v18931_v59, 0.0  ;;  %v25394_v5 = vld [vmem:[#allocation121_spill] sm:$0xff] }
 0xfad   : > { %11348 = vadd.xlane.f32.xlu1 %v11347_v23  ;;  %v25396_v23 = vld [vmem:[#allocation119_spill] sm:$0xff] }
 0xfae   : > { %16737 = vmatmul.mubr.msk.bf16.gmra.mrb[116].mxu0 %vm3942_vm0, %v11413_v44 }
 0xfaf   : > { %11339 = vadd.xlane.f32.xlu0 %v11338_v27  ;;  %11936 = vmatpush1.bf16.msra.mxu0 %v18332_v13 }
 0xfb0   : > { %11937 = vmatprep.subr.bf16.mxu0 %v18338_v4  ;;  %11963 = vmatprep.mubr.bf16.mxu0 %v25184_v53 }
 0xfb1   : > { %11342 = vadd.xlane.f32.xlu1 %v11341_v28 }
 0xfb3   : > { %11393 = vadd.xlane.f32.xlu0 %v11392_v56  ;;  %11938 = vmatpush1.bf16.msra.mxu0 %v18336_v7 }
 0xfb5   : > { %11396 = vadd.xlane.f32.xlu1 %v11395_v17 }
 0xfb7   : > { %11387 = vadd.xlane.f32.xlu0 %v11386_v35 }
 0xfb9   : > { %11390 = vadd.xlane.f32.xlu1 %v11389_v6 }
 0xfbb   : > { %11357 = vadd.xlane.f32.xlu0 %v11356_v49 }
 0xfbd   : > { %11360 = vadd.xlane.f32.xlu1 %v11359_v60 }
 0xfbf   : > { %11351 = vadd.xlane.f32.xlu0 %v11350_v54 }
 0xfc1   : > { %11354 = vadd.xlane.f32.xlu1 %v11353_v31 }
 0xfc3   : > { %11369 = vadd.xlane.f32.xlu0 %v11368_v33 }
 0xfc5   : > { %11372 = vadd.xlane.f32.xlu1 %v11371_v58 }
 0xfc7   : > { %11363 = vadd.xlane.f32.xlu0 %v11362_v55 }
 0xfc9   : > { %11366 = vadd.xlane.f32.xlu1 %v11365_v50 }
 0xfda   : > { %12399 = vrot.lane.b32.xlu1 %v25327_v30, %s19347_s21  ;;  %v25373_v30 = vld [vmem:[#allocation83_spill] sm:$0xff] }
 0xfdd   : > { %12397 = vrot.lane.b32.xlu0 %v25324_v1, %s19347_s21  ;;  %v25372_v1 = vld [vmem:[#allocation31_spill] sm:$0xff] }
 0xfde   : > { %12401 = vrot.lane.b32.xlu1 %v25329_v3, %s19347_s21  ;;  %v25374_v3 = vld [vmem:[#allocation12_spill] sm:$0xff] }
 0xfe1   : > { %12385 = vrot.lane.b32.xlu0 %v25334_v42, %s19347_s21  ;;  %v25377_v42 = vld [vmem:[#allocation27_spill] sm:$0xff] }
 0xfe2   : > { %12403 = vrot.lane.b32.xlu1 %v25331_v45, %s19347_s21  ;;  %v25375_v45 = vld [vmem:[#allocation33_spill] sm:$0xff] }
 0xfe5   : > { %12510 = vrot.lane.b32.xlu0 %v25333_v22, %s19347_s21  ;;  %v25376_v22 = vld [vmem:[#allocation52_spill] sm:$0xff] }
 0xfe6   : > { %12387 = vrot.lane.b32.xlu1 %v25335_v19, %s19347_s21  ;;  %v25378_v19 = vld [vmem:[#allocation50_spill] sm:$0xff] }
 0xfe9   : > { %12389 = vrot.lane.b32.xlu0 %v25336_v25, %s19347_s21  ;;  %v25379_v25 = vld [vmem:[#allocation53_spill] sm:$0xff] }
 0xfea   : > { %12512 = vrot.lane.b32.xlu1 %v25337_v47, %s19347_s21  ;;  %v25380_v47 = vld [vmem:[#allocation54_spill] sm:$0xff] }
 0xfed   : > { %12514 = vrot.lane.b32.xlu0 %v25340_v29, %s19347_s21  ;;  %v25383_v29 = vld [vmem:[#allocation56_spill] sm:$0xff] }
 0xfee   : > { %12391 = vrot.lane.b32.xlu1 %v25338_v0, %s19347_s21  ;;  %v25381_v0 = vld [vmem:[#allocation86_spill] sm:$0xff] }
 0xff1   : > { %12498 = vrot.lane.b32.xlu0 %v25339_v62, %s19347_s21  ;;  %v25382_v62 = vld [vmem:[#allocation88_spill] sm:$0xff] }
 0xff2   : > { %12516 = vrot.lane.b32.xlu1 %v25341_v16, %s19347_s21  ;;  %v11310_v16 = vpop.xlane.xlu0 %11309 }
 0xff3   : > { %18932 = vrcp.f32 %v11310_v16 }
 0xff5   : > { %12623 = vrot.lane.b32.xlu0 %v25343_v32, %s19347_s21  ;;  %v25384_v32 = vld [vmem:[#allocation58_spill] sm:$0xff] }
 0xff6   : > { %12500 = vrot.lane.b32.xlu1 %v25346_v15, %s19347_s21  ;;  %v11313_v15 = vpop.xlane.xlu1 %11312  ;;  %v11304_v61 = vpop.xlane.xlu0 %11303 }
 0xff7   : > { %18934 = vrcp.f32 %v11313_v15 }
 0xff8   : > { %18936 = vrcp.f32 %v11304_v61 }
 0xff9   : > { %12502 = vrot.lane.b32.xlu0 %v25372_v1, %s19347_s21 }
 0xffa   : > { %12625 = vrot.lane.b32.xlu1 %v25373_v30, %s19347_s21  ;;  %v11307_v46 = vpop.xlane.xlu1 %11306  ;;  %v11322_v2 = vpop.xlane.xlu0 %11321 }
 0xffb   : > { %18938 = vrcp.f32 %v11307_v46 }
 0xffc   : > { %18940 = vrcp.f32 %v11322_v2 }
 0xffd   : > { %12627 = vrot.lane.b32.xlu0 %v25374_v3, %s19347_s21  ;;  %v18933_v59 = vpop.eup %18932 }
 0xffe   : > { %12504 = vrot.lane.b32.xlu1 %v25375_v45, %s19347_s21  ;;  %v11325_v40 = vpop.xlane.xlu1 %11324  ;;  %v11316_v52 = vpop.xlane.xlu0 %11315 }
 0xfff   : > { %18942 = vrcp.f32 %v11325_v40 }
0x1000   : > { %18944 = vrcp.f32 %v11316_v52 }
0x1001   : > { %12611 = vrot.lane.b32.xlu0 %v25376_v22, %s19347_s21  ;;  %v18935_v44 = vpop.eup %18934 }
0x1002   : > { %12629 = vrot.lane.b32.xlu1 %v25377_v42, %s19347_s21  ;;  %v11319_v34 = vpop.xlane.xlu1 %11318  ;;  %v11334_v11 = vpop.xlane.xlu0 %11333 }
0x1003   : > { %18946 = vrcp.f32 %v11319_v34  ;;  %v18937_v27 = vpop.eup %18936 }
0x1004   : > { %18948 = vrcp.f32 %v11334_v11 }
0x1005   : > { %12736 = vrot.lane.b32.xlu0 %v25378_v19, %s19347_s21  ;;  %v18939_v7 = vpop.eup %18938 }
0x1006   : > { %12613 = vrot.lane.b32.xlu1 %v25379_v25, %s19347_s21  ;;  %v11337_v48 = vpop.xlane.xlu1 %11336  ;;  %v11328_v28 = vpop.xlane.xlu0 %11327 }
0x1007   : > { %v18941_v33 = vpop.eup %18940  ;;  %18950 = vrcp.f32 %v11337_v48 }
0x1008   : > { %18952 = vrcp.f32 %v11328_v28 }
0x1009   : > { %12615 = vrot.lane.b32.xlu0 %v25380_v47, %s19347_s21  ;;  %v18943_v55 = vpop.eup %18942 }
0x100a   : > { %12738 = vrot.lane.b32.xlu1 %v25381_v0, %s19347_s21  ;;  %v11331_v60 = vpop.xlane.xlu1 %11330  ;;  %v18945_v30 = vpop.eup %18944 }
0x100b   : > { %18954 = vrcp.f32 %v11331_v60 }
0x100d   : > { %12740 = vrot.lane.b32.xlu0 %v25382_v62, %s19347_s21 }
0x100e   : > { %12617 = vrot.lane.b32.xlu1 %v25383_v29, %s19347_s21 }
0x1011   : > { %12724 = vrot.lane.b32.xlu0 %v25384_v32, %s19347_s21 }
0x1012   : > { %12742 = vrot.lane.b32.xlu1 %v25385_v14, %s19347_s21 }
0x1015   : > { %12728 = vrot.lane.b32.xlu0 %v25386_v20, %s19347_s21 }
0x1016   : > { %12726 = vrot.lane.b32.xlu1 %v25387_v43, %s19347_s21 }
0x1019   : > { %13173 = vrot.lane.b32.xlu0 %v25388_v36, %s19347_s21 }
0x101a   : > { %12730 = vrot.lane.b32.xlu1 %v25389_v9, %s19347_s21 }
0x101d   : > { %13177 = vrot.lane.b32.xlu0 %v25390_v63, %s19347_s21 }
0x101e   : > { %13175 = vrot.lane.b32.xlu1 %v25391_v51, %s19347_s21 }
0x1021   : > { %13266 = vrot.lane.b32.xlu0 %v25392_v57, %s19347_s21 }
0x1022   : > { %13179 = vrot.lane.b32.xlu1 %v25393_v24, %s19347_s21 }
0x1025   : > { %13270 = vrot.lane.b32.xlu0 %v25394_v5, %s19347_s21 }
0x1026   : > { %13268 = vrot.lane.b32.xlu1 %v25395_v10, %s19347_s21 }
0x1029   : > { %13359 = vrot.lane.b32.xlu0 %v25365_v39, %s19347_s21  ;;  %v16686_v13 = vpop.f32.mrb[152].mxu1 }
0x102a   : > { %13272 = vrot.lane.b32.xlu1 %v25396_v23, %s19347_s21  ;;  %v11460_v4 = vpop.f32.mrb[153].mxu1  ;;  %v11756_v56 = vmul.f32 %v18933_v59, %v16686_v13 }
0x102b   : > { %v16687_v26 = vpop.f32.mrb[154].mxu1  ;;  %v11754_v6 = vmul.f32 %v18937_v27, %v11460_v4 }
0x102c   : > { %v11757_v17 = vmul.f32 %v18935_v44, %v16687_v26  ;;  %v11463_v35 = vpop.f32.mrb[155].mxu1 }
0x102d   : > { %v11755_v49 = vmul.f32 %v18939_v7, %v11463_v35 }
0x102e   : > { %v11787_v54 = vpack.c.bf16 %v11757_v17, %v11756_v56  ;;  %13361 = vrot.lane.b32.xlu1 %v25366_v12, %s19347_s21  ;;  %v18947_v12 = vpop.eup %18946 }
0x102f   : > { %v11786_v39 = vpack.c.bf16 %v11755_v49, %v11754_v6  ;;  %v18949_v9 = vpop.eup %18948 }
0x1030   : > { %v23734_v31 = vpop.xlane.xlu0 %11381  ;;  %v18951_v63 = vpop.eup %18950 }
0x1031   : > { %v16690_v58 = vpop.f32.mrb[156].mxu1  ;;  %15139 = vmatmul.mubr.msk.bf16.vlgmr.msra.gmra.mrb[248].mxu0 %vm3942_vm0, %v11786_v39  ;;  %16748 = vmatprep.mubr.msk.bf16.mxu1 %vm3942_vm0, %v11786_v39  ;;  %v18953_v57 = vpop.eup %18952 }
0x1032   : > { %v23738_v50 = vpop.xlane.xlu1 %11384  ;;  %v11476_v1 = vpop.f32.mrb[157].mxu1  ;;  %16749 = vmatmul.mubr.msk.bf16.vlgmr.msra.gmra.mrb[8].mxu1 %vm3942_vm0, %v11787_v54  ;;  %11973 = vmatprep.mubr.bf16.mxu0 %v25184_v53  ;;  %v11760_v45 = vmul.f32 %v18941_v33, %v16690_v58 }
0x1033   : > { %v16691_v3 = vpop.f32.mrb[158].mxu1  ;;  %v11758_v25 = vmul.f32 %v18945_v30, %v11476_v1  ;;  %v18955_v24 = vpop.eup %18954 }
0x1034   : > { %v23742_v22 = vpop.xlane.xlu0 %11375  ;;  %v11761_v42 = vmul.f32 %v18943_v55, %v16691_v3  ;;  %v11479_v19 = vpop.f32.mrb[159].mxu1 }
0x1035   : > { %v11759_v47 = vmul.f32 %v18947_v12, %v11479_v19 }
0x1036   : > { %v11789_v0 = vpack.c.bf16 %v11761_v42, %v11760_v45  ;;  %v23744_v62 = vpop.xlane.xlu1 %11378 }
0x1037   : > { %v11788_v29 = vpack.c.bf16 %v11759_v47, %v11758_v25 }
0x1038   : > { %v11346_v16 = vpop.xlane.xlu0 %11345 }
0x1039   : > { %15140 = vmatmul.mubr.msk.bf16.gmra.mrb[252].mxu0 %vm3942_vm0, %v11787_v54  ;;  %16752 = vmatprep.mubr.msk.bf16.mxu1 %vm3942_vm0, %v11788_v29  ;;  %18956 = vrcp.f32 %v11346_v16 }
0x103a   : > { %v11349_v32 = vpop.xlane.xlu1 %11348  ;;  %16753 = vmatmul.mubr.msk.bf16.gmra.mrb[12].mxu1 %vm3942_vm0, %v11789_v0  ;;  %11983 = vmatprep.mubr.bf16.mxu0 %v25184_v53 }
0x103b   : > { %18958 = vrcp.f32 %v11349_v32 }
0x103c   : > { %v11340_v15 = vpop.xlane.xlu0 %11339 }
0x103d   : > { %18960 = vrcp.f32 %v11340_v15 }
0x103e   : > { %v11343_v14 = vpop.xlane.xlu1 %11342 }
0x103f   : > { %18962 = vrcp.f32 %v11343_v14 }
0x1040   : > { %v23750_v20 = vpop.xlane.xlu0 %11393 }
0x1041   : > { %15141 = vmatmul.mubr.msk.bf16.gmra.mrb[0].mxu0 %vm3942_vm0, %v11788_v29 }
0x1042   : > { %v23753_v61 = vpop.xlane.xlu1 %11396  ;;  %11993 = vmatprep.mubr.bf16.mxu0 %v25184_v53 }
0x1043   : > { %v18957_v27 = vpop.eup %18956 }
0x1044   : > { %v23756_v43 = vpop.xlane.xlu0 %11387 }
0x1045   : > { %v18959_v7 = vpop.eup %18958 }
0x1046   : > { %v23758_v46 = vpop.xlane.xlu1 %11390 }
0x1047   : > { %v18961_v17 = vpop.eup %18960 }
0x1048   : > { %v11358_v36 = vpop.xlane.xlu0 %11357 }
0x1049   : > { %v16702_v2 = vpop.f32.mrb[104].mxu0  ;;  %15142 = vmatmul.mubr.msk.bf16.gmra.mrb[4].mxu0 %vm3942_vm0, %v11789_v0  ;;  %v18963_v6 = vpop.eup %18962  ;;  %18964 = vrcp.f32 %v11358_v36 }
0x104a   : > { %v11361_v40 = vpop.xlane.xlu1 %11360  ;;  %v11537_v51 = vpop.f32.mrb[105].mxu0  ;;  %12003 = vmatprep.mubr.bf16.mxu0 %v25184_v53  ;;  %v11764_v34 = vmul.f32 %v18949_v9, %v16702_v2 }
0x104b   : > { %v16703_v52 = vpop.f32.mrb[106].mxu0  ;;  %v11762_v48 = vmul.f32 %v18953_v57, %v11537_v51  ;;  %18966 = vrcp.f32 %v11361_v40 }
0x104c   : > { %v11765_v5 = vmul.f32 %v18951_v63, %v16703_v52  ;;  %v11352_v11 = vpop.xlane.xlu0 %11351  ;;  %v11540_v10 = vpop.f32.mrb[107].mxu0 }
0x104d   : > { %v11763_v59 = vmul.f32 %v18955_v24, %v11540_v10  ;;  %18968 = vrcp.f32 %v11352_v11 }
0x104e   : > { %v11791_v13 = vpack.c.bf16 %v11765_v5, %v11764_v34  ;;  %v11355_v44 = vpop.xlane.xlu1 %11354 }
0x104f   : > { %v11790_v23 = vpack.c.bf16 %v11763_v59, %v11762_v48  ;;  %18970 = vrcp.f32 %v11355_v44 }
0x1050   : > { %v11370_v4 = vpop.xlane.xlu0 %11369 }
0x1051   : > { %v16706_v26 = vpop.f32.mrb[108].mxu0  ;;  %16756 = vmatprep.mubr.msk.bf16.mxu1 %vm3942_vm0, %v11790_v23  ;;  %15143 = vmatmul.mubr.msk.bf16.gmra.mrb[8].mxu0 %vm3942_vm0, %v11790_v23  ;;  %18972 = vrcp.f32 %v11370_v4 }
0x1052   : > { %v11373_v28 = vpop.xlane.xlu1 %11372  ;;  %v11553_v56 = vpop.f32.mrb[109].mxu0  ;;  %16757 = vmatmul.mubr.msk.bf16.gmra.mrb[16].mxu1 %vm3942_vm0, %v11791_v13  ;;  %12013 = vmatprep.mubr.bf16.mxu0 %v25184_v53  ;;  %v11768_v49 = vmul.f32 %v18957_v27, %v16706_v26 }
0x1053   : > { %v16707_v35 = vpop.f32.mrb[110].mxu0  ;;  %v11766_v33 = vmul.f32 %v18961_v17, %v11553_v56  ;;  %18974 = vrcp.f32 %v11373_v28  ;;  %v18965_v15 = vpop.eup %18964 }
0x1054   : > { %v11769_v60 = vmul.f32 %v18959_v7, %v16707_v35  ;;  %v11364_v54 = vpop.xlane.xlu0 %11363  ;;  %v11556_v39 = vpop.f32.mrb[111].mxu0 }
0x1055   : > { %v11767_v58 = vmul.f32 %v18963_v6, %v11556_v39  ;;  %18976 = vrcp.f32 %v11364_v54  ;;  %v18967_v36 = vpop.eup %18966 }
0x1056   : > { %v11793_v55 = vpack.c.bf16 %v11769_v60, %v11768_v49  ;;  %v11367_v1 = vpop.xlane.xlu1 %11366 }
0x1057   : > { %v11792_v30 = vpack.c.bf16 %v11767_v58, %v11766_v33  ;;  %18978 = vrcp.f32 %v11367_v1  ;;  %v18969_v40 = vpop.eup %18968 }
0x1058   : > { %v12398_v3 = vpop.permute.xlu0 %12397  ;;  %18980 = vrcp.f32 %v23734_v31 }
0x1059   : > { %16760 = vmatprep.mubr.msk.bf16.mxu1 %vm3942_vm0, %v11792_v30  ;;  %17788 = vmatprep.subr.msk.bf16.mxu1 %vm3942_vm0, %v12398_v3  ;;  %v12418_v12 = vsel %vm3942_vm0, %v12398_v3, 0  ;;  %v18971_v57 = vpop.eup %18970  ;;  %18982 = vrcp.f32 %v23738_v50 }
0x105a   : > { %v12400_v45 = vpop.permute.xlu1 %12399  ;;  %15144 = vmatmul.mubr.msk.bf16.gmra.mrb[12].mxu0 %vm3942_vm0, %v11791_v13  ;;  %16761 = vmatmul.mubr.msk.bf16.gmra.mrb[20].mxu1 %vm3942_vm0, %v11793_v55  ;;  %18984 = vrcp.f32 %v23742_v22 }
0x105b   : > { %16781 = vmatpush3.bf16.xpose.msra.mxu1 %v12418_v12  ;;  %12023 = vmatprep.mubr.bf16.mxu0 %v25184_v53  ;;  %v12421_v0 = vsel %vm3942_vm0, %v12400_v45, 0  ;;  %v18973_v23 = vpop.eup %18972  ;;  %18986 = vrcp.f32 %v23744_v62 }
0x105c   : > { %17789 = vmatprep.subr.msk.bf16.mxu1 %vm3942_vm0, %v12400_v45  ;;  %v23773_v42 = vpop.permute.xlu0 %12385  ;;  %18988 = vrcp.f32 %v23750_v20 }
0x105d   : > { %v18975_v27 = vpop.eup %18974  ;;  %18990 = vrcp.f32 %v23753_v61 }
0x105e   : > { %v12402_v19 = vpop.permute.xlu1 %12401  ;;  %18992 = vrcp.f32 %v23756_v43 }
0x105f   : > { %v12424_v63 = vsel %vm3942_vm0, %v12402_v19, 0  ;;  %v18977_v50 = vpop.eup %18976  ;;  %18994 = vrcp.f32 %v23758_v46 }
0x1060   : > { %v23775_v25 = vpop.permute.xlu0 %12510 }
0x1061   : > { %v18979_v22 = vpop.eup %18978 }
0x1062   : > { %v12404_v47 = vpop.permute.xlu1 %12403  ;;  %15145 = vmatmul.mubr.msk.bf16.gmra.mrb[16].mxu0 %vm3942_vm0, %v11792_v30  ;;  %v18981_v58 = vpop.eup %18980 }
0x1063   : > { %16783 = vmatpush3.bf16.xpose.msra.mxu1 %v12421_v0  ;;  %12033 = vmatprep.mubr.bf16.mxu0 %v25184_v53  ;;  %v12427_v31 = vsel %vm3942_vm0, %v12404_v47, 0  ;;  %v18983_v1 = vpop.eup %18982 }
0x1064   : > { %17790 = vmatprep.subr.msk.bf16.mxu1 %vm3942_vm0, %v12402_v19  ;;  %v23781_v29 = vpop.permute.xlu0 %12389  ;;  %v18985_v20 = vpop.eup %18984 }
0x1065   : > { %v18987_v12 = vpop.eup %18986 }
0x1066   : > { %v23783_v16 = vpop.permute.xlu1 %12387 }
0x1068   : > { %v23785_v32 = vpop.permute.xlu0 %12514 }
0x1069   : > { %v16718_v14 = vpop.f32.mrb[160].mxu1 }
0x106a   : > { %v23787_v9 = vpop.permute.xlu1 %12512  ;;  %v11614_v2 = vpop.f32.mrb[161].mxu1  ;;  %15146 = vmatmul.mubr.msk.bf16.gmra.mrb[20].mxu0 %vm3942_vm0, %v11793_v55  ;;  %v11772_v52 = vmul.f32 %v18965_v15, %v16718_v14 }
0x106b   : > { %16785 = vmatpush3.bf16.xpose.msra.mxu1 %v12424_v63  ;;  %v16719_v51 = vpop.f32.mrb[162].mxu1  ;;  %12043 = vmatprep.mubr.bf16.mxu0 %v25184_v53  ;;  %v11770_v11 = vmul.f32 %v18969_v40, %v11614_v2  ;;  %v18989_v63 = vpop.eup %18988 }
0x106c   : > { %v11773_v24 = vmul.f32 %v18967_v36, %v16719_v51  ;;  %17791 = vmatprep.subr.msk.bf16.mxu1 %vm3942_vm0, %v12404_v47  ;;  %v23793_v34 = vpop.permute.xlu0 %12498  ;;  %v11617_v5 = vpop.f32.mrb[163].mxu1 }
0x106d   : > { %v11771_v10 = vmul.f32 %v18971_v57, %v11617_v5  ;;  %v18991_v57 = vpop.eup %18990 }
0x106e   : > { %v11795_v48 = vpack.c.bf16 %v11773_v24, %v11772_v52  ;;  %v23795_v59 = vpop.permute.xlu1 %12391  ;;  %v18993_v5 = vpop.eup %18992 }
0x106f   : > { %v11794_v13 = vpack.c.bf16 %v11771_v10, %v11770_v11  ;;  %v18995_v10 = vpop.eup %18994 }
0x1070   : > { %v23799_v44 = vpop.permute.xlu0 %12623 }
0x1071   : > { %v16722_v4 = vpop.f32.mrb[164].mxu1  ;;  %16764 = vmatprep.mubr.msk.bf16.mxu1 %vm3942_vm0, %v11794_v13 }
0x1072   : > { %v23804_v26 = vpop.permute.xlu1 %12516  ;;  %v11630_v7 = vpop.f32.mrb[165].mxu1  ;;  %15147 = vmatmul.mubr.msk.bf16.gmra.mrb[24].mxu0 %vm3942_vm0, %v11794_v13  ;;  %16765 = vmatmul.mubr.msk.bf16.gmra.mrb[24].mxu1 %vm3942_vm0, %v11795_v48  ;;  %v11776_v56 = vmul.f32 %v18973_v23, %v16722_v4 }
0x1073   : > { %16787 = vmatpush3.bf16.xpose.msra.mxu1 %v12427_v31  ;;  %v16723_v28 = vpop.f32.mrb[166].mxu1  ;;  %12053 = vmatprep.mubr.bf16.mxu0 %v25184_v53  ;;  %v11774_v6 = vmul.f32 %v18977_v50, %v11630_v7 }
0x1074   : > { %v11777_v17 = vmul.f32 %v18975_v27, %v16723_v28  ;;  %17792 = vmatprep.subr.msk.bf16.mxu1 %vm3942_vm0, %v23775_v25  ;;  %v23812_v62 = vpop.permute.xlu0 %12502  ;;  %v11633_v35 = vpop.f32.mrb[167].mxu1 }
0x1075   : > { %v11775_v49 = vmul.f32 %v18979_v22, %v11633_v35 }
0x1076   : > { %v11797_v60 = vpack.c.bf16 %v11777_v17, %v11776_v56  ;;  %v23814_v54 = vpop.permute.xlu1 %12500 }
0x1077   : > { %v11796_v39 = vpack.c.bf16 %v11775_v49, %v11774_v6 }
0x1078   : > { %v23818_v33 = vpop.permute.xlu0 %12627 }
0x1079   : > { %v16734_v55 = vpop.f32.mrb[112].mxu0  ;;  %16768 = vmatprep.mubr.msk.bf16.mxu1 %vm3942_vm0, %v11796_v39 }
0x107a   : > { %v23823_v30 = vpop.permute.xlu1 %12625  ;;  %v11691_v3 = vpop.f32.mrb[113].mxu0  ;;  %15148 = vmatmul.mubr.msk.bf16.gmra.mrb[32].mxu0 %vm3942_vm0, %v11795_v48  ;;  %16769 = vmatmul.mubr.msk.bf16.gmra.mrb[28].mxu1 %vm3942_vm0, %v11797_v60  ;;  %v11780_v45 = vmul.f32 %v18981_v58, %v16734_v55 }
0x107b   : > { %v16735_v61 = vpop.f32.mrb[114].mxu0  ;;  %12063 = vmatprep.mubr.bf16.mxu0 %v25184_v53  ;;  %v11778_v0 = vmul.f32 %v18985_v20, %v11691_v3 }
0x107c   : > { %v11781_v43 = vmul.f32 %v18983_v1, %v16735_v61  ;;  %v23828_v19 = vpop.permute.xlu0 %12611  ;;  %v11694_v47 = vpop.f32.mrb[115].mxu0 }
0x107d   : > { %v11779_v15 = vmul.f32 %v18987_v12, %v11694_v47 }
0x107e   : > { %v11799_v46 = vpack.c.bf16 %v11781_v43, %v11780_v45  ;;  %v23830_v14 = vpop.permute.xlu1 %12504 }
0x107f   : > { %v11798_v36 = vpack.c.bf16 %v11779_v15, %v11778_v0 }
0x1080   : > { %v12737_v2 = vpop.permute.xlu0 %12736 }
0x1081   : > { %v12757_v40 = vsel %vm3942_vm0, %v12737_v2, 0  ;;  %v16738_v51 = vpop.f32.mrb[116].mxu0  ;;  %16772 = vmatprep.mubr.msk.bf16.mxu1 %vm3942_vm0, %v11798_v36  ;;  %17800 = vmatprep.subr.msk.bf16.mxu0 %vm3942_vm0, %v12737_v2 }
0x1082   : > { %v23835_v52 = vpop.permute.xlu1 %12629  ;;  %v11707_v24 = vpop.f32.mrb[117].mxu0  ;;  %15149 = vmatmul.mubr.msk.bf16.gmra.mrb[28].mxu0 %vm3942_vm0, %v11796_v39  ;;  %16773 = vmatmul.mubr.msk.bf16.gmra.mrb[32].mxu1 %vm3942_vm0, %v11799_v46  ;;  %v11784_v48 = vmul.f32 %v18989_v63, %v16738_v51 }
0x1083   : > { %16829 = vmatpush3.bf16.xpose.msra.mxu0 %v12757_v40  ;;  %v16739_v11 = vpop.f32.mrb[118].mxu0  ;;  %12073 = vmatprep.mubr.bf16.mxu0 %v25184_v53  ;;  %v11782_v27 = vmul.f32 %v18993_v5, %v11707_v24 }
0x1084   : > { %v11785_v13 = vmul.f32 %v18991_v57, %v16739_v11  ;;  %v23840_v23 = vpop.permute.xlu0 %12615  ;;  %v11710_v4 = vpop.f32.mrb[119].mxu0 }
0x1085   : > { %v11783_v7 = vmul.f32 %v18995_v10, %v11710_v4 }
0x1086   : > { %v11801_v31 = vpack.c.bf16 %v11785_v13, %v11784_v48  ;;  %v23842_v50 = vpop.permute.xlu1 %12613 }
0x1087   : > { %v11800_v28 = vpack.c.bf16 %v11783_v7, %v11782_v27 }
0x1088   : > { %v12741_v22 = vpop.permute.xlu0 %12740 }
0x1089   : > { %16776 = vmatprep.mubr.msk.bf16.mxu1 %vm3942_vm0, %v11800_v28 }
0x108a   : > { %v12739_v56 = vpop.permute.xlu1 %12738  ;;  %15150 = vmatmul.mubr.msk.bf16.gmra.mrb[36].mxu0 %vm3942_vm0, %v11797_v60  ;;  %16777 = vmatmul.mubr.msk.bf16.gmra.mrb[36].mxu1 %vm3942_vm0, %v11801_v31  ;;  %v12531_v60 = vsel %vm3942_vm0, %v23775_v25, 0  ;;  %v12534_v25 = vsel %vm3942_vm0, %v23787_v9, 0 }
0x108b   : > { %v12760_v17 = vsel %vm3942_vm0, %v12739_v56, 0  ;;  %16788 = vmatprep.mubr.msk.bf16.mxu1 %vm3942_vm0, %v23773_v42  ;;  %17801 = vmatprep.subr.msk.bf16.mxu0 %vm3942_vm0, %v12739_v56  ;;  %v12763_v42 = vsel %vm3942_vm0, %v12741_v22, 0 }
0x108c   : > { %v12725_v35 = vpop.permute.xlu0 %12724  ;;  %16831 = vmatpush3.bf16.xpose.msra.mxu0 %v12760_v17  ;;  %12083 = vmatprep.mubr.bf16.mxu0 %v25184_v53 }
0x108d   : > { %17802 = vmatprep.subr.msk.bf16.mxu0 %vm3942_vm0, %v12741_v22 }
0x108e   : > { %v23853_v6 = vpop.permute.xlu1 %12617 }
0x1090   : > { %v12729_v49 = vpop.permute.xlu0 %12728 }
0x1092   : > { %15151 = vmatmul.mubr.msk.bf16.gmra.mrb[40].mxu0 %vm3942_vm0, %v11798_v36  ;;  %16789 = vmatmul.mubr.msk.bf16.vlgmr.msra.gmra.mrb[168].mxu1 %vm3942_vm0, %v23783_v16  ;;  %v12743_v39 = vpop.permute.xlu1 %12742 }
0x1093   : > { %16797 = vmatpush3.bf16.xpose.msra.mxu1 %v12531_v60  ;;  %16792 = vmatprep.mubr.msk.bf16.mxu1 %vm3942_vm0, %v23781_v29  ;;  %v12766_v29 = vsel %vm3942_vm0, %v12743_v39, 0 }
0x1094   : > { %17793 = vmatprep.subr.msk.bf16.mxu1 %vm3942_vm0, %v23787_v9  ;;  %v13174_v58 = vpop.permute.xlu0 %13173  ;;  %16833 = vmatpush3.bf16.xpose.msra.mxu0 %v12763_v42  ;;  %v12537_v9 = vsel %vm3942_vm0, %v23785_v32, 0 }
0x1095   : > { %17803 = vmatprep.subr.msk.bf16.mxu0 %vm3942_vm0, %v12743_v39  ;;  %12093 = vmatprep.mubr.bf16.mxu0 %v25184_v53 }
0x1096   : > { %v12727_v55 = vpop.permute.xlu1 %12726 }
0x1098   : > { %v13178_v16 = vpop.permute.xlu0 %13177 }
0x109a   : > { %15152 = vmatmul.mubr.msk.bf16.gmra.mrb[44].mxu0 %vm3942_vm0, %v11799_v46  ;;  %16793 = vmatmul.mubr.msk.bf16.gmra.mrb[172].mxu1 %vm3942_vm0, %v23795_v59  ;;  %v12731_v3 = vpop.permute.xlu1 %12730  ;;  %v12540_v59 = vsel %vm3942_vm0, %v23804_v26, 0 }
0x109b   : > { %16799 = vmatpush3.bf16.xpose.msra.mxu1 %v12534_v25  ;;  %16804 = vmatprep.mubr.msk.bf16.mxu1 %vm3942_vm0, %v23793_v34 }
0x109c   : > { %17794 = vmatprep.subr.msk.bf16.mxu1 %vm3942_vm0, %v23785_v32  ;;  %v13267_v1 = vpop.permute.xlu0 %13266  ;;  %16835 = vmatpush3.bf16.xpose.msra.mxu0 %v12766_v29  ;;  %v12644_v32 = vsel %vm3942_vm0, %v23799_v44, 0 }
0x109d   : > { %16860 = vmatprep.subr.bf16.mxu0 %v13267_v1  ;;  %12103 = vmatprep.mubr.bf16.mxu0 %v25184_v53 }
0x109e   : > { %v13176_v34 = vpop.permute.xlu1 %13175 }
0x10a0   : > { %v13271_v61 = vpop.permute.xlu0 %13270 }
0x10a2   : > { %15153 = vmatmul.mubr.msk.bf16.gmra.mrb[48].mxu0 %vm3942_vm0, %v11800_v28  ;;  %v13180_v20 = vpop.permute.xlu1 %13179 }
0x10a3   : > { %16801 = vmatpush3.bf16.xpose.msra.mxu1 %v12537_v9  ;;  %12113 = vmatprep.mubr.bf16.mxu0 %v25184_v53 }
0x10a4   : > { %17795 = vmatprep.subr.msk.bf16.mxu1 %vm3942_vm0, %v23804_v26 }
0x10a6   : > { %v13269_v26 = vpop.permute.xlu1 %13268 }
0x10aa   : > { %15154 = vmatmul.mubr.msk.bf16.gmra.mrb[52].mxu0 %vm3942_vm0, %v11801_v31 }
0x10ab   : > { %16803 = vmatpush3.bf16.xpose.msra.mxu1 %v12540_v59  ;;  %16836 = vmatprep.mubr.msk.bf16.mxu0 %vm3942_vm0, %v12725_v35 }
0x10ac   : > { %17796 = vmatprep.subr.msk.bf16.mxu1 %vm3942_vm0, %v23799_v44  ;;  %v12647_v44 = vsel %vm3942_vm0, %v23823_v30, 0 }
0x10b2   : > { %16805 = vmatmul.mubr.msk.bf16.vlgmr.msra.gmra.mrb[176].mxu1 %vm3942_vm0, %v23814_v54  ;;  %16837 = vmatmul.mubr.msk.bf16.vlgmr.msra.gmra.mrb[120].mxu0 %vm3942_vm0, %v12727_v55  ;;  %v12650_v54 = vsel %vm3942_vm0, %v23818_v33, 0 }
0x10b3   : > { %16808 = vmatprep.mubr.msk.bf16.mxu1 %vm3942_vm0, %v23812_v62  ;;  %16813 = vmatpush3.bf16.xpose.msra.mxu1 %v12644_v32  ;;  %v13273_v62 = vpop.permute.xlu1 %13272 }
0x10b4   : > { %16861 = vmatpush3.bf16.msra.mxu0 %v13267_v1  ;;  %17797 = vmatprep.subr.msk.bf16.mxu1 %vm3942_vm0, %v23823_v30  ;;  %v12653_v30 = vsel %vm3942_vm0, %v23835_v52, 0 }
0x10b5   : > { %16840 = vmatprep.mubr.msk.bf16.mxu0 %vm3942_vm0, %v12729_v49  ;;  %16862 = vmatprep.subr.bf16.mxu0 %v13269_v26 }
0x10b7   : > { %v13362_v28 = vpop.permute.xlu1 %13361 }
0x10b8   : > { %16863 = vmatpush3.bf16.msra.mxu0 %v13269_v26 }
0x10b9   : > { %16864 = vmatprep.subr.bf16.mxu0 %v13271_v61 }
0x10ba   : > { %16809 = vmatmul.mubr.msk.bf16.gmra.mrb[180].mxu1 %vm3942_vm0, %v23830_v14  ;;  %16841 = vmatmul.mubr.msk.bf16.gmra.mrb[124].mxu0 %vm3942_vm0, %v12731_v3 }
0x10bb   : > { %16815 = vmatpush3.bf16.xpose.msra.mxu1 %v12647_v44  ;;  %16820 = vmatprep.mubr.msk.bf16.mxu1 %vm3942_vm0, %v23828_v19 }
0x10bc   : > { %16865 = vmatpush3.bf16.msra.mxu0 %v13271_v61  ;;  %17798 = vmatprep.subr.msk.bf16.mxu1 %vm3942_vm0, %v23818_v33  ;;  %v23921_v33 = vpop.permute.xlu0 %13359 }
0x10bd   : > { %16866 = vmatprep.subr.bf16.mxu0 %v13273_v62 }
0x10c0   : > { %16867 = vmatpush3.bf16.msra.mxu0 %v13273_v62 }
0x10c3   : > { %16817 = vmatpush3.bf16.xpose.msra.mxu1 %v12650_v54 }
0x10c4   : > { %17799 = vmatprep.subr.msk.bf16.mxu1 %vm3942_vm0, %v23835_v52 }
0x10cb   : > { %16819 = vmatpush3.bf16.xpose.msra.mxu1 %v12653_v30 }
0x10cc   : > { %16844 = vmatprep.subr.bf16.mxu1 %v13174_v58 }
0x10d2   : > { %16821 = vmatmul.mubr.msk.bf16.vlgmr.msra.gmra.mrb[184].mxu1 %vm3942_vm0, %v23842_v50 }
0x10d3   : > { %16824 = vmatprep.mubr.msk.bf16.mxu1 %vm3942_vm0, %v23840_v23  ;;  %16845 = vmatpush3.bf16.msra.mxu1 %v13174_v58 }
0x10d4   : > { %16846 = vmatprep.subr.bf16.mxu1 %v13176_v34 }
0x10d7   : > { %16847 = vmatpush3.bf16.msra.mxu1 %v13176_v34 }
0x10d8   : > { %16848 = vmatprep.subr.bf16.mxu1 %v13178_v16 }
0x10da   : > { %16825 = vmatmul.mubr.msk.bf16.gmra.mrb[188].mxu1 %vm3942_vm0, %v23853_v6 }
0x10db   : > { %16849 = vmatpush3.bf16.msra.mxu1 %v13178_v16 }
0x10dc   : > { %16850 = vmatprep.subr.bf16.mxu1 %v13180_v20 }
0x10df   : > { %16851 = vmatpush3.bf16.msra.mxu1 %v13180_v20 }
0x10e0   : > { %16876 = vmatprep.subr.bf16.mxu1 %v23921_v33 }
0x1105   : > { %v23924_v12 = vpop.f32.mrb[8].mxu1 }
0x1106   : > { %v23926_v45 = vpop.f32.mrb[9].mxu1 }
0x1107   : > { %v23928_v43 = vpop.f32.mrb[10].mxu1 }
0x1108   : > { %v23930_v19 = vpop.f32.mrb[11].mxu1 }
0x1165   : > { %v16790_v47 = vpop.f32.mrb[168].mxu1 }
0x1166   : > { %v23934_v15 = vsel %vm20755_vm1, %v16790_v47, -inf  ;;  %v12463_v46 = vpop.f32.mrb[169].mxu1 }
0x1167   : > { %v12871_v14 = vsel %vm3942_vm0, %v23934_v15, -inf  ;;  %v16791_v36 = vpop.f32.mrb[170].mxu1  ;;  %v23940_v63 = vsel %vm20763_vm2, %v12463_v46, -inf }
0x1168   : > { %12872 = vmax.xlane.f32.xlu0 %v12871_v14  ;;  %v12466_v40 = vpop.f32.mrb[171].mxu1  ;;  %v12865_v24 = vsel %vm3942_vm0, %v23940_v63, -inf  ;;  %v23952_v11 = vsel %vm20767_vm3, %v16791_v36, -inf }
0x1169   : > { %v23944_v57 = vsel %vm20779_vm4, %v12466_v40, -inf  ;;  %v12874_v4 = vsel %vm3942_vm0, %v23952_v11, -inf }
0x116a   : > { %v12868_v52 = vsel %vm3942_vm0, %v23944_v57, -inf }
0x116b   : > { %12869 = vmax.xlane.f32.xlu1 %v12868_v52 }
0x116c   : > { %12866 = vmax.xlane.f32.xlu0 %v12865_v24 }
0x116d   : > { %v16794_v10 = vpop.f32.mrb[172].mxu1 }
0x116e   : > { %v23956_v13 = vsel %vm20806_vm5, %v16794_v10, -inf  ;;  %v12479_v23 = vpop.f32.mrb[173].mxu1 }
0x116f   : > { %v12883_v27 = vsel %vm3942_vm0, %v23956_v13, -inf  ;;  %v16795_v7 = vpop.f32.mrb[174].mxu1  ;;  %v23964_v50 = vsel %vm20815_vm6, %v12479_v23, -inf }
0x1170   : > { %v23968_v22 = vsel %vm20819_vm7, %v16795_v7, -inf  ;;  %12875 = vmax.xlane.f32.xlu0 %v12874_v4  ;;  %12884 = vmax.xlane.f32.xlu1 %v12883_v27  ;;  %v12482_v56 = vpop.f32.mrb[175].mxu1  ;;  %v12877_v17 = vsel %vm3942_vm0, %v23964_v50, -inf }
0x1171   : > { %v12886_v35 = vsel %vm3942_vm0, %v23968_v22, -inf  ;;  %v23976_v49 = vsel %vm20831_vm8, %v12482_v56, -inf }
0x1172   : > { %v12880_v60 = vsel %vm3942_vm0, %v23976_v49, -inf }
0x1174   : > { %12878 = vmax.xlane.f32.xlu0 %v12877_v17  ;;  %12887 = vmax.xlane.f32.xlu1 %v12886_v35 }
0x1178   : > { %12881 = vmax.xlane.f32.xlu1 %v12880_v60 }
0x1185   : > { %v16806_v42 = vpop.f32.mrb[176].mxu1  ;;  %v23980_v39 = vpop.f32.mrb[120].mxu0 }
0x1186   : > { %v23984_v58 = vsel %vm20755_vm1, %v16806_v42, -inf  ;;  %v12576_v16 = vpop.f32.mrb[177].mxu1  ;;  %v12802_v25 = vpop.f32.mrb[121].mxu0 }
0x1187   : > { %v12895_v29 = vsel %vm3942_vm0, %v23984_v58, -inf  ;;  %v16807_v55 = vpop.f32.mrb[178].mxu1  ;;  %v23988_v1 = vpop.f32.mrb[122].mxu0  ;;  %v23992_v3 = vsel %vm20763_vm2, %v12576_v16, -inf }
0x1188   : > { %12896 = vmax.xlane.f32.xlu0 %v12895_v29  ;;  %v12579_v9 = vpop.f32.mrb[179].mxu1  ;;  %v12805_v34 = vpop.f32.mrb[123].mxu0  ;;  %v12889_v32 = vsel %vm3942_vm0, %v23992_v3, -inf  ;;  %v24004_v26 = vsel %vm20767_vm3, %v16807_v55, -inf }
0x1189   : > { %v23996_v59 = vsel %vm20779_vm4, %v12579_v9, -inf  ;;  %v12898_v47 = vsel %vm3942_vm0, %v24004_v26, -inf  ;;  %v24046_v9 = vsel %vm20779_vm4, %v12805_v34, -inf }
0x118a   : > { %v12892_v20 = vsel %vm3942_vm0, %v23996_v59, -inf }
0x118b   : > { %12893 = vmax.xlane.f32.xlu1 %v12892_v20 }
0x118c   : > { %12890 = vmax.xlane.f32.xlu0 %v12889_v32 }
0x118d   : > { %v16810_v61 = vpop.f32.mrb[180].mxu1  ;;  %v16842_v44 = vpop.f32.mrb[124].mxu0 }
0x118e   : > { %v24008_v62 = vsel %vm20806_vm5, %v16810_v61, -inf  ;;  %v12592_v54 = vpop.f32.mrb[181].mxu1  ;;  %v24010_v30 = vpop.f32.mrb[125].mxu0  ;;  %v24100_v0 = vsel %vm20806_vm5, %v16842_v44, -inf }
0x118f   : > { %v12907_v46 = vsel %vm3942_vm0, %v24008_v62, -inf  ;;  %v16811_v14 = vpop.f32.mrb[182].mxu1  ;;  %v16843_v36 = vpop.f32.mrb[126].mxu0  ;;  %v24018_v40 = vsel %vm20815_vm6, %v12592_v54, -inf  ;;  %v24121_v44 = vsel %vm20815_vm6, %v24010_v30, -inf }
0x1190   : > { %12899 = vmax.xlane.f32.xlu0 %v12898_v47  ;;  %12908 = vmax.xlane.f32.xlu1 %v12907_v46  ;;  %v12595_v52 = vpop.f32.mrb[183].mxu1  ;;  %v12821_v24 = vpop.f32.mrb[127].mxu0  ;;  %v12901_v10 = vsel %vm3942_vm0, %v24018_v40, -inf  ;;  %v24028_v42 = vsel %vm20819_vm7, %v16811_v14, -inf }
0x1191   : > { %v12910_v16 = vsel %vm3942_vm0, %v24028_v42, -inf  ;;  %v24038_v29 = vsel %vm20831_vm8, %v12595_v52, -inf  ;;  %v24083_v52 = vsel %vm20755_vm1, %v23980_v39, -inf }
0x1192   : > { %v12904_v55 = vsel %vm3942_vm0, %v24038_v29, -inf }
0x1194   : > { %12902 = vmax.xlane.f32.xlu0 %v12901_v10  ;;  %v24087_v10 = vsel %vm20831_vm8, %v12821_v24, -inf  ;;  %v12955_v24 = vsel %vm3942_vm0, %v24100_v0, -inf }
0x11a1   : > { %13365 = vrot.lane.b32.xlu1 %v25368_v37, %s19347_s21  ;;  %v24034_v37 = vsel %vm20763_vm2, %v12802_v25, -inf  ;;  %v12940_v25 = vsel %vm3942_vm0, %v24046_v9, -inf }
0x11a5   : > { %v16822_v23 = vpop.f32.mrb[184].mxu1 }
0x11a6   : > { %v12689_v4 = vpop.f32.mrb[185].mxu1  ;;  %v24050_v20 = vsel %vm20755_vm1, %v16822_v23, -inf  ;;  %v12943_v23 = vsel %vm3942_vm0, %v24083_v52, -inf }
0x11a7   : > { %v16823_v27 = vpop.f32.mrb[186].mxu1  ;;  %v12919_v32 = vsel %vm3942_vm0, %v24050_v20, -inf  ;;  %v24058_v61 = vsel %vm20763_vm2, %v12689_v4, -inf  ;;  %v12952_v4 = vsel %vm3942_vm0, %v24087_v10, -inf }
0x11a8   : > { %v12692_v7 = vpop.f32.mrb[187].mxu1  ;;  %v12913_v54 = vsel %vm3942_vm0, %v24058_v61, -inf  ;;  %v24070_v46 = vsel %vm20767_vm3, %v16823_v27, -inf  ;;  %v24096_v27 = vsel %vm20767_vm3, %v23988_v1, -inf }
0x11a9   : > { %v24062_v34 = vsel %vm20779_vm4, %v12692_v7, -inf  ;;  %v12922_v51 = vsel %vm3942_vm0, %v24070_v46, -inf  ;;  %v12946_v39 = vsel %vm3942_vm0, %v24096_v27, -inf  ;;  %v24108_v7 = vsel %vm20819_vm7, %v16843_v36, -inf }
0x11aa   : > { %13363 = vrot.lane.b32.xlu0 %v25367_v21, %s19347_s21  ;;  %v12937_v21 = vsel %vm3942_vm0, %v24034_v37, -inf  ;;  %v12916_v47 = vsel %vm3942_vm0, %v24062_v34, -inf  ;;  %v12958_v48 = vsel %vm3942_vm0, %v24108_v7, -inf }
0x11ad   : > { %v16826_v56 = vpop.f32.mrb[188].mxu1 }
0x11ae   : > { %v12705_v17 = vpop.f32.mrb[189].mxu1  ;;  %v24074_v2 = vsel %vm20806_vm5, %v16826_v56, -inf  ;;  %v12949_v56 = vsel %vm3942_vm0, %v24121_v44, -inf }
0x11af   : > { %v16827_v35 = vpop.f32.mrb[190].mxu1  ;;  %v12931_v14 = vsel %vm3942_vm0, %v24074_v2, -inf  ;;  %v24112_v5 = vsel %vm20815_vm6, %v12705_v17, -inf }
0x11b0   : > { %v12708_v60 = vpop.f32.mrb[191].mxu1  ;;  %v12925_v1 = vsel %vm3942_vm0, %v24112_v5, -inf  ;;  %v24125_v36 = vsel %vm20819_vm7, %v16827_v35, -inf }
0x11b1   : > { %v12934_v17 = vsel %vm3942_vm0, %v24125_v36, -inf }
0x11c5   : > { %12911 = vmax.xlane.f32.xlu1 %v12910_v16  ;;  %v24133_v16 = vsel %vm20831_vm8, %v12708_v60, -inf }
0x11c6   : > { %v12928_v31 = vsel %vm3942_vm0, %v24133_v16, -inf }
0x11c9   : > { %12905 = vmax.xlane.f32.xlu1 %v12904_v55  ;;  %12938 = vmax.xlane.f32.xlu0 %v12937_v21 }
0x11cd   : > { %12920 = vmax.xlane.f32.xlu0 %v12919_v32  ;;  %12941 = vmax.xlane.f32.xlu1 %v12940_v25 }
0x11d1   : > { %12914 = vmax.xlane.f32.xlu0 %v12913_v54  ;;  %12917 = vmax.xlane.f32.xlu1 %v12916_v47 }
0x11d5   : > { %12923 = vmax.xlane.f32.xlu0 %v12922_v51  ;;  %12932 = vmax.xlane.f32.xlu1 %v12931_v14 }
0x11d9   : > { %12944 = vmax.xlane.f32.xlu0 %v12943_v23  ;;  %12953 = vmax.xlane.f32.xlu1 %v12952_v4 }
0x11dd   : > { %12947 = vmax.xlane.f32.xlu0 %v12946_v39  ;;  %12956 = vmax.xlane.f32.xlu1 %v12955_v24 }
0x11e1   : > { %12926 = vmax.xlane.f32.xlu0 %v12925_v1  ;;  %12959 = vmax.xlane.f32.xlu1 %v12958_v48 }
0x11e5   : > { %12950 = vmax.xlane.f32.xlu0 %v12949_v56  ;;  %12935 = vmax.xlane.f32.xlu1 %v12934_v17 }
0x11e9   : > { %12929 = vmax.xlane.f32.xlu1 %v12928_v31 }
0x11f5   : > { %v12873_v30 = vpop.xlane.xlu0 %12872 }
0x11f6   : > { %v12963_v21 = vsub.f32 %v23934_v15, %v12873_v30 }
0x11f8   : > { %v12870_v35 = vpop.xlane.xlu1 %12869  ;;  %v12997_v54 = vmul.f32 1.442695, %v12963_v21 }
0x11f9   : > { %v12962_v55 = vsub.f32 %v23944_v57, %v12870_v35  ;;  %v12867_v25 = vpop.xlane.xlu0 %12866 }
0x11fa   : > { %v12961_v32 = vsub.f32 %v23940_v63, %v12867_v25  ;;  %13454 = vrot.lane.b32.xlu1 %v25369_v41, %s19347_s21 }
0x11fb   : > { %v12995_v6 = vmul.f32 1.442695, %v12962_v55  ;;  %13452 = vrot.lane.b32.xlu0 %v25356_v8, %s19347_s21 }
0x11fc   : > { %v12993_v60 = vmul.f32 1.442695, %v12961_v32 }
0x11fd   : > { %18996 = vpow2.f32 %v12995_v6  ;;  %v12876_v47 = vpop.xlane.xlu0 %12875  ;;  %v12885_v51 = vpop.xlane.xlu1 %12884 }
0x11fe   : > { %18998 = vpow2.f32 %v12993_v60  ;;  %v12964_v15 = vsub.f32 %v23952_v11, %v12876_v47  ;;  %13458 = vrot.lane.b32.xlu1 %v25371_v18, %s19347_s21  ;;  %v12967_v23 = vsub.f32 %v23956_v13, %v12885_v51 }
0x11ff   : > { %13456 = vrot.lane.b32.xlu0 %v25370_v38, %s19347_s21  ;;  %19000 = vpow2.f32 %v12997_v54 }
0x1200   : > { %v12999_v63 = vmul.f32 1.442695, %v12964_v15  ;;  %v13005_v48 = vmul.f32 1.442695, %v12967_v23 }
0x1201   : > { %v12879_v41 = vpop.xlane.xlu0 %12878  ;;  %v12888_v57 = vpop.xlane.xlu1 %12887 }
0x1202   : > { %19002 = vpow2.f32 %v12999_v63  ;;  %v12965_v8 = vsub.f32 %v23964_v50, %v12879_v41  ;;  %v12968_v14 = vsub.f32 %v23968_v22, %v12888_v57 }
0x1204   : > { %v13001_v4 = vmul.f32 1.442695, %v12965_v8  ;;  %v13007_v39 = vmul.f32 1.442695, %v12968_v14 }
0x1205   : > { %v12882_v11 = vpop.xlane.xlu1 %12881 }
0x1206   : > { %v12966_v24 = vsub.f32 %v23976_v49, %v12882_v11  ;;  %19004 = vpow2.f32 %v13001_v4 }
0x1207   : > { %v18997_v18 = vpop.eup %18996  ;;  %19006 = vpow2.f32 %v13007_v39 }
0x1208   : > { %v18999_v1 = vpop.eup %18998  ;;  %v13003_v38 = vmul.f32 1.442695, %v12966_v24  ;;  %v13060_v8 = vsel %vm3942_vm0, %v18997_v18, 0.0 }
0x1209   : > { %v13153_v56 = vpack.c.bf16 %v18997_v18, %v18999_v1  ;;  %v19001_v17 = vpop.eup %19000  ;;  %v13057_v15 = vsel %vm3942_vm0, %v18999_v1, 0.0 }
0x120a   : > { %19008 = vpow2.f32 %v13003_v38 }
0x120b   : > { %19010 = vpow2.f32 %v13005_v48  ;;  %16852 = vmatprep.mubr.msk.bf16.mxu1 %vm3942_vm0, %v13153_v56 }
0x120c   : > { %v19003_v50 = vpop.eup %19002 }
0x120d   : > { %v13154_v22 = vpack.c.bf16 %v19003_v50, %v19001_v17  ;;  %v13066_v23 = vsel %vm3942_vm0, %v19003_v50, 0.0 }
0x120f   : > { %16853 = vmatmul.mubr.msk.bf16.vlgmr.msra.gmra.mrb[192].mxu1 %vm3942_vm0, %v13154_v22 }
0x1210   : > { %16877 = vmatpush3.bf16.msra.mxu1 %v23921_v33  ;;  %v19005_v13 = vpop.eup %19004 }
0x1211   : > { %16878 = vmatprep.subr.bf16.mxu1 %v13362_v28  ;;  %v19007_v49 = vpop.eup %19006  ;;  %v13069_v48 = vsel %vm3942_vm0, %v19005_v13, 0.0 }
0x1214   : > { %v19009_v31 = vpop.eup %19008  ;;  %16879 = vmatpush3.bf16.msra.mxu1 %v13362_v28 }
0x1215   : > { %v19011_v30 = vpop.eup %19010  ;;  %v12897_v35 = vpop.xlane.xlu0 %12896  ;;  %v13155_v21 = vpack.c.bf16 %v19009_v31, %v19005_v13 }
0x1216   : > { %v13156_v55 = vpack.c.bf16 %v19007_v49, %v19011_v30  ;;  %v12971_v32 = vsub.f32 %v23984_v58, %v12897_v35  ;;  %v13075_v22 = vsel %vm3942_vm0, %v19011_v30, 0.0 }
0x1217   : > { %16856 = vmatprep.mubr.msk.bf16.mxu1 %vm3942_vm0, %v13155_v21 }
0x1218   : > { %v12894_v25 = vpop.xlane.xlu1 %12893  ;;  %16857 = vmatmul.mubr.msk.bf16.gmra.mrb[196].mxu1 %vm3942_vm0, %v13156_v55  ;;  %v13013_v51 = vmul.f32 1.442695, %v12971_v32 }
0x1219   : > { %v12970_v6 = vsub.f32 %v23996_v59, %v12894_v25  ;;  %v12891_v60 = vpop.xlane.xlu0 %12890  ;;  %v13063_v59 = vsel %vm3942_vm0, %v19001_v17, 0.0 }
0x121a   : > { %v12969_v33 = vsub.f32 %v23992_v3, %v12891_v60 }
0x121b   : > { %v13011_v54 = vmul.f32 1.442695, %v12970_v6 }
0x121c   : > { %v13009_v47 = vmul.f32 1.442695, %v12969_v33 }
0x121d   : > { %19012 = vpow2.f32 %v13011_v54  ;;  %v12900_v28 = vpop.xlane.xlu0 %12899  ;;  %v12909_v57 = vpop.xlane.xlu1 %12908 }
0x121e   : > { %19014 = vpow2.f32 %v13009_v47  ;;  %v12972_v63 = vsub.f32 %v24004_v26, %v12900_v28  ;;  %13058 = vadd.xlane.f32.xlu0 %v13057_v15  ;;  %v13072_v26 = vsel %vm3942_vm0, %v19009_v31, 0.0  ;;  %v12975_v24 = vsub.f32 %v24008_v62, %v12909_v57 }
0x121f   : > { %19016 = vpow2.f32 %v13013_v51 }
0x1220   : > { %v13015_v41 = vmul.f32 1.442695, %v12972_v63  ;;  %v13021_v17 = vmul.f32 1.442695, %v12975_v24 }
0x1221   : > { %v12903_v58 = vpop.xlane.xlu0 %12902  ;;  %v13366_v39 = vpop.permute.xlu1 %13365 }
0x1222   : > { %19018 = vpow2.f32 %v13015_v41  ;;  %13064 = vadd.xlane.f32.xlu0 %v13063_v59  ;;  %13061 = vadd.xlane.f32.xlu1 %v13060_v8  ;;  %v12973_v3 = vsub.f32 %v24018_v40, %v12903_v58  ;;  %v13078_v40 = vsel %vm3942_vm0, %v19007_v49, 0.0 }
0x1224   : > { %v13017_v18 = vmul.f32 1.442695, %v12973_v3 }
0x1225   : > { %v13364_v14 = vpop.permute.xlu0 %13363 }
0x1226   : > { %16880 = vmatprep.subr.bf16.mxu1 %v13364_v14  ;;  %13067 = vadd.xlane.f32.xlu0 %v13066_v23  ;;  %19020 = vpow2.f32 %v13017_v18 }
0x1227   : > { %v19013_v4 = vpop.eup %19012  ;;  %13073 = vadd.xlane.f32.xlu1 %v13072_v26  ;;  %16881 = vmatpush3.bf16.msra.mxu1 %v13364_v14  ;;  %19022 = vpow2.f32 %v13021_v17 }
0x1228   : > { %v19015_v11 = vpop.eup %19014  ;;  %16882 = vmatprep.subr.bf16.mxu1 %v13366_v39  ;;  %v13084_v62 = vsel %vm3942_vm0, %v19013_v4, 0.0 }
0x1229   : > { %v13157_v1 = vpack.c.bf16 %v19013_v4, %v19015_v11  ;;  %v19017_v38 = vpop.eup %19016  ;;  %v13081_v13 = vsel %vm3942_vm0, %v19015_v11, 0.0  ;;  %v24188_v11 = vld [vmem:[#allocation7 + $0x1e8] ss:$12 sps:$4 sm:$0xff]  }
0x122a   : > { %13070 = vadd.xlane.f32.xlu0 %v13069_v48  ;;  %v13087_v31 = vsel %vm3942_vm0, %v19017_v38, 0.0 }
0x122b   : > { %13079 = vadd.xlane.f32.xlu1 %v13078_v40  ;;  %16868 = vmatprep.mubr.msk.bf16.mxu0 %vm3942_vm0, %v13157_v1 }
0x122c   : > { %v19019_v56 = vpop.eup %19018  ;;  %16883 = vmatpush3.bf16.msra.mxu1 %v13366_v39 }
0x122d   : > { %v13158_v50 = vpack.c.bf16 %v19019_v56, %v19017_v38  ;;  %v13090_v49 = vsel %vm3942_vm0, %v19019_v56, 0.0  ;;  %16964 = vmatprep.subr.bf16.mxu1 %v24188_v11 }
0x122e   : > { %13076 = vadd.xlane.f32.xlu0 %v13075_v22 }
0x122f   : > { %13085 = vadd.xlane.f32.xlu1 %v13084_v62  ;;  %16869 = vmatmul.mubr.msk.bf16.vlgmr.msra.gmra.mrb[128].mxu0 %vm3942_vm0, %v13158_v50 }
0x1230   : > { %v19021_v35 = vpop.eup %19020 }
0x1231   : > { %v13093_v21 = vsel %vm3942_vm0, %v19021_v35, 0.0  ;;  %v19023_v30 = vpop.eup %19022 }
0x1232   : > { %13082 = vadd.xlane.f32.xlu0 %v13081_v13  ;;  %v13099_v55 = vsel %vm3942_vm0, %v19023_v30, 0.0 }
0x1233   : > { %13091 = vadd.xlane.f32.xlu1 %v13090_v49 }
0x1236   : > { %13088 = vadd.xlane.f32.xlu0 %v13087_v31 }
0x123a   : > { %13094 = vadd.xlane.f32.xlu0 %v13093_v21 }
0x123e   : > { %13100 = vadd.xlane.f32.xlu0 %v13099_v55 }
0x1252   : > { %v12912_v25 = vpop.xlane.xlu1 %12911 }
0x1253   : > { %v12976_v32 = vsub.f32 %v24028_v42, %v12912_v25 }
0x1255   : > { %v13023_v6 = vmul.f32 1.442695, %v12976_v32 }
0x1256   : > { %v12906_v60 = vpop.xlane.xlu1 %12905  ;;  %v12939_v33 = vpop.xlane.xlu0 %12938 }
0x1257   : > { %v12974_v54 = vsub.f32 %v24038_v29, %v12906_v60  ;;  %v12985_v47 = vsub.f32 %v24034_v37, %v12939_v33  ;;  %19024 = vpow2.f32 %v13023_v6 }
0x1259   : > { %v13019_v51 = vmul.f32 1.442695, %v12974_v54  ;;  %v13041_v63 = vmul.f32 1.442695, %v12985_v47 }
0x125a   : > { %v12921_v28 = vpop.xlane.xlu0 %12920  ;;  %v12942_v15 = vpop.xlane.xlu1 %12941 }
0x125b   : > { %19026 = vpow2.f32 %v13019_v51  ;;  %v12986_v41 = vsub.f32 %v24046_v9, %v12942_v15  ;;  %v12979_v57 = vsub.f32 %v24050_v20, %v12921_v28 }
0x125c   : > { %19028 = vpow2.f32 %v13041_v63 }
0x125d   : > { %v13043_v58 = vmul.f32 1.442695, %v12986_v41  ;;  %v13029_v37 = vmul.f32 1.442695, %v12979_v57 }
0x125e   : > { %v12915_v59 = vpop.xlane.xlu0 %12914  ;;  %v12918_v42 = vpop.xlane.xlu1 %12917 }
0x125f   : > { %v12977_v8 = vsub.f32 %v24058_v61, %v12915_v59  ;;  %v12978_v29 = vsub.f32 %v24062_v34, %v12918_v42  ;;  %19030 = vpow2.f32 %v13043_v58 }
0x1261   : > { %v13025_v3 = vmul.f32 1.442695, %v12977_v8  ;;  %v13027_v14 = vmul.f32 1.442695, %v12978_v29  ;;  %v19025_v9 = vpop.eup %19024  ;;  %v24221_v8 = vld [vmem:[#allocation7 + $0x218] ss:$12 sps:$4 sm:$0xff]  }
0x1262   : > { %v12924_v23 = vpop.xlane.xlu0 %12923  ;;  %v12933_v26 = vpop.xlane.xlu1 %12932  ;;  %v13160_v48 = vpack.c.bf16 %v19025_v9, %v19023_v30  ;;  %v13102_v56 = vsel %vm3942_vm0, %v19025_v9, 0.0 }
0x1263   : > { %19032 = vpow2.f32 %v13025_v3  ;;  %v12980_v4 = vsub.f32 %v24070_v46, %v12924_v23  ;;  %v12983_v22 = vsub.f32 %v24074_v2, %v12933_v26  ;;  %v24227_v3 = vld [vmem:[#allocation7 + $0x230] ss:$12 sps:$4 sm:$0xff]  }
0x1264   : > { %19034 = vpow2.f32 %v13027_v14 }
0x1265   : > { %v19027_v20 = vpop.eup %19026  ;;  %19036 = vpow2.f32 %v13029_v37  ;;  %v13031_v39 = vmul.f32 1.442695, %v12980_v4  ;;  %v13037_v6 = vmul.f32 1.442695, %v12983_v22  ;;  %v18340_v22 = vld [vmem:[#allocation7 + $0x1e0] ss:$12 sps:$4 sm:$0xff]  }
0x1266   : > { %v12945_v24 = vpop.xlane.xlu0 %12944  ;;  %v12954_v61 = vpop.xlane.xlu1 %12953  ;;  %v13096_v34 = vsel %vm3942_vm0, %v19027_v20, 0.0  ;;  %v13159_v18 = vpack.c.bf16 %v19027_v20, %v19021_v35 }
0x1267   : > { %19038 = vpow2.f32 %v13031_v39  ;;  %13097 = vadd.xlane.f32.xlu1 %v13096_v34  ;;  %v24193_v46 = vpop.eup %19028  ;;  %v12987_v21 = vsub.f32 %v24083_v52, %v12945_v24  ;;  %v12990_v63 = vsub.f32 %v24087_v10, %v12954_v61  ;;  %v18342_v39 = vld [vmem:[#allocation7 + $0x1e4] ss:$12 sps:$4 sm:$0xff]  }
0x1268   : > { %16872 = vmatprep.mubr.msk.bf16.mxu0 %vm3942_vm0, %v13159_v18 }
0x1269   : > { %16873 = vmatmul.mubr.msk.bf16.gmra.mrb[132].mxu0 %vm3942_vm0, %v13160_v48  ;;  %v24196_v1 = vpop.eup %19030  ;;  %v13045_v28 = vmul.f32 1.442695, %v12987_v21  ;;  %v13051_v10 = vmul.f32 1.442695, %v12990_v63 }
0x126a   : > { %v12948_v40 = vpop.xlane.xlu0 %12947  ;;  %v24198_v38 = vpop.xlane.xlu1 %12956  ;;  %v13165_v17 = vpack.c.bf16 %v24196_v1, %v24193_v46 }
0x126b   : > { %13103 = vadd.xlane.f32.xlu1 %v13102_v56  ;;  %v12988_v25 = vsub.f32 %v24096_v27, %v12948_v40  ;;  %v12991_v14 = vsub.f32 %v24100_v0, %v24198_v38  ;;  %v13129_v56 = vsel %vm3942_vm0, %v24193_v46, 0.0 }
0x126c   : > { %16900 = vmatprep.mubr.msk.bf16.mxu0 %vm3942_vm0, %v13165_v17 }
0x126d   : > { %v19033_v50 = vpop.eup %19032  ;;  %v13047_v41 = vmul.f32 1.442695, %v12988_v25  ;;  %v13053_v9 = vmul.f32 1.442695, %v12991_v14 }
0x126e   : > { %v19035_v62 = vpop.eup %19034  ;;  %v12927_v13 = vpop.xlane.xlu0 %12926  ;;  %v13105_v31 = vsel %vm3942_vm0, %v19033_v50, 0.0 }
0x126f   : > { %v12960_v49 = vpop.xlane.xlu1 %12959  ;;  %v19037_v35 = vpop.eup %19036  ;;  %v12981_v30 = vsub.f32 %v24112_v5, %v12927_v13  ;;  %13106 = vadd.xlane.f32.xlu0 %v13105_v31  ;;  %v13108_v55 = vsel %vm3942_vm0, %v19035_v62, 0.0  ;;  %v13161_v32 = vpack.c.bf16 %v19035_v62, %v19033_v50  ;;  %v24213_v5 = vld [vmem:[#allocation7 + $0x200] ss:$12 sps:$4 sm:$0xff]  }
0x1270   : > { %13109 = vadd.xlane.f32.xlu1 %v13108_v55  ;;  %v13111_v51 = vsel %vm3942_vm0, %v19037_v35, 0.0 }
0x1271   : > { %v19039_v2 = vpop.eup %19038  ;;  %v13033_v60 = vmul.f32 1.442695, %v12981_v30  ;;  %16884 = vmatprep.mubr.msk.bf16.mxu1 %vm3942_vm0, %v13161_v32  ;;  %v18348_v30 = vld [vmem:[#allocation7 + $0x214] ss:$12 sps:$4 sm:$0xff]  }
0x1272   : > { %v13162_v33 = vpack.c.bf16 %v19039_v2, %v19037_v35  ;;  %v12951_v54 = vpop.xlane.xlu0 %12950  ;;  %v13114_v52 = vsel %vm3942_vm0, %v19039_v2, 0.0  ;;  %v18343_v35 = vld [vmem:[#allocation7 + $0x1f8] ss:$12 sps:$4 sm:$0xff]   ;;  %v13132_v2 = vsel %vm3942_vm0, %v24196_v1, 0.0 }
0x1273   : > { %v12936_v47 = vpop.xlane.xlu1 %12935  ;;  %19040 = vpow2.f32 %v13033_v60  ;;  %v12989_v27 = vsub.f32 %v24121_v44, %v12951_v54  ;;  %13112 = vadd.xlane.f32.xlu0 %v13111_v51  ;;  %v18352_v60 = vld [vmem:[#allocation7 + $0x22c] ss:$12 sps:$4 sm:$0xff]  }
0x1274   : > { %v12984_v15 = vsub.f32 %v24125_v36, %v12936_v47  ;;  %13115 = vadd.xlane.f32.xlu1 %v13114_v52  ;;  %16885 = vmatmul.mubr.msk.bf16.vlgmr.msra.gmra.mrb[200].mxu1 %vm3942_vm0, %v13162_v33  ;;  %19042 = vpow2.f32 %v13037_v6  ;;  %v12992_v36 = vsub.f32 %v24108_v7, %v12960_v49  ;;  %v18345_v49 = vld [vmem:[#allocation7 + $0x1fc] ss:$12 sps:$4 sm:$0xff]  }
0x1275   : > { %v13049_v57 = vmul.f32 1.442695, %v12989_v27  ;;  %16968 = vmatpush3.bf16.msra.mxu1 %v24188_v11  ;;  %19044 = vpow2.f32 %v13045_v28  ;;  %v18346_v6 = vld [vmem:[#allocation7 + $0x210] ss:$12 sps:$4 sm:$0xff]   ;;  %v18350_v47 = vld [vmem:[#allocation7 + $0x228] ss:$12 sps:$4 sm:$0xff]  }
0x1276   : > { %v13039_v58 = vmul.f32 1.442695, %v12984_v15  ;;  %v13453_v59 = vpop.permute.xlu0 %13452  ;;  %16965 = vmatprep.subr.bf16.mxu1 %v24213_v5  ;;  %19046 = vpow2.f32 %v13047_v41  ;;  %v13055_v7 = vmul.f32 1.442695, %v12992_v36 }
0x1277   : > { %v12930_v42 = vpop.xlane.xlu1 %12929  ;;  %16892 = vmatprep.subr.bf16.mxu0 %v13453_v59  ;;  %19048 = vpow2.f32 %v13049_v57 }
0x1278   : > { %v12982_v44 = vsub.f32 %v24133_v16, %v12930_v42  ;;  %16893 = vmatpush3.bf16.msra.mxu0 %v13453_v59  ;;  %19050 = vpow2.f32 %v13039_v58 }
0x1279   : > { %16969 = vmatpush3.bf16.msra.mxu1 %v24213_v5 }
0x127a   : > { %v13035_v29 = vmul.f32 1.442695, %v12982_v44  ;;  %16966 = vmatprep.subr.bf16.mxu1 %v24221_v8  ;;  %v13457_v16 = vpop.permute.xlu0 %13456 }
0x127b   : > { %v13455_v37 = vpop.permute.xlu1 %13454 }
0x127c   : > { %19052 = vpow2.f32 %v13035_v29  ;;  %16894 = vmatprep.subr.bf16.mxu0 %v13455_v37 }
0x127d   : > { %19054 = vpow2.f32 %v13051_v10  ;;  %16895 = vmatpush3.bf16.msra.mxu0 %v13455_v37  ;;  %v19041_v23 = vpop.eup %19040  ;;  %16970 = vmatpush3.bf16.msra.mxu1 %v24221_v8 }
0x127e   : > { %16896 = vmatprep.subr.bf16.mxu0 %v13457_v16  ;;  %v13117_v26 = vsel %vm3942_vm0, %v19041_v23, 0.0  ;;  %16967 = vmatprep.subr.bf16.mxu1 %v24227_v3  ;;  %v19043_v4 = vpop.eup %19042  ;;  %19056 = vpow2.f32 %v13055_v7 }
0x127f   : > { %13118 = vadd.xlane.f32.xlu0 %v13117_v26  ;;  %v13459_v20 = vpop.permute.xlu1 %13458  ;;  %v19045_v0 = vpop.eup %19044  ;;  %v13123_v61 = vsel %vm3942_vm0, %v19043_v4, 0.0  ;;  %19058 = vpow2.f32 %v13053_v9 }
0x1280   : > { %v19047_v24 = vpop.eup %19046  ;;  %v13135_v31 = vsel %vm3942_vm0, %v19045_v0, 0.0 }
0x1281   : > { %16897 = vmatpush3.bf16.msra.mxu0 %v13457_v16  ;;  %16971 = vmatpush3.bf16.msra.mxu1 %v24227_v3  ;;  %v19049_v34 = vpop.eup %19048  ;;  %v13166_v38 = vpack.c.bf16 %v19047_v24, %v19045_v0  ;;  %v13138_v54 = vsel %vm3942_vm0, %v19047_v24, 0.0 }
0x1282   : > { %16898 = vmatprep.subr.bf16.mxu0 %v13459_v20  ;;  %v19051_v18 = vpop.eup %19050  ;;  %v13141_v32 = vsel %vm3942_vm0, %v19049_v34, 0.0 }
0x1283   : > { %13124 = vadd.xlane.f32.xlu0 %v13123_v61  ;;  %v13164_v62 = vpack.c.bf16 %v19051_v18, %v19043_v4  ;;  %v13126_v46 = vsel %vm3942_vm0, %v19051_v18, 0.0 }
0x1285   : > { %16899 = vmatpush3.bf16.msra.mxu0 %v13459_v20 }
0x1286   : > { %v19053_v48 = vpop.eup %19052  ;;  %13750 = vmatprep.subr.bf16.mxu0 %v18342_v39 }
0x1287   : > { %v19055_v40 = vpop.eup %19054  ;;  %v13120_v17 = vsel %vm3942_vm0, %v19053_v48, 0.0  ;;  %v13163_v50 = vpack.c.bf16 %v19053_v48, %v19041_v23  ;;  %13130 = vadd.xlane.f32.xlu0 %v13129_v56 }
0x1288   : > { %13121 = vadd.xlane.f32.xlu1 %v13120_v17  ;;  %v13167_v13 = vpack.c.bf16 %v19055_v40, %v19049_v34  ;;  %16901 = vmatmul.mubr.msk.bf16.vlgmr.msra.gmra.mrb[136].mxu0 %vm3942_vm0, %v13166_v38  ;;  %v19057_v21 = vpop.eup %19056  ;;  %v13144_v1 = vsel %vm3942_vm0, %v19055_v40, 0.0 }
0x1289   : > { %16888 = vmatprep.mubr.msk.bf16.mxu1 %vm3942_vm0, %v13163_v50  ;;  %13751 = vmatpush1.bf16.msra.mxu0 %v18340_v22  ;;  %v19059_v55 = vpop.eup %19058  ;;  %v13150_v51 = vsel %vm3942_vm0, %v19057_v21, 0.0 }
0x128a   : > { %16904 = vmatprep.mubr.msk.bf16.mxu0 %vm3942_vm0, %v13167_v13  ;;  %16889 = vmatmul.mubr.msk.bf16.gmra.mrb[204].mxu1 %vm3942_vm0, %v13164_v62  ;;  %v13168_v25 = vpack.c.bf16 %v19057_v21, %v19059_v55  ;;  %v13147_v33 = vsel %vm3942_vm0, %v19059_v55, 0.0 }
0x128b   : > { %13136 = vadd.xlane.f32.xlu0 %v13135_v31  ;;  %13752 = vmatprep.subr.bf16.mxu0 %v18345_v49 }
0x128c   : > { %13127 = vadd.xlane.f32.xlu1 %v13126_v46 }
0x128d   : > { %13753 = vmatpush1.bf16.msra.mxu0 %v18343_v35 }
0x128e   : > { %13754 = vmatprep.subr.bf16.mxu0 %v18348_v30 }
0x128f   : > { %13142 = vadd.xlane.f32.xlu0 %v13141_v32 }
0x1290   : > { %13133 = vadd.xlane.f32.xlu1 %v13132_v2  ;;  %16905 = vmatmul.mubr.msk.bf16.gmra.mrb[140].mxu0 %vm3942_vm0, %v13168_v25 }
0x1291   : > { %13782 = vmatprep.mubr.bf16.mxu0 %v25184_v53  ;;  %13755 = vmatpush1.bf16.msra.mxu0 %v18346_v6 }
0x1292   : > { %13756 = vmatprep.subr.bf16.mxu0 %v18352_v60 }
0x1293   : > { %13148 = vadd.xlane.f32.xlu0 %v13147_v33 }
0x1294   : > { %13139 = vadd.xlane.f32.xlu1 %v13138_v54 }
0x1295   : > { %13757 = vmatpush1.bf16.msra.mxu0 %v18350_v47 }
0x1296   : > { %16908 = vmatprep.subr.bf16.mxu0 %v24188_v11 }
0x1298   : > { %13145 = vadd.xlane.f32.xlu1 %v13144_v1 }
0x129c   : > { %13151 = vadd.xlane.f32.xlu1 %v13150_v51 }
0x12ab   : > { %v13059_v52 = vpop.xlane.xlu0 %13058 }
0x12ac   : > { %19060 = vrcp.f32 %v13059_v52 }
0x12af   : > { %v13065_v28 = vpop.xlane.xlu0 %13064  ;;  %v13062_v27 = vpop.xlane.xlu1 %13061 }
0x12b0   : > { %19062 = vrcp.f32 %v13065_v28 }
0x12b3   : > { %v13068_v15 = vpop.xlane.xlu0 %13067 }
0x12b4   : > { %v13074_v63 = vpop.xlane.xlu1 %13073  ;;  %19064 = vrcp.f32 %v13068_v15 }
0x12b5   : > { %19066 = vrcp.f32 %v13062_v27 }
0x12b6   : > { %19068 = vrcp.f32 %v13074_v63  ;;  %v19061_v59 = vpop.eup %19060 }
0x12b7   : > { %v13071_v41 = vpop.xlane.xlu0 %13070 }
0x12b8   : > { %v13080_v57 = vpop.xlane.xlu1 %13079 }
0x12b9   : > { %19070 = vrcp.f32 %v13080_v57 }
0x12ba   : > { %v19063_v44 = vpop.eup %19062 }
0x12bb   : > { %v13077_v58 = vpop.xlane.xlu0 %13076 }
0x12bc   : > { %19072 = vrcp.f32 %v13077_v58  ;;  %v13086_v50 = vpop.xlane.xlu1 %13085 }
0x12bd   : > { %19074 = vrcp.f32 %v13071_v41 }
0x12be   : > { %v19065_v36 = vpop.eup %19064  ;;  %19076 = vrcp.f32 %v13086_v50 }
0x12bf   : > { %v19067_v37 = vpop.eup %19066  ;;  %v13083_v62 = vpop.xlane.xlu0 %13082 }
0x12c0   : > { %v19069_v20 = vpop.eup %19068 }
0x12c3   : > { %v19071_v39 = vpop.eup %19070  ;;  %v13089_v13 = vpop.xlane.xlu0 %13088 }
0x12c6   : > { %v19073_v61 = vpop.eup %19072 }
0x12c7   : > { %v19075_v18 = vpop.eup %19074  ;;  %v13095_v54 = vpop.xlane.xlu0 %13094 }
0x12c8   : > { %v19077_v49 = vpop.eup %19076 }
0x12cb   : > { %v13101_v1 = vpop.xlane.xlu0 %13100 }
0x12e2   : > { %v16854_v42 = vpop.f32.mrb[192].mxu1 }
0x12e3   : > { %v13231_v10 = vpop.f32.mrb[193].mxu1  ;;  %v13575_v14 = vmul.f32 %v19063_v44, %v16854_v42 }
0x12e4   : > { %v16855_v29 = vpop.f32.mrb[194].mxu1  ;;  %v13573_v7 = vmul.f32 %v19061_v59, %v13231_v10 }
0x12e5   : > { %v13576_v16 = vmul.f32 %v19065_v36, %v16855_v29  ;;  %v13234_v23 = vpop.f32.mrb[195].mxu1 }
0x12e6   : > { %v13574_v26 = vmul.f32 %v19067_v37, %v13234_v23 }
0x12e7   : > { %v24255_v4 = vpack.c.bf16 %v13576_v16, %v13575_v14 }
0x12e8   : > { %v24257_v9 = vpack.c.bf16 %v13574_v26, %v13573_v7 }
0x12ea   : > { %15215 = vmatmul.mubr.msk.bf16.vlgmr.msra.gmra.mrb[248].mxu0 %vm3942_vm0, %v24257_v9 }
0x12eb   : > { %v16858_v0 = vpop.f32.mrb[196].mxu1  ;;  %13792 = vmatprep.mubr.bf16.mxu0 %v25184_v53  ;;  %16909 = vmatpush3.bf16.msra.mxu0 %v24188_v11 }
0x12ec   : > { %v13247_v24 = vpop.f32.mrb[197].mxu1  ;;  %16910 = vmatprep.subr.bf16.mxu0 %v24213_v5  ;;  %v13579_v48 = vmul.f32 %v19073_v61, %v16858_v0 }
0x12ed   : > { %v16859_v34 = vpop.f32.mrb[198].mxu1  ;;  %v13577_v56 = vmul.f32 %v19075_v18, %v13247_v24 }
0x12ee   : > { %v13580_v40 = vmul.f32 %v19071_v39, %v16859_v34  ;;  %v13250_v38 = vpop.f32.mrb[199].mxu1 }
0x12ef   : > { %v13578_v17 = vmul.f32 %v19069_v20, %v13250_v38  ;;  %16911 = vmatpush3.bf16.msra.mxu0 %v24213_v5  ;;  %v13092_v5 = vpop.xlane.xlu1 %13091 }
0x12f0   : > { %v13608_v22 = vpack.c.bf16 %v13580_v40, %v13579_v48  ;;  %16912 = vmatprep.subr.bf16.mxu0 %v24221_v8  ;;  %19078 = vrcp.f32 %v13092_v5 }
0x12f1   : > { %v13607_v11 = vpack.c.bf16 %v13578_v17, %v13577_v56  ;;  %19080 = vrcp.f32 %v13089_v13 }
0x12f2   : > { %15216 = vmatmul.mubr.msk.bf16.gmra.mrb[252].mxu0 %vm3942_vm0, %v24255_v4  ;;  %19082 = vrcp.f32 %v13083_v62 }
0x12f3   : > { %16920 = vmatprep.mubr.msk.bf16.mxu1 %vm3942_vm0, %v13607_v11  ;;  %13802 = vmatprep.mubr.bf16.mxu0 %v25184_v53  ;;  %19084 = vrcp.f32 %v13095_v54 }
0x12f4   : > { %16921 = vmatmul.mubr.msk.bf16.vlgmr.msra.gmra.mrb[12].mxu1 %vm3942_vm0, %v13608_v22  ;;  %16913 = vmatpush3.bf16.msra.mxu0 %v24221_v8  ;;  %v13098_v33 = vpop.xlane.xlu1 %13097  ;;  %19086 = vrcp.f32 %v13101_v1 }
0x12f5   : > { %16914 = vmatprep.subr.bf16.mxu0 %v24227_v3 }
0x12f8   : > { %16915 = vmatpush3.bf16.msra.mxu0 %v24227_v3  ;;  %v13104_v47 = vpop.xlane.xlu1 %13103 }
0x12f9   : > { %19088 = vrcp.f32 %v13104_v47 }
0x12fa   : > { %15217 = vmatmul.mubr.msk.bf16.gmra.mrb[0].mxu0 %vm3942_vm0, %v13607_v11  ;;  %v19079_v46 = vpop.eup %19078  ;;  %19090 = vrcp.f32 %v13098_v33 }
0x12fb   : > { %13812 = vmatprep.mubr.bf16.mxu0 %v25184_v53  ;;  %v19081_v35 = vpop.eup %19080 }
0x12fc   : > { %v19083_v30 = vpop.eup %19082  ;;  %v13107_v51 = vpop.xlane.xlu0 %13106 }
0x12fd   : > { %v13110_v52 = vpop.xlane.xlu1 %13109  ;;  %v19085_v41 = vpop.eup %19084  ;;  %19092 = vrcp.f32 %v13107_v51 }
0x12fe   : > { %v19087_v58 = vpop.eup %19086 }
0x1300   : > { %v13113_v28 = vpop.xlane.xlu0 %13112 }
0x1301   : > { %v13116_v27 = vpop.xlane.xlu1 %13115  ;;  %19094 = vrcp.f32 %v13113_v28 }
0x1302   : > { %v16870_v31 = vpop.f32.mrb[128].mxu0  ;;  %15218 = vmatmul.mubr.msk.bf16.gmra.mrb[4].mxu0 %vm3942_vm0, %v13608_v22  ;;  %19096 = vrcp.f32 %v13116_v27 }
0x1303   : > { %v13324_v8 = vpop.f32.mrb[129].mxu0  ;;  %13822 = vmatprep.mubr.bf16.mxu0 %v25184_v53  ;;  %v13583_v55 = vmul.f32 %v19081_v35, %v16870_v31  ;;  %v19089_v42 = vpop.eup %19088  ;;  %19098 = vrcp.f32 %v13110_v52 }
0x1304   : > { %v16871_v21 = vpop.f32.mrb[130].mxu0  ;;  %v13581_v32 = vmul.f32 %v19083_v30, %v13324_v8  ;;  %v19091_v10 = vpop.eup %19090 }
0x1305   : > { %v13584_v3 = vmul.f32 %v19079_v46, %v16871_v21  ;;  %v13327_v25 = vpop.f32.mrb[131].mxu0 }
0x1306   : > { %v13582_v2 = vmul.f32 %v19077_v49, %v13327_v25 }
0x1307   : > { %v13610_v6 = vpack.c.bf16 %v13584_v3, %v13583_v55  ;;  %v19093_v24 = vpop.eup %19092 }
0x1308   : > { %v13609_v60 = vpack.c.bf16 %v13582_v2, %v13581_v32 }
0x130a   : > { %16924 = vmatprep.mubr.msk.bf16.mxu1 %vm3942_vm0, %v13609_v60  ;;  %15219 = vmatmul.mubr.msk.bf16.gmra.mrb[8].mxu0 %vm3942_vm0, %v13609_v60 }
0x130b   : > { %16925 = vmatmul.mubr.msk.bf16.gmra.mrb[16].mxu1 %vm3942_vm0, %v13610_v6  ;;  %13832 = vmatprep.mubr.bf16.mxu0 %v25184_v53  ;;  %v19095_v34 = vpop.eup %19094 }
0x130c   : > { %v13119_v15 = vpop.xlane.xlu0 %13118  ;;  %v19097_v48 = vpop.eup %19096 }
0x130d   : > { %v19099_v38 = vpop.eup %19098  ;;  %19100 = vrcp.f32 %v13119_v15 }
0x1310   : > { %v13125_v36 = vpop.xlane.xlu0 %13124 }
0x1311   : > { %19102 = vrcp.f32 %v13125_v36 }
0x1312   : > { %15220 = vmatmul.mubr.msk.bf16.gmra.mrb[12].mxu0 %vm3942_vm0, %v13610_v6 }
0x1313   : > { %13842 = vmatprep.mubr.bf16.mxu0 %v25184_v53 }
0x1314   : > { %v13131_v0 = vpop.xlane.xlu0 %13130 }
0x1315   : > { %v13122_v63 = vpop.xlane.xlu1 %13121  ;;  %19104 = vrcp.f32 %v13131_v0 }
0x1317   : > { %v19101_v35 = vpop.eup %19100 }
0x1318   : > { %v13137_v22 = vpop.xlane.xlu0 %13136 }
0x1319   : > { %v13128_v16 = vpop.xlane.xlu1 %13127  ;;  %19106 = vrcp.f32 %v13137_v22 }
0x131a   : > { %19108 = vrcp.f32 %v13128_v16 }
0x131b   : > { %v19103_v30 = vpop.eup %19102 }
0x131c   : > { %v13143_v31 = vpop.xlane.xlu0 %13142 }
0x131d   : > { %v13134_v39 = vpop.xlane.xlu1 %13133 }
0x131f   : > { %v19105_v55 = vpop.eup %19104 }
0x1320   : > { %v13149_v8 = vpop.xlane.xlu0 %13148 }
0x1321   : > { %v13140_v5 = vpop.xlane.xlu1 %13139 }
0x1322   : > { %19110 = vrcp.f32 %v13140_v5 }
0x1323   : > { %19112 = vrcp.f32 %v13134_v39  ;;  %v19107_v3 = vpop.eup %19106 }
0x1324   : > { %19114 = vrcp.f32 %v13122_v63  ;;  %v19109_v32 = vpop.eup %19108 }
0x1325   : > { %v13146_v46 = vpop.xlane.xlu1 %13145  ;;  %19116 = vrcp.f32 %v13143_v31 }
0x1326   : > { %19118 = vrcp.f32 %v13149_v8 }
0x1329   : > { %v13152_v21 = vpop.xlane.xlu1 %13151 }
0x132a   : > { %19120 = vrcp.f32 %v13152_v21 }
0x132b   : > { %19122 = vrcp.f32 %v13146_v46 }
0x132c   : > { %v19111_v60 = vpop.eup %19110 }
0x132d   : > { %v19113_v47 = vpop.eup %19112 }
0x132e   : > { %v19115_v27 = vpop.eup %19114 }
0x133c   : > { %v16874_v57 = vpop.f32.mrb[132].mxu0 }
0x133d   : > { %v13340_v59 = vpop.f32.mrb[133].mxu0  ;;  %v13587_v29 = vmul.f32 %v19087_v58, %v16874_v57 }
0x133e   : > { %v16875_v44 = vpop.f32.mrb[134].mxu0  ;;  %v13585_v23 = vmul.f32 %v19085_v41, %v13340_v59 }
0x133f   : > { %v13588_v37 = vmul.f32 %v19089_v42, %v16875_v44  ;;  %v13343_v14 = vpop.f32.mrb[135].mxu0 }
0x1340   : > { %v13586_v7 = vmul.f32 %v19091_v10, %v13343_v14 }
0x1341   : > { %v13612_v26 = vpack.c.bf16 %v13588_v37, %v13587_v29  ;;  %v19117_v37 = vpop.eup %19116 }
0x1342   : > { %v13611_v20 = vpack.c.bf16 %v13586_v7, %v13585_v23  ;;  %v19119_v16 = vpop.eup %19118 }
0x1343   : > { %v19121_v7 = vpop.eup %19120 }
0x1344   : > { %15221 = vmatmul.mubr.msk.bf16.gmra.mrb[16].mxu0 %vm3942_vm0, %v13611_v20  ;;  %16928 = vmatprep.mubr.msk.bf16.mxu1 %vm3942_vm0, %v13611_v20  ;;  %v19123_v20 = vpop.eup %19122 }
0x1345   : > { %16929 = vmatmul.mubr.msk.bf16.gmra.mrb[20].mxu1 %vm3942_vm0, %v13612_v26  ;;  %13852 = vmatprep.mubr.bf16.mxu0 %v25184_v53 }
0x1347   : > { %v16886_v61 = vpop.f32.mrb[200].mxu1 }
0x1348   : > { %v13417_v18 = vpop.f32.mrb[201].mxu1  ;;  %v13591_v56 = vmul.f32 %v19095_v34, %v16886_v61 }
0x1349   : > { %v16887_v40 = vpop.f32.mrb[202].mxu1  ;;  %v13589_v62 = vmul.f32 %v19093_v24, %v13417_v18 }
0x134a   : > { %v13592_v17 = vmul.f32 %v19097_v48, %v16887_v40  ;;  %v13420_v50 = vpop.f32.mrb[203].mxu1  ;;  %v25405_v40 = vld [vmem:[#allocation117_spill] sm:$0xff] }
0x134b   : > { %v13590_v11 = vmul.f32 %v19099_v38, %v13420_v50  ;;  %v14204_v38 = vsub.s32 0, %v25405_v40  ;;  %v14212_v5 = vsub.s32 2, %v25405_v40 }
0x134c   : > { %v13614_v13 = vpack.c.bf16 %v13592_v17, %v13591_v56  ;;  %15222 = vmatmul.mubr.msk.bf16.gmra.mrb[20].mxu0 %vm3942_vm0, %v13612_v26  ;;  %v14200_v56 = vld [vmem:[%s24582_s3] sm:$0x7]  ;;  %v14208_v17 = vsub.s32 1, %v25405_v40 }
0x134d   : > { %v13613_v49 = vpack.c.bf16 %v13590_v11, %v13589_v62  ;;  %13862 = vmatprep.mubr.bf16.mxu0 %v25184_v53  ;;  %v24323_v50 = vrot.slane %v14200_v56, %v14204_v38  ;;  %v24338_v46 = vrot.slane %v14200_v56, %v14212_v5 }
0x134f   : > { %16932 = vmatprep.mubr.msk.bf16.mxu1 %vm3942_vm0, %v13613_v49 }
0x1350   : > { %16933 = vmatmul.mubr.msk.bf16.gmra.mrb[24].mxu1 %vm3942_vm0, %v13614_v13 }
0x1354   : > { %15223 = vmatmul.mubr.msk.bf16.gmra.mrb[24].mxu0 %vm3942_vm0, %v13613_v49 }
0x1355   : > { %13872 = vmatprep.mubr.bf16.mxu0 %v25184_v53 }
0x135b   : > { %v16902_v25 = vpop.f32.mrb[136].mxu0 }
0x135c   : > { %v13510_v2 = vpop.f32.mrb[137].mxu0  ;;  %15224 = vmatmul.mubr.msk.bf16.gmra.mrb[32].mxu0 %vm3942_vm0, %v13614_v13  ;;  %v13599_v1 = vmul.f32 %v19107_v3, %v16902_v25 }
0x135d   : > { %v16890_v6 = vpop.f32.mrb[204].mxu1  ;;  %v16903_v33 = vpop.f32.mrb[138].mxu0  ;;  %13882 = vmatprep.mubr.bf16.mxu0 %v25184_v53  ;;  %v13597_v15 = vmul.f32 %v19105_v55, %v13510_v2 }
0x135e   : > { %v13433_v54 = vpop.f32.mrb[205].mxu1  ;;  %v13600_v51 = vmul.f32 %v19111_v60, %v16903_v33  ;;  %v13513_v52 = vpop.f32.mrb[139].mxu0  ;;  %v13595_v63 = vmul.f32 %v19103_v30, %v16890_v6 }
0x135f   : > { %v16891_v28 = vpop.f32.mrb[206].mxu1  ;;  %v13598_v41 = vmul.f32 %v19113_v47, %v13513_v52  ;;  %v13593_v42 = vmul.f32 %v19101_v35, %v13433_v54 }
0x1360   : > { %v13596_v57 = vmul.f32 %v19109_v32, %v16891_v28  ;;  %v13436_v58 = vpop.f32.mrb[207].mxu1  ;;  %v13618_v59 = vpack.c.bf16 %v13600_v51, %v13599_v1 }
0x1361   : > { %v13594_v44 = vmul.f32 %v19115_v27, %v13436_v58  ;;  %v13617_v10 = vpack.c.bf16 %v13598_v41, %v13597_v15 }
0x1362   : > { %v13616_v36 = vpack.c.bf16 %v13596_v57, %v13595_v63 }
0x1363   : > { %v13615_v29 = vpack.c.bf16 %v13594_v44, %v13593_v42  ;;  %v16906_v14 = vpop.f32.mrb[140].mxu0 }
0x1364   : > { %v13526_v23 = vpop.f32.mrb[141].mxu0  ;;  %v13603_v0 = vmul.f32 %v19119_v16, %v16906_v14 }
0x1365   : > { %15225 = vmatmul.mubr.msk.bf16.gmra.mrb[28].mxu0 %vm3942_vm0, %v13615_v29  ;;  %16936 = vmatprep.mubr.msk.bf16.mxu1 %vm3942_vm0, %v13615_v29  ;;  %v16907_v26 = vpop.f32.mrb[142].mxu0  ;;  %v13601_v61 = vmul.f32 %v19117_v37, %v13526_v23 }
0x1366   : > { %16937 = vmatmul.mubr.msk.bf16.gmra.mrb[28].mxu1 %vm3942_vm0, %v13616_v36  ;;  %13892 = vmatprep.mubr.bf16.mxu0 %v25184_v53  ;;  %v13604_v39 = vmul.f32 %v19121_v7, %v16907_v26  ;;  %v13529_v24 = vpop.f32.mrb[143].mxu0 }
0x1367   : > { %16940 = vmatprep.mubr.msk.bf16.mxu1 %vm3942_vm0, %v13617_v10  ;;  %v13602_v34 = vmul.f32 %v19123_v20, %v13529_v24 }
0x1368   : > { %v13620_v18 = vpack.c.bf16 %v13604_v39, %v13603_v0 }
0x1369   : > { %v13619_v48 = vpack.c.bf16 %v13602_v34, %v13601_v61 }
0x136d   : > { %15226 = vmatmul.mubr.msk.bf16.gmra.mrb[36].mxu0 %vm3942_vm0, %v13616_v36 }
0x136e   : > { %16941 = vmatmul.mubr.msk.bf16.gmra.mrb[32].mxu1 %vm3942_vm0, %v13618_v59  ;;  %13902 = vmatprep.mubr.bf16.mxu0 %v25184_v53 }
0x136f   : > { %16944 = vmatprep.mubr.msk.bf16.mxu1 %vm3942_vm0, %v13619_v48 }
0x1375   : > { %15227 = vmatmul.mubr.msk.bf16.gmra.mrb[40].mxu0 %vm3942_vm0, %v13617_v10 }
0x1376   : > { %16945 = vmatmul.mubr.msk.bf16.gmra.mrb[36].mxu1 %vm3942_vm0, %v13620_v18  ;;  %13912 = vmatprep.mubr.bf16.mxu0 %v25184_v53 }
0x137d   : > { %15228 = vmatmul.mubr.msk.bf16.gmra.mrb[44].mxu0 %vm3942_vm0, %v13618_v59 }
0x137e   : > { %13922 = vmatprep.mubr.bf16.mxu0 %v25184_v53 }
0x1385   : > { %15229 = vmatmul.mubr.msk.bf16.gmra.mrb[48].mxu0 %vm3942_vm0, %v13619_v48 }
0x1386   : > { %13932 = vmatprep.mubr.bf16.mxu0 %v25184_v53  ;;  %v24325_v53 = vrot.slane %v14200_v56, %v14208_v17 }
0x138d   : > { %15230 = vmatmul.mubr.msk.bf16.gmra.mrb[52].mxu0 %vm3942_vm0, %v13620_v18 }
0x138e   : > { %16916 = vmatprep.mubr.msk.bf16.mxu0 %vm3942_vm0, %v24257_v9 }
0x1395   : > { %16917 = vmatmul.mubr.msk.bf16.vlgmr.msra.gmra.mrb[144].mxu0 %vm3942_vm0, %v24255_v4 }
0x13bd   : > { %v13784_v22 = vpop.f32.mrb[248].mxu0 }
0x13be   : > { %v14217_v62 = vadd.f32 %v24323_v50, %v13784_v22  ;;  %v13786_v9 = vpop.f32.mrb[249].mxu0 }
0x13bf   : > { %v14218_v11 = vadd.f32 %v24325_v53, %v13786_v9  ;;  %v13788_v4 = vpop.f32.mrb[250].mxu0 }
0x13c0   : > { %14313 = vst [vmem:[%s24330_s27] sm:$0xff] %v14217_v62  ;;  %v14220_v13 = vadd.f32 %v24323_v50, %v13788_v4  ;;  %v13790_v49 = vpop.f32.mrb[251].mxu0 }
0x13c1   : > { %14314 = vst [vmem:[%s24330_s27 + $0x8] sm:$0xff] %v14218_v11  ;;  %v14221_v31 = vadd.f32 %v24325_v53, %v13790_v49 }
0x13c2   : > { %14316 = vst [vmem:[%s24330_s27 + $0x18] sm:$0xff] %v14220_v13 }
0x13c3   : > { %14317 = vst [vmem:[%s24330_s27 + $0x20] sm:$0xff] %v14221_v31 }
0x13c5   : > { %v13794_v8 = vpop.f32.mrb[252].mxu0 }
0x13c6   : > { %v14223_v35 = vadd.f32 %v24323_v50, %v13794_v8  ;;  %v13796_v21 = vpop.f32.mrb[253].mxu0 }
0x13c7   : > { %v14224_v30 = vadd.f32 %v24325_v53, %v13796_v21  ;;  %v13798_v55 = vpop.f32.mrb[254].mxu0  ;;  %v16922_v3 = vpop.f32.mrb[12].mxu1 }
0x13c8   : > { %14319 = vst [vmem:[%s24330_s27 + $0x30] sm:$0xff] %v14223_v35  ;;  %v14226_v25 = vadd.f32 %v24323_v50, %v13798_v55  ;;  %v14237_v32 = vadd.f32 %v16922_v3, %v24338_v46  ;;  %v13800_v2 = vpop.f32.mrb[255].mxu0  ;;  %v13993_v6 = vpop.f32.mrb[13].mxu1 }
0x13c9   : > { %14320 = vst [vmem:[%s24330_s27 + $0x38] sm:$0xff] %v14224_v30  ;;  %v14227_v60 = vadd.f32 %v24325_v53, %v13800_v2  ;;  %v14231_v33 = vadd.f32 %v24338_v46, %v13993_v6  ;;  %v16923_v54 = vpop.f32.mrb[14].mxu1 }
0x13ca   : > { %14322 = vst [vmem:[%s24330_s27 + $0x48] sm:$0xff] %v14226_v25  ;;  %14333 = vst [vmem:[%s24330_s27 + $0xa0] sm:$0xff] %v14237_v32  ;;  %v14240_v47 = vadd.f32 %v16923_v54, %v24338_v46  ;;  %v13996_v1 = vpop.f32.mrb[15].mxu1 }
0x13cb   : > { %14323 = vst [vmem:[%s24330_s27 + $0x50] sm:$0xff] %v14227_v60  ;;  %14327 = vst [vmem:[%s24330_s27 + $0x70] sm:$0xff] %v14231_v33  ;;  %v14234_v51 = vadd.f32 %v24338_v46, %v13996_v1 }
0x13cc   : > { %14336 = vst [vmem:[%s24330_s27 + $0xb8] sm:$0xff] %v14240_v47 }
0x13cd   : > { %14330 = vst [vmem:[%s24330_s27 + $0x88] sm:$0xff] %v14234_v51  ;;  %v13804_v52 = vpop.f32.mrb[0].mxu0 }
0x13ce   : > { %v14229_v28 = vadd.f32 %v24323_v50, %v13804_v52  ;;  %v13806_v27 = vpop.f32.mrb[1].mxu0 }
0x13cf   : > { %v14230_v15 = vadd.f32 %v24325_v53, %v13806_v27  ;;  %v13808_v63 = vpop.f32.mrb[2].mxu0 }
0x13d0   : > { %14325 = vst [vmem:[%s24330_s27 + $0x60] sm:$0xff] %v14229_v28  ;;  %v14232_v41 = vadd.f32 %v24323_v50, %v13808_v63  ;;  %v13810_v57 = vpop.f32.mrb[3].mxu0 }
0x13d1   : > { %14326 = vst [vmem:[%s24330_s27 + $0x68] sm:$0xff] %v14230_v15  ;;  %v14233_v58 = vadd.f32 %v24325_v53, %v13810_v57 }
0x13d2   : > { %14328 = vst [vmem:[%s24330_s27 + $0x78] sm:$0xff] %v14232_v41 }
0x13d3   : > { %14329 = vst [vmem:[%s24330_s27 + $0x80] sm:$0xff] %v14233_v58 }
0x13d5   : > { %v13814_v59 = vpop.f32.mrb[4].mxu0 }
0x13d6   : > { %v14235_v42 = vadd.f32 %v24323_v50, %v13814_v59  ;;  %v13816_v44 = vpop.f32.mrb[5].mxu0 }
0x13d7   : > { %v14236_v10 = vadd.f32 %v24325_v53, %v13816_v44  ;;  %v13818_v36 = vpop.f32.mrb[6].mxu0 }
0x13d8   : > { %14331 = vst [vmem:[%s24330_s27 + $0x90] sm:$0xff] %v14235_v42  ;;  %v14238_v29 = vadd.f32 %v24323_v50, %v13818_v36  ;;  %v13820_v37 = vpop.f32.mrb[7].mxu0 }
0x13d9   : > { %14332 = vst [vmem:[%s24330_s27 + $0x98] sm:$0xff] %v14236_v10  ;;  %v14239_v14 = vadd.f32 %v24325_v53, %v13820_v37 }
0x13da   : > { %14334 = vst [vmem:[%s24330_s27 + $0xa8] sm:$0xff] %v14238_v29 }
0x13db   : > { %14335 = vst [vmem:[%s24330_s27 + $0xb0] sm:$0xff] %v14239_v14 }
0x13dd   : > { %v13824_v16 = vpop.f32.mrb[8].mxu0 }
0x13de   : > { %v14241_v23 = vadd.f32 %v24323_v50, %v13824_v16  ;;  %v16926_v7 = vpop.f32.mrb[16].mxu1  ;;  %v13826_v26 = vpop.f32.mrb[9].mxu0 }
0x13df   : > { %v14249_v20 = vadd.f32 %v16926_v7, %v24338_v46  ;;  %v14242_v0 = vadd.f32 %v24325_v53, %v13826_v26  ;;  %v14009_v39 = vpop.f32.mrb[17].mxu1  ;;  %v13828_v24 = vpop.f32.mrb[10].mxu0 }
0x13e0   : > { %14337 = vst [vmem:[%s24330_s27 + $0xc0] sm:$0xff] %v14241_v23  ;;  %v14243_v61 = vadd.f32 %v24338_v46, %v14009_v39  ;;  %v14244_v34 = vadd.f32 %v24323_v50, %v13828_v24  ;;  %v16927_v18 = vpop.f32.mrb[18].mxu1  ;;  %v13830_v48 = vpop.f32.mrb[11].mxu0 }
0x13e1   : > { %14345 = vst [vmem:[%s24330_s27 + $0x100] sm:$0xff] %v14249_v20  ;;  %14338 = vst [vmem:[%s24330_s27 + $0xc8] sm:$0xff] %v14242_v0  ;;  %v14252_v40 = vadd.f32 %v16927_v18, %v24338_v46  ;;  %v14245_v38 = vadd.f32 %v24325_v53, %v13830_v48  ;;  %v14012_v56 = vpop.f32.mrb[19].mxu1 }
0x13e2   : > { %14339 = vst [vmem:[%s24330_s27 + $0xd0] sm:$0xff] %v14243_v61  ;;  %14340 = vst [vmem:[%s24330_s27 + $0xd8] sm:$0xff] %v14244_v34  ;;  %v14246_v17 = vadd.f32 %v24338_v46, %v14012_v56 }
0x13e3   : > { %14348 = vst [vmem:[%s24330_s27 + $0x118] sm:$0xff] %v14252_v40  ;;  %14341 = vst [vmem:[%s24330_s27 + $0xe0] sm:$0xff] %v14245_v38 }
0x13e4   : > { %14342 = vst [vmem:[%s24330_s27 + $0xe8] sm:$0xff] %v14246_v17 }
0x13e5   : > { %v13834_v22 = vpop.f32.mrb[12].mxu0 }
0x13e6   : > { %v14247_v62 = vadd.f32 %v24323_v50, %v13834_v22  ;;  %v13836_v9 = vpop.f32.mrb[13].mxu0 }
0x13e7   : > { %v14248_v11 = vadd.f32 %v24325_v53, %v13836_v9  ;;  %v13838_v4 = vpop.f32.mrb[14].mxu0 }
0x13e8   : > { %14343 = vst [vmem:[%s24330_s27 + $0xf0] sm:$0xff] %v14247_v62  ;;  %v14250_v5 = vadd.f32 %v24323_v50, %v13838_v4  ;;  %v13840_v13 = vpop.f32.mrb[15].mxu0 }
0x13e9   : > { %14344 = vst [vmem:[%s24330_s27 + $0xf8] sm:$0xff] %v14248_v11  ;;  %v14251_v49 = vadd.f32 %v24325_v53, %v13840_v13 }
0x13ea   : > { %14346 = vst [vmem:[%s24330_s27 + $0x108] sm:$0xff] %v14250_v5 }
0x13eb   : > { %14347 = vst [vmem:[%s24330_s27 + $0x110] sm:$0xff] %v14251_v49 }
0x1417   : > { %v13844_v31 = vpop.f32.mrb[16].mxu0 }
0x1418   : > { %v14253_v8 = vadd.f32 %v24323_v50, %v13844_v31  ;;  %v13846_v35 = vpop.f32.mrb[17].mxu0  ;;  %v16930_v21 = vpop.f32.mrb[20].mxu1 }
0x1419   : > { %v14254_v30 = vadd.f32 %v24325_v53, %v13846_v35  ;;  %v14261_v55 = vadd.f32 %v16930_v21, %v24338_v46  ;;  %v13848_v3 = vpop.f32.mrb[18].mxu0  ;;  %v14025_v25 = vpop.f32.mrb[21].mxu1 }
0x141a   : > { %14349 = vst [vmem:[%s24330_s27 + $0x120] sm:$0xff] %v14253_v8  ;;  %v14256_v32 = vadd.f32 %v24323_v50, %v13848_v3  ;;  %v14255_v2 = vadd.f32 %v24338_v46, %v14025_v25  ;;  %v13850_v6 = vpop.f32.mrb[19].mxu0  ;;  %v16931_v60 = vpop.f32.mrb[22].mxu1 }
0x141b   : > { %14350 = vst [vmem:[%s24330_s27 + $0x128] sm:$0xff] %v14254_v30  ;;  %14357 = vst [vmem:[%s24330_s27 + $0x160] sm:$0xff] %v14261_v55  ;;  %v14257_v33 = vadd.f32 %v24325_v53, %v13850_v6  ;;  %v14264_v54 = vadd.f32 %v16931_v60, %v24338_v46  ;;  %v14028_v47 = vpop.f32.mrb[23].mxu1 }
0x141c   : > { %14352 = vst [vmem:[%s24330_s27 + $0x138] sm:$0xff] %v14256_v32  ;;  %14351 = vst [vmem:[%s24330_s27 + $0x130] sm:$0xff] %v14255_v2  ;;  %v14258_v1 = vadd.f32 %v24338_v46, %v14028_v47 }
0x141d   : > { %14353 = vst [vmem:[%s24330_s27 + $0x140] sm:$0xff] %v14257_v33  ;;  %14360 = vst [vmem:[%s24330_s27 + $0x178] sm:$0xff] %v14264_v54 }
0x141e   : > { %14354 = vst [vmem:[%s24330_s27 + $0x148] sm:$0xff] %v14258_v1 }
0x141f   : > { %v13854_v51 = vpop.f32.mrb[20].mxu0 }
0x1420   : > { %v14259_v52 = vadd.f32 %v24323_v50, %v13854_v51  ;;  %v13856_v28 = vpop.f32.mrb[21].mxu0 }
0x1421   : > { %v14260_v27 = vadd.f32 %v24325_v53, %v13856_v28  ;;  %v13858_v15 = vpop.f32.mrb[22].mxu0 }
0x1422   : > { %14355 = vst [vmem:[%s24330_s27 + $0x150] sm:$0xff] %v14259_v52  ;;  %v14262_v63 = vadd.f32 %v24323_v50, %v13858_v15  ;;  %v13860_v41 = vpop.f32.mrb[23].mxu0 }
0x1423   : > { %14356 = vst [vmem:[%s24330_s27 + $0x158] sm:$0xff] %v14260_v27  ;;  %v14263_v57 = vadd.f32 %v24325_v53, %v13860_v41  ;;  %v16934_v58 = vpop.f32.mrb[24].mxu1 }
0x1424   : > { %14358 = vst [vmem:[%s24330_s27 + $0x168] sm:$0xff] %v14262_v63  ;;  %v14273_v59 = vadd.f32 %v16934_v58, %v24338_v46  ;;  %v14041_v42 = vpop.f32.mrb[25].mxu1 }
0x1425   : > { %14359 = vst [vmem:[%s24330_s27 + $0x170] sm:$0xff] %v14263_v57  ;;  %v14267_v44 = vadd.f32 %v24338_v46, %v14041_v42  ;;  %v16935_v10 = vpop.f32.mrb[26].mxu1 }
0x1426   : > { %14369 = vst [vmem:[%s24330_s27 + $0x1c0] sm:$0xff] %v14273_v59  ;;  %v14276_v36 = vadd.f32 %v16935_v10, %v24338_v46  ;;  %v14044_v29 = vpop.f32.mrb[27].mxu1 }
0x1427   : > { %14363 = vst [vmem:[%s24330_s27 + $0x190] sm:$0xff] %v14267_v44  ;;  %v14270_v37 = vadd.f32 %v24338_v46, %v14044_v29  ;;  %v13864_v14 = vpop.f32.mrb[24].mxu0 }
0x1428   : > { %14372 = vst [vmem:[%s24330_s27 + $0x1d8] sm:$0xff] %v14276_v36  ;;  %v14265_v16 = vadd.f32 %v24323_v50, %v13864_v14  ;;  %v13866_v23 = vpop.f32.mrb[25].mxu0 }
0x1429   : > { %14366 = vst [vmem:[%s24330_s27 + $0x1a8] sm:$0xff] %v14270_v37  ;;  %v14266_v7 = vadd.f32 %v24325_v53, %v13866_v23  ;;  %v13868_v26 = vpop.f32.mrb[26].mxu0 }
0x142a   : > { %14361 = vst [vmem:[%s24330_s27 + $0x180] sm:$0xff] %v14265_v16  ;;  %v14268_v20 = vadd.f32 %v24323_v50, %v13868_v26  ;;  %v13870_v0 = vpop.f32.mrb[27].mxu0 }
0x142b   : > { %14362 = vst [vmem:[%s24330_s27 + $0x188] sm:$0xff] %v14266_v7  ;;  %v14269_v39 = vadd.f32 %v24325_v53, %v13870_v0 }
0x142c   : > { %14364 = vst [vmem:[%s24330_s27 + $0x198] sm:$0xff] %v14268_v20 }
0x142d   : > { %14365 = vst [vmem:[%s24330_s27 + $0x1a0] sm:$0xff] %v14269_v39 }
0x142f   : > { %v13874_v24 = vpop.f32.mrb[32].mxu0 }
0x1430   : > { %v14271_v61 = vadd.f32 %v24323_v50, %v13874_v24  ;;  %v13876_v34 = vpop.f32.mrb[33].mxu0 }
0x1431   : > { %v14272_v18 = vadd.f32 %v24325_v53, %v13876_v34  ;;  %v13878_v48 = vpop.f32.mrb[34].mxu0 }
0x1432   : > { %14367 = vst [vmem:[%s24330_s27 + $0x1b0] sm:$0xff] %v14271_v61  ;;  %v14274_v40 = vadd.f32 %v24323_v50, %v13878_v48  ;;  %v13880_v38 = vpop.f32.mrb[35].mxu0 }
0x1433   : > { %14368 = vst [vmem:[%s24330_s27 + $0x1b8] sm:$0xff] %v14272_v18  ;;  %v14275_v56 = vadd.f32 %v24325_v53, %v13880_v38 }
0x1434   : > { %14370 = vst [vmem:[%s24330_s27 + $0x1c8] sm:$0xff] %v14274_v40 }
0x1435   : > { %14371 = vst [vmem:[%s24330_s27 + $0x1d0] sm:$0xff] %v14275_v56 }
0x1438   : > { %v13884_v17 = vpop.f32.mrb[28].mxu0 }
0x1439   : > { %v14277_v22 = vadd.f32 %v24323_v50, %v13884_v17  ;;  %v13886_v62 = vpop.f32.mrb[29].mxu0  ;;  %v16938_v9 = vpop.f32.mrb[28].mxu1 }
0x143a   : > { %v14278_v11 = vadd.f32 %v24325_v53, %v13886_v62  ;;  %v14285_v4 = vadd.f32 %v16938_v9, %v24338_v46  ;;  %v13888_v5 = vpop.f32.mrb[30].mxu0  ;;  %v14057_v13 = vpop.f32.mrb[29].mxu1 }
0x143b   : > { %14373 = vst [vmem:[%s24330_s27 + $0x1e0] sm:$0xff] %v14277_v22  ;;  %v14280_v49 = vadd.f32 %v24323_v50, %v13888_v5  ;;  %v14279_v31 = vadd.f32 %v24338_v46, %v14057_v13  ;;  %v13890_v8 = vpop.f32.mrb[31].mxu0  ;;  %v16939_v35 = vpop.f32.mrb[30].mxu1 }
0x143c   : > { %14374 = vst [vmem:[%s24330_s27 + $0x1e8] sm:$0xff] %v14278_v11  ;;  %14381 = vst [vmem:[%s24330_s27 + $0x220] sm:$0xff] %v14285_v4  ;;  %v14281_v21 = vadd.f32 %v24325_v53, %v13890_v8  ;;  %v14288_v30 = vadd.f32 %v16939_v35, %v24338_v46  ;;  %v14060_v55 = vpop.f32.mrb[31].mxu1 }
0x143d   : > { %14376 = vst [vmem:[%s24330_s27 + $0x1f8] sm:$0xff] %v14280_v49  ;;  %14375 = vst [vmem:[%s24330_s27 + $0x1f0] sm:$0xff] %v14279_v31  ;;  %v14282_v3 = vadd.f32 %v24338_v46, %v14060_v55 }
0x143e   : > { %14377 = vst [vmem:[%s24330_s27 + $0x200] sm:$0xff] %v14281_v21  ;;  %14384 = vst [vmem:[%s24330_s27 + $0x238] sm:$0xff] %v14288_v30 }
0x143f   : > { %14378 = vst [vmem:[%s24330_s27 + $0x208] sm:$0xff] %v14282_v3 }
0x1440   : > { %v13894_v25 = vpop.f32.mrb[36].mxu0 }
0x1441   : > { %v14283_v32 = vadd.f32 %v24323_v50, %v13894_v25  ;;  %v13896_v2 = vpop.f32.mrb[37].mxu0  ;;  %v16942_v6 = vpop.f32.mrb[32].mxu1 }
0x1442   : > { %v14284_v60 = vadd.f32 %v24325_v53, %v13896_v2  ;;  %v14297_v33 = vadd.f32 %v16942_v6, %v24338_v46  ;;  %v13898_v54 = vpop.f32.mrb[38].mxu0  ;;  %v14073_v47 = vpop.f32.mrb[33].mxu1 }
0x1443   : > { %14379 = vst [vmem:[%s24330_s27 + $0x210] sm:$0xff] %v14283_v32  ;;  %v14286_v1 = vadd.f32 %v24323_v50, %v13898_v54  ;;  %v14291_v51 = vadd.f32 %v24338_v46, %v14073_v47  ;;  %v13900_v52 = vpop.f32.mrb[39].mxu0  ;;  %v16943_v28 = vpop.f32.mrb[34].mxu1 }
0x1444   : > { %14380 = vst [vmem:[%s24330_s27 + $0x218] sm:$0xff] %v14284_v60  ;;  %14393 = vst [vmem:[%s24330_s27 + $0x280] sm:$0xff] %v14297_v33  ;;  %v14287_v27 = vadd.f32 %v24325_v53, %v13900_v52  ;;  %v14300_v15 = vadd.f32 %v16943_v28, %v24338_v46  ;;  %v14076_v63 = vpop.f32.mrb[35].mxu1 }
0x1445   : > { %14382 = vst [vmem:[%s24330_s27 + $0x228] sm:$0xff] %v14286_v1  ;;  %14387 = vst [vmem:[%s24330_s27 + $0x250] sm:$0xff] %v14291_v51  ;;  %v14294_v41 = vadd.f32 %v24338_v46, %v14076_v63 }
0x1446   : > { %14383 = vst [vmem:[%s24330_s27 + $0x230] sm:$0xff] %v14287_v27  ;;  %14396 = vst [vmem:[%s24330_s27 + $0x298] sm:$0xff] %v14300_v15 }
0x1447   : > { %14390 = vst [vmem:[%s24330_s27 + $0x268] sm:$0xff] %v14294_v41 }
0x1448   : > { %v13904_v57 = vpop.f32.mrb[40].mxu0 }
0x1449   : > { %v14289_v58 = vadd.f32 %v24323_v50, %v13904_v57  ;;  %v13906_v59 = vpop.f32.mrb[41].mxu0  ;;  %v16946_v42 = vpop.f32.mrb[36].mxu1 }
0x144a   : > { %v14290_v44 = vadd.f32 %v24325_v53, %v13906_v59  ;;  %v14309_v10 = vadd.f32 %v16946_v42, %v24338_v46  ;;  %v13908_v36 = vpop.f32.mrb[42].mxu0  ;;  %v14089_v29 = vpop.f32.mrb[37].mxu1 }
0x144b   : > { %14385 = vst [vmem:[%s24330_s27 + $0x240] sm:$0xff] %v14289_v58  ;;  %v14292_v37 = vadd.f32 %v24323_v50, %v13908_v36  ;;  %v14303_v14 = vadd.f32 %v24338_v46, %v14089_v29  ;;  %v13910_v16 = vpop.f32.mrb[43].mxu0  ;;  %v16947_v23 = vpop.f32.mrb[38].mxu1 }
0x144c   : > { %14386 = vst [vmem:[%s24330_s27 + $0x248] sm:$0xff] %v14290_v44  ;;  %14405 = vst [vmem:[%s24330_s27 + $0x2e0] sm:$0xff] %v14309_v10  ;;  %v14293_v7 = vadd.f32 %v24325_v53, %v13910_v16  ;;  %v14312_v26 = vadd.f32 %v16947_v23, %v24338_v46  ;;  %v14092_v20 = vpop.f32.mrb[39].mxu1 }
0x144d   : > { %14388 = vst [vmem:[%s24330_s27 + $0x258] sm:$0xff] %v14292_v37  ;;  %14399 = vst [vmem:[%s24330_s27 + $0x2b0] sm:$0xff] %v14303_v14  ;;  %v14306_v0 = vadd.f32 %v24338_v46, %v14092_v20 }
0x144e   : > { %14389 = vst [vmem:[%s24330_s27 + $0x260] sm:$0xff] %v14293_v7  ;;  %14408 = vst [vmem:[%s24330_s27 + $0x2f8] sm:$0xff] %v14312_v26 }
0x144f   : > { %14402 = vst [vmem:[%s24330_s27 + $0x2c8] sm:$0xff] %v14306_v0 }
0x1450   : > { %v13914_v39 = vpop.f32.mrb[44].mxu0 }
0x1451   : > { %v14295_v24 = vadd.f32 %v24323_v50, %v13914_v39  ;;  %v13916_v61 = vpop.f32.mrb[45].mxu0 }
0x1452   : > { %v14296_v34 = vadd.f32 %v24325_v53, %v13916_v61  ;;  %v13918_v18 = vpop.f32.mrb[46].mxu0 }
0x1453   : > { %14391 = vst [vmem:[%s24330_s27 + $0x270] sm:$0xff] %v14295_v24  ;;  %v14298_v48 = vadd.f32 %v24323_v50, %v13918_v18  ;;  %v13920_v40 = vpop.f32.mrb[47].mxu0 }
0x1454   : > { %14392 = vst [vmem:[%s24330_s27 + $0x278] sm:$0xff] %v14296_v34  ;;  %v14299_v38 = vadd.f32 %v24325_v53, %v13920_v40 }
0x1455   : > { %14394 = vst [vmem:[%s24330_s27 + $0x288] sm:$0xff] %v14298_v48 }
0x1456   : > { %14395 = vst [vmem:[%s24330_s27 + $0x290] sm:$0xff] %v14299_v38 }
0x1458   : > { %v13924_v56 = vpop.f32.mrb[48].mxu0 }
0x1459   : > { %v14301_v17 = vadd.f32 %v24323_v50, %v13924_v56  ;;  %v13926_v22 = vpop.f32.mrb[49].mxu0 }
0x145a   : > { %v14302_v62 = vadd.f32 %v24325_v53, %v13926_v22  ;;  %v13928_v9 = vpop.f32.mrb[50].mxu0 }
0x145b   : > { %14397 = vst [vmem:[%s24330_s27 + $0x2a0] sm:$0xff] %v14301_v17  ;;  %v14304_v11 = vadd.f32 %v24323_v50, %v13928_v9  ;;  %v13930_v4 = vpop.f32.mrb[51].mxu0 }
0x145c   : > { %14398 = vst [vmem:[%s24330_s27 + $0x2a8] sm:$0xff] %v14302_v62  ;;  %v14305_v5 = vadd.f32 %v24325_v53, %v13930_v4 }
0x145d   : > { %14400 = vst [vmem:[%s24330_s27 + $0x2b8] sm:$0xff] %v14304_v11 }
0x145e   : > { %14401 = vst [vmem:[%s24330_s27 + $0x2c0] sm:$0xff] %v14305_v5 }
0x1460   : > { %v13934_v13 = vpop.f32.mrb[52].mxu0 }
0x1461   : > { %v14307_v49 = vadd.f32 %v24323_v50, %v13934_v13  ;;  %v13936_v31 = vpop.f32.mrb[53].mxu0 }
0x1462   : > { %v14308_v8 = vadd.f32 %v24325_v53, %v13936_v31  ;;  %v13938_v35 = vpop.f32.mrb[54].mxu0 }
0x1463   : > { %14403 = vst [vmem:[%s24330_s27 + $0x2d0] sm:$0xff] %v14307_v49  ;;  %v14310_v21 = vadd.f32 %v24323_v50, %v13938_v35  ;;  %v13940_v30 = vpop.f32.mrb[55].mxu0 }
0x1464   : > { %14404 = vst [vmem:[%s24330_s27 + $0x2d8] sm:$0xff] %v14308_v8  ;;  %v14311_v55 = vadd.f32 %v24325_v53, %v13940_v30 }
0x1465   : > { %14406 = vst [vmem:[%s24330_s27 + $0x2e8] sm:$0xff] %v14310_v21 }
0x1466   : > { %14407 = vst [vmem:[%s24330_s27 + $0x2f0] sm:$0xff] %v14311_v55 }
0x1468   : > { %v16918_v3 = vpop.f32.mrb[144].mxu0 }
0x1469   : > { %v17004_v25 = vadd.f32 %v16918_v3, %v23924_v12  ;;  %v13977_v32 = vpop.f32.mrb[145].mxu0 }
0x146a   : > { %v17005_v2 = vadd.f32 %v13977_v32, %v23926_v45  ;;  %v16919_v6 = vpop.f32.mrb[146].mxu0 }
0x146b   : > { %v14225_v50 = vadd.f32 %v17004_v25, %v24338_v46  ;;  %v17006_v60 = vadd.f32 %v16919_v6, %v23928_v43  ;;  %v13980_v53 = vpop.f32.mrb[147].mxu0 }
0x146c   : > { %v14219_v33 = vadd.f32 %v17005_v2, %v24338_v46  ;;  %v17007_v54 = vadd.f32 %v13980_v53, %v23930_v19 }
0x146d   : > { %14321 = vst [vmem:[%s24330_s27 + $0x40] sm:$0xff] %v14225_v50  ;;  %v14228_v12 = vadd.f32 %v17006_v60, %v24338_v46 }
0x146e   : > { %14315 = vst [vmem:[%s24330_s27 + $0x10] sm:$0xff] %v14219_v33  ;;  %v14222_v45 = vadd.f32 %v17007_v54, %v24338_v46 }
0x146f   : > { %14324 = vst [vmem:[%s24330_s27 + $0x58] sm:$0xff] %v14228_v12 }
0x1470   : > { %14318 = vst [vmem:[%s24330_s27 + $0x28] sm:$0xff] %v14222_v45 }
0x1471   : > { %19280 = shalt.err (!%p19277_p2)
}
0x1472   : > { %s19281_s28 = scalar_lea.hbm %s24529_s30, 12288  ;;  %s19285_s23 = scalar_lea.hbm %s24583_s4, 24576 }
0x1473   : > { %p19282_p13 = scmp.ne.s32.totalorder %s24529_s30, %s19281_s28  ;;  %p19286_p4 = scmp.lt.u32.totalorder %s24529_s30, %s24583_s4 }
0x1474   : > { %p19287_p7 = scmp.lt.u32.totalorder %s19285_s23, %s19281_s28  ;;  %p19289_p11 = scmp.lt.u32.totalorder %s19281_s28, %s24529_s30 }
0x1475   : > { %p19283_p6 = pnand %p19282_p13, %p25406_p0 }
0x1476   : > { %p19288_p8 = por %p19287_p7, %p19286_p4 }
0x1477   : > { %p19284_p10 = pneg %p19283_p6 }
0x1478   : > { %p19290_p1 = por %p19289_p11, %p19288_p8 }
0x147a   : > { %p19291_p3 = pnand %p19290_p1, %p19284_p10 }
0x147c   : > { %19294 = shalt.err (!%p19291_p3)
}
0x147d   : > { %s19349_s27 = smov 384   ;;  %s19350_s5 = smov 24  }
0x147e   : > { %17819 = dma.vmem_to_hbm [thread:$0]  (%p25406_p0), %s24533_s25, 12288, %s24529_s30, %s14410_s20, %s19349_s27, %s19349_s27, %s19350_s5  }
0x147f PF: > { %s14439_s19 = sand.u32 1, %s19325_s15   ;;  %p25407_p5 = scmp.ne.s32.totalorder %s24853_s22, 0 }
0x1480   : > { %p25408_p9 = scmp.ge.s32.totalorder %s19337_s18, 2  ;;  %s14440_s9 = scalar_lea.sflag [#allocation4], %s14439_s19 }
0x1482   : > { %p17833_p12 = pnand %p25408_p9, %p25407_p5 }
0x1484   : > { %19320 = dma.done.wait (!%p17833_p12), %s14440_s9, 12288  }
0x1485   : > { %19322 = vsyncadd (!%p17833_p12), %s14440_s9, 4294955008  ;;  %p18_p2 = scmp.ge.s32.totalorder %s19489_s11, 4   ;;  %s25409_s15 = smov %s19329_s16 }
0x1486   : > { %s25410_s16 = smov %s19333_s17  ;;  %s25411_s17 = smov %s19498_s14 }
0x1487   : > { %s25412_s18 = smov %s19489_s11  ;;  %20 = sbr.rel (!%p18_p2) target bundleno = 6 (0x6), region = 94 }
0x148e   :  { %14445 = vsyncpa [#allocation3], 1 }
0x148f   :  { %14447 = vsyncpa [#allocation3 + $0x1], 1 }
0x1490   :  { %14448 = vsyncpa [#allocation6], 1 }
0x1491   :  { %14449 = vsyncpa [#allocation4], 1 }
0x1492   :  { %14451 = vsyncpa [#allocation4 + $0x1], 1 }

</bundles_post_ra>
